<compile_context>
chip_gen: v5e
topology: v5e:2x2
jax: 0.10.0
libtpu: 0.0.40
codegen_flags: <defaults>
</compile_context>

<pallas_src>
import functools

import jax
import jax.numpy as jnp
from jax import lax
from jax.experimental import pallas as pl
from jax.experimental.pallas import tpu as pltpu

LANE = 128
_VMEM_LIMIT = 48 * 1024 * 1024  # stay well under v7x's 64 MiB physical VMEM


def _round_up(x, m):
    return (x + m - 1) // m * m


# --------------------------- Pass A: conv + partial BN stats ----------------
def _conv_partial_kernel(x_ref, w_ref, b_ref, o_ref, stats_ref, col_ref, *, H, W, K):
    """Conv2d(stride=1,'same') for one image x one Cout tile + partial BN stats.

    x_ref:     (1, H+2p, W+2p, Cin)  bf16 zero-padded input (NHWC)
    w_ref:     (KKCp, TCout)         bf16 im2col-flattened weights (zero padded)
    b_ref:     (1, TCout)            f32 conv bias
    o_ref:     (1, H*W, TCout)       f32 conv+bias output (pre-BN)
    stats_ref: (1, 2, TCout)         f32 partial [sum, sum-of-squares] over this image
    col_ref:   (H*W, KKCp)           bf16 VMEM scratch: im2col of this image
    """
    Cin = x_ref.shape[-1]
    HW = H * W

    # Build the im2col matrix once in VMEM scratch (deep MXU contraction
    # instead of K*K shallow Cin-deep per-tap matmuls + accumulate passes).
    col_ref[...] = jnp.zeros(col_ref.shape, col_ref.dtype)  # zero the padded tail
    for kh in range(K):
        for kw in range(K):
            patch = x_ref[0, kh:kh + H, kw:kw + W, :]        # (H, W, Cin) bf16
            c0 = (kh * K + kw) * Cin
            col_ref[:, c0:c0 + Cin] = patch.reshape(HW, Cin)

    # Single (HW, KKCp) x (KKCp, TCout) bf16 matmul, f32 accumulation.
    y = jnp.dot(col_ref[...], w_ref[...], preferred_element_type=jnp.float32)
    y = y + b_ref[...]                                       # (1, TCout) broadcast

    o_ref[0] = y.astype(o_ref.dtype)

    # Per-image partial statistics for BatchNorm (var = E[x^2] - mean^2 form,
    # reduced globally by a tiny XLA op in the wrapper).
    stats_ref[0, 0:1, :] = jnp.sum(y, axis=0, keepdims=True)
    stats_ref[0, 1:2, :] = jnp.sum(y * y, axis=0, keepdims=True)


# --------------------------- Pass B: normalize + ReLU -----------------------
def _bn_relu_kernel(y_ref, scale_ref, shift_ref, o_ref):
    """y*scale + shift, then ReLU.  f32 epilogue math, one lane-dense store."""
    y = y_ref[0]                                             # (TR, TCout) f32
    o = jnp.maximum(y * scale_ref[...] + shift_ref[...], 0.0)
    o_ref[0] = o.astype(o_ref.dtype)


# --------------------------- one Conv+BN+ReLU stage -------------------------
def conv_bn_relu_stage(x_nhwc, w_hwio, bias, gamma, beta, *, eps=1e-5,
                       out_dtype=jnp.float32):
    """x_nhwc: (N,H,W,Cin); w_hwio: (K,K,Cin,Cout). Returns (N,H,W,Cout)."""
    N, H, W, Cin = x_nhwc.shape
    K = w_hwio.shape[0]
    Cout = w_hwio.shape[3]
    assert K % 2 == 1, "'same' padding (kernel_size//2) assumes odd kernel_size"
    p = K // 2
    HW = H * W

    Cpad = _round_up(max(Cout, LANE), LANE)      # lane-dense output channels
    TCout = LANE                                 # Cout tile width
    n_ct = Cpad // TCout
    KKC = K * K * Cin
    KKCp = _round_up(max(KKC, LANE), LANE)       # padded im2col contraction depth

    # bf16 MXU inputs (accumulation stays f32 inside the kernel).
    xp = jnp.pad(x_nhwc.astype(jnp.bfloat16), ((0, 0), (p, p), (p, p), (0, 0)))
    # TODO(synk): supply spatial halos via overlapping windows / manual DMA (and
    # intra-image row tiling for very large H*W) instead of this padded copy.

    w2d = w_hwio.reshape(KKC, Cout)
    w2d = jnp.pad(w2d, ((0, KKCp - KKC), (0, Cpad - Cout))).astype(jnp.bfloat16)
    b2d = jnp.pad(bias, (0, Cpad - Cout)).reshape(1, Cpad).astype(jnp.float32)

    Hp, Wp = H + 2 * p, W + 2 * p
    conv_kernel = functools.partial(_conv_partial_kernel, H=H, W=W, K=K)
    y_conv, stats = pl.pallas_call(
        conv_kernel,
        grid=(N, n_ct),
        in_specs=[
            pl.BlockSpec((1, Hp, Wp, Cin), lambda n, j: (n, 0, 0, 0)),
            pl.BlockSpec((KKCp, TCout), lambda n, j: (0, j)),
            pl.BlockSpec((1, TCout), lambda n, j: (0, j)),
        ],
        out_specs=(
            pl.BlockSpec((1, HW, TCout), lambda n, j: (n, 0, j)),
            pl.BlockSpec((1, 2, TCout), lambda n, j: (n, 0, j)),
        ),
        out_shape=(
            jax.ShapeDtypeStruct((N, HW, Cpad), jnp.float32),
            jax.ShapeDtypeStruct((N, 2, Cpad), jnp.float32),
        ),
        scratch_shapes=[pltpu.VMEM((HW, KKCp), jnp.bfloat16)],
        compiler_params=pltpu.CompilerParams(
            dimension_semantics=("parallel", "parallel"),
            vmem_limit_bytes=_VMEM_LIMIT),
    )(xp, w2d, b2d)

    # Global BatchNorm batch statistics from the per-image partials (tiny XLA
    # reduction), folded into a per-channel scale/shift for pass B.
    count = jnp.float32(N * HW)
    tot = jnp.sum(stats, axis=0)                 # (2, Cpad)
    mean = tot[0] / count
    var = tot[1] / count - mean * mean           # biased variance (BN train mode)
    gamma_p = jnp.pad(gamma, (0, Cpad - Cout)).astype(jnp.float32)
    beta_p = jnp.pad(beta, (0, Cpad - Cout)).astype(jnp.float32)
    inv = lax.rsqrt(var + eps)
    scale = (gamma_p * inv).reshape(1, Cpad)
    shift = (beta_p - mean * gamma_p * inv).reshape(1, Cpad)

    TR = 128 if HW % 128 == 0 else HW            # row tile of flattened H*W axis
    y = pl.pallas_call(
        _bn_relu_kernel,
        grid=(N, HW // TR, n_ct),
        in_specs=[
            pl.BlockSpec((1, TR, TCout), lambda n, r, j: (n, r, j)),
            pl.BlockSpec((1, TCout), lambda n, r, j: (0, j)),
            pl.BlockSpec((1, TCout), lambda n, r, j: (0, j)),
        ],
        out_specs=pl.BlockSpec((1, TR, TCout), lambda n, r, j: (n, r, j)),
        out_shape=jax.ShapeDtypeStruct((N, HW, Cpad), out_dtype),
        compiler_params=pltpu.CompilerParams(
            dimension_semantics=("parallel", "parallel", "parallel"),
            vmem_limit_bytes=_VMEM_LIMIT),
    )(y_conv, scale, shift)

    # Back to NHWC, drop the channel padding.
    return y.reshape(N, H, W, Cpad)[..., :Cout]


def conv_block_forward(x_nchw, params, *, eps=1e-5):
    """ConvBlock forward.  x_nchw: (N, Cin, H, W)  ->  (N, Cout, H, W)."""
    x = jnp.transpose(x_nchw, (0, 2, 3, 1))      # NCHW -> NHWC (lane-dense C)
    # TODO(synk): keep activations NHWC end-to-end if the caller allows; these
    # boundary transposes are extra HBM-bound ops.
    y = conv_bn_relu_stage(x, params["w1"], params["b1"], params["g1"],
                           params["be1"], eps=eps, out_dtype=jnp.bfloat16)
    y = conv_bn_relu_stage(y, params["w2"], params["b2"], params["g2"],
                           params["be2"], eps=eps, out_dtype=jnp.float32)
    return jnp.transpose(y, (0, 3, 1, 2))        # NHWC -> NCHW


# ---------------- plain-JAX reference (bf16-matmul matched, for testing) ----
def _ref_stage(x_nhwc, w_hwio, bias, gamma, beta, eps=1e-5, out_dtype=jnp.float32):
    y = lax.conv_general_dilated(
        x_nhwc.astype(jnp.bfloat16), w_hwio.astype(jnp.bfloat16),
        window_strides=(1, 1), padding="SAME",
        dimension_numbers=("NHWC", "HWIO", "NHWC"),
        preferred_element_type=jnp.float32)
    y = y + bias[None, None, None, :]
    mean = jnp.mean(y, axis=(0, 1, 2))
    var = jnp.mean(y * y, axis=(0, 1, 2)) - mean * mean
    y = (y - mean) * lax.rsqrt(var + eps) * gamma + beta
    return jnp.maximum(y, 0.0).astype(out_dtype)


def _ref_forward(x_nchw, p, eps=1e-5):
    x = jnp.transpose(x_nchw, (0, 2, 3, 1))
    y = _ref_stage(x, p["w1"], p["b1"], p["g1"], p["be1"], eps, jnp.bfloat16)
    y = _ref_stage(y, p["w2"], p["b2"], p["g2"], p["be2"], eps, jnp.float32)
    return jnp.transpose(y, (0, 3, 1, 2))


def init_params(key, in_channels, out_channels, kernel_size):
    ks = jax.random.split(key, 6)
    # PyTorch Conv2d weight is (Cout, Cin, K, K); we store HWIO = (K, K, Cin, Cout).
    w1 = 0.1 * jax.random.normal(
        ks[0], (kernel_size, kernel_size, in_channels, out_channels), jnp.float32)
    b1 = 0.1 * jax.random.normal(ks[1], (out_channels,), jnp.float32)
    w2 = 0.1 * jax.random.normal(
        ks[2], (kernel_size, kernel_size, out_channels, out_channels), jnp.float32)
    b2 = 0.1 * jax.random.normal(ks[3], (out_channels,), jnp.float32)
    g1 = 1.0 + 0.05 * jax.random.normal(ks[4], (out_channels,), jnp.float32)
    be1 = 0.05 * jax.random.normal(ks[5], (out_channels,), jnp.float32)
    g2 = jnp.ones((out_channels,), jnp.float32)
    be2 = jnp.zeros((out_channels,), jnp.float32)
    return dict(w1=w1, b1=b1, g1=g1, be1=be1, w2=w2, b2=b2, g2=g2, be2=be2)


if __name__ == "__main__":
    key = jax.random.PRNGKey(0)
    k_x, k_p = jax.random.split(key)

    N, Cin, Cout, H, W, K = 2, 4, 8, 16, 16, 3
    x = jax.random.normal(k_x, (N, Cin, H, W), jnp.float32)   # NCHW like PyTorch
    params = init_params(k_p, Cin, Cout, K)

    fwd = jax.jit(conv_block_forward)
    out = jax.block_until_ready(fwd(x, params))
    ref = jax.block_until_ready(_ref_forward(x, params))

    assert out.shape == (N, Cout, H, W), out.shape
    err = float(jnp.max(jnp.abs(out - ref)))
    assert err < 2e-2, f"max abs err {err}"    # bf16-MXU-level agreement
    print("KERNEL_OK")
</pallas_src>

<mosaic_0001>
module attributes {stable_mosaic.version = 11 : i64} {
  func.func @_bn_relu_kernel(%arg0: i32, %arg1: i32, %arg2: i32, %arg3: memref<1x128x128xf32, #tpu.memory_space<vmem>>, %arg4: memref<1x128xf32, #tpu.memory_space<vmem>>, %arg5: memref<1x128xf32, #tpu.memory_space<vmem>>, %arg6: memref<1x128x128xbf16, #tpu.memory_space<vmem>>) attributes {dimension_semantics = [#tpu.dimension_semantics<parallel>, #tpu.dimension_semantics<parallel>, #tpu.dimension_semantics<parallel>], iteration_bounds = array<i64: 2, 2, 1>, scalar_prefetch = 0 : i64, scratch_operands = 0 : i64, tpu.core_type = #tpu.core_type<tc>, window_params = [{transform_indices = @transform_0, window_bounds = array<i64: 1, 128, 128>}, {transform_indices = @transform_1, window_bounds = array<i64: 1, 128>}, {transform_indices = @transform_2, window_bounds = array<i64: 1, 128>}, {transform_indices = @transform_3, window_bounds = array<i64: 1, 128, 128>}]} {
    %c0 = arith.constant 0 : index
    %c0_0 = arith.constant 0 : index
    %c0_1 = arith.constant 0 : index
    %0 = vector.load %arg3[%c0, %c0_0, %c0_1] : memref<1x128x128xf32, #tpu.memory_space<vmem>>, vector<1x128x128xf32>
    %1 = vector.shape_cast %0 : vector<1x128x128xf32> to vector<128x128xf32>
    %c0_2 = arith.constant 0 : index
    %c0_3 = arith.constant 0 : index
    %2 = vector.load %arg4[%c0_2, %c0_3] : memref<1x128xf32, #tpu.memory_space<vmem>>, vector<1x128xf32>
    %3 = vector.broadcast %2 : vector<1x128xf32> to vector<128x128xf32>
    %4 = arith.mulf %1, %3 : vector<128x128xf32>
    %c0_4 = arith.constant 0 : index
    %c0_5 = arith.constant 0 : index
    %5 = vector.load %arg5[%c0_4, %c0_5] : memref<1x128xf32, #tpu.memory_space<vmem>>, vector<1x128xf32>
    %6 = vector.broadcast %5 : vector<1x128xf32> to vector<128x128xf32>
    %7 = arith.addf %4, %6 : vector<128x128xf32>
    %cst = arith.constant 0.000000e+00 : f32
    %8 = vector.broadcast %cst : f32 to vector<128x128xf32>
    %9 = arith.maximumf %7, %8 : vector<128x128xf32>
    %10 = arith.truncf %9 : vector<128x128xf32> to vector<128x128xbf16>
    %c0_6 = arith.constant 0 : index
    %c0_7 = arith.constant 0 : index
    %c0_8 = arith.constant 0 : index
    %11 = vector.load %arg6[%c0_6, %c0_7, %c0_8] : memref<1x128x128xbf16, #tpu.memory_space<vmem>>, vector<1x128x128xbf16>
    %12 = vector.shape_cast %11 : vector<1x128x128xbf16> to vector<128x128xbf16>
    %13 = vector.shape_cast %10 : vector<128x128xbf16> to vector<1x128x128xbf16>
    tpu.vector_store %arg6[%c0_6, %c0_7, %c0_8], %13 {strides = array<i32>} : memref<1x128x128xbf16, #tpu.memory_space<vmem>>, vector<1x128x128xbf16>,
    return
  }
  func.func @transform_0(%arg0: i32, %arg1: i32, %arg2: i32) -> (i32, i32, i32) {
    %c0_i32 = arith.constant 0 : i32
    return %arg0, %arg1, %arg2 : i32, i32, i32
  }
  func.func @transform_1(%arg0: i32, %arg1: i32, %arg2: i32) -> (i32, i32) {
    %c0_i32 = arith.constant 0 : i32
    %c0_i32_0 = arith.constant 0 : i32
    return %c0_i32, %arg2 : i32, i32
  }
  func.func @transform_2(%arg0: i32, %arg1: i32, %arg2: i32) -> (i32, i32) {
    %c0_i32 = arith.constant 0 : i32
    %c0_i32_0 = arith.constant 0 : i32
    return %c0_i32, %arg2 : i32, i32
  }
  func.func @transform_3(%arg0: i32, %arg1: i32, %arg2: i32) -> (i32, i32, i32) {
    %c0_i32 = arith.constant 0 : i32
    return %arg0, %arg1, %arg2 : i32, i32, i32
  }
}

module attributes {stable_mosaic.version = 11 : i64} {
  func.func @_conv_partial_kernel(%arg0: i32, %arg1: i32, %arg2: memref<1x18x18x4xbf16, #tpu.memory_space<vmem>>, %arg3: memref<128x128xbf16, #tpu.memory_space<vmem>>, %arg4: memref<1x128xf32, #tpu.memory_space<vmem>>, %arg5: memref<1x256x128xf32, #tpu.memory_space<vmem>>, %arg6: memref<1x2x128xf32, #tpu.memory_space<vmem>>, %arg7: memref<256x128xbf16, #tpu.memory_space<vmem>>) attributes {dimension_semantics = [#tpu.dimension_semantics<parallel>, #tpu.dimension_semantics<parallel>], iteration_bounds = array<i64: 2, 1>, scalar_prefetch = 0 : i64, scratch_operands = 1 : i64, tpu.core_type = #tpu.core_type<tc>, window_params = [{transform_indices = @transform_0, window_bounds = array<i64: 1, 18, 18, 4>}, {transform_indices = @transform_1, window_bounds = array<i64: 128, 128>}, {transform_indices = @transform_2, window_bounds = array<i64: 1, 128>}, {transform_indices = @transform_3, window_bounds = array<i64: 1, 256, 128>}, {transform_indices = @transform_4, window_bounds = array<i64: 1, 2, 128>}]} {
    %cst = arith.constant 0.000000e+00 : bf16
    %0 = vector.broadcast %cst : bf16 to vector<256x128xbf16>
    %c0 = arith.constant 0 : index
    %c0_0 = arith.constant 0 : index
    %1 = vector.load %arg7[%c0, %c0_0] : memref<256x128xbf16, #tpu.memory_space<vmem>>, vector<256x128xbf16>
    tpu.vector_store %arg7[%c0, %c0_0], %0 {strides = array<i32>} : memref<256x128xbf16, #tpu.memory_space<vmem>>, vector<256x128xbf16>,
    %c0_1 = arith.constant 0 : index
    %c0_2 = arith.constant 0 : index
    %c0_3 = arith.constant 0 : index
    %c0_4 = arith.constant 0 : index
    %2 = vector.load %arg2[%c0_1, %c0_2, %c0_3, %c0_4] : memref<1x18x18x4xbf16, #tpu.memory_space<vmem>>, vector<1x16x16x4xbf16>
    %3 = vector.shape_cast %2 : vector<1x16x16x4xbf16> to vector<16x16x4xbf16>
    %4 = vector.shape_cast %3 : vector<16x16x4xbf16> to vector<256x4xbf16>
    %c0_5 = arith.constant 0 : index
    %c0_6 = arith.constant 0 : index
    %5 = vector.load %arg7[%c0_5, %c0_6] : memref<256x128xbf16, #tpu.memory_space<vmem>>, vector<256x4xbf16>
    tpu.vector_store %arg7[%c0_5, %c0_6], %4 {strides = array<i32>} : memref<256x128xbf16, #tpu.memory_space<vmem>>, vector<256x4xbf16>,
    %c0_7 = arith.constant 0 : index
    %c0_8 = arith.constant 0 : index
    %c1 = arith.constant 1 : index
    %c0_9 = arith.constant 0 : index
    %6 = vector.load %arg2[%c0_7, %c0_8, %c1, %c0_9] : memref<1x18x18x4xbf16, #tpu.memory_space<vmem>>, vector<1x16x16x4xbf16>
    %7 = vector.shape_cast %6 : vector<1x16x16x4xbf16> to vector<16x16x4xbf16>
    %8 = vector.shape_cast %7 : vector<16x16x4xbf16> to vector<256x4xbf16>
    %c0_10 = arith.constant 0 : index
    %c4 = arith.constant 4 : index
    %9 = vector.load %arg7[%c0_10, %c4] : memref<256x128xbf16, #tpu.memory_space<vmem>>, vector<256x4xbf16>
    tpu.vector_store %arg7[%c0_10, %c4], %8 {strides = array<i32>} : memref<256x128xbf16, #tpu.memory_space<vmem>>, vector<256x4xbf16>,
    %c0_11 = arith.constant 0 : index
    %c0_12 = arith.constant 0 : index
    %c2 = arith.constant 2 : index
    %c0_13 = arith.constant 0 : index
    %10 = vector.load %arg2[%c0_11, %c0_12, %c2, %c0_13] : memref<1x18x18x4xbf16, #tpu.memory_space<vmem>>, vector<1x16x16x4xbf16>
    %11 = vector.shape_cast %10 : vector<1x16x16x4xbf16> to vector<16x16x4xbf16>
    %12 = vector.shape_cast %11 : vector<16x16x4xbf16> to vector<256x4xbf16>
    %c0_14 = arith.constant 0 : index
    %c8 = arith.constant 8 : index
    %13 = vector.load %arg7[%c0_14, %c8] : memref<256x128xbf16, #tpu.memory_space<vmem>>, vector<256x4xbf16>
    tpu.vector_store %arg7[%c0_14, %c8], %12 {strides = array<i32>} : memref<256x128xbf16, #tpu.memory_space<vmem>>, vector<256x4xbf16>,
    %c0_15 = arith.constant 0 : index
    %c1_16 = arith.constant 1 : index
    %c0_17 = arith.constant 0 : index
    %c0_18 = arith.constant 0 : index
    %14 = vector.load %arg2[%c0_15, %c1_16, %c0_17, %c0_18] : memref<1x18x18x4xbf16, #tpu.memory_space<vmem>>, vector<1x16x16x4xbf16>
    %15 = vector.shape_cast %14 : vector<1x16x16x4xbf16> to vector<16x16x4xbf16>
    %16 = vector.shape_cast %15 : vector<16x16x4xbf16> to vector<256x4xbf16>
    %c0_19 = arith.constant 0 : index
    %c12 = arith.constant 12 : index
    %17 = vector.load %arg7[%c0_19, %c12] : memref<256x128xbf16, #tpu.memory_space<vmem>>, vector<256x4xbf16>
    tpu.vector_store %arg7[%c0_19, %c12], %16 {strides = array<i32>} : memref<256x128xbf16, #tpu.memory_space<vmem>>, vector<256x4xbf16>,
    %c0_20 = arith.constant 0 : index
    %c1_21 = arith.constant 1 : index
    %c1_22 = arith.constant 1 : index
    %c0_23 = arith.constant 0 : index
    %18 = vector.load %arg2[%c0_20, %c1_21, %c1_22, %c0_23] : memref<1x18x18x4xbf16, #tpu.memory_space<vmem>>, vector<1x16x16x4xbf16>
    %19 = vector.shape_cast %18 : vector<1x16x16x4xbf16> to vector<16x16x4xbf16>
    %20 = vector.shape_cast %19 : vector<16x16x4xbf16> to vector<256x4xbf16>
    %c0_24 = arith.constant 0 : index
    %c16 = arith.constant 16 : index
    %21 = vector.load %arg7[%c0_24, %c16] : memref<256x128xbf16, #tpu.memory_space<vmem>>, vector<256x4xbf16>
    tpu.vector_store %arg7[%c0_24, %c16], %20 {strides = array<i32>} : memref<256x128xbf16, #tpu.memory_space<vmem>>, vector<256x4xbf16>,
    %c0_25 = arith.constant 0 : index
    %c1_26 = arith.constant 1 : index
    %c2_27 = arith.constant 2 : index
    %c0_28 = arith.constant 0 : index
    %22 = vector.load %arg2[%c0_25, %c1_26, %c2_27, %c0_28] : memref<1x18x18x4xbf16, #tpu.memory_space<vmem>>, vector<1x16x16x4xbf16>
    %23 = vector.shape_cast %22 : vector<1x16x16x4xbf16> to vector<16x16x4xbf16>
    %24 = vector.shape_cast %23 : vector<16x16x4xbf16> to vector<256x4xbf16>
    %c0_29 = arith.constant 0 : index
    %c20 = arith.constant 20 : index
    %25 = vector.load %arg7[%c0_29, %c20] : memref<256x128xbf16, #tpu.memory_space<vmem>>, vector<256x4xbf16>
    tpu.vector_store %arg7[%c0_29, %c20], %24 {strides = array<i32>} : memref<256x128xbf16, #tpu.memory_space<vmem>>, vector<256x4xbf16>,
    %c0_30 = arith.constant 0 : index
    %c2_31 = arith.constant 2 : index
    %c0_32 = arith.constant 0 : index
    %c0_33 = arith.constant 0 : index
    %26 = vector.load %arg2[%c0_30, %c2_31, %c0_32, %c0_33] : memref<1x18x18x4xbf16, #tpu.memory_space<vmem>>, vector<1x16x16x4xbf16>
    %27 = vector.shape_cast %26 : vector<1x16x16x4xbf16> to vector<16x16x4xbf16>
    %28 = vector.shape_cast %27 : vector<16x16x4xbf16> to vector<256x4xbf16>
    %c0_34 = arith.constant 0 : index
    %c24 = arith.constant 24 : index
    %29 = vector.load %arg7[%c0_34, %c24] : memref<256x128xbf16, #tpu.memory_space<vmem>>, vector<256x4xbf16>
    tpu.vector_store %arg7[%c0_34, %c24], %28 {strides = array<i32>} : memref<256x128xbf16, #tpu.memory_space<vmem>>, vector<256x4xbf16>,
    %c0_35 = arith.constant 0 : index
    %c2_36 = arith.constant 2 : index
    %c1_37 = arith.constant 1 : index
    %c0_38 = arith.constant 0 : index
    %30 = vector.load %arg2[%c0_35, %c2_36, %c1_37, %c0_38] : memref<1x18x18x4xbf16, #tpu.memory_space<vmem>>, vector<1x16x16x4xbf16>
    %31 = vector.shape_cast %30 : vector<1x16x16x4xbf16> to vector<16x16x4xbf16>
    %32 = vector.shape_cast %31 : vector<16x16x4xbf16> to vector<256x4xbf16>
    %c0_39 = arith.constant 0 : index
    %c28 = arith.constant 28 : index
    %33 = vector.load %arg7[%c0_39, %c28] : memref<256x128xbf16, #tpu.memory_space<vmem>>, vector<256x4xbf16>
    tpu.vector_store %arg7[%c0_39, %c28], %32 {strides = array<i32>} : memref<256x128xbf16, #tpu.memory_space<vmem>>, vector<256x4xbf16>,
    %c0_40 = arith.constant 0 : index
    %c2_41 = arith.constant 2 : index
    %c2_42 = arith.constant 2 : index
    %c0_43 = arith.constant 0 : index
    %34 = vector.load %arg2[%c0_40, %c2_41, %c2_42, %c0_43] : memref<1x18x18x4xbf16, #tpu.memory_space<vmem>>, vector<1x16x16x4xbf16>
    %35 = vector.shape_cast %34 : vector<1x16x16x4xbf16> to vector<16x16x4xbf16>
    %36 = vector.shape_cast %35 : vector<16x16x4xbf16> to vector<256x4xbf16>
    %c0_44 = arith.constant 0 : index
    %c32 = arith.constant 32 : index
    %37 = vector.load %arg7[%c0_44, %c32] : memref<256x128xbf16, #tpu.memory_space<vmem>>, vector<256x4xbf16>
    tpu.vector_store %arg7[%c0_44, %c32], %36 {strides = array<i32>} : memref<256x128xbf16, #tpu.memory_space<vmem>>, vector<256x4xbf16>,
    %c0_45 = arith.constant 0 : index
    %c0_46 = arith.constant 0 : index
    %38 = vector.load %arg7[%c0_45, %c0_46] : memref<256x128xbf16, #tpu.memory_space<vmem>>, vector<256x128xbf16>
    %c0_47 = arith.constant 0 : index
    %c0_48 = arith.constant 0 : index
    %39 = vector.load %arg3[%c0_47, %c0_48] : memref<128x128xbf16, #tpu.memory_space<vmem>>, vector<128x128xbf16>
    %cst_49 = arith.constant dense<0.000000e+00> : vector<256x128xf32>
    %40 = tpu.matmul %38, %39, %cst_49 {dimension_numbers = #tpu.dot_dimension_numbers<[1], [0], [0], [1], [0, 0, 1, 1], [], []>} : vector<256x128xbf16>, vector<128x128xbf16>, vector<256x128xf32> -> vector<256x128xf32>
    %c0_50 = arith.constant 0 : index
    %c0_51 = arith.constant 0 : index
    %41 = vector.load %arg4[%c0_50, %c0_51] : memref<1x128xf32, #tpu.memory_space<vmem>>, vector<1x128xf32>
    %42 = vector.broadcast %41 : vector<1x128xf32> to vector<256x128xf32>
    %43 = arith.addf %40, %42 : vector<256x128xf32>
    %c0_52 = arith.constant 0 : index
    %c0_53 = arith.constant 0 : index
    %c0_54 = arith.constant 0 : index
    %44 = vector.load %arg5[%c0_52, %c0_53, %c0_54] : memref<1x256x128xf32, #tpu.memory_space<vmem>>, vector<1x256x128xf32>
    %45 = vector.shape_cast %44 : vector<1x256x128xf32> to vector<256x128xf32>
    %46 = vector.shape_cast %43 : vector<256x128xf32> to vector<1x256x128xf32>
    tpu.vector_store %arg5[%c0_52, %c0_53, %c0_54], %46 {strides = array<i32>} : memref<1x256x128xf32, #tpu.memory_space<vmem>>, vector<1x256x128xf32>,
    %cst_55 = arith.constant dense<0.000000e+00> : vector<128xf32>
    %47 = vector.multi_reduction <add>, %43, %cst_55 [0] : vector<256x128xf32> to vector<128xf32>
    %48 = vector.shape_cast %47 : vector<128xf32> to vector<1x128xf32>
    %c0_56 = arith.constant 0 : index
    %c0_57 = arith.constant 0 : index
    %c0_58 = arith.constant 0 : index
    %49 = vector.load %arg6[%c0_56, %c0_57, %c0_58] : memref<1x2x128xf32, #tpu.memory_space<vmem>>, vector<1x1x128xf32>
    %50 = vector.shape_cast %49 : vector<1x1x128xf32> to vector<1x128xf32>
    %51 = vector.shape_cast %48 : vector<1x128xf32> to vector<1x1x128xf32>
    tpu.vector_store %arg6[%c0_56, %c0_57, %c0_58], %51 {strides = array<i32>} : memref<1x2x128xf32, #tpu.memory_space<vmem>>, vector<1x1x128xf32>,
    %52 = arith.mulf %43, %43 : vector<256x128xf32>
    %cst_59 = arith.constant dense<0.000000e+00> : vector<128xf32>
    %53 = vector.multi_reduction <add>, %52, %cst_59 [0] : vector<256x128xf32> to vector<128xf32>
    %54 = vector.shape_cast %53 : vector<128xf32> to vector<1x128xf32>
    %c0_60 = arith.constant 0 : index
    %c1_61 = arith.constant 1 : index
    %c0_62 = arith.constant 0 : index
    %55 = vector.load %arg6[%c0_60, %c1_61, %c0_62] : memref<1x2x128xf32, #tpu.memory_space<vmem>>, vector<1x1x128xf32>
    %56 = vector.shape_cast %55 : vector<1x1x128xf32> to vector<1x128xf32>
    %57 = vector.shape_cast %54 : vector<1x128xf32> to vector<1x1x128xf32>
    tpu.vector_store %arg6[%c0_60, %c1_61, %c0_62], %57 {strides = array<i32>} : memref<1x2x128xf32, #tpu.memory_space<vmem>>, vector<1x1x128xf32>,
    return
  }
  func.func @transform_0(%arg0: i32, %arg1: i32) -> (i32, i32, i32, i32) {
    %c0_i32 = arith.constant 0 : i32
    %c0_i32_0 = arith.constant 0 : i32
    %c0_i32_1 = arith.constant 0 : i32
    %c0_i32_2 = arith.constant 0 : i32
    return %arg0, %c0_i32, %c0_i32_0, %c0_i32_1 : i32, i32, i32, i32
  }
  func.func @transform_1(%arg0: i32, %arg1: i32) -> (i32, i32) {
    %c0_i32 = arith.constant 0 : i32
    %c0_i32_0 = arith.constant 0 : i32
    return %c0_i32, %arg1 : i32, i32
  }
  func.func @transform_2(%arg0: i32, %arg1: i32) -> (i32, i32) {
    %c0_i32 = arith.constant 0 : i32
    %c0_i32_0 = arith.constant 0 : i32
    return %c0_i32, %arg1 : i32, i32
  }
  func.func @transform_3(%arg0: i32, %arg1: i32) -> (i32, i32, i32) {
    %c0_i32 = arith.constant 0 : i32
    %c0_i32_0 = arith.constant 0 : i32
    return %arg0, %c0_i32, %arg1 : i32, i32, i32
  }
  func.func @transform_4(%arg0: i32, %arg1: i32) -> (i32, i32, i32) {
    %c0_i32 = arith.constant 0 : i32
    %c0_i32_0 = arith.constant 0 : i32
    return %arg0, %c0_i32, %arg1 : i32, i32, i32
  }
}

module attributes {stable_mosaic.version = 11 : i64} {
  func.func @_conv_partial_kernel(%arg0: i32, %arg1: i32, %arg2: memref<1x18x18x8xbf16, #tpu.memory_space<vmem>>, %arg3: memref<128x128xbf16, #tpu.memory_space<vmem>>, %arg4: memref<1x128xf32, #tpu.memory_space<vmem>>, %arg5: memref<1x256x128xf32, #tpu.memory_space<vmem>>, %arg6: memref<1x2x128xf32, #tpu.memory_space<vmem>>, %arg7: memref<256x128xbf16, #tpu.memory_space<vmem>>) attributes {dimension_semantics = [#tpu.dimension_semantics<parallel>, #tpu.dimension_semantics<parallel>], iteration_bounds = array<i64: 2, 1>, scalar_prefetch = 0 : i64, scratch_operands = 1 : i64, tpu.core_type = #tpu.core_type<tc>, window_params = [{transform_indices = @transform_0, window_bounds = array<i64: 1, 18, 18, 8>}, {transform_indices = @transform_1, window_bounds = array<i64: 128, 128>}, {transform_indices = @transform_2, window_bounds = array<i64: 1, 128>}, {transform_indices = @transform_3, window_bounds = array<i64: 1, 256, 128>}, {transform_indices = @transform_4, window_bounds = array<i64: 1, 2, 128>}]} {
    %cst = arith.constant 0.000000e+00 : bf16
    %0 = vector.broadcast %cst : bf16 to vector<256x128xbf16>
    %c0 = arith.constant 0 : index
    %c0_0 = arith.constant 0 : index
    %1 = vector.load %arg7[%c0, %c0_0] : memref<256x128xbf16, #tpu.memory_space<vmem>>, vector<256x128xbf16>
    tpu.vector_store %arg7[%c0, %c0_0], %0 {strides = array<i32>} : memref<256x128xbf16, #tpu.memory_space<vmem>>, vector<256x128xbf16>,
    %c0_1 = arith.constant 0 : index
    %c0_2 = arith.constant 0 : index
    %c0_3 = arith.constant 0 : index
    %c0_4 = arith.constant 0 : index
    %2 = vector.load %arg2[%c0_1, %c0_2, %c0_3, %c0_4] : memref<1x18x18x8xbf16, #tpu.memory_space<vmem>>, vector<1x16x16x8xbf16>
    %3 = vector.shape_cast %2 : vector<1x16x16x8xbf16> to vector<16x16x8xbf16>
    %4 = vector.shape_cast %3 : vector<16x16x8xbf16> to vector<256x8xbf16>
    %c0_5 = arith.constant 0 : index
    %c0_6 = arith.constant 0 : index
    %5 = vector.load %arg7[%c0_5, %c0_6] : memref<256x128xbf16, #tpu.memory_space<vmem>>, vector<256x8xbf16>
    tpu.vector_store %arg7[%c0_5, %c0_6], %4 {strides = array<i32>} : memref<256x128xbf16, #tpu.memory_space<vmem>>, vector<256x8xbf16>,
    %c0_7 = arith.constant 0 : index
    %c0_8 = arith.constant 0 : index
    %c1 = arith.constant 1 : index
    %c0_9 = arith.constant 0 : index
    %6 = vector.load %arg2[%c0_7, %c0_8, %c1, %c0_9] : memref<1x18x18x8xbf16, #tpu.memory_space<vmem>>, vector<1x16x16x8xbf16>
    %7 = vector.shape_cast %6 : vector<1x16x16x8xbf16> to vector<16x16x8xbf16>
    %8 = vector.shape_cast %7 : vector<16x16x8xbf16> to vector<256x8xbf16>
    %c0_10 = arith.constant 0 : index
    %c8 = arith.constant 8 : index
    %9 = vector.load %arg7[%c0_10, %c8] : memref<256x128xbf16, #tpu.memory_space<vmem>>, vector<256x8xbf16>
    tpu.vector_store %arg7[%c0_10, %c8], %8 {strides = array<i32>} : memref<256x128xbf16, #tpu.memory_space<vmem>>, vector<256x8xbf16>,
    %c0_11 = arith.constant 0 : index
    %c0_12 = arith.constant 0 : index
    %c2 = arith.constant 2 : index
    %c0_13 = arith.constant 0 : index
    %10 = vector.load %arg2[%c0_11, %c0_12, %c2, %c0_13] : memref<1x18x18x8xbf16, #tpu.memory_space<vmem>>, vector<1x16x16x8xbf16>
    %11 = vector.shape_cast %10 : vector<1x16x16x8xbf16> to vector<16x16x8xbf16>
    %12 = vector.shape_cast %11 : vector<16x16x8xbf16> to vector<256x8xbf16>
    %c0_14 = arith.constant 0 : index
    %c16 = arith.constant 16 : index
    %13 = vector.load %arg7[%c0_14, %c16] : memref<256x128xbf16, #tpu.memory_space<vmem>>, vector<256x8xbf16>
    tpu.vector_store %arg7[%c0_14, %c16], %12 {strides = array<i32>} : memref<256x128xbf16, #tpu.memory_space<vmem>>, vector<256x8xbf16>,
    %c0_15 = arith.constant 0 : index
    %c1_16 = arith.constant 1 : index
    %c0_17 = arith.constant 0 : index
    %c0_18 = arith.constant 0 : index
    %14 = vector.load %arg2[%c0_15, %c1_16, %c0_17, %c0_18] : memref<1x18x18x8xbf16, #tpu.memory_space<vmem>>, vector<1x16x16x8xbf16>
    %15 = vector.shape_cast %14 : vector<1x16x16x8xbf16> to vector<16x16x8xbf16>
    %16 = vector.shape_cast %15 : vector<16x16x8xbf16> to vector<256x8xbf16>
    %c0_19 = arith.constant 0 : index
    %c24 = arith.constant 24 : index
    %17 = vector.load %arg7[%c0_19, %c24] : memref<256x128xbf16, #tpu.memory_space<vmem>>, vector<256x8xbf16>
    tpu.vector_store %arg7[%c0_19, %c24], %16 {strides = array<i32>} : memref<256x128xbf16, #tpu.memory_space<vmem>>, vector<256x8xbf16>,
    %c0_20 = arith.constant 0 : index
    %c1_21 = arith.constant 1 : index
    %c1_22 = arith.constant 1 : index
    %c0_23 = arith.constant 0 : index
    %18 = vector.load %arg2[%c0_20, %c1_21, %c1_22, %c0_23] : memref<1x18x18x8xbf16, #tpu.memory_space<vmem>>, vector<1x16x16x8xbf16>
    %19 = vector.shape_cast %18 : vector<1x16x16x8xbf16> to vector<16x16x8xbf16>
    %20 = vector.shape_cast %19 : vector<16x16x8xbf16> to vector<256x8xbf16>
    %c0_24 = arith.constant 0 : index
    %c32 = arith.constant 32 : index
    %21 = vector.load %arg7[%c0_24, %c32] : memref<256x128xbf16, #tpu.memory_space<vmem>>, vector<256x8xbf16>
    tpu.vector_store %arg7[%c0_24, %c32], %20 {strides = array<i32>} : memref<256x128xbf16, #tpu.memory_space<vmem>>, vector<256x8xbf16>,
    %c0_25 = arith.constant 0 : index
    %c1_26 = arith.constant 1 : index
    %c2_27 = arith.constant 2 : index
    %c0_28 = arith.constant 0 : index
    %22 = vector.load %arg2[%c0_25, %c1_26, %c2_27, %c0_28] : memref<1x18x18x8xbf16, #tpu.memory_space<vmem>>, vector<1x16x16x8xbf16>
    %23 = vector.shape_cast %22 : vector<1x16x16x8xbf16> to vector<16x16x8xbf16>
    %24 = vector.shape_cast %23 : vector<16x16x8xbf16> to vector<256x8xbf16>
    %c0_29 = arith.constant 0 : index
    %c40 = arith.constant 40 : index
    %25 = vector.load %arg7[%c0_29, %c40] : memref<256x128xbf16, #tpu.memory_space<vmem>>, vector<256x8xbf16>
    tpu.vector_store %arg7[%c0_29, %c40], %24 {strides = array<i32>} : memref<256x128xbf16, #tpu.memory_space<vmem>>, vector<256x8xbf16>,
    %c0_30 = arith.constant 0 : index
    %c2_31 = arith.constant 2 : index
    %c0_32 = arith.constant 0 : index
    %c0_33 = arith.constant 0 : index
    %26 = vector.load %arg2[%c0_30, %c2_31, %c0_32, %c0_33] : memref<1x18x18x8xbf16, #tpu.memory_space<vmem>>, vector<1x16x16x8xbf16>
    %27 = vector.shape_cast %26 : vector<1x16x16x8xbf16> to vector<16x16x8xbf16>
    %28 = vector.shape_cast %27 : vector<16x16x8xbf16> to vector<256x8xbf16>
    %c0_34 = arith.constant 0 : index
    %c48 = arith.constant 48 : index
    %29 = vector.load %arg7[%c0_34, %c48] : memref<256x128xbf16, #tpu.memory_space<vmem>>, vector<256x8xbf16>
    tpu.vector_store %arg7[%c0_34, %c48], %28 {strides = array<i32>} : memref<256x128xbf16, #tpu.memory_space<vmem>>, vector<256x8xbf16>,
    %c0_35 = arith.constant 0 : index
    %c2_36 = arith.constant 2 : index
    %c1_37 = arith.constant 1 : index
    %c0_38 = arith.constant 0 : index
    %30 = vector.load %arg2[%c0_35, %c2_36, %c1_37, %c0_38] : memref<1x18x18x8xbf16, #tpu.memory_space<vmem>>, vector<1x16x16x8xbf16>
    %31 = vector.shape_cast %30 : vector<1x16x16x8xbf16> to vector<16x16x8xbf16>
    %32 = vector.shape_cast %31 : vector<16x16x8xbf16> to vector<256x8xbf16>
    %c0_39 = arith.constant 0 : index
    %c56 = arith.constant 56 : index
    %33 = vector.load %arg7[%c0_39, %c56] : memref<256x128xbf16, #tpu.memory_space<vmem>>, vector<256x8xbf16>
    tpu.vector_store %arg7[%c0_39, %c56], %32 {strides = array<i32>} : memref<256x128xbf16, #tpu.memory_space<vmem>>, vector<256x8xbf16>,
    %c0_40 = arith.constant 0 : index
    %c2_41 = arith.constant 2 : index
    %c2_42 = arith.constant 2 : index
    %c0_43 = arith.constant 0 : index
    %34 = vector.load %arg2[%c0_40, %c2_41, %c2_42, %c0_43] : memref<1x18x18x8xbf16, #tpu.memory_space<vmem>>, vector<1x16x16x8xbf16>
    %35 = vector.shape_cast %34 : vector<1x16x16x8xbf16> to vector<16x16x8xbf16>
    %36 = vector.shape_cast %35 : vector<16x16x8xbf16> to vector<256x8xbf16>
    %c0_44 = arith.constant 0 : index
    %c64 = arith.constant 64 : index
    %37 = vector.load %arg7[%c0_44, %c64] : memref<256x128xbf16, #tpu.memory_space<vmem>>, vector<256x8xbf16>
    tpu.vector_store %arg7[%c0_44, %c64], %36 {strides = array<i32>} : memref<256x128xbf16, #tpu.memory_space<vmem>>, vector<256x8xbf16>,
    %c0_45 = arith.constant 0 : index
    %c0_46 = arith.constant 0 : index
    %38 = vector.load %arg7[%c0_45, %c0_46] : memref<256x128xbf16, #tpu.memory_space<vmem>>, vector<256x128xbf16>
    %c0_47 = arith.constant 0 : index
    %c0_48 = arith.constant 0 : index
    %39 = vector.load %arg3[%c0_47, %c0_48] : memref<128x128xbf16, #tpu.memory_space<vmem>>, vector<128x128xbf16>
    %cst_49 = arith.constant dense<0.000000e+00> : vector<256x128xf32>
    %40 = tpu.matmul %38, %39, %cst_49 {dimension_numbers = #tpu.dot_dimension_numbers<[1], [0], [0], [1], [0, 0, 1, 1], [], []>} : vector<256x128xbf16>, vector<128x128xbf16>, vector<256x128xf32> -> vector<256x128xf32>
    %c0_50 = arith.constant 0 : index
    %c0_51 = arith.constant 0 : index
    %41 = vector.load %arg4[%c0_50, %c0_51] : memref<1x128xf32, #tpu.memory_space<vmem>>, vector<1x128xf32>
    %42 = vector.broadcast %41 : vector<1x128xf32> to vector<256x128xf32>
    %43 = arith.addf %40, %42 : vector<256x128xf32>
    %c0_52 = arith.constant 0 : index
    %c0_53 = arith.constant 0 : index
    %c0_54 = arith.constant 0 : index
    %44 = vector.load %arg5[%c0_52, %c0_53, %c0_54] : memref<1x256x128xf32, #tpu.memory_space<vmem>>, vector<1x256x128xf32>
    %45 = vector.shape_cast %44 : vector<1x256x128xf32> to vector<256x128xf32>
    %46 = vector.shape_cast %43 : vector<256x128xf32> to vector<1x256x128xf32>
    tpu.vector_store %arg5[%c0_52, %c0_53, %c0_54], %46 {strides = array<i32>} : memref<1x256x128xf32, #tpu.memory_space<vmem>>, vector<1x256x128xf32>,
    %cst_55 = arith.constant dense<0.000000e+00> : vector<128xf32>
    %47 = vector.multi_reduction <add>, %43, %cst_55 [0] : vector<256x128xf32> to vector<128xf32>
    %48 = vector.shape_cast %47 : vector<128xf32> to vector<1x128xf32>
    %c0_56 = arith.constant 0 : index
    %c0_57 = arith.constant 0 : index
    %c0_58 = arith.constant 0 : index
    %49 = vector.load %arg6[%c0_56, %c0_57, %c0_58] : memref<1x2x128xf32, #tpu.memory_space<vmem>>, vector<1x1x128xf32>
    %50 = vector.shape_cast %49 : vector<1x1x128xf32> to vector<1x128xf32>
    %51 = vector.shape_cast %48 : vector<1x128xf32> to vector<1x1x128xf32>
    tpu.vector_store %arg6[%c0_56, %c0_57, %c0_58], %51 {strides = array<i32>} : memref<1x2x128xf32, #tpu.memory_space<vmem>>, vector<1x1x128xf32>,
    %52 = arith.mulf %43, %43 : vector<256x128xf32>
    %cst_59 = arith.constant dense<0.000000e+00> : vector<128xf32>
    %53 = vector.multi_reduction <add>, %52, %cst_59 [0] : vector<256x128xf32> to vector<128xf32>
    %54 = vector.shape_cast %53 : vector<128xf32> to vector<1x128xf32>
    %c0_60 = arith.constant 0 : index
    %c1_61 = arith.constant 1 : index
    %c0_62 = arith.constant 0 : index
    %55 = vector.load %arg6[%c0_60, %c1_61, %c0_62] : memref<1x2x128xf32, #tpu.memory_space<vmem>>, vector<1x1x128xf32>
    %56 = vector.shape_cast %55 : vector<1x1x128xf32> to vector<1x128xf32>
    %57 = vector.shape_cast %54 : vector<1x128xf32> to vector<1x1x128xf32>
    tpu.vector_store %arg6[%c0_60, %c1_61, %c0_62], %57 {strides = array<i32>} : memref<1x2x128xf32, #tpu.memory_space<vmem>>, vector<1x1x128xf32>,
    return
  }
  func.func @transform_0(%arg0: i32, %arg1: i32) -> (i32, i32, i32, i32) {
    %c0_i32 = arith.constant 0 : i32
    %c0_i32_0 = arith.constant 0 : i32
    %c0_i32_1 = arith.constant 0 : i32
    %c0_i32_2 = arith.constant 0 : i32
    return %arg0, %c0_i32, %c0_i32_0, %c0_i32_1 : i32, i32, i32, i32
  }
  func.func @transform_1(%arg0: i32, %arg1: i32) -> (i32, i32) {
    %c0_i32 = arith.constant 0 : i32
    %c0_i32_0 = arith.constant 0 : i32
    return %c0_i32, %arg1 : i32, i32
  }
  func.func @transform_2(%arg0: i32, %arg1: i32) -> (i32, i32) {
    %c0_i32 = arith.constant 0 : i32
    %c0_i32_0 = arith.constant 0 : i32
    return %c0_i32, %arg1 : i32, i32
  }
  func.func @transform_3(%arg0: i32, %arg1: i32) -> (i32, i32, i32) {
    %c0_i32 = arith.constant 0 : i32
    %c0_i32_0 = arith.constant 0 : i32
    return %arg0, %c0_i32, %arg1 : i32, i32, i32
  }
  func.func @transform_4(%arg0: i32, %arg1: i32) -> (i32, i32, i32) {
    %c0_i32 = arith.constant 0 : i32
    %c0_i32_0 = arith.constant 0 : i32
    return %arg0, %c0_i32, %arg1 : i32, i32, i32
  }
}

module attributes {stable_mosaic.version = 11 : i64} {
  func.func @_bn_relu_kernel(%arg0: i32, %arg1: i32, %arg2: i32, %arg3: memref<1x128x128xf32, #tpu.memory_space<vmem>>, %arg4: memref<1x128xf32, #tpu.memory_space<vmem>>, %arg5: memref<1x128xf32, #tpu.memory_space<vmem>>, %arg6: memref<1x128x128xf32, #tpu.memory_space<vmem>>) attributes {dimension_semantics = [#tpu.dimension_semantics<parallel>, #tpu.dimension_semantics<parallel>, #tpu.dimension_semantics<parallel>], iteration_bounds = array<i64: 2, 2, 1>, scalar_prefetch = 0 : i64, scratch_operands = 0 : i64, tpu.core_type = #tpu.core_type<tc>, window_params = [{transform_indices = @transform_0, window_bounds = array<i64: 1, 128, 128>}, {transform_indices = @transform_1, window_bounds = array<i64: 1, 128>}, {transform_indices = @transform_2, window_bounds = array<i64: 1, 128>}, {transform_indices = @transform_3, window_bounds = array<i64: 1, 128, 128>}]} {
    %c0 = arith.constant 0 : index
    %c0_0 = arith.constant 0 : index
    %c0_1 = arith.constant 0 : index
    %0 = vector.load %arg3[%c0, %c0_0, %c0_1] : memref<1x128x128xf32, #tpu.memory_space<vmem>>, vector<1x128x128xf32>
    %1 = vector.shape_cast %0 : vector<1x128x128xf32> to vector<128x128xf32>
    %c0_2 = arith.constant 0 : index
    %c0_3 = arith.constant 0 : index
    %2 = vector.load %arg4[%c0_2, %c0_3] : memref<1x128xf32, #tpu.memory_space<vmem>>, vector<1x128xf32>
    %3 = vector.broadcast %2 : vector<1x128xf32> to vector<128x128xf32>
    %4 = arith.mulf %1, %3 : vector<128x128xf32>
    %c0_4 = arith.constant 0 : index
    %c0_5 = arith.constant 0 : index
    %5 = vector.load %arg5[%c0_4, %c0_5] : memref<1x128xf32, #tpu.memory_space<vmem>>, vector<1x128xf32>
    %6 = vector.broadcast %5 : vector<1x128xf32> to vector<128x128xf32>
    %7 = arith.addf %4, %6 : vector<128x128xf32>
    %cst = arith.constant 0.000000e+00 : f32
    %8 = vector.broadcast %cst : f32 to vector<128x128xf32>
    %9 = arith.maximumf %7, %8 : vector<128x128xf32>
    %c0_6 = arith.constant 0 : index
    %c0_7 = arith.constant 0 : index
    %c0_8 = arith.constant 0 : index
    %10 = vector.load %arg6[%c0_6, %c0_7, %c0_8] : memref<1x128x128xf32, #tpu.memory_space<vmem>>, vector<1x128x128xf32>
    %11 = vector.shape_cast %10 : vector<1x128x128xf32> to vector<128x128xf32>
    %12 = vector.shape_cast %9 : vector<128x128xf32> to vector<1x128x128xf32>
    tpu.vector_store %arg6[%c0_6, %c0_7, %c0_8], %12 {strides = array<i32>} : memref<1x128x128xf32, #tpu.memory_space<vmem>>, vector<1x128x128xf32>,
    return
  }
  func.func @transform_0(%arg0: i32, %arg1: i32, %arg2: i32) -> (i32, i32, i32) {
    %c0_i32 = arith.constant 0 : i32
    return %arg0, %arg1, %arg2 : i32, i32, i32
  }
  func.func @transform_1(%arg0: i32, %arg1: i32, %arg2: i32) -> (i32, i32) {
    %c0_i32 = arith.constant 0 : i32
    %c0_i32_0 = arith.constant 0 : i32
    return %c0_i32, %arg2 : i32, i32
  }
  func.func @transform_2(%arg0: i32, %arg1: i32, %arg2: i32) -> (i32, i32) {
    %c0_i32 = arith.constant 0 : i32
    %c0_i32_0 = arith.constant 0 : i32
    return %c0_i32, %arg2 : i32, i32
  }
  func.func @transform_3(%arg0: i32, %arg1: i32, %arg2: i32) -> (i32, i32, i32) {
    %c0_i32 = arith.constant 0 : i32
    return %arg0, %arg1, %arg2 : i32, i32, i32
  }
}

</mosaic_0001>

<bundles_post_ra>
// kernel: conv_block_forward.5
= control target key start
LH: loop header
LB: loop body
LE: loop exit
PB: predicated region body
PF: predicated region fallthrough
CT: control target
= control target key end

     0   :  { %s662_s12 = smov 0   ;;  %s664_s13 = smov 0   ;;  %s787_s0 = inlined_call_operand.vmem [shape: f32[2,256,128], index: 0, kind: input, shape index: {}]   ;;  %s788_s1 = inlined_call_operand.vmem [shape: f32[1,128], index: 1, kind: input, shape index: {}]   ;;  %s789_s2 = inlined_call_operand.vmem [shape: f32[1,128], index: 2, kind: input, shape index: {}]   ;;  %s790_s3 = inlined_call_operand.vmem [shape: bf16[2,256,128], index: 3, kind: output, shape index: {}]  }
   0x1   :  { %s666_s14 = smov 0   ;;  %s668_s15 = smov 0  }
   0x2   :  { %s670_s16 = smov 0  }
   0x3 LB: > { %s28_s17 = sadd.s32 1, %s632_s14  ;;  %s32_s18 = sadd.s32 1, %s636_s15  ;;  %s640_s16 = sphi %s670_s16, %s13_s16   ;;  %s636_s15 = sphi %s668_s15, %s794_s15   ;;  %s632_s14 = sphi %s666_s14, %s793_s14   ;;  %s628_s13 = sphi %s664_s13, %s792_s13   ;;  %s624_s12 = sphi %s662_s12, %s791_s12  }
   0x4   : > { %p30_p0 = scmp.ge.s32.totalorder %s28_s17, 2  ;;  %p504_p1 = scmp.ge.s32.totalorder %s640_s16, 1 }
   0x5   : > { %p188_p2 = scmp.lt.s32.totalorder %s640_s16, 5 }
   0x6   : > { %s796_s17 = smov (%p30_p0, %s28_s17), 0  ;;  %s798_s18 = smov (!%p30_p0, %s32_s18), %s636_s15 }
   0x7   : > { %p189_p3 = pnand %p504_p1, %p188_p2  ;;  %p34_p4 = scmp.ge.s32.totalorder %s798_s18, 2 }
   0x8   : > { %s505_s19 = sshll.u32 (!%p189_p3), %s624_s12, 4  ;;  %p233_p5 = scmp.lt.s32.totalorder (!%p189_p3), %s628_s13, 1 }
   0x9   : > { %s800_s18 = smov (%p34_p4, %s798_s18), 0  ;;  %192 = sbr.rel (%p189_p3) target bundleno = 40 (0x28), region = 32 }
   0xa   : > { %p235_p6 = scmp.lt.s32.totalorder (!%p189_p3), %s505_s19, 31 }
   0xe   : > { %s802_s13 = smov (!%p233_p5, %s628_s13), 1  ;;  %s804_s19 = smov (!%p235_p6, %s505_s19), 31  ;;  %v697_v0 = vld [vmem:[%s788_s1] ss:$0 sm:$0xff] }
   0xf   : > { %s506_s20 = sshll.u32 %s802_s13, 5  ;;  %v708_v1 = vld [vmem:[%s789_s2] ss:$0 sm:$0xff] }
  0x10   : > { %s692_s21 = sadd.s32 %s506_s20, %s804_s19 }
  0x11   : > { %s507_s24 = sshll.u32 %s692_s21, 3  ;;  %s510_s30 = sshll.u32 %s692_s21, 2 }
  0x12   : > { %s703_s27 = scalar_lea.vmem %s787_s0, %s507_s24  ;;  %s740_s6 = scalar_lea.vmem %s790_s3, %s510_s30 }
  0x13   : > { %v264_v2 = vld [vmem:[%s703_s27] sm:$0xff]  ;;  %v265_v3 = vld [vmem:[%s703_s27 + $0x8] sm:$0xff]  ;;  %v266_v4 = vld [vmem:[%s703_s27 + $0x10] sm:$0xff] }
  0x14   : > { %v284_v5 = vmul.f32 %v697_v0, %v264_v2  ;;  %v285_v6 = vmul.f32 %v697_v0, %v265_v3  ;;  %v267_v7 = vld [vmem:[%s703_s27 + $0x18] sm:$0xff]  ;;  %v286_v8 = vmul.f32 %v697_v0, %v266_v4  ;;  %v268_v9 = vld [vmem:[%s703_s27 + $0x20] sm:$0xff]  ;;  %v269_v10 = vld [vmem:[%s703_s27 + $0x28] sm:$0xff] }
  0x15   : > { %v287_v11 = vmul.f32 %v697_v0, %v267_v7  ;;  %v288_v12 = vmul.f32 %v697_v0, %v268_v9  ;;  %v289_v13 = vmul.f32 %v697_v0, %v269_v10  ;;  %v270_v14 = vld [vmem:[%s703_s27 + $0x30] sm:$0xff]  ;;  %v271_v15 = vld [vmem:[%s703_s27 + $0x38] sm:$0xff]  ;;  %v272_v24 = vld [vmem:[%s703_s27 + $0x40] sm:$0xff] }
  0x16   : > { %v304_v16 = vadd.f32 %v708_v1, %v284_v5  ;;  %v305_v17 = vadd.f32 %v708_v1, %v285_v6  ;;  %v306_v18 = vadd.f32 %v708_v1, %v286_v8  ;;  %v290_v19 = vmul.f32 %v697_v0, %v270_v14  ;;  %v273_v25 = vld [vmem:[%s703_s27 + $0x48] sm:$0xff]  ;;  %v274_v30 = vld [vmem:[%s703_s27 + $0x50] sm:$0xff]  ;;  %v275_v35 = vld [vmem:[%s703_s27 + $0x58] sm:$0xff] }
  0x17   : > { %v307_v20 = vadd.f32 %v708_v1, %v287_v11  ;;  %v308_v21 = vadd.f32 %v708_v1, %v288_v12  ;;  %v309_v22 = vadd.f32 %v708_v1, %v289_v13  ;;  %v291_v23 = vmul.f32 %v697_v0, %v271_v15  ;;  %v276_v36 = vld [vmem:[%s703_s27 + $0x60] sm:$0xff]  ;;  %v277_v41 = vld [vmem:[%s703_s27 + $0x68] sm:$0xff]  ;;  %v278_v42 = vld [vmem:[%s703_s27 + $0x70] sm:$0xff] }
  0x18   : > { %v320_v26 = vmax.f32 %v304_v16, 0.0  ;;  %v321_v27 = vmax.f32 %v305_v17, 0.0  ;;  %v322_v28 = vmax.f32 %v306_v18, 0.0  ;;  %v310_v29 = vadd.f32 %v708_v1, %v290_v19  ;;  %v279_v51 = vld [vmem:[%s703_s27 + $0x78] sm:$0xff] }
  0x19   : > { %v323_v31 = vmax.f32 %v307_v20, 0.0  ;;  %v324_v32 = vmax.f32 %v308_v21, 0.0  ;;  %v325_v33 = vmax.f32 %v309_v22, 0.0  ;;  %v311_v34 = vadd.f32 %v708_v1, %v291_v23 }
  0x1a   : > { %v516_v37 = vpack.c.bf16 %v321_v27, %v320_v26  ;;  %v326_v38 = vmax.f32 %v310_v29, 0.0  ;;  %v292_v39 = vmul.f32 %v697_v0, %v272_v24  ;;  %v293_v40 = vmul.f32 %v697_v0, %v273_v25 }
  0x1b   : > { %v521_v43 = vpack.c.bf16 %v323_v31, %v322_v28  ;;  %v526_v44 = vpack.c.bf16 %v325_v33, %v324_v32  ;;  %v327_v45 = vmax.f32 %v311_v34, 0.0  ;;  %v294_v46 = vmul.f32 %v697_v0, %v274_v30 }
  0x1c   : > { %517 = vst [vmem:[%s740_s6] sm:$0xff] %v516_v37   ;;  %v312_v47 = vadd.f32 %v708_v1, %v292_v39  ;;  %v313_v48 = vadd.f32 %v708_v1, %v293_v40  ;;  %v295_v49 = vmul.f32 %v697_v0, %v275_v35  ;;  %v296_v50 = vmul.f32 %v697_v0, %v276_v36 }
  0x1d   : > { %553 = vst [vmem:[%s740_s6 + $0x8] sm:$0xff] %v521_v43   ;;  %v531_v52 = vpack.c.bf16 %v327_v45, %v326_v38  ;;  %v314_v53 = vadd.f32 %v708_v1, %v294_v46  ;;  %v297_v54 = vmul.f32 %v697_v0, %v277_v41  ;;  %v298_v55 = vmul.f32 %v697_v0, %v278_v42 }
  0x1e   : > { %554 = vst [vmem:[%s740_s6 + $0x10] sm:$0xff] %v526_v44   ;;  %v328_v56 = vmax.f32 %v312_v47, 0.0  ;;  %v329_v57 = vmax.f32 %v313_v48, 0.0  ;;  %v315_v58 = vadd.f32 %v708_v1, %v295_v49  ;;  %v316_v59 = vadd.f32 %v708_v1, %v296_v50 }
  0x1f   : > { %555 = vst [vmem:[%s740_s6 + $0x18] sm:$0xff] %v531_v52   ;;  %v330_v60 = vmax.f32 %v314_v53, 0.0  ;;  %v317_v61 = vadd.f32 %v708_v1, %v297_v54  ;;  %v299_v62 = vmul.f32 %v697_v0, %v279_v51  ;;  %v318_v63 = vadd.f32 %v708_v1, %v298_v55 }
  0x20   : > { %v536_v2 = vpack.c.bf16 %v329_v57, %v328_v56  ;;  %v331_v3 = vmax.f32 %v315_v58, 0.0  ;;  %v332_v4 = vmax.f32 %v316_v59, 0.0 }
  0x21   : > { %v333_v5 = vmax.f32 %v317_v61, 0.0  ;;  %v319_v6 = vadd.f32 %v708_v1, %v299_v62  ;;  %v334_v7 = vmax.f32 %v318_v63, 0.0 }
  0x22   : > { %556 = vst [vmem:[%s740_s6 + $0x20] sm:$0xff] %v536_v2   ;;  %v541_v8 = vpack.c.bf16 %v331_v3, %v330_v60 }
  0x23   : > { %v546_v9 = vpack.c.bf16 %v333_v5, %v332_v4  ;;  %v335_v10 = vmax.f32 %v319_v6, 0.0 }
  0x24   : > { %557 = vst [vmem:[%s740_s6 + $0x28] sm:$0xff] %v541_v8  }
  0x25   : > { %558 = vst [vmem:[%s740_s6 + $0x30] sm:$0xff] %v546_v9   ;;  %v551_v11 = vpack.c.bf16 %v335_v10, %v334_v7 }
  0x27   : > { %559 = vst [vmem:[%s740_s6 + $0x38] sm:$0xff] %v551_v11  }
  0x28 PF: > { %s13_s16 = sadd.s32 1, %s640_s16   ;;  %s791_s12 = smov %s632_s14 }
  0x29   : > { %p10_p7 = scmp.ge.s32.totalorder %s13_s16, 6   ;;  %s792_s13 = smov %s636_s15 }
  0x2a   : > { %s793_s14 = smov %s796_s17  ;;  %s794_s15 = smov %s800_s18 }
  0x2b   :  { %12 = sbr.rel (!%p10_p7) target bundleno = 3 (0x3), region = 68 }

// kernel: conv_block_forward.7
= control target key start
LH: loop header
LB: loop body
LE: loop exit
PB: predicated region body
PF: predicated region fallthrough
CT: control target
= control target key end

     0   :  { %s599_s12 = smov 0   ;;  %s601_s13 = smov 0   ;;  %s710_s0 = inlined_call_operand.vmem [shape: f32[2,256,128], index: 0, kind: input, shape index: {}]   ;;  %s711_s1 = inlined_call_operand.vmem [shape: f32[1,128], index: 1, kind: input, shape index: {}]   ;;  %s712_s2 = inlined_call_operand.vmem [shape: f32[1,128], index: 2, kind: input, shape index: {}]   ;;  %s713_s3 = inlined_call_operand.vmem [shape: f32[2,256,128], index: 3, kind: output, shape index: {}]  }
   0x1   :  { %s603_s14 = smov 0   ;;  %s605_s15 = smov 0  }
   0x2   :  { %s607_s16 = smov 0  }
   0x3 LB: > { %s28_s17 = sadd.s32 1, %s569_s14  ;;  %s32_s18 = sadd.s32 1, %s573_s15  ;;  %s577_s16 = sphi %s607_s16, %s13_s16   ;;  %s573_s15 = sphi %s605_s15, %s717_s15   ;;  %s569_s14 = sphi %s603_s14, %s716_s14   ;;  %s565_s13 = sphi %s601_s13, %s715_s13   ;;  %s561_s12 = sphi %s599_s12, %s714_s12  }
   0x4   : > { %p30_p0 = scmp.ge.s32.totalorder %s28_s17, 2  ;;  %p488_p1 = scmp.ge.s32.totalorder %s577_s16, 1 }
   0x5   : > { %p188_p2 = scmp.lt.s32.totalorder %s577_s16, 5 }
   0x6   : > { %s719_s17 = smov (%p30_p0, %s28_s17), 0  ;;  %s721_s18 = smov (!%p30_p0, %s32_s18), %s573_s15 }
   0x7   : > { %p189_p3 = pnand %p488_p1, %p188_p2  ;;  %p34_p4 = scmp.ge.s32.totalorder %s721_s18, 2 }
   0x8   : > { %s489_s19 = sshll.u32 (!%p189_p3), %s561_s12, 4  ;;  %p233_p5 = scmp.lt.s32.totalorder (!%p189_p3), %s565_s13, 1 }
   0x9   : > { %s723_s18 = smov (%p34_p4, %s721_s18), 0  ;;  %192 = sbr.rel (%p189_p3) target bundleno = 42 (0x2a), region = 32 }
   0xa   : > { %p235_p6 = scmp.lt.s32.totalorder (!%p189_p3), %s489_s19, 31 }
   0xe   : > { %s725_s13 = smov (!%p233_p5, %s565_s13), 1  ;;  %s727_s19 = smov (!%p235_p6, %s489_s19), 31  ;;  %v537_v0 = vld [vmem:[%s711_s1] ss:$0 sm:$0xff] }
   0xf   : > { %s490_s20 = sshll.u32 %s725_s13, 5  ;;  %v640_v1 = vld [vmem:[%s712_s2] ss:$0 sm:$0xff] }
  0x10   : > { %s241_s21 = sadd.s32 %s490_s20, %s727_s19 }
  0x11   : > { %s491_s24 = sshll.u32 %s241_s21, 3 }
  0x12   : > { %s635_s27 = scalar_lea.vmem %s710_s0, %s491_s24  ;;  %s656_s5 = scalar_lea.vmem %s713_s3, %s491_s24 }
  0x13   : > { %v264_v2 = vld [vmem:[%s635_s27] sm:$0xff]  ;;  %v265_v3 = vld [vmem:[%s635_s27 + $0x8] sm:$0xff]  ;;  %v266_v4 = vld [vmem:[%s635_s27 + $0x10] sm:$0xff] }
  0x14   : > { %v284_v5 = vmul.f32 %v537_v0, %v264_v2  ;;  %v285_v6 = vmul.f32 %v537_v0, %v265_v3  ;;  %v286_v7 = vmul.f32 %v537_v0, %v266_v4  ;;  %v267_v8 = vld [vmem:[%s635_s27 + $0x18] sm:$0xff]  ;;  %v268_v9 = vld [vmem:[%s635_s27 + $0x20] sm:$0xff]  ;;  %v269_v10 = vld [vmem:[%s635_s27 + $0x28] sm:$0xff] }
  0x15   : > { %v287_v11 = vmul.f32 %v537_v0, %v267_v8  ;;  %v288_v12 = vmul.f32 %v537_v0, %v268_v9  ;;  %v289_v13 = vmul.f32 %v537_v0, %v269_v10  ;;  %v270_v14 = vld [vmem:[%s635_s27 + $0x30] sm:$0xff]  ;;  %v271_v15 = vld [vmem:[%s635_s27 + $0x38] sm:$0xff]  ;;  %v272_v24 = vld [vmem:[%s635_s27 + $0x40] sm:$0xff] }
  0x16   : > { %v304_v16 = vadd.f32 %v640_v1, %v284_v5  ;;  %v305_v17 = vadd.f32 %v640_v1, %v285_v6  ;;  %v306_v18 = vadd.f32 %v640_v1, %v286_v7  ;;  %v290_v19 = vmul.f32 %v537_v0, %v270_v14  ;;  %v273_v25 = vld [vmem:[%s635_s27 + $0x48] sm:$0xff]  ;;  %v274_v26 = vld [vmem:[%s635_s27 + $0x50] sm:$0xff]  ;;  %v275_v31 = vld [vmem:[%s635_s27 + $0x58] sm:$0xff] }
  0x17   : > { %v307_v20 = vadd.f32 %v640_v1, %v287_v11  ;;  %v308_v21 = vadd.f32 %v640_v1, %v288_v12  ;;  %v309_v22 = vadd.f32 %v640_v1, %v289_v13  ;;  %v291_v23 = vmul.f32 %v537_v0, %v271_v15  ;;  %v276_v32 = vld [vmem:[%s635_s27 + $0x60] sm:$0xff]  ;;  %v277_v33 = vld [vmem:[%s635_s27 + $0x68] sm:$0xff]  ;;  %v278_v37 = vld [vmem:[%s635_s27 + $0x70] sm:$0xff] }
  0x18   : > { %v320_v27 = vmax.f32 %v304_v16, 0.0  ;;  %v321_v28 = vmax.f32 %v305_v17, 0.0  ;;  %v322_v29 = vmax.f32 %v306_v18, 0.0  ;;  %v310_v30 = vadd.f32 %v640_v1, %v290_v19  ;;  %v279_v42 = vld [vmem:[%s635_s27 + $0x78] sm:$0xff] }
  0x19   : > { %v323_v34 = vmax.f32 %v307_v20, 0.0  ;;  %v324_v35 = vmax.f32 %v308_v21, 0.0  ;;  %v311_v36 = vadd.f32 %v640_v1, %v291_v23  ;;  %v325_v38 = vmax.f32 %v309_v22, 0.0 }
  0x1a   : > { %336 = vst [vmem:[%s656_s5] sm:$0xff] %v320_v27  ;;  %v292_v39 = vmul.f32 %v537_v0, %v272_v24  ;;  %v293_v40 = vmul.f32 %v537_v0, %v273_v25  ;;  %v294_v41 = vmul.f32 %v537_v0, %v274_v26  ;;  %v326_v43 = vmax.f32 %v310_v30, 0.0 }
  0x1b   : > { %337 = vst [vmem:[%s656_s5 + $0x8] sm:$0xff] %v321_v28  ;;  %v295_v44 = vmul.f32 %v537_v0, %v275_v31  ;;  %v296_v45 = vmul.f32 %v537_v0, %v276_v32  ;;  %v297_v46 = vmul.f32 %v537_v0, %v277_v33  ;;  %v298_v50 = vmul.f32 %v537_v0, %v278_v37 }
  0x1c   : > { %338 = vst [vmem:[%s656_s5 + $0x10] sm:$0xff] %v322_v29  ;;  %v312_v47 = vadd.f32 %v640_v1, %v292_v39  ;;  %v313_v48 = vadd.f32 %v640_v1, %v293_v40  ;;  %v314_v49 = vadd.f32 %v640_v1, %v294_v41  ;;  %v327_v51 = vmax.f32 %v311_v36, 0.0 }
  0x1d   : > { %339 = vst [vmem:[%s656_s5 + $0x18] sm:$0xff] %v323_v34  ;;  %v315_v52 = vadd.f32 %v640_v1, %v295_v44  ;;  %v299_v53 = vmul.f32 %v537_v0, %v279_v42  ;;  %v316_v55 = vadd.f32 %v640_v1, %v296_v45  ;;  %v317_v57 = vadd.f32 %v640_v1, %v297_v46 }
  0x1e   : > { %340 = vst [vmem:[%s656_s5 + $0x20] sm:$0xff] %v324_v35  ;;  %v328_v54 = vmax.f32 %v312_v47, 0.0  ;;  %v329_v56 = vmax.f32 %v313_v48, 0.0  ;;  %v330_v58 = vmax.f32 %v314_v49, 0.0  ;;  %v318_v59 = vadd.f32 %v640_v1, %v298_v50 }
  0x1f   : > { %341 = vst [vmem:[%s656_s5 + $0x28] sm:$0xff] %v325_v38  ;;  %v331_v60 = vmax.f32 %v315_v52, 0.0  ;;  %v319_v61 = vadd.f32 %v640_v1, %v299_v53  ;;  %v332_v62 = vmax.f32 %v316_v55, 0.0  ;;  %v333_v63 = vmax.f32 %v317_v57, 0.0 }
  0x20   : > { %342 = vst [vmem:[%s656_s5 + $0x30] sm:$0xff] %v326_v43  ;;  %v334_v0 = vmax.f32 %v318_v59, 0.0 }
  0x21   : > { %343 = vst [vmem:[%s656_s5 + $0x38] sm:$0xff] %v327_v51  ;;  %v335_v2 = vmax.f32 %v319_v61, 0.0 }
  0x22   : > { %344 = vst [vmem:[%s656_s5 + $0x40] sm:$0xff] %v328_v54 }
  0x23   : > { %345 = vst [vmem:[%s656_s5 + $0x48] sm:$0xff] %v329_v56 }
  0x24   : > { %346 = vst [vmem:[%s656_s5 + $0x50] sm:$0xff] %v330_v58 }
  0x25   : > { %347 = vst [vmem:[%s656_s5 + $0x58] sm:$0xff] %v331_v60 }
  0x26   : > { %348 = vst [vmem:[%s656_s5 + $0x60] sm:$0xff] %v332_v62 }
  0x27   : > { %349 = vst [vmem:[%s656_s5 + $0x68] sm:$0xff] %v333_v63 }
  0x28   : > { %350 = vst [vmem:[%s656_s5 + $0x70] sm:$0xff] %v334_v0 }
  0x29   : > { %351 = vst [vmem:[%s656_s5 + $0x78] sm:$0xff] %v335_v2 }
  0x2a PF: > { %s13_s16 = sadd.s32 1, %s577_s16   ;;  %s714_s12 = smov %s569_s14 }
  0x2b   : > { %p10_p7 = scmp.ge.s32.totalorder %s13_s16, 6   ;;  %s715_s13 = smov %s573_s15 }
  0x2c   : > { %s716_s14 = smov %s719_s17  ;;  %s717_s15 = smov %s723_s18 }
  0x2d   :  { %12 = sbr.rel (!%p10_p7) target bundleno = 3 (0x3), region = 68 }

// kernel: conv_block_forward.4
= control target key start
LH: loop header
LB: loop body
LE: loop exit
PB: predicated region body
PF: predicated region fallthrough
CT: control target
= control target key end

     0   :  { %s4580_s15 = smov 0   ;;  %s4582_s16 = smov 0   ;;  %s6201_s0 = inlined_call_operand.vmem [shape: bf16[2,18,18,4], index: 0, kind: input, shape index: {}]   ;;  %s6202_s1 = inlined_call_operand.vmem [shape: bf16[128,128], index: 1, kind: input, shape index: {}]   ;;  %s6203_s2 = inlined_call_operand.vmem [shape: f32[1,128], index: 2, kind: input, shape index: {}]   ;;  %s6204_s3 = inlined_call_operand.vmem [shape: f32[2,256,128], index: 3, kind: output, shape index: {0}]   ;;  %s6205_s4 = inlined_call_operand.vmem [shape: f32[2,2,128], index: 4, kind: output, shape index: {1}]  }
   0x1   :  { %s4584_s17 = smov 0  }
   0x2 LB: > { %s27_s18 = sadd.s32 1, %s4540_s16  ;;  %p4031_p0 = scmp.ge.s32.totalorder %s4544_s17, 1  ;;  %s4544_s17 = sphi %s4584_s17, %s15_s17   ;;  %s4540_s16 = sphi %s4582_s16, %s6211_s16   ;;  %s4536_s15 = sphi %s4580_s15, %s6210_s15  }
   0x3   : > { %p29_p1 = scmp.ge.s32.totalorder %s27_s18, 2  ;;  %p198_p2 = scmp.lt.s32.totalorder %s4544_s17, 3 }
   0x5   : > { %s6213_s18 = smov (%p29_p1, %s27_s18), 0  ;;  %p199_p3 = pnand %p4031_p0, %p198_p2 }
   0x6   : > { %p241_p4 = scmp.lt.s32.totalorder (!%p199_p3), %s4536_s15, 1  ;;  %s4546_s23 = smov (!%p199_p3), 4  }
   0x7   : > { %202 = sbr.rel (%p199_p3) target bundleno = 989 (0x3dd), region = 32  ;;  %s4548_s24 = smov (!%p199_p3), 8  }
   0x8   : > { %s4549_s25 = smov (!%p199_p3), 12   ;;  %s4550_s26 = smov (!%p199_p3), 16  }
   0x9   : > { %s4551_s27 = smov (!%p199_p3), 20   ;;  %s4552_s28 = smov (!%p199_p3), 24  }
   0xa   : > { %s4553_s29 = smov (!%p199_p3), 28   ;;  %s4554_s30 = smov (!%p199_p3), 32  }
   0xc   : > { %s6215_s15 = smov (!%p241_p4, %s4536_s15), 1  ;;  %vm414_vm0 = vsmask.f32 3328  ;;  %vm415_vm1 = vsmask.f32 7440  ;;  %vm1026_vm3 = vcmask 1042432  }
   0xd   : > { %s4487_s19 = smul.u32 216, %s6215_s15  ;;  %vm4615_vm2 = vmor %vm414_vm0, %vm415_vm1  ;;  %vm1027_vm4 = vcmask 1046532   ;;  %vm333_vm6 = vcmask 27648   ;;  %vm897_vm7 = vcmask 60448   ;;  %vm1237_vm8 = vcmask 93248  }
   0xe   : > { %vm4789_vm5 = vmor %vm1026_vm3, %vm1027_vm4  ;;  %vm1431_vm9 = vcmask 126048   ;;  %vm1992_vm10 = vcmask 158848   ;;  %vm2329_vm11 = vcmask 191648   ;;  %vm2523_vm12 = vcmask 224448  }
   0xf   : > { %s4604_s22 = scalar_lea.vmem %s6201_s0, %s4487_s19  ;;  %vm3084_vm13 = vcmask 257248   ;;  %vm3421_vm14 = vcmask 290048  }
  0x10   : > { %v369_v0 = vld [vmem:[%s4604_s22 + $0xc] sm:$0xf]  ;;  %v370_v1 = vld [vmem:[%s4604_s22 + $0x10] sm:$0xf]  ;;  %v366_v2 = vld [vmem:[%s4604_s22] sm:$0xf] }
  0x11   : > { %v442_v3 = vshrl.u32 %v369_v0, 16  ;;  %v445_v4 = vshll.u32 %v369_v0, 16  ;;  %v451_v5 = vshll.u32 %v370_v1, 16  ;;  %v455_v6 = vshrl.u32 %v370_v1, 16  ;;  %v367_v7 = vld [vmem:[%s4604_s22 + $0x4] sm:$0xf] }
  0x12   : > { %v418_v8 = vshrl.u32 %v366_v2, 16  ;;  %v421_v9 = vshll.u32 %v366_v2, 16  ;;  %v427_v10 = vshll.u32 %v367_v7, 16  ;;  %v431_v11 = vshrl.u32 %v367_v7, 16  ;;  %v371_v12 = vld [vmem:[%s4604_s22 + $0x14] sm:$0x1] }
  0x13   : > { %v444_v13 = vrot.slane %v442_v3, 4  ;;  %v447_v14 = vrot.slane %v445_v4, 5  ;;  %v453_v15 = vrot.slane %v451_v5, 5  ;;  %v457_v16 = vrot.slane %v455_v6, 4  ;;  %v368_v17 = vld [vmem:[%s4604_s22 + $0x8] sm:$0x1] }
  0x14   : > { %v420_v18 = vrot.slane %v418_v8, 4  ;;  %v423_v19 = vrot.slane %v421_v9, 5  ;;  %v433_v20 = vrot.slane %v431_v11, 4  ;;  %v376_v21 = vld [vmem:[%s4604_s22 + $0x28] sm:$0xf]  ;;  %v461_v24 = vshll.u32 %v371_v12, 16 }
  0x15   : > { %v448_v22 = vor.u32 %v447_v14, %v444_v13  ;;  %v458_v23 = vor.u32 %v457_v16, %v453_v15  ;;  %v429_v27 = vrot.slane %v427_v10, 5  ;;  %v499_v28 = vshll.u32 %v376_v21, 16  ;;  %v375_v30 = vld [vmem:[%s4604_s22 + $0x24] sm:$0xf]  ;;  %v372_v35 = vld [vmem:[%s4604_s22 + $0x18] sm:$0xf] }
  0x16   : > { %v424_v26 = vor.u32 %v423_v19, %v420_v18  ;;  %v503_v29 = vshrl.u32 %v376_v21, 16  ;;  %v437_v32 = vshll.u32 %v368_v17, 16  ;;  %v463_v38 = vrot.slane %v461_v24, 5  ;;  %v373_v40 = vld [vmem:[%s4604_s22 + $0x1c] sm:$0xf] }
  0x17   : > { %v449_v31 = vrot.slane %v448_v22, 4  ;;  %v434_v34 = vor.u32 %v433_v20, %v429_v27  ;;  %v459_v37 = vrot.slane %v458_v23, 4  ;;  %v490_v39 = vshrl.u32 %v375_v30, 16  ;;  %v377_v42 = vld [vmem:[%s4604_s22 + $0x2c] sm:$0x1] }
  0x18   : > { %v425_v33 = vrot.slane %v424_v26, 4  ;;  %v4628_v43 = vrot.slane %v499_v28, 5  ;;  %v505_v44 = vrot.slane %v503_v29, 4  ;;  %v493_v45 = vshll.u32 %v375_v30, 16  ;;  %v381_v50 = vld [vmem:[%s4604_s22 + $0x3c] sm:$0xf] }
  0x19   : > { %v454_v36 = vsel %vm4615_vm2, %v449_v31, %v453_v15  ;;  %v439_v46 = vrot.slane %v437_v32, 5  ;;  %v492_v47 = vrot.slane %v490_v39, 4  ;;  %v466_v48 = vshrl.u32 %v372_v35, 16  ;;  %v379_v58 = vld [vmem:[%s4604_s22 + $0x34] sm:$0xf] }
  0x1a   : > { %805 = vrot.lane.b32.xlu1 %v454_v36, %s4546_s23  ;;  %v430_v41 = vsel %vm4615_vm2, %v425_v33, %v429_v27  ;;  %v469_v49 = vshll.u32 %v372_v35, 16  ;;  %v435_v51 = vrot.slane %v434_v34, 4  ;;  %v495_v52 = vrot.slane %v493_v45, 5  ;;  %v374_v6 = vld [vmem:[%s4604_s22 + $0x20] sm:$0x1] }
  0x1b   : > { %801 = vrot.lane.b32.xlu0 %v430_v41, %s4546_s23  ;;  %v475_v53 = vshll.u32 %v373_v40, 16  ;;  %v479_v54 = vshrl.u32 %v373_v40, 16  ;;  %v509_v55 = vshll.u32 %v377_v42, 16  ;;  %v468_v56 = vrot.slane %v466_v48, 4  ;;  %v382_v15 = vld [vmem:[%s4604_s22 + $0x40] sm:$0xf] }
  0x1c   : > { %v471_v57 = vrot.slane %v469_v49, 5  ;;  %v506_v59 = vor.u32 %v505_v44, %v4628_v43  ;;  %v538_v61 = vshrl.u32 %v381_v50, 16  ;;  %v541_v62 = vshll.u32 %v381_v50, 16  ;;  %v380_v16 = vld [vmem:[%s4604_s22 + $0x38] sm:$0x1] }
  0x1d   : > { %v481_v60 = vrot.slane %v479_v54, 4  ;;  %v464_v63 = vsel %vm4615_vm2, %v459_v37, %v463_v38  ;;  %v496_v0 = vor.u32 %v495_v52, %v492_v47  ;;  %v477_v2 = vrot.slane %v475_v53, 5  ;;  %v385_v20 = vld [vmem:[%s4604_s22 + $0x4c] sm:$0xf]  ;;  %v378_v21 = vld [vmem:[%s4604_s22 + $0x30] sm:$0xf] }
  0x1e   : > { %v472_v1 = vor.u32 %v471_v57, %v468_v56  ;;  %v440_v3 = vsel %vm4615_vm2, %v435_v51, %v439_v46  ;;  %v523_v4 = vshll.u32 %v379_v58, 16  ;;  %v527_v5 = vshrl.u32 %v379_v58, 16  ;;  %v384_v24 = vld [vmem:[%s4604_s22 + $0x48] sm:$0xf]  ;;  %v390_v47 = vld [vmem:[%s4604_s22 + $0x60] sm:$0xf] }
  0x1f   : > { %v511_v7 = vrot.slane %v509_v55, 5  ;;  %v507_v9 = vrot.slane %v506_v59, 4  ;;  %v540_v10 = vrot.slane %v538_v61, 4  ;;  %v543_v11 = vrot.slane %v541_v62, 5  ;;  %v386_v49 = vld [vmem:[%s4604_s22 + $0x50] sm:$0x1] }
  0x20   : > { %v473_v8 = vrot.slane %v472_v1, 4  ;;  %v482_v12 = vor.u32 %v481_v60, %v477_v2  ;;  %v497_v13 = vrot.slane %v496_v0, 4  ;;  %v485_v17 = vshll.u32 %v374_v6, 16  ;;  %v388_v53 = vld [vmem:[%s4604_s22 + $0x58] sm:$0xf] }
  0x21   : > { %v4646_v18 = vrot.slane %v523_v4, 5  ;;  %v529_v19 = vrot.slane %v527_v5, 4  ;;  %v512_v26 = vsel %vm4615_vm2, %v507_v9, %v511_v7  ;;  %v544_v27 = vor.u32 %v543_v11, %v540_v10  ;;  %v383_v58 = vld [vmem:[%s4604_s22 + $0x44] sm:$0x1]  ;;  %v394_v11 = vld [vmem:[%s4604_s22 + $0x70] sm:$0xf] }
  0x22   : > { %807 = vrot.lane.b32.xlu1 %v464_v63, %s4546_s23  ;;  %v478_v14 = vsel %vm4615_vm2, %v473_v8, %v477_v2  ;;  %v483_v22 = vrot.slane %v482_v12, 4  ;;  %v487_v23 = vrot.slane %v485_v17, 5  ;;  %v547_v28 = vshll.u32 %v382_v15, 16  ;;  %v387_v2 = vld [vmem:[%s4604_s22 + $0x54] sm:$0xf] }
  0x23   : > { %803 = vrot.lane.b32.xlu0 %v440_v3, %s4546_s23  ;;  %809 = vrot.lane.b32.xlu2 %v478_v14, %s4546_s23  ;;  %v533_v29 = vshll.u32 %v380_v16, 16  ;;  %v502_v30 = vsel %vm4615_vm2, %v497_v13, %v4628_v43  ;;  %v571_v31 = vshll.u32 %v385_v20, 16  ;;  %v575_v32 = vshrl.u32 %v385_v20, 16  ;;  %v391_v6 = vld [vmem:[%s4604_s22 + $0x64] sm:$0xf] }
  0x24   : > { %v514_v33 = vshrl.u32 %v378_v21, 16  ;;  %v530_v34 = vor.u32 %v529_v19, %v4646_v18  ;;  %v562_v35 = vshrl.u32 %v384_v24, 16  ;;  %v565_v36 = vshll.u32 %v384_v24, 16  ;;  %v393_v20 = vld [vmem:[%s4604_s22 + $0x6c] sm:$0xf] }
  0x25   : > { %v517_v37 = vshll.u32 %v378_v21, 16  ;;  %v551_v38 = vshrl.u32 %v382_v15, 16  ;;  %v488_v39 = vsel %vm4615_vm2, %v483_v22, %v487_v23  ;;  %v549_v41 = vrot.slane %v547_v28, 5  ;;  %v389_v15 = vld [vmem:[%s4604_s22 + $0x5c] sm:$0x1] }
  0x26   : > { %v516_v40 = vrot.slane %v514_v33, 4  ;;  %v545_v43 = vrot.slane %v544_v27, 4  ;;  %v535_v44 = vrot.slane %v533_v29, 5  ;;  %v4661_v45 = vrot.slane %v571_v31, 5 }
  0x27   : > { %v519_v42 = vrot.slane %v517_v37, 5  ;;  %v577_v46 = vrot.slane %v575_v32, 4  ;;  %v531_v48 = vrot.slane %v530_v34, 4  ;;  %v564_v50 = vrot.slane %v562_v35, 4 }
  0x28   : > { %v567_v51 = vrot.slane %v565_v36, 5  ;;  %v553_v54 = vrot.slane %v551_v38, 4  ;;  %v610_v56 = vshrl.u32 %v390_v47, 16  ;;  %v613_v57 = vshll.u32 %v390_v47, 16  ;;  %v397_v47 = vld [vmem:[%s4604_s22 + $0x7c] sm:$0xf] }
  0x29   : > { %v520_v52 = vor.u32 %v519_v42, %v516_v40  ;;  %v550_v59 = vsel %vm4615_vm2, %v545_v43, %v549_v41  ;;  %v578_v60 = vor.u32 %v577_v46, %v4661_v45  ;;  %v581_v61 = vshll.u32 %v386_v49, 16  ;;  %v399_v42 = vld [vmem:[%s4604_s22 + $0x84] sm:$0xf]  ;;  %v392_v49 = vld [vmem:[%s4604_s22 + $0x68] sm:$0x1] }
  0x2a   : > { %815 = vrot.lane.b32.xlu1 %v512_v26, %s4546_s23  ;;  %v536_v62 = vsel %vm4615_vm2, %v531_v48, %v535_v44  ;;  %v568_v63 = vor.u32 %v567_v51, %v564_v50  ;;  %v595_v0 = vshll.u32 %v388_v53, 16  ;;  %v599_v1 = vshrl.u32 %v388_v53, 16 }
  0x2b   : > { %813 = vrot.lane.b32.xlu0 %v502_v30, %s4546_s23  ;;  %811 = vrot.lane.b32.xlu2 %v488_v39, %s4546_s23  ;;  %v521_v55 = vrot.slane %v520_v52, 4  ;;  %v554_v4 = vor.u32 %v553_v54, %v549_v41  ;;  %v557_v5 = vshll.u32 %v383_v58, 16  ;;  %v612_v7 = vrot.slane %v610_v56, 4  ;;  %v395_v41 = vld [vmem:[%s4604_s22 + $0x74] sm:$0x1] }
  0x2c   : > { %v615_v8 = vrot.slane %v613_v57, 5  ;;  %v579_v9 = vrot.slane %v578_v60, 4  ;;  %v583_v10 = vrot.slane %v581_v61, 5  ;;  %v586_v12 = vshrl.u32 %v387_v2, 16  ;;  %v396_v54 = vld [vmem:[%s4604_s22 + $0x78] sm:$0xf] }
  0x2d   : > { %v526_v3 = vsel %vm4615_vm2, %v521_v55, %v4646_v18  ;;  %v589_v13 = vshll.u32 %v387_v2, 16  ;;  %v569_v14 = vrot.slane %v568_v63, 4  ;;  %v4683_v16 = vrot.slane %v595_v0, 5 }
  0x2e   : > { %v601_v17 = vrot.slane %v599_v1, 4  ;;  %v555_v18 = vrot.slane %v554_v4, 4  ;;  %v559_v19 = vrot.slane %v557_v5, 5  ;;  %v588_v21 = vrot.slane %v586_v12, 4  ;;  %v400_v4 = vld [vmem:[%s4604_s22 + $0x88] sm:$0xf] }
  0x2f   : > { %v591_v22 = vrot.slane %v589_v13, 5  ;;  %v616_v23 = vor.u32 %v615_v8, %v612_v7  ;;  %v619_v24 = vshll.u32 %v391_v6, 16  ;;  %v643_v26 = vshll.u32 %v394_v11, 16 }
  0x30   : > { %v647_v27 = vshrl.u32 %v394_v11, 16  ;;  %v584_v28 = vsel %vm4615_vm2, %v579_v9, %v583_v10  ;;  %v605_v29 = vshll.u32 %v389_v15, 16  ;;  %v574_v30 = vsel %vm4615_vm2, %v569_v14, %v4661_v45  ;;  %v403_v9 = vld [vmem:[%s4604_s22 + $0x94] sm:$0xf]  ;;  %v398_v11 = vld [vmem:[%s4604_s22 + $0x80] sm:$0x1] }
  0x31   : > { %v602_v31 = vor.u32 %v601_v17, %v4683_v16  ;;  %v634_v32 = vshrl.u32 %v393_v20, 16  ;;  %v637_v33 = vshll.u32 %v393_v20, 16  ;;  %v623_v34 = vshrl.u32 %v391_v6, 16  ;;  %v402_v14 = vld [vmem:[%s4604_s22 + $0x90] sm:$0xf] }
  0x32   : > { %821 = vrot.lane.b32.xlu1 %v550_v59, %s4546_s23  ;;  %v560_v35 = vsel %vm4615_vm2, %v555_v18, %v559_v19  ;;  %v592_v36 = vor.u32 %v591_v22, %v588_v21  ;;  %v617_v37 = vrot.slane %v616_v23, 4  ;;  %v621_v38 = vrot.slane %v619_v24, 5 }
  0x33   : > { %819 = vrot.lane.b32.xlu0 %v536_v62, %s4546_s23  ;;  %817 = vrot.lane.b32.xlu2 %v526_v3, %s4546_s23  ;;  %v4695_v39 = vrot.slane %v643_v26, 5  ;;  %v649_v40 = vrot.slane %v647_v27, 4  ;;  %v603_v43 = vrot.slane %v602_v31, 4  ;;  %v607_v44 = vrot.slane %v605_v29, 5 }
  0x34   : > { %v636_v45 = vrot.slane %v634_v32, 4  ;;  %v639_v46 = vrot.slane %v637_v33, 5  ;;  %v593_v48 = vrot.slane %v592_v36, 4  ;;  %v625_v50 = vrot.slane %v623_v34, 4 }
  0x35   : > { %v622_v51 = vsel %vm4615_vm2, %v617_v37, %v621_v38  ;;  %v650_v52 = vor.u32 %v649_v40, %v4695_v39  ;;  %v653_v53 = vshll.u32 %v395_v41, 16  ;;  %v682_v55 = vshrl.u32 %v399_v42, 16  ;;  %v404_v37 = vld [vmem:[%s4604_s22 + $0x98] sm:$0x1]  ;;  %v408_v40 = vld [vmem:[%s4604_s22 + $0xa8] sm:$0xf] }
  0x36   : > { %v685_v56 = vshll.u32 %v399_v42, 16  ;;  %v667_v57 = vshll.u32 %v397_v47, 16  ;;  %v671_v58 = vshrl.u32 %v397_v47, 16  ;;  %v608_v59 = vsel %vm4615_vm2, %v603_v43, %v607_v44  ;;  %v406_v42 = vld [vmem:[%s4604_s22 + $0xa0] sm:$0xf] }
  0x37   : > { %v640_v60 = vor.u32 %v639_v46, %v636_v45  ;;  %v629_v61 = vshll.u32 %v392_v49, 16  ;;  %v598_v62 = vsel %vm4615_vm2, %v593_v48, %v4683_v16  ;;  %v626_v63 = vor.u32 %v625_v50, %v621_v38  ;;  %v401_v43 = vld [vmem:[%s4604_s22 + $0x8c] sm:$0x1]  ;;  %v405_v47 = vld [vmem:[%s4604_s22 + $0x9c] sm:$0xf] }
  0x38   : > { %v658_v0 = vshrl.u32 %v396_v54, 16  ;;  %v661_v1 = vshll.u32 %v396_v54, 16  ;;  %v651_v2 = vrot.slane %v650_v52, 4  ;;  %v655_v3 = vrot.slane %v653_v53, 5 }
  0x39   : > { %v684_v5 = vrot.slane %v682_v55, 4  ;;  %v687_v6 = vrot.slane %v685_v56, 5  ;;  %v4715_v7 = vrot.slane %v667_v57, 5  ;;  %v673_v8 = vrot.slane %v671_v58, 4 }
  0x3a   : > { %827 = vrot.lane.b32.xlu1 %v584_v28, %s4546_s23  ;;  %v641_v10 = vrot.slane %v640_v60, 4  ;;  %v627_v12 = vrot.slane %v626_v63, 4  ;;  %v631_v13 = vrot.slane %v629_v61, 5  ;;  %v660_v15 = vrot.slane %v658_v0, 4 }
  0x3b   : > { %825 = vrot.lane.b32.xlu0 %v574_v30, %s4546_s23  ;;  %823 = vrot.lane.b32.xlu2 %v560_v35, %s4546_s23  ;;  %v663_v16 = vrot.slane %v661_v1, 5  ;;  %v691_v17 = vshll.u32 %v400_v4, 16  ;;  %v715_v18 = vshll.u32 %v403_v9, 16  ;;  %v719_v19 = vshrl.u32 %v403_v9, 16  ;;  %v407_v1 = vld [vmem:[%s4604_s22 + $0xa4] sm:$0x1] }
  0x3c   : > { %v656_v20 = vsel %vm4615_vm2, %v651_v2, %v655_v3  ;;  %v688_v21 = vor.u32 %v687_v6, %v684_v5  ;;  %v674_v22 = vor.u32 %v673_v8, %v4715_v7  ;;  %v677_v23 = vshll.u32 %v398_v11, 16  ;;  %v412_v5 = vld [vmem:[%s4604_s22 + $0xb8] sm:$0xf]  ;;  %v411_v8 = vld [vmem:[%s4604_s22 + $0xb4] sm:$0xf] }
  0x3d   : > { %v646_v24 = vsel %vm4615_vm2, %v641_v10, %v4695_v39  ;;  %v706_v26 = vshrl.u32 %v402_v14, 16  ;;  %v709_v27 = vshll.u32 %v402_v14, 16  ;;  %v695_v28 = vshrl.u32 %v400_v4, 16 }
  0x3e   : > { %v632_v29 = vsel %vm4615_vm2, %v627_v12, %v631_v13  ;;  %v664_v30 = vor.u32 %v663_v16, %v660_v15  ;;  %v4730_v31 = vrot.slane %v715_v18, 5  ;;  %v721_v32 = vrot.slane %v719_v19, 4 }
  0x3f   : > { %v689_v33 = vrot.slane %v688_v21, 4  ;;  %v693_v34 = vrot.slane %v691_v17, 5  ;;  %v675_v35 = vrot.slane %v674_v22, 4  ;;  %v679_v36 = vrot.slane %v677_v23, 5 }
  0x40   : > { %v708_v38 = vrot.slane %v706_v26, 4  ;;  %v711_v39 = vrot.slane %v709_v27, 5  ;;  %v665_v41 = vrot.slane %v664_v30, 4  ;;  %v697_v44 = vrot.slane %v695_v28, 4 }
  0x41   : > { %v722_v45 = vor.u32 %v721_v32, %v4730_v31  ;;  %v725_v46 = vshll.u32 %v404_v37, 16  ;;  %v694_v48 = vsel %vm4615_vm2, %v689_v33, %v693_v34  ;;  %v680_v49 = vsel %vm4615_vm2, %v675_v35, %v679_v36  ;;  %v410_v36 = vld [vmem:[%s4604_s22 + $0xb0] sm:$0x1] }
  0x42   : > { %833 = vrot.lane.b32.xlu1 %v622_v51, %s4546_s23  ;;  %v754_v50 = vshrl.u32 %v408_v40, 16  ;;  %v757_v51 = vshll.u32 %v408_v40, 16  ;;  %v712_v52 = vor.u32 %v711_v39, %v708_v38  ;;  %v739_v53 = vshll.u32 %v406_v42, 16 }
  0x43   : > { %831 = vrot.lane.b32.xlu0 %v608_v59, %s4546_s23  ;;  %829 = vrot.lane.b32.xlu2 %v598_v62, %s4546_s23  ;;  %v743_v54 = vshrl.u32 %v406_v42, 16  ;;  %v701_v55 = vshll.u32 %v401_v43, 16  ;;  %v670_v56 = vsel %vm4615_vm2, %v665_v41, %v4715_v7  ;;  %v698_v57 = vor.u32 %v697_v44, %v693_v34  ;;  %v409_v62 = vld [vmem:[%s4604_s22 + $0xac] sm:$0xf] }
  0x44   : > { %v730_v58 = vshrl.u32 %v405_v47, 16  ;;  %v733_v59 = vshll.u32 %v405_v47, 16  ;;  %v723_v60 = vrot.slane %v722_v45, 4  ;;  %v727_v61 = vrot.slane %v725_v46, 5 }
  0x45   : > { %v756_v63 = vrot.slane %v754_v50, 4  ;;  %v759_v0 = vrot.slane %v757_v51, 5  ;;  %v713_v2 = vrot.slane %v712_v52, 4  ;;  %v741_v3 = vrot.slane %v739_v53, 5  ;;  %v933_v52 = vld [vmem:[%s4604_s22 + $0xc] sm:$0xe] }
  0x46   : > { %v745_v4 = vrot.slane %v743_v54, 4  ;;  %v699_v6 = vrot.slane %v698_v57, 4  ;;  %v703_v7 = vrot.slane %v701_v55, 5  ;;  %v732_v9 = vrot.slane %v730_v58, 4  ;;  %v934_v54 = vld [vmem:[%s4604_s22 + $0x10] sm:$0xf] }
  0x47   : > { %v735_v10 = vrot.slane %v733_v59, 5  ;;  %v728_v11 = vsel %vm4615_vm2, %v723_v60, %v727_v61  ;;  %v763_v12 = vshll.u32 %v409_v62, 16  ;;  %v760_v13 = vor.u32 %v759_v0, %v756_v63  ;;  %v932_v55 = vld [vmem:[%s4604_s22 + $0x8] sm:$0x1]  ;;  %v930_v58 = vld [vmem:[%s4604_s22] sm:$0xe] }
  0x48   : > { %v749_v14 = vshll.u32 %v407_v1, 16  ;;  %v787_v15 = vshll.u32 %v412_v5, 16  ;;  %v791_v16 = vshrl.u32 %v412_v5, 16  ;;  %v718_v17 = vsel %vm4615_vm2, %v713_v2, %v4730_v31  ;;  %v413_v31 = vld [vmem:[%s4604_s22 + $0xbc] sm:$0x1] }
  0x49   : > { %v746_v18 = vor.u32 %v745_v4, %v741_v3  ;;  %v778_v19 = vshrl.u32 %v411_v8, 16  ;;  %v767_v21 = vshrl.u32 %v409_v62, 16  ;;  %v704_v22 = vsel %vm4615_vm2, %v699_v6, %v703_v7  ;;  %v305_v62 = vld [vmem:[%s4604_s22 + $0x18] sm:$0xf]  ;;  %v937_v1 = vld [vmem:[%s4604_s22 + $0x1c] sm:$0xf] }
  0x4a   : > { %839 = vrot.lane.b32.xlu1 %v656_v20, %s4546_s23  ;;  %v781_v20 = vshll.u32 %v411_v8, 16  ;;  %v736_v23 = vor.u32 %v735_v10, %v732_v9  ;;  %v765_v26 = vrot.slane %v763_v12, 5  ;;  %v789_v27 = vrot.slane %v787_v15, 5  ;;  %v938_v7 = vld [vmem:[%s4604_s22 + $0x20] sm:$0x1] }
  0x4b   : > { %837 = vrot.lane.b32.xlu0 %v646_v24, %s4546_s23  ;;  %835 = vrot.lane.b32.xlu2 %v632_v29, %s4546_s23  ;;  %v761_v24 = vrot.slane %v760_v13, 4  ;;  %v793_v28 = vrot.slane %v791_v16, 4  ;;  %v747_v29 = vrot.slane %v746_v18, 4  ;;  %v751_v30 = vrot.slane %v749_v14, 5  ;;  %v936_v8 = vld [vmem:[%s4604_s22 + $0x18] sm:$0xe] }
  0x4c   : > { %v780_v32 = vrot.slane %v778_v19, 4  ;;  %v783_v33 = vrot.slane %v781_v20, 5  ;;  %v737_v34 = vrot.slane %v736_v23, 4  ;;  %v769_v35 = vrot.slane %v767_v21, 4  ;;  %v935_v10 = vld [vmem:[%s4604_s22 + $0x14] sm:$0x1] }
  0x4d   : > { %v766_v37 = vsel %vm4615_vm2, %v761_v24, %v765_v26  ;;  %v794_v38 = vor.u32 %v793_v28, %v789_v27  ;;  %v797_v39 = vshll.u32 %v413_v31, 16  ;;  %v752_v40 = vsel %vm4615_vm2, %v747_v29, %v751_v30  ;;  %v940_v14 = vld [vmem:[%s4604_s22 + $0x28] sm:$0xf]  ;;  %v942_v18 = vld [vmem:[%s4604_s22 + $0x30] sm:$0xe] }
  0x4e   : > { %v784_v41 = vor.u32 %v783_v33, %v780_v32  ;;  %v742_v42 = vsel %vm4615_vm2, %v737_v34, %v741_v3  ;;  %v770_v43 = vor.u32 %v769_v35, %v765_v26  ;;  %v773_v44 = vshll.u32 %v410_v36, 16  ;;  %v943_v20 = vld [vmem:[%s4604_s22 + $0x34] sm:$0xf]  ;;  %v939_v24 = vld [vmem:[%s4604_s22 + $0x24] sm:$0xe] }
  0x4f   : > { %v795_v45 = vrot.slane %v794_v38, 4  ;;  %v799_v46 = vrot.slane %v797_v39, 5  ;;  %v4037_v59 = vrot.slane %v933_v52, 9  ;;  %v1038_v60 = vrot.slane %v934_v54, 5  ;;  %v946_v30 = vld [vmem:[%s4604_s22 + $0x40] sm:$0xf] }
  0x50   : > { %v785_v47 = vrot.slane %v784_v41, 4  ;;  %v775_v50 = vrot.slane %v773_v44, 5  ;;  %v1034_v61 = vrot.slane %v932_v55, 5  ;;  %v4547_v2 = vmov 0   ;;  %v947_v36 = vld [vmem:[%s4604_s22 + $0x44] sm:$0x1] }
  0x51   : > { %v800_v51 = vsel %vm4615_vm2, %v795_v45, %v799_v46  ;;  %273 = vst [vmem:[#allocation2 + $0x10] sm:$0xf] %v4547_v2  ;;  %v4036_v3 = vrot.slane %v930_v58, 9  ;;  %v1039_v4 = vsel %vm4789_vm5, %v4037_v59, %v1038_v60  ;;  %v1045_v5 = vrot.slane %v937_v1, 5  ;;  %v944_v39 = vld [vmem:[%s4604_s22 + $0x38] sm:$0x1] }
  0x52   : > { %845 = vrot.lane.b32.xlu1 %v694_v48, %s4546_s23  ;;  %v931_v48 = vld [vmem:[%s4604_s22 + $0x4] sm:$0xf]  ;;  %v790_v53 = vsel %vm4615_vm2, %v785_v47, %v789_v27  ;;  %338 = vst.msk [vmem:[#allocation2 + $0x10] sm:$0xf] %vm333_vm6, %v305_v62  ;;  %v1048_v12 = vrot.slane %v938_v7, 5  ;;  %v4038_v13 = vrot.slane %v936_v8, 9 }
  0x53   : > { %843 = vrot.lane.b32.xlu0 %v680_v49, %s4546_s23  ;;  %841 = vrot.lane.b32.xlu2 %v670_v56, %s4546_s23  ;;  %v771_v49 = vrot.slane %v770_v43, 4  ;;  %v1031_v56 = vrot.slane %v931_v48, 5  ;;  %269 = vst [vmem:[#allocation2] sm:$0xf] %v4547_v2  ;;  %v1040_v15 = vrot.slane %v1038_v60, 4  ;;  %v1041_v16 = vrot.slane %v935_v10, 5 }
  0x54   : > { %270 = vst [vmem:[#allocation2 + $0x4] sm:$0xf] %v4547_v2  ;;  %v1046_v19 = vsel %vm4789_vm5, %v4038_v13, %v1045_v5  ;;  %v1052_v21 = vrot.slane %v940_v14, 5  ;;  %v4040_v26 = vrot.slane %v942_v18, 9  ;;  %v1059_v27 = vrot.slane %v943_v20, 5 }
  0x55   : > { %v776_v57 = vsel %vm4615_vm2, %v771_v49, %v775_v50  ;;  %v1033_v0 = vrot.slane %v1031_v56, 4  ;;  %271 = vst [vmem:[#allocation2 + $0x8] sm:$0xf] %v4547_v2  ;;  %v1032_v9 = vsel %vm4789_vm5, %v4036_v3, %v1031_v56  ;;  %v1042_v23 = vsel %vm4789_vm5, %v1040_v15, %v1041_v16  ;;  %v949_v43 = vld [vmem:[%s4604_s22 + $0x4c] sm:$0xf] }
  0x56   : > { %272 = vst [vmem:[#allocation2 + $0xc] sm:$0xf] %v4547_v2  ;;  %v1054_v28 = vrot.slane %v1052_v21, 4  ;;  %v4039_v31 = vrot.slane %v939_v24, 9  ;;  %v1060_v33 = vsel %vm4789_vm5, %v4040_v26, %v1059_v27  ;;  %v1066_v34 = vrot.slane %v946_v30, 5 }
  0x57   : > { %v1035_v6 = vsel %vm4789_vm5, %v1033_v0, %v1034_v61  ;;  %274 = vst [vmem:[#allocation2 + $0x14] sm:$0xf] %v4547_v2  ;;  %v1069_v41 = vrot.slane %v947_v36, 5  ;;  %v1061_v44 = vrot.slane %v1059_v27, 4  ;;  %v1062_v45 = vrot.slane %v944_v39, 5 }
  0x58   : > { %275 = vst [vmem:[#allocation2 + $0x18] sm:$0xf] %v4547_v2  ;;  %v1053_v38 = vsel %vm4789_vm5, %v4039_v31, %v1052_v21  ;;  %v951_v48 = vld [vmem:[%s4604_s22 + $0x54] sm:$0xe]  ;;  %v952_v50 = vld [vmem:[%s4604_s22 + $0x58] sm:$0xf] }
  0x59   : > { %276 = vst [vmem:[#allocation2 + $0x1c] sm:$0xf] %v4547_v2  ;;  %v950_v52 = vld [vmem:[%s4604_s22 + $0x50] sm:$0x1]  ;;  %v948_v54 = vld [vmem:[%s4604_s22 + $0x48] sm:$0xe] }
  0x5a   : > { %851 = vrot.lane.b32.xlu1 %v728_v11, %s4546_s23  ;;  %v1047_v11 = vrot.slane %v1045_v5, 4  ;;  %277 = vst [vmem:[#allocation2 + $0x20] sm:$0xf] %v4547_v2  ;;  %v303_v55 = vld [vmem:[%s4604_s22 + $0xc] sm:$0xf]  ;;  %v4043_v56 = vrot.slane %v951_v48, 9 }
  0x5b   : > { %849 = vrot.lane.b32.xlu0 %v718_v17, %s4546_s23  ;;  %847 = vrot.lane.b32.xlu2 %v704_v22, %s4546_s23  ;;  %278 = vst [vmem:[#allocation2 + $0x24] sm:$0xf] %v4547_v2  ;;  %v941_v22 = vld [vmem:[%s4604_s22 + $0x2c] sm:$0x1]  ;;  %v1076_v60 = vrot.slane %v950_v52, 5  ;;  %v4042_v1 = vrot.slane %v948_v54, 9 }
  0x5c   : > { %v1049_v17 = vsel %vm4789_vm5, %v1047_v11, %v1048_v12  ;;  %279 = vst [vmem:[#allocation2 + $0x28] sm:$0xf] %v4547_v2  ;;  %v1055_v29 = vrot.slane %v941_v22, 5  ;;  %v955_v61 = vld [vmem:[%s4604_s22 + $0x64] sm:$0xf] }
  0x5d   : > { %280 = vst [vmem:[#allocation2 + $0x2c] sm:$0xf] %v4547_v2  ;;  %v301_v0 = vld [vmem:[%s4604_s22] sm:$0xf]  ;;  %v306_v5 = vld [vmem:[%s4604_s22 + $0x1c] sm:$0xf] }
  0x5e   : > { %281 = vst [vmem:[#allocation2 + $0x30] sm:$0xf] %v4547_v2  ;;  %v1056_v35 = vsel %vm4789_vm5, %v1054_v28, %v1055_v29  ;;  %v956_v7 = vld [vmem:[%s4604_s22 + $0x68] sm:$0x1]  ;;  %v304_v8 = vld [vmem:[%s4604_s22 + $0x10] sm:$0xf] }
  0x5f   : > { %282 = vst [vmem:[#allocation2 + $0x34] sm:$0xf] %v4547_v2  ;;  %v953_v11 = vld [vmem:[%s4604_s22 + $0x5c] sm:$0x1]  ;;  %v302_v12 = vld [vmem:[%s4604_s22 + $0x4] sm:$0xf] }
  0x60   : > { %283 = vst [vmem:[#allocation2 + $0x38] sm:$0xf] %v4547_v2  ;;  %v1090_v14 = vrot.slane %v956_v7, 5  ;;  %v1083_v21 = vrot.slane %v953_v11, 5  ;;  %v308_v22 = vld [vmem:[%s4604_s22 + $0x28] sm:$0xf] }
  0x61   : > { %284 = vst [vmem:[#allocation2 + $0x3c] sm:$0xf] %v4547_v2  ;;  %v307_v26 = vld [vmem:[%s4604_s22 + $0x24] sm:$0xf]  ;;  %v960_v27 = vld [vmem:[%s4604_s22 + $0x78] sm:$0xe] }
  0x62   : > { %857 = vrot.lane.b32.xlu1 %v766_v37, %s4546_s23  ;;  %285 = vst [vmem:[#allocation2 + $0x40] sm:$0xf] %v4547_v2  ;;  %v945_v37 = vld [vmem:[%s4604_s22 + $0x3c] sm:$0xe]  ;;  %v959_v31 = vld [vmem:[%s4604_s22 + $0x74] sm:$0x1] }
  0x63   : > { %855 = vrot.lane.b32.xlu0 %v752_v40, %s4546_s23  ;;  %853 = vrot.lane.b32.xlu2 %v742_v42, %s4546_s23  ;;  %286 = vst [vmem:[#allocation2 + $0x44] sm:$0xf] %v4547_v2  ;;  %v1068_v40 = vrot.slane %v1066_v34, 4  ;;  %v4041_v42 = vrot.slane %v945_v37, 9  ;;  %v961_v29 = vld [vmem:[%s4604_s22 + $0x7c] sm:$0xf] }
  0x64   : > { %287 = vst [vmem:[#allocation2 + $0x48] sm:$0xf] %v4547_v2  ;;  %v1101_v36 = vrot.slane %v961_v29, 5  ;;  %v1097_v39 = vrot.slane %v959_v31, 5  ;;  %v315_v48 = vld [vmem:[%s4604_s22 + $0x54] sm:$0xf] }
  0x65   : > { %288 = vst [vmem:[#allocation2 + $0x4c] sm:$0xf] %v4547_v2  ;;  %v1070_v47 = vsel %vm4789_vm5, %v1068_v40, %v1069_v41  ;;  %v1067_v49 = vsel %vm4789_vm5, %v4041_v42, %v1066_v34  ;;  %v957_v34 = vld [vmem:[%s4604_s22 + $0x6c] sm:$0xe]  ;;  %v964_v40 = vld [vmem:[%s4604_s22 + $0x88] sm:$0xf] }
  0x66   : > { %289 = vst [vmem:[#allocation2 + $0x50] sm:$0xf] %v4547_v2  ;;  %v311_v42 = vld [vmem:[%s4604_s22 + $0x3c] sm:$0xf]  ;;  %v314_v52 = vld [vmem:[%s4604_s22 + $0x4c] sm:$0xf] }
  0x67   : > { %290 = vst [vmem:[#allocation2 + $0x54] sm:$0xf] %v4547_v2  ;;  %v962_v54 = vld [vmem:[%s4604_s22 + $0x80] sm:$0x1]  ;;  %v323_v31 = vld [vmem:[%s4604_s22 + $0x84] sm:$0xf] }
  0x68   : > { %291 = vst [vmem:[#allocation2 + $0x58] sm:$0xf] %v4547_v2 }
  0x69   : > { %292 = vst [vmem:[#allocation2 + $0x5c] sm:$0xf] %v4547_v2 }
  0x6a   : > { %863 = vrot.lane.b32.xlu1 %v800_v51, %s4546_s23  ;;  %293 = vst [vmem:[#allocation2 + $0x60] sm:$0xf] %v4547_v2  ;;  %v1073_v51 = vrot.slane %v949_v43, 5  ;;  %v4045_v43 = vrot.slane %v957_v34, 9  ;;  %v322_v34 = vld [vmem:[%s4604_s22 + $0x7c] sm:$0xf] }
  0x6b   : > { %861 = vrot.lane.b32.xlu0 %v790_v53, %s4546_s23  ;;  %859 = vrot.lane.b32.xlu2 %v776_v57, %s4546_s23  ;;  %294 = vst [vmem:[#allocation2 + $0x64] sm:$0xf] %v4547_v2  ;;  %v1063_v53 = vsel %vm4789_vm5, %v1061_v44, %v1062_v45  ;;  %v1080_v57 = vrot.slane %v952_v50, 5  ;;  %v310_v44 = vld [vmem:[%s4604_s22 + $0x34] sm:$0xf] }
  0x6c   : > { %295 = vst [vmem:[#allocation2 + $0x68] sm:$0xf] %v4547_v2  ;;  %v1075_v59 = vrot.slane %v1073_v51, 4  ;;  %v1074_v10 = vsel %vm4789_vm5, %v4042_v1, %v1073_v51  ;;  %v965_v50 = vld [vmem:[%s4604_s22 + $0x8c] sm:$0x1]  ;;  %v1104_v1 = vrot.slane %v962_v54, 5 }
  0x6d   : > { %296 = vst [vmem:[#allocation2 + $0x6c] sm:$0xf] %v4547_v2  ;;  %v1082_v20 = vrot.slane %v1080_v57, 4  ;;  %v963_v51 = vld [vmem:[%s4604_s22 + $0x84] sm:$0xe] }
  0x6e   : > { %297 = vst [vmem:[#allocation2 + $0x70] sm:$0xf] %v4547_v2  ;;  %v329_v54 = vld [vmem:[%s4604_s22 + $0xa8] sm:$0xf] }
  0x6f   : > { %298 = vst [vmem:[#allocation2 + $0x74] sm:$0xf] %v4547_v2 }
  0x70   : > { %299 = vst [vmem:[#allocation2 + $0x78] sm:$0xf] %v4547_v2 }
  0x71   : > { %300 = vst [vmem:[#allocation2 + $0x7c] sm:$0xf] %v4547_v2  ;;  %v1077_v2 = vsel %vm4789_vm5, %v1075_v59, %v1076_v60  ;;  %v313_v59 = vld [vmem:[%s4604_s22 + $0x48] sm:$0xf]  ;;  %v967_v60 = vld [vmem:[%s4604_s22 + $0x94] sm:$0xf] }
  0x72   : > { %1145 = vrot.lane.b32.xlu1 %v1039_v4, %s4548_s24  ;;  %336 = vst.msk [vmem:[#allocation2 + $0x8] sm:$0xf] %vm333_vm6, %v303_v55  ;;  %v1081_v4 = vsel %vm4789_vm5, %v4043_v56, %v1080_v57  ;;  %v1111_v56 = vrot.slane %v965_v50, 5  ;;  %v4047_v57 = vrot.slane %v963_v51, 9  ;;  %v330_v51 = vld [vmem:[%s4604_s22 + $0xac] sm:$0xf] }
  0x73   : > { %1143 = vrot.lane.b32.xlu0 %v1035_v6, %s4548_s24  ;;  %1141 = vrot.lane.b32.xlu2 %v1032_v9, %s4548_s24  ;;  %v1087_v6 = vrot.slane %v955_v61, 5  ;;  %334 = vst.msk [vmem:[#allocation2] sm:$0xf] %vm333_vm6, %v301_v0  ;;  %v954_v9 = vld [vmem:[%s4604_s22 + $0x60] sm:$0xe]  ;;  %v1103_v0 = vrot.slane %v1101_v36, 4 }
  0x74   : > { %339 = vst.msk [vmem:[#allocation2 + $0x14] sm:$0xf] %vm333_vm6, %v306_v5  ;;  %v4044_v16 = vrot.slane %v954_v9, 9  ;;  %v316_v9 = vld [vmem:[%s4604_s22 + $0x58] sm:$0xf] }
  0x75   : > { %v1089_v13 = vrot.slane %v1087_v6, 4  ;;  %337 = vst.msk [vmem:[#allocation2 + $0xc] sm:$0xf] %vm333_vm6, %v304_v8  ;;  %v1115_v8 = vrot.slane %v967_v60, 5  ;;  %v1105_v11 = vsel %vm4789_vm5, %v1103_v0, %v1104_v1  ;;  %v332_v0 = vld [vmem:[%s4604_s22 + $0xb8] sm:$0xf] }
  0x76   : > { %335 = vst.msk [vmem:[#allocation2 + $0x4] sm:$0xf] %vm333_vm6, %v302_v12  ;;  %v1088_v28 = vsel %vm4789_vm5, %v4044_v16, %v1087_v6  ;;  %v970_v6 = vld [vmem:[%s4604_s22 + $0xa0] sm:$0xf]  ;;  %v321_v12 = vld [vmem:[%s4604_s22 + $0x78] sm:$0xf] }
  0x77   : > { %v1091_v24 = vsel %vm4789_vm5, %v1089_v13, %v1090_v14  ;;  %341 = vst.msk [vmem:[#allocation2 + $0x1c] sm:$0xf] %vm333_vm6, %v308_v22  ;;  %v966_v13 = vld [vmem:[%s4604_s22 + $0x90] sm:$0xe]  ;;  %v4052_v1 = vld [vmem:[%s4604_s22 + $0xc] sm:$0xf] }
  0x78   : > { %340 = vst.msk [vmem:[#allocation2 + $0x18] sm:$0xf] %vm333_vm6, %v307_v26  ;;  %v4048_v22 = vrot.slane %v966_v13, 9 }
  0x79   : > { %344 = vst.msk [vmem:[#allocation2 + $0x28] sm:$0xf] %vm333_vm6, %v311_v42 }
  0x7a   : > { %1151 = vrot.lane.b32.xlu1 %v1049_v17, %s4548_s24  ;;  %v309_v17 = vld [vmem:[%s4604_s22 + $0x30] sm:$0xf]  ;;  %343 = vst.msk [vmem:[#allocation2 + $0x24] sm:$0xf] %vm333_vm6, %v310_v44  ;;  %v327_v44 = vld [vmem:[%s4604_s22 + $0x9c] sm:$0xf] }
  0x7b   : > { %1149 = vrot.lane.b32.xlu0 %v1046_v19, %s4548_s24  ;;  %1147 = vrot.lane.b32.xlu2 %v1042_v23, %s4548_s24  ;;  %v958_v19 = vld [vmem:[%s4604_s22 + $0x70] sm:$0xf]  ;;  %342 = vst.msk [vmem:[#allocation2 + $0x20] sm:$0xf] %vm333_vm6, %v309_v17  ;;  %v1117_v17 = vrot.slane %v1115_v8, 4 }
  0x7c   : > { %v1094_v30 = vrot.slane %v958_v19, 5  ;;  %348 = vst.msk [vmem:[#allocation2 + $0x38] sm:$0xf] %vm333_vm6, %v315_v48  ;;  %v973_v19 = vld [vmem:[%s4604_s22 + $0xac] sm:$0xf] }
  0x7d   : > { %v810_v32 = vpop.permute.xlu2 %809  ;;  %347 = vst.msk [vmem:[#allocation2 + $0x34] sm:$0xf] %vm333_vm6, %v314_v52  ;;  %v325_v48 = vld [vmem:[%s4604_s22 + $0x90] sm:$0xf]  ;;  %v977_v52 = vld [vmem:[%s4604_s22 + $0xbc] sm:$0x1] }
  0x7e   : > { %902 = vst.msk [vmem:[#allocation2 + $0x10] sm:$0xf] %vm897_vm7, %v810_v32  ;;  %v312_v32 = vld [vmem:[%s4604_s22 + $0x40] sm:$0xf] }
  0x7f   : > { %345 = vst.msk [vmem:[#allocation2 + $0x2c] sm:$0xf] %vm333_vm6, %v312_v32  ;;  %v972_v32 = vld [vmem:[%s4604_s22 + $0xa8] sm:$0xe] }
  0x80   : > { %346 = vst.msk [vmem:[#allocation2 + $0x30] sm:$0xf] %vm333_vm6, %v313_v59 }
  0x81   : > { %349 = vst.msk [vmem:[#allocation2 + $0x3c] sm:$0xf] %vm333_vm6, %v316_v9  ;;  %v4054_v9 = vld [vmem:[%s4604_s22 + $0x18] sm:$0xf] }
  0x82   : > { %1157 = vrot.lane.b32.xlu1 %v1060_v33, %s4548_s24  ;;  %v1084_v33 = vsel %vm4789_vm5, %v1082_v20, %v1083_v21  ;;  %354 = vst.msk [vmem:[#allocation2 + $0x50] sm:$0xf] %vm333_vm6, %v321_v12  ;;  %v320_v21 = vld [vmem:[%s4604_s22 + $0x70] sm:$0xf] }
  0x83   : > { %1155 = vrot.lane.b32.xlu0 %v1056_v35, %s4548_s24  ;;  %1153 = vrot.lane.b32.xlu2 %v1053_v38, %s4548_s24  ;;  %v4046_v35 = vrot.slane %v960_v27, 9  ;;  %v1096_v38 = vrot.slane %v1094_v30, 4  ;;  %v1129_v27 = vrot.slane %v973_v19, 5  ;;  %353 = vst.msk [vmem:[#allocation2 + $0x4c] sm:$0xf] %vm333_vm6, %v320_v21 }
  0x84   : > { %356 = vst.msk [vmem:[#allocation2 + $0x58] sm:$0xf] %vm333_vm6, %v323_v31  ;;  %v4060_v21 = vld [vmem:[%s4604_s22 + $0x3c] sm:$0xf] }
  0x85   : > { %v812_v46 = vpop.permute.xlu2 %811  ;;  %355 = vst.msk [vmem:[#allocation2 + $0x54] sm:$0xf] %vm333_vm6, %v322_v34  ;;  %v4066_v34 = vld [vmem:[%s4604_s22 + $0x60] sm:$0xf] }
  0x86   : > { %903 = vst.msk [vmem:[#allocation2 + $0x14] sm:$0xf] %vm897_vm7, %v812_v46  ;;  %v1102_v46 = vsel %vm4789_vm5, %v4046_v35, %v1101_v36  ;;  %v971_v35 = vld [vmem:[%s4604_s22 + $0xa4] sm:$0x1]  ;;  %v1131_v36 = vrot.slane %v1129_v27, 4 }
  0x87   : > { %360 = vst.msk [vmem:[#allocation2 + $0x68] sm:$0xf] %vm333_vm6, %v327_v44 }
  0x88   : > { %358 = vst.msk [vmem:[#allocation2 + $0x60] sm:$0xf] %vm333_vm6, %v325_v48 }
  0x89   : > { %363 = vst.msk [vmem:[#allocation2 + $0x74] sm:$0xf] %vm333_vm6, %v330_v51  ;;  %v4076_v51 = vld [vmem:[%s4604_s22 + $0x9c] sm:$0xf] }
  0x8a   : > { %1163 = vrot.lane.b32.xlu1 %v1070_v47, %s4548_s24  ;;  %v1108_v47 = vrot.slane %v964_v40, 5  ;;  %v976_v40 = vld [vmem:[%s4604_s22 + $0xb8] sm:$0xf]  ;;  %362 = vst.msk [vmem:[#allocation2 + $0x70] sm:$0xf] %vm333_vm6, %v329_v54 }
  0x8b   : > { %1161 = vrot.lane.b32.xlu0 %v1067_v49, %s4548_s24  ;;  %1159 = vrot.lane.b32.xlu2 %v1063_v53, %s4548_s24  ;;  %v1098_v49 = vsel %vm4789_vm5, %v1096_v38, %v1097_v39  ;;  %v1095_v53 = vsel %vm4789_vm5, %v4045_v43, %v1094_v30  ;;  %v974_v30 = vld [vmem:[%s4604_s22 + $0xb0] sm:$0x1]  ;;  %v4050_v39 = vrot.slane %v972_v32, 9  ;;  %v1125_v43 = vrot.slane %v971_v35, 5  ;;  %365 = vst.msk [vmem:[#allocation2 + $0x7c] sm:$0xf] %vm333_vm6, %v332_v0 }
  0x8c   : > { %v806_v58 = vpop.permute.xlu1 %805  ;;  %v1110_v55 = vrot.slane %v1108_v47, 4  ;;  %v1109_v7 = vsel %vm4789_vm5, %v4047_v57, %v1108_v47  ;;  %v1136_v50 = vrot.slane %v976_v40, 5  ;;  %v4065_v35 = vld [vmem:[%s4604_s22 + $0x58] sm:$0xf]  ;;  %v4069_v40 = vld [vmem:[%s4604_s22 + $0x70] sm:$0xf] }
  0x8d   : > { %v802_v62 = vpop.permute.xlu0 %801  ;;  %v818_v3 = vpop.permute.xlu2 %817  ;;  %900 = vst.msk [vmem:[#allocation2 + $0x8] sm:$0xf] %vm897_vm7, %v806_v58  ;;  %v4085_v54 = vld [vmem:[%s4604_s22 + $0x10] sm:$0xf] }
  0x8e   : > { %898 = vst.msk [vmem:[#allocation2] sm:$0xf] %vm897_vm7, %v802_v62  ;;  %v318_v62 = vld [vmem:[%s4604_s22 + $0x64] sm:$0xf]  ;;  %v1112_v5 = vsel %vm4789_vm5, %v1110_v55, %v1111_v56  ;;  %v975_v55 = vld [vmem:[%s4604_s22 + $0xb4] sm:$0xe] }
  0x8f   : > { %906 = vst.msk [vmem:[#allocation2 + $0x20] sm:$0xf] %vm897_vm7, %v818_v3  ;;  %v969_v3 = vld [vmem:[%s4604_s22 + $0x9c] sm:$0xe]  ;;  %v1138_v57 = vrot.slane %v1136_v50, 4  ;;  %v4051_v60 = vrot.slane %v975_v55, 9 }
  0x90   : > { %351 = vst.msk [vmem:[#allocation2 + $0x44] sm:$0xf] %vm333_vm6, %v318_v62  ;;  %v4049_v14 = vrot.slane %v969_v3, 9  ;;  %v331_v3 = vld [vmem:[%s4604_s22 + $0xb4] sm:$0xf] }
  0x91   : > { %364 = vst.msk [vmem:[#allocation2 + $0x78] sm:$0xf] %vm333_vm6, %v331_v3  ;;  %v4077_v3 = vld [vmem:[%s4604_s22 + $0xa0] sm:$0xf] }
  0x92   : > { %1169 = vrot.lane.b32.xlu1 %v1081_v4, %s4548_s24 }
  0x93   : > { %1167 = vrot.lane.b32.xlu0 %v1077_v2, %s4548_s24  ;;  %1165 = vrot.lane.b32.xlu2 %v1074_v10, %s4548_s24  ;;  %v317_v2 = vld [vmem:[%s4604_s22 + $0x60] sm:$0xf]  ;;  %v968_v10 = vld [vmem:[%s4604_s22 + $0x98] sm:$0x1] }
  0x94   : > { %v808_v15 = vpop.permute.xlu1 %807  ;;  %350 = vst.msk [vmem:[#allocation2 + $0x40] sm:$0xf] %vm333_vm6, %v317_v2 }
  0x95   : > { %901 = vst.msk [vmem:[#allocation2 + $0xc] sm:$0xf] %vm897_vm7, %v808_v15  ;;  %v804_v18 = vpop.permute.xlu0 %803  ;;  %v824_v23 = vpop.permute.xlu2 %823  ;;  %v1122_v15 = vrot.slane %v970_v6, 5 }
  0x96   : > { %899 = vst.msk [vmem:[#allocation2 + $0x4] sm:$0xf] %vm897_vm7, %v804_v18  ;;  %v1118_v18 = vrot.slane %v968_v10, 5  ;;  %v4053_v10 = vld [vmem:[%s4604_s22 + $0x10] sm:$0xf] }
  0x97   : > { %909 = vst.msk [vmem:[#allocation2 + $0x2c] sm:$0xf] %vm897_vm7, %v824_v23  ;;  %v1123_v26 = vsel %vm4789_vm5, %v4049_v14, %v1122_v15  ;;  %v1124_v42 = vrot.slane %v1122_v15, 4  ;;  %v4058_v14 = vld [vmem:[%s4604_s22 + $0x30] sm:$0xf] }
  0x98   : > { %v1119_v29 = vsel %vm4789_vm5, %v1117_v17, %v1118_v18  ;;  %v4057_v15 = vld [vmem:[%s4604_s22 + $0x28] sm:$0xf] }
  0x9a   : > { %1175 = vrot.lane.b32.xlu1 %v1091_v24, %s4548_s24  ;;  %v319_v24 = vld [vmem:[%s4604_s22 + $0x6c] sm:$0xf] }
  0x9b   : > { %1173 = vrot.lane.b32.xlu0 %v1088_v28, %s4548_s24  ;;  %1171 = vrot.lane.b32.xlu2 %v1084_v33, %s4548_s24  ;;  %v324_v28 = vld [vmem:[%s4604_s22 + $0x88] sm:$0xf]  ;;  %352 = vst.msk [vmem:[#allocation2 + $0x48] sm:$0xf] %vm333_vm6, %v319_v24  ;;  %v1116_v33 = vsel %vm4789_vm5, %v4048_v22, %v1115_v8  ;;  %v4055_v8 = vld [vmem:[%s4604_s22 + $0x1c] sm:$0xf] }
  0x9c   : > { %v816_v37 = vpop.permute.xlu1 %815  ;;  %357 = vst.msk [vmem:[#allocation2 + $0x5c] sm:$0xf] %vm333_vm6, %v324_v28  ;;  %v4059_v22 = vld [vmem:[%s4604_s22 + $0x34] sm:$0xf]  ;;  %v4063_v28 = vld [vmem:[%s4604_s22 + $0x4c] sm:$0xf] }
  0x9d   : > { %905 = vst.msk [vmem:[#allocation2 + $0x1c] sm:$0xf] %vm897_vm7, %v816_v37  ;;  %v814_v41 = vpop.permute.xlu0 %813  ;;  %v830_v45 = vpop.permute.xlu2 %829  ;;  %v1132_v37 = vrot.slane %v974_v30, 5 }
  0x9e   : > { %904 = vst.msk [vmem:[#allocation2 + $0x18] sm:$0xf] %vm897_vm7, %v814_v41 }
  0x9f   : > { %912 = vst.msk [vmem:[#allocation2 + $0x38] sm:$0xf] %vm897_vm7, %v830_v45  ;;  %v1133_v47 = vsel %vm4789_vm5, %v1131_v36, %v1132_v37 }
  0xa2   : > { %1181 = vrot.lane.b32.xlu1 %v1102_v46, %s4548_s24  ;;  %v326_v46 = vld [vmem:[%s4604_s22 + $0x94] sm:$0xf] }
  0xa3   : > { %1179 = vrot.lane.b32.xlu0 %v1098_v49, %s4548_s24  ;;  %1177 = vrot.lane.b32.xlu2 %v1095_v53, %s4548_s24  ;;  %v1130_v49 = vsel %vm4789_vm5, %v4050_v39, %v1129_v27  ;;  %v1126_v53 = vsel %vm4789_vm5, %v1124_v42, %v1125_v43  ;;  %359 = vst.msk [vmem:[#allocation2 + $0x64] sm:$0xf] %vm333_vm6, %v326_v46  ;;  %v4064_v27 = vld [vmem:[%s4604_s22 + $0x54] sm:$0xf]  ;;  %v4070_v39 = vld [vmem:[%s4604_s22 + $0x78] sm:$0xf] }
  0xa4   : > { %v822_v58 = vpop.permute.xlu1 %821  ;;  %v4072_v46 = vld [vmem:[%s4604_s22 + $0x84] sm:$0xf] }
  0xa5   : > { %908 = vst.msk [vmem:[#allocation2 + $0x28] sm:$0xf] %vm897_vm7, %v822_v58  ;;  %v820_v61 = vpop.permute.xlu0 %819  ;;  %v836_v4 = vpop.permute.xlu2 %835  ;;  %v1139_v58 = vrot.slane %v977_v52, 5  ;;  %v4075_v52 = vld [vmem:[%s4604_s22 + $0x94] sm:$0xf] }
  0xa6   : > { %907 = vst.msk [vmem:[#allocation2 + $0x24] sm:$0xf] %vm897_vm7, %v820_v61  ;;  %v328_v61 = vld [vmem:[%s4604_s22 + $0xa0] sm:$0xf] }
  0xa7   : > { %915 = vst.msk [vmem:[#allocation2 + $0x44] sm:$0xf] %vm897_vm7, %v836_v4  ;;  %v1140_v4 = vsel %vm4789_vm5, %v1138_v57, %v1139_v58  ;;  %v4084_v57 = vld [vmem:[%s4604_s22 + $0xc] sm:$0xf] }
  0xa8   : > { %361 = vst.msk [vmem:[#allocation2 + $0x6c] sm:$0xf] %vm333_vm6, %v328_v61  ;;  %v4079_v61 = vld [vmem:[%s4604_s22 + $0xac] sm:$0xf]  ;;  %v1513_v0 = vshrl.u32 %v4084_v57, 16 }
  0xaa   : > { %1187 = vrot.lane.b32.xlu1 %v1112_v5, %s4548_s24  ;;  %v1137_v5 = vsel %vm4789_vm5, %v4051_v60, %v1136_v50  ;;  %v1526_v60 = vshrl.u32 %v4085_v54, 16 }
  0xab   : > { %1185 = vrot.lane.b32.xlu0 %v1109_v7, %s4548_s24  ;;  %1183 = vrot.lane.b32.xlu2 %v1105_v11, %s4548_s24 }
  0xac   : > { %v828_v16 = vpop.permute.xlu1 %827 }
  0xad   : > { %911 = vst.msk [vmem:[#allocation2 + $0x34] sm:$0xf] %vm897_vm7, %v828_v16  ;;  %v826_v20 = vpop.permute.xlu0 %825  ;;  %v842_v23 = vpop.permute.xlu2 %841  ;;  %v4056_v16 = vld [vmem:[%s4604_s22 + $0x24] sm:$0xf] }
  0xae   : > { %910 = vst.msk [vmem:[#allocation2 + $0x30] sm:$0xf] %vm897_vm7, %v826_v20  ;;  %v4061_v20 = vld [vmem:[%s4604_s22 + $0x40] sm:$0xf] }
  0xaf   : > { %918 = vst.msk [vmem:[#allocation2 + $0x50] sm:$0xf] %vm897_vm7, %v842_v23 }
  0xb2   : > { %1193 = vrot.lane.b32.xlu1 %v1123_v26, %s4548_s24 }
  0xb3   : > { %1191 = vrot.lane.b32.xlu0 %v1119_v29, %s4548_s24  ;;  %1189 = vrot.lane.b32.xlu2 %v1116_v33, %s4548_s24  ;;  %v4062_v29 = vld [vmem:[%s4604_s22 + $0x48] sm:$0xf]  ;;  %v4067_v33 = vld [vmem:[%s4604_s22 + $0x64] sm:$0xf] }
  0xb4   : > { %v834_v38 = vpop.permute.xlu1 %833 }
  0xb5   : > { %914 = vst.msk [vmem:[#allocation2 + $0x40] sm:$0xf] %vm897_vm7, %v834_v38  ;;  %v832_v41 = vpop.permute.xlu0 %831  ;;  %v848_v45 = vpop.permute.xlu2 %847 }
  0xb6   : > { %913 = vst.msk [vmem:[#allocation2 + $0x3c] sm:$0xf] %vm897_vm7, %v832_v41  ;;  %v4068_v41 = vld [vmem:[%s4604_s22 + $0x6c] sm:$0xf] }
  0xb7   : > { %921 = vst.msk [vmem:[#allocation2 + $0x5c] sm:$0xf] %vm897_vm7, %v848_v45  ;;  %v4073_v45 = vld [vmem:[%s4604_s22 + $0x88] sm:$0xf] }
  0xba   : > { %1199 = vrot.lane.b32.xlu1 %v1133_v47, %s4548_s24  ;;  %v4071_v47 = vld [vmem:[%s4604_s22 + $0x7c] sm:$0xf] }
  0xbb   : > { %1197 = vrot.lane.b32.xlu0 %v1130_v49, %s4548_s24  ;;  %1195 = vrot.lane.b32.xlu2 %v1126_v53, %s4548_s24  ;;  %v4074_v53 = vld [vmem:[%s4604_s22 + $0x90] sm:$0xf] }
  0xbc   : > { %v840_v56 = vpop.permute.xlu1 %839 }
  0xbd   : > { %917 = vst.msk [vmem:[#allocation2 + $0x4c] sm:$0xf] %vm897_vm7, %v840_v56  ;;  %v838_v59 = vpop.permute.xlu0 %837  ;;  %v854_v62 = vpop.permute.xlu2 %853 }
  0xbe   : > { %916 = vst.msk [vmem:[#allocation2 + $0x48] sm:$0xf] %vm897_vm7, %v838_v59  ;;  %v1522_v59 = vshll.u32 %v4085_v54, 16  ;;  %v4083_v54 = vld [vmem:[%s4604_s22 + $0xc4] sm:$0xf] }
  0xbf   : > { %924 = vst.msk [vmem:[#allocation2 + $0x68] sm:$0xf] %vm897_vm7, %v854_v62  ;;  %v4078_v62 = vld [vmem:[%s4604_s22 + $0xa8] sm:$0xf] }
  0xc2   : > { %1335 = vrot.lane.b32.xlu1 %v4052_v1, %s4549_s25  ;;  %v1516_v1 = vshll.u32 %v4084_v57, 16 }
  0xc3   : > { %1203 = vrot.lane.b32.xlu0 %v1140_v4, %s4548_s24  ;;  %1201 = vrot.lane.b32.xlu2 %v1137_v5, %s4548_s24  ;;  %v5134_v4 = vrot.slane %v1522_v59, 5  ;;  %v1528_v5 = vrot.slane %v1526_v60, 4 }
  0xc4   : > { %v846_v6 = vpop.permute.xlu1 %845 }
  0xc5   : > { %920 = vst.msk [vmem:[#allocation2 + $0x58] sm:$0xf] %vm897_vm7, %v846_v6  ;;  %v844_v2 = vpop.permute.xlu0 %843  ;;  %v860_v7 = vpop.permute.xlu2 %859  ;;  %v4086_v6 = vld [vmem:[%s4604_s22 + $0x14] sm:$0x1] }
  0xc6   : > { %919 = vst.msk [vmem:[#allocation2 + $0x54] sm:$0xf] %vm897_vm7, %v844_v2 }
  0xc7   : > { %927 = vst.msk [vmem:[#allocation2 + $0x74] sm:$0xf] %vm897_vm7, %v860_v7  ;;  %v1515_v7 = vrot.slane %v1513_v0, 4  ;;  %v4099_v0 = vld [vmem:[%s4604_s22 + $0x48] sm:$0xf] }
  0xca   : > { %1341 = vrot.lane.b32.xlu1 %v4055_v8, %s4549_s25  ;;  %v1518_v8 = vrot.slane %v1516_v1, 5 }
  0xcb   : > { %1339 = vrot.lane.b32.xlu0 %v4054_v9, %s4549_s25  ;;  %1337 = vrot.lane.b32.xlu2 %v4053_v10, %s4549_s25  ;;  %v4090_v9 = vld [vmem:[%s4604_s22 + $0x24] sm:$0xf] }
  0xcc   : > { %v852_v11 = vpop.permute.xlu1 %851 }
  0xcd   : > { %923 = vst.msk [vmem:[#allocation2 + $0x64] sm:$0xf] %vm897_vm7, %v852_v11  ;;  %v850_v12 = vpop.permute.xlu0 %849  ;;  %v1142_v13 = vpop.permute.xlu2 %1141  ;;  %v4088_v11 = vld [vmem:[%s4604_s22 + $0x1c] sm:$0xf] }
  0xce   : > { %922 = vst.msk [vmem:[#allocation2 + $0x60] sm:$0xf] %vm897_vm7, %v850_v12  ;;  %v1529_v12 = vor.u32 %v1528_v5, %v5134_v4  ;;  %v4097_v5 = vld [vmem:[%s4604_s22 + $0x40] sm:$0xf] }
  0xcf   : > { %1238 = vst.msk [vmem:[#allocation2] sm:$0xf] %vm1237_vm8, %v1142_v13  ;;  %v1532_v13 = vshll.u32 %v4086_v6, 16 }
  0xd2   : > { %1347 = vrot.lane.b32.xlu1 %v4058_v14, %s4549_s25 }
  0xd3   : > { %1345 = vrot.lane.b32.xlu0 %v4057_v15, %s4549_s25  ;;  %1343 = vrot.lane.b32.xlu2 %v4056_v16, %s4549_s25  ;;  %v4087_v15 = vld [vmem:[%s4604_s22 + $0x18] sm:$0xf]  ;;  %v4082_v16 = vld [vmem:[%s4604_s22 + $0xc0] sm:$0xf] }
  0xd4   : > { %v858_v17 = vpop.permute.xlu1 %857 }
  0xd5   : > { %926 = vst.msk [vmem:[#allocation2 + $0x70] sm:$0xf] %vm897_vm7, %v858_v17  ;;  %v856_v18 = vpop.permute.xlu0 %855  ;;  %v1148_v19 = vpop.permute.xlu2 %1147  ;;  %v1561_v17 = vshrl.u32 %v4090_v9, 16 }
  0xd6   : > { %925 = vst.msk [vmem:[#allocation2 + $0x6c] sm:$0xf] %vm897_vm7, %v856_v18  ;;  %v1564_v18 = vshll.u32 %v4090_v9, 16 }
  0xd7   : > { %1241 = vst.msk [vmem:[#allocation2 + $0xc] sm:$0xf] %vm1237_vm8, %v1148_v19  ;;  %v4081_v19 = vld [vmem:[%s4604_s22 + $0xb8] sm:$0xf] }
  0xda   : > { %1353 = vrot.lane.b32.xlu1 %v4061_v20, %s4549_s25  ;;  %v1519_v20 = vor.u32 %v1518_v8, %v1515_v7  ;;  %v4096_v8 = vld [vmem:[%s4604_s22 + $0x3c] sm:$0xf] }
  0xdb   : > { %1351 = vrot.lane.b32.xlu0 %v4060_v21, %s4549_s25  ;;  %1349 = vrot.lane.b32.xlu2 %v4059_v22, %s4549_s25  ;;  %v1546_v21 = vshll.u32 %v4088_v11, 16  ;;  %v1550_v22 = vshrl.u32 %v4088_v11, 16 }
  0xdc   : > { %v864_v23 = vpop.permute.xlu1 %863 }
  0xdd   : > { %929 = vst.msk [vmem:[#allocation2 + $0x7c] sm:$0xf] %vm897_vm7, %v864_v23  ;;  %v862_v24 = vpop.permute.xlu0 %861  ;;  %v1154_v26 = vpop.permute.xlu2 %1153  ;;  %v4080_v23 = vld [vmem:[%s4604_s22 + $0xb4] sm:$0xf] }
  0xde   : > { %928 = vst.msk [vmem:[#allocation2 + $0x78] sm:$0xf] %vm897_vm7, %v862_v24  ;;  %v1537_v24 = vshrl.u32 %v4087_v15, 16 }
  0xdf   : > { %1244 = vst.msk [vmem:[#allocation2 + $0x18] sm:$0xf] %vm1237_vm8, %v1154_v26  ;;  %v1540_v26 = vshll.u32 %v4087_v15, 16 }
  0xe2   : > { %1359 = vrot.lane.b32.xlu1 %v4064_v27, %s4549_s25  ;;  %v1530_v27 = vrot.slane %v1529_v12, 4 }
  0xe3   : > { %1357 = vrot.lane.b32.xlu0 %v4063_v28, %s4549_s25  ;;  %1355 = vrot.lane.b32.xlu2 %v4062_v29, %s4549_s25  ;;  %v1534_v28 = vrot.slane %v1532_v13, 5  ;;  %v1563_v29 = vrot.slane %v1561_v17, 4  ;;  %v1633_v13 = vshrl.u32 %v4099_v0, 16  ;;  %v1618_v17 = vshll.u32 %v4097_v5, 16 }
  0xe4   : > { %v1146_v30 = vpop.permute.xlu1 %1145 }
  0xe5   : > { %1240 = vst.msk [vmem:[#allocation2 + $0x8] sm:$0xf] %vm1237_vm8, %v1146_v30  ;;  %v1144_v31 = vpop.permute.xlu0 %1143  ;;  %v1160_v32 = vpop.permute.xlu2 %1159  ;;  %v1566_v30 = vrot.slane %v1564_v18, 5  ;;  %v1622_v18 = vshrl.u32 %v4097_v5, 16 }
  0xe6   : > { %1239 = vst.msk [vmem:[#allocation2 + $0x4] sm:$0xf] %vm1237_vm8, %v1144_v31  ;;  %v4094_v31 = vld [vmem:[%s4604_s22 + $0x34] sm:$0xf] }
  0xe7   : > { %1247 = vst.msk [vmem:[#allocation2 + $0x24] sm:$0xf] %vm1237_vm8, %v1160_v32  ;;  %v4093_v32 = vld [vmem:[%s4604_s22 + $0x30] sm:$0xf] }
  0xea   : > { %1365 = vrot.lane.b32.xlu1 %v4067_v33, %s4549_s25 }
  0xeb   : > { %1363 = vrot.lane.b32.xlu0 %v4066_v34, %s4549_s25  ;;  %1361 = vrot.lane.b32.xlu2 %v4065_v35, %s4549_s25  ;;  %v1520_v34 = vrot.slane %v1519_v20, 4  ;;  %v4091_v35 = vld [vmem:[%s4604_s22 + $0x28] sm:$0xf]  ;;  %v1609_v20 = vshrl.u32 %v4096_v8, 16 }
  0xec   : > { %v1152_v36 = vpop.permute.xlu1 %1151 }
  0xed   : > { %1243 = vst.msk [vmem:[#allocation2 + $0x14] sm:$0xf] %vm1237_vm8, %v1152_v36  ;;  %v1150_v37 = vpop.permute.xlu0 %1149  ;;  %v1166_v38 = vpop.permute.xlu2 %1165  ;;  %v5155_v36 = vrot.slane %v1546_v21, 5  ;;  %v1612_v21 = vshll.u32 %v4096_v8, 16  ;;  %v4106_v8 = vld [vmem:[%s4604_s22 + $0x64] sm:$0xf] }
  0xee   : > { %1242 = vst.msk [vmem:[#allocation2 + $0x10] sm:$0xf] %vm1237_vm8, %v1150_v37  ;;  %v1552_v37 = vrot.slane %v1550_v22, 4 }
  0xef   : > { %1250 = vst.msk [vmem:[#allocation2 + $0x30] sm:$0xf] %vm1237_vm8, %v1166_v38 }
  0xf2   : > { %1371 = vrot.lane.b32.xlu1 %v4070_v39, %s4549_s25  ;;  %v4089_v39 = vld [vmem:[%s4604_s22 + $0x20] sm:$0x1] }
  0xf3   : > { %1369 = vrot.lane.b32.xlu0 %v4069_v40, %s4549_s25  ;;  %1367 = vrot.lane.b32.xlu2 %v4068_v41, %s4549_s25  ;;  %v1539_v40 = vrot.slane %v1537_v24, 4  ;;  %v1542_v41 = vrot.slane %v1540_v26, 5  ;;  %v4103_v26 = vld [vmem:[%s4604_s22 + $0x58] sm:$0xf] }
  0xf4   : > { %v1158_v42 = vpop.permute.xlu1 %1157 }
  0xf5   : > { %1246 = vst.msk [vmem:[#allocation2 + $0x20] sm:$0xf] %vm1237_vm8, %v1158_v42  ;;  %v1156_v43 = vpop.permute.xlu0 %1155  ;;  %v1172_v44 = vpop.permute.xlu2 %1171 }
  0xf6   : > { %1245 = vst.msk [vmem:[#allocation2 + $0x1c] sm:$0xf] %vm1237_vm8, %v1156_v43  ;;  %v1594_v43 = vshll.u32 %v4094_v31, 16 }
  0xf7   : > { %1253 = vst.msk [vmem:[#allocation2 + $0x3c] sm:$0xf] %vm1237_vm8, %v1172_v44  ;;  %v1598_v44 = vshrl.u32 %v4094_v31, 16  ;;  %v1635_v31 = vrot.slane %v1633_v13, 4 }
  0xf9   : > { %v1600_v57 = vrot.slane %v1598_v44, 4 }
  0xfa   : > { %1377 = vrot.lane.b32.xlu1 %v4073_v45, %s4549_s25  ;;  %v1585_v45 = vshrl.u32 %v4093_v32, 16 }
  0xfb   : > { %1375 = vrot.lane.b32.xlu0 %v4072_v46, %s4549_s25  ;;  %1373 = vrot.lane.b32.xlu2 %v4071_v47, %s4549_s25  ;;  %v1588_v46 = vshll.u32 %v4093_v32, 16  ;;  %v1535_v47 = vsel %vm4615_vm2, %v1530_v27, %v1534_v28 }
  0xfc   : > { %v1164_v48 = vpop.permute.xlu1 %1163 }
  0xfd   : > { %1249 = vst.msk [vmem:[#allocation2 + $0x2c] sm:$0xf] %vm1237_vm8, %v1164_v48  ;;  %v1162_v49 = vpop.permute.xlu0 %1161  ;;  %v1178_v50 = vpop.permute.xlu2 %1177  ;;  %v1567_v48 = vor.u32 %v1566_v30, %v1563_v29  ;;  %v1590_v59 = vrot.slane %v1588_v46, 5  ;;  %v4100_v30 = vld [vmem:[%s4604_s22 + $0x4c] sm:$0xf] }
  0xfe   : > { %1248 = vst.msk [vmem:[#allocation2 + $0x28] sm:$0xf] %vm1237_vm8, %v1162_v49  ;;  %v1570_v49 = vshll.u32 %v4091_v35, 16 }
  0xff   : > { %1256 = vst.msk [vmem:[#allocation2 + $0x48] sm:$0xf] %vm1237_vm8, %v1178_v50  ;;  %v1525_v50 = vsel %vm4615_vm2, %v1520_v34, %v5134_v4  ;;  %v1568_v60 = vrot.slane %v1567_v48, 4  ;;  %v5194_v34 = vrot.slane %v1618_v17, 5 }
 0x102   : > { %1383 = vrot.lane.b32.xlu1 %v4076_v51, %s4549_s25  ;;  %v1553_v51 = vor.u32 %v1552_v37, %v5155_v36  ;;  %v1666_v37 = vshll.u32 %v4103_v26, 16 }
 0x103   : > { %1381 = vrot.lane.b32.xlu0 %v4075_v52, %s4549_s25  ;;  %1379 = vrot.lane.b32.xlu2 %v4074_v53, %s4549_s25  ;;  %v1556_v52 = vshll.u32 %v4089_v39, 16  ;;  %v1574_v53 = vshrl.u32 %v4091_v35, 16  ;;  %v1624_v35 = vrot.slane %v1622_v18, 4  ;;  %v4102_v39 = vld [vmem:[%s4604_s22 + $0x54] sm:$0xf]  ;;  %v1690_v18 = vshll.u32 %v4106_v8, 16 }
 0x104   : > { %v1170_v55 = vpop.permute.xlu1 %1169 }
 0x105   : > { %1252 = vst.msk [vmem:[#allocation2 + $0x38] sm:$0xf] %vm1237_vm8, %v1170_v55  ;;  %v1168_v56 = vpop.permute.xlu0 %1167  ;;  %v1184_v58 = vpop.permute.xlu2 %1183  ;;  %v1543_v55 = vor.u32 %v1542_v41, %v1539_v40  ;;  %v1558_v4 = vrot.slane %v1556_v52, 5  ;;  %v1576_v7 = vrot.slane %v1574_v53, 4  ;;  %v1611_v40 = vrot.slane %v1609_v20, 4 }
 0x106   : > { %1251 = vst.msk [vmem:[#allocation2 + $0x34] sm:$0xf] %vm1237_vm8, %v1168_v56  ;;  %v5169_v56 = vrot.slane %v1594_v43, 5  ;;  %v1614_v41 = vrot.slane %v1612_v21, 5  ;;  %v1657_v52 = vshrl.u32 %v4102_v39, 16 }
 0x107   : > { %1259 = vst.msk [vmem:[#allocation2 + $0x54] sm:$0xf] %vm1237_vm8, %v1184_v58  ;;  %v1587_v58 = vrot.slane %v1585_v45, 4  ;;  %v4104_v53 = vld [vmem:[%s4604_s22 + $0x5c] sm:$0x1] }
 0x108   : > { %v1601_v9 = vor.u32 %v1600_v57, %v5169_v56  ;;  %v1660_v57 = vshll.u32 %v4102_v39, 16  ;;  %v4111_v39 = vld [vmem:[%s4604_s22 + $0x78] sm:$0xf] }
 0x109   : > { %v1591_v11 = vor.u32 %v1590_v59, %v1587_v58  ;;  %v1615_v58 = vor.u32 %v1614_v41, %v1611_v40  ;;  %v1646_v59 = vshrl.u32 %v4100_v30, 16 }
 0x10a   : > { %1389 = vrot.lane.b32.xlu1 %v4079_v61, %s4549_s25  ;;  %v1572_v61 = vrot.slane %v1570_v49, 5  ;;  %v1602_v27 = vrot.slane %v1601_v9, 4 }
 0x10b   : > { %1387 = vrot.lane.b32.xlu0 %v4078_v62, %s4549_s25  ;;  %1385 = vrot.lane.b32.xlu2 %v4077_v3, %s4549_s25  ;;  %v4095_v62 = vld [vmem:[%s4604_s22 + $0x38] sm:$0x1]  ;;  %v1554_v3 = vrot.slane %v1553_v51, 4  ;;  %v1592_v29 = vrot.slane %v1591_v11, 4 }
 0x10c   : > { %v1176_v2 = vpop.permute.xlu1 %1175  ;;  %v1573_v15 = vsel %vm4615_vm2, %v1568_v60, %v1572_v61 }
 0x10d   : > { %1255 = vst.msk [vmem:[#allocation2 + $0x44] sm:$0xf] %vm1237_vm8, %v1176_v2  ;;  %v1174_v10 = vpop.permute.xlu0 %1173  ;;  %v1190_v14 = vpop.permute.xlu2 %1189  ;;  %v1544_v2 = vrot.slane %v1543_v55, 4  ;;  %v1597_v46 = vsel %vm4615_vm2, %v1592_v29, %v5169_v56 }
 0x10e   : > { %1254 = vst.msk [vmem:[#allocation2 + $0x40] sm:$0xf] %vm1237_vm8, %v1174_v10  ;;  %v1604_v10 = vshll.u32 %v4095_v62, 16 }
 0x10f   : > { %1262 = vst.msk [vmem:[#allocation2 + $0x60] sm:$0xf] %vm1237_vm8, %v1190_v14  ;;  %v4092_v14 = vld [vmem:[%s4604_s22 + $0x2c] sm:$0x1]  ;;  %v1549_v22 = vsel %vm4615_vm2, %v1544_v2, %v5155_v36  ;;  %v1662_v2 = vrot.slane %v1660_v57, 5 }
 0x110   : > { %v1580_v24 = vshll.u32 %v4092_v14, 16  ;;  %v1606_v28 = vrot.slane %v1604_v10, 5  ;;  %v4101_v14 = vld [vmem:[%s4604_s22 + $0x50] sm:$0x1] }
 0x112   : > { %1395 = vrot.lane.b32.xlu1 %v4082_v16, %s4549_s25  ;;  %v1636_v16 = vshll.u32 %v4099_v0, 16  ;;  %v1582_v44 = vrot.slane %v1580_v24, 5  ;;  %v1607_v45 = vsel %vm4615_vm2, %v1602_v27, %v1606_v28 }
 0x113   : > { %1393 = vrot.lane.b32.xlu0 %v4081_v19, %s4549_s25  ;;  %1391 = vrot.lane.b32.xlu2 %v4080_v23, %s4549_s25  ;;  %v1559_v19 = vsel %vm4615_vm2, %v1554_v3, %v1558_v4  ;;  %v1577_v23 = vor.u32 %v1576_v7, %v1572_v61  ;;  %v4108_v61 = vld [vmem:[%s4604_s22 + $0x6c] sm:$0xf]  ;;  %v1676_v3 = vshll.u32 %v4104_v53, 16  ;;  %v1616_v7 = vrot.slane %v1615_v58, 4 }
 0x114   : > { %v1182_v33 = vpop.permute.xlu1 %1181  ;;  %v1638_v32 = vrot.slane %v1636_v16, 5  ;;  %v1705_v10 = vshrl.u32 %v4108_v61, 16  ;;  %v1708_v11 = vshll.u32 %v4108_v61, 16  ;;  %v1732_v53 = vshll.u32 %v4111_v39, 16 }
 0x115   : > { %1258 = vst.msk [vmem:[#allocation2 + $0x50] sm:$0xf] %vm1237_vm8, %v1182_v33  ;;  %v1180_v38 = vpop.permute.xlu0 %1179  ;;  %v1196_v42 = vpop.permute.xlu2 %1195  ;;  %v4098_v33 = vld [vmem:[%s4604_s22 + $0x44] sm:$0x1]  ;;  %v1578_v43 = vrot.slane %v1577_v23, 4  ;;  %v1678_v21 = vrot.slane %v1676_v3, 5  ;;  %v1621_v23 = vsel %vm4615_vm2, %v1616_v7, %v5194_v34 }
 0x116   : > { %1257 = vst.msk [vmem:[#allocation2 + $0x4c] sm:$0xf] %vm1237_vm8, %v1180_v38  ;;  %v1670_v38 = vshrl.u32 %v4103_v26, 16  ;;  %v1639_v49 = vor.u32 %v1638_v32, %v1635_v31  ;;  %v1628_v51 = vshll.u32 %v4098_v33, 16  ;;  %v1652_v26 = vshll.u32 %v4101_v14, 16 }
 0x117   : > { %1265 = vst.msk [vmem:[#allocation2 + $0x6c] sm:$0xf] %vm1237_vm8, %v1196_v42  ;;  %v1583_v56 = vsel %vm4615_vm2, %v1578_v43, %v1582_v44  ;;  %v1707_v29 = vrot.slane %v1705_v10, 4  ;;  %v4109_v31 = vld [vmem:[%s4604_s22 + $0x70] sm:$0xf]  ;;  %v5233_v32 = vrot.slane %v1690_v18, 5 }
 0x118   : > { %v1672_v55 = vrot.slane %v1670_v38, 4  ;;  %v1640_v62 = vrot.slane %v1639_v49, 4  ;;  %v4107_v38 = vld [vmem:[%s4604_s22 + $0x68] sm:$0x1]  ;;  %v1718_v57 = vshrl.u32 %v4109_v31, 16 }
 0x119   : > { %v4114_v10 = vld [vmem:[%s4604_s22 + $0x84] sm:$0xf] }
 0x11a   : > { %1898 = vrot.lane.b32.xlu1 %v1535_v47, %s4550_s26  ;;  %v1642_v47 = vshll.u32 %v4100_v30, 16  ;;  %v1710_v30 = vrot.slane %v1708_v11, 5 }
 0x11b   : > { %1896 = vrot.lane.b32.xlu0 %v1525_v50, %s4550_s26  ;;  %1397 = vrot.lane.b32.xlu2 %v4083_v54, %s4549_s25  ;;  %v1625_v50 = vor.u32 %v1624_v35, %v5194_v34  ;;  %v5208_v54 = vrot.slane %v1666_v37, 5  ;;  %v4112_v35 = vld [vmem:[%s4604_s22 + $0x7c] sm:$0xf] }
 0x11c   : > { %v1188_v1 = vpop.permute.xlu1 %1187  ;;  %v1644_v60 = vrot.slane %v1642_v47, 5  ;;  %v1742_v49 = vshrl.u32 %v4112_v35, 16 }
 0x11d   : > { %1261 = vst.msk [vmem:[#allocation2 + $0x5c] sm:$0xf] %vm1237_vm8, %v1188_v1  ;;  %v1186_v6 = vpop.permute.xlu0 %1185  ;;  %v1202_v12 = vpop.permute.xlu2 %1201  ;;  %v1626_v0 = vrot.slane %v1625_v50, 4  ;;  %v1630_v1 = vrot.slane %v1628_v51, 5  ;;  %v1673_v5 = vor.u32 %v1672_v55, %v5208_v54  ;;  %v1700_v51 = vshll.u32 %v4107_v38, 16 }
 0x11e   : > { %1260 = vst.msk [vmem:[#allocation2 + $0x58] sm:$0xf] %vm1237_vm8, %v1186_v6  ;;  %v1659_v6 = vrot.slane %v1657_v52, 4  ;;  %v1645_v16 = vsel %vm4615_vm2, %v1640_v62, %v1644_v60  ;;  %v1729_v52 = vshrl.u32 %v4111_v39, 16  ;;  %v1744_v62 = vrot.slane %v1742_v49, 4 }
 0x11f   : > { %1268 = vst.msk [vmem:[#allocation2 + $0x78] sm:$0xf] %vm1237_vm8, %v1202_v12  ;;  %v1648_v12 = vrot.slane %v1646_v59, 4  ;;  %v1631_v17 = vsel %vm4615_vm2, %v1626_v0, %v1630_v1  ;;  %v1674_v20 = vrot.slane %v1673_v5, 4  ;;  %v1702_v1 = vrot.slane %v1700_v51, 5 }
 0x120   : > { %v1731_v3 = vrot.slane %v1729_v52, 4  ;;  %v4120_v38 = vld [vmem:[%s4604_s22 + $0x9c] sm:$0xf] }
 0x121   : > { %v1649_v24 = vor.u32 %v1648_v12, %v1644_v60  ;;  %v1679_v34 = vsel %vm4615_vm2, %v1674_v20, %v1678_v21  ;;  %v1801_v51 = vshrl.u32 %v4120_v38, 16  ;;  %v1804_v52 = vshll.u32 %v4120_v38, 16 }
 0x122   : > { %1904 = vrot.lane.b32.xlu1 %v1573_v15, %s4550_s26  ;;  %v4105_v15 = vld [vmem:[%s4604_s22 + $0x60] sm:$0xf] }
 0x123   : > { %1902 = vrot.lane.b32.xlu0 %v1559_v19, %s4550_s26  ;;  %1900 = vrot.lane.b32.xlu2 %v1549_v22, %s4550_s26  ;;  %v1694_v19 = vshrl.u32 %v4106_v8, 16  ;;  %v1663_v22 = vor.u32 %v1662_v2, %v1659_v6  ;;  %v1681_v27 = vshrl.u32 %v4105_v15, 16  ;;  %v1684_v28 = vshll.u32 %v4105_v15, 16  ;;  %v4117_v6 = vld [vmem:[%s4604_s22 + $0x90] sm:$0xf] }
 0x124   : > { %v1194_v36 = vpop.permute.xlu1 %1193  ;;  %v1650_v41 = vrot.slane %v1649_v24, 4  ;;  %v4115_v2 = vld [vmem:[%s4604_s22 + $0x88] sm:$0xf]  ;;  %v4110_v15 = vld [vmem:[%s4604_s22 + $0x74] sm:$0x1]  ;;  %v1777_v18 = vshrl.u32 %v4117_v6, 16 }
 0x125   : > { %1264 = vst.msk [vmem:[#allocation2 + $0x68] sm:$0xf] %vm1237_vm8, %v1194_v36  ;;  %v1192_v42 = vpop.permute.xlu0 %1191  ;;  %v1338_v48 = vpop.permute.xlu2 %1337  ;;  %v1696_v33 = vrot.slane %v1694_v19, 4  ;;  %v1664_v37 = vrot.slane %v1663_v22, 4  ;;  %v1683_v43 = vrot.slane %v1681_v27, 4  ;;  %v1686_v44 = vrot.slane %v1684_v28, 5 }
 0x126   : > { %1263 = vst.msk [vmem:[#allocation2 + $0x64] sm:$0xf] %vm1237_vm8, %v1192_v42  ;;  %v1654_v42 = vrot.slane %v1652_v26, 5  ;;  %v1780_v19 = vshll.u32 %v4117_v6, 16  ;;  %v1762_v20 = vshll.u32 %v4115_v2, 16  ;;  %v1766_v21 = vshrl.u32 %v4115_v2, 16 }
 0x127   : > { %1433 = vst.msk [vmem:[#allocation2 + $0x4] sm:$0xf] %vm1431_vm9, %v1338_v48  ;;  %v1738_v48 = vshll.u32 %v4112_v35, 16  ;;  %v1697_v50 = vor.u32 %v1696_v33, %v5233_v32  ;;  %v1669_v55 = vsel %vm4615_vm2, %v1664_v37, %v5208_v54  ;;  %v1687_v59 = vor.u32 %v1686_v44, %v1683_v43  ;;  %v4113_v54 = vld [vmem:[%s4604_s22 + $0x80] sm:$0x1] }
 0x128   : > { %v1655_v58 = vsel %vm4615_vm2, %v1650_v41, %v1654_v42  ;;  %v1753_v22 = vshrl.u32 %v4114_v10, 16  ;;  %v1724_v27 = vshll.u32 %v4110_v15, 16  ;;  %v1779_v33 = vrot.slane %v1777_v18, 4  ;;  %v4116_v42 = vld [vmem:[%s4604_s22 + $0x8c] sm:$0x1] }
 0x129   : > { %v5251_v61 = vrot.slane %v1738_v48, 5  ;;  %v1698_v0 = vrot.slane %v1697_v50, 4  ;;  %v1688_v8 = vrot.slane %v1687_v59, 4  ;;  %v1782_v35 = vrot.slane %v1780_v19, 5  ;;  %v4123_v15 = vld [vmem:[%s4604_s22 + $0xa8] sm:$0xf] }
 0x12a   : > { %1910 = vrot.lane.b32.xlu1 %v1607_v45, %s4550_s26  ;;  %v1711_v45 = vor.u32 %v1710_v30, %v1707_v29  ;;  %v4118_v30 = vld [vmem:[%s4604_s22 + $0x94] sm:$0xf]  ;;  %v5276_v37 = vrot.slane %v1762_v20, 5  ;;  %v1755_v39 = vrot.slane %v1753_v22, 4  ;;  %v1726_v44 = vrot.slane %v1724_v27, 5 }
 0x12b   : > { %1908 = vrot.lane.b32.xlu0 %v1597_v46, %s4550_s26  ;;  %1906 = vrot.lane.b32.xlu2 %v1583_v56, %s4550_s26  ;;  %v1714_v46 = vshll.u32 %v4109_v31, 16  ;;  %v1745_v12 = vor.u32 %v1744_v62, %v5251_v61  ;;  %v1693_v24 = vsel %vm4615_vm2, %v1688_v8, %v5233_v32  ;;  %v1768_v32 = vrot.slane %v1766_v21, 4 }
 0x12c   : > { %v1200_v4 = vpop.permute.xlu1 %1199  ;;  %v1712_v56 = vrot.slane %v1711_v45, 4  ;;  %v1783_v49 = vor.u32 %v1782_v35, %v1779_v33  ;;  %v1786_v50 = vshll.u32 %v4118_v30, 16  ;;  %v1790_v59 = vshrl.u32 %v4118_v30, 16 }
 0x12d   : > { %1267 = vst.msk [vmem:[#allocation2 + $0x74] sm:$0xf] %vm1237_vm8, %v1200_v4  ;;  %v1198_v9 = vpop.permute.xlu0 %1197  ;;  %v1344_v13 = vpop.permute.xlu2 %1343  ;;  %v1716_v60 = vrot.slane %v1714_v46, 5  ;;  %v1734_v4 = vrot.slane %v1732_v53, 5  ;;  %v1746_v28 = vrot.slane %v1745_v12, 4  ;;  %v1825_v27 = vshrl.u32 %v4123_v15, 16 }
 0x12e   : > { %1266 = vst.msk [vmem:[#allocation2 + $0x70] sm:$0xf] %vm1237_vm8, %v1198_v9  ;;  %v1720_v9 = vrot.slane %v1718_v57, 4  ;;  %v1772_v57 = vshll.u32 %v4116_v42, 16 }
 0x12f   : > { %1436 = vst.msk [vmem:[#allocation2 + $0x10] sm:$0xf] %vm1431_vm9, %v1344_v13  ;;  %v1717_v11 = vsel %vm4615_vm2, %v1712_v56, %v1716_v60  ;;  %v1748_v13 = vshll.u32 %v4113_v54, 16  ;;  %v1803_v54 = vrot.slane %v1801_v51, 4 }
 0x130   : > { %v1721_v26 = vor.u32 %v1720_v9, %v1716_v60  ;;  %v4122_v60 = vld [vmem:[%s4604_s22 + $0xa4] sm:$0x1]  ;;  %v1774_v6 = vrot.slane %v1772_v57, 5 }
 0x131   : > { %v1750_v29 = vrot.slane %v1748_v13, 5  ;;  %v1820_v9 = vshll.u32 %v4122_v60, 16 }
 0x132   : > { %1916 = vrot.lane.b32.xlu1 %v1645_v16, %s4550_s26  ;;  %v1703_v16 = vsel %vm4615_vm2, %v1698_v0, %v1702_v1  ;;  %v1722_v43 = vrot.slane %v1721_v26, 4  ;;  %v1784_v1 = vrot.slane %v1783_v49, 4 }
 0x133   : > { %1914 = vrot.lane.b32.xlu0 %v1631_v17, %s4550_s26  ;;  %1912 = vrot.lane.b32.xlu2 %v1621_v23, %s4550_s26  ;;  %v1735_v17 = vor.u32 %v1734_v4, %v1731_v3  ;;  %v1756_v23 = vshll.u32 %v4114_v10, 16  ;;  %v1751_v45 = vsel %vm4615_vm2, %v1746_v28, %v1750_v29  ;;  %v1806_v3 = vrot.slane %v1804_v52, 5  ;;  %v4124_v10 = vld [vmem:[%s4604_s22 + $0xac] sm:$0xf] }
 0x134   : > { %v1336_v36 = vpop.permute.xlu1 %1335  ;;  %v1727_v56 = vsel %vm4615_vm2, %v1722_v43, %v1726_v44  ;;  %v1834_v22 = vshll.u32 %v4124_v10, 16  ;;  %v1828_v28 = vshll.u32 %v4123_v15, 16  ;;  %v1822_v30 = vrot.slane %v1820_v9, 5 }
 0x135   : > { %1432 = vst.msk [vmem:[#allocation2] sm:$0xf] %vm1431_vm9, %v1336_v36  ;;  %v1204_v40 = vpop.permute.xlu0 %1203  ;;  %v1350_v47 = vpop.permute.xlu2 %1349  ;;  %v1736_v31 = vrot.slane %v1735_v17, 4  ;;  %v4121_v36 = vld [vmem:[%s4604_s22 + $0xa0] sm:$0xf]  ;;  %v1807_v17 = vor.u32 %v1806_v3, %v1803_v54  ;;  %v1827_v44 = vrot.slane %v1825_v27, 4 }
 0x136   : > { %1269 = vst.msk [vmem:[#allocation2 + $0x7c] sm:$0xf] %vm1237_vm8, %v1204_v40  ;;  %v1758_v40 = vrot.slane %v1756_v23, 5  ;;  %v1814_v48 = vshrl.u32 %v4121_v36, 16  ;;  %v1838_v23 = vshrl.u32 %v4124_v10, 16 }
 0x137   : > { %1439 = vst.msk [vmem:[#allocation2 + $0x1c] sm:$0xf] %vm1431_vm9, %v1350_v47  ;;  %v1810_v47 = vshll.u32 %v4121_v36, 16  ;;  %v1741_v53 = vsel %vm4615_vm2, %v1736_v31, %v5251_v61  ;;  %v1788_v61 = vrot.slane %v1786_v50, 5  ;;  %v4127_v31 = vld [vmem:[%s4604_s22 + $0xb8] sm:$0xf] }
 0x138   : > { %v1816_v0 = vrot.slane %v1814_v48, 4  ;;  %v1808_v33 = vrot.slane %v1807_v17, 4  ;;  %v1840_v38 = vrot.slane %v1838_v23, 4 }
 0x139   : > { %v5293_v62 = vrot.slane %v1810_v47, 5  ;;  %v1858_v47 = vshll.u32 %v4127_v31, 16 }
 0x13a   : > { %1922 = vrot.lane.b32.xlu1 %v1679_v34, %s4550_s26 }
 0x13b   : > { %1920 = vrot.lane.b32.xlu0 %v1669_v55, %s4550_s26  ;;  %1918 = vrot.lane.b32.xlu2 %v1655_v58, %s4550_s26  ;;  %v1769_v55 = vor.u32 %v1768_v32, %v5276_v37  ;;  %v1759_v58 = vor.u32 %v1758_v40, %v1755_v39  ;;  %v1817_v12 = vor.u32 %v1816_v0, %v5293_v62  ;;  %v1836_v32 = vrot.slane %v1834_v22, 5  ;;  %v4130_v39 = vld [vmem:[%s4604_s22 + $0xc4] sm:$0xf]  ;;  %v4129_v40 = vld [vmem:[%s4604_s22 + $0xc0] sm:$0xf] }
 0x13c   : > { %v1342_v5 = vpop.permute.xlu1 %1341  ;;  %v1813_v49 = vsel %vm4615_vm2, %v1808_v33, %v5293_v62  ;;  %v1882_v51 = vshll.u32 %v4130_v39, 16  ;;  %v1886_v52 = vshrl.u32 %v4130_v39, 16  ;;  %v1873_v57 = vshrl.u32 %v4129_v40, 16  ;;  %v4135_v33 = vld [vmem:[%s4604_s22 + $0x18] sm:$0xe] }
 0x13d   : > { %1435 = vst.msk [vmem:[#allocation2 + $0xc] sm:$0xf] %vm1431_vm9, %v1342_v5  ;;  %v1340_v7 = vpop.permute.xlu0 %1339  ;;  %v1356_v14 = vpop.permute.xlu2 %1355  ;;  %v1770_v5 = vrot.slane %v1769_v55, 4  ;;  %v1760_v2 = vrot.slane %v1759_v58, 4  ;;  %v1818_v29 = vrot.slane %v1817_v12, 4  ;;  %v1876_v58 = vshll.u32 %v4129_v40, 16 }
 0x13e   : > { %1434 = vst.msk [vmem:[#allocation2 + $0x8] sm:$0xf] %vm1431_vm9, %v1340_v7  ;;  %v4126_v7 = vld [vmem:[%s4604_s22 + $0xb4] sm:$0xf]  ;;  %v1860_v0 = vrot.slane %v1858_v47, 5 }
 0x13f   : > { %1442 = vst.msk [vmem:[#allocation2 + $0x28] sm:$0xf] %vm1431_vm9, %v1356_v14  ;;  %v4119_v14 = vld [vmem:[%s4604_s22 + $0x98] sm:$0x1]  ;;  %v1849_v18 = vshrl.u32 %v4126_v7, 16  ;;  %v1852_v19 = vshll.u32 %v4126_v7, 16  ;;  %v1775_v20 = vsel %vm4615_vm2, %v1770_v5, %v1774_v6  ;;  %v1765_v21 = vsel %vm4615_vm2, %v1760_v2, %v5276_v37 }
 0x140   : > { %v1796_v26 = vshll.u32 %v4119_v14, 16  ;;  %v4131_v5 = vld [vmem:[%s4604_s22 + $0xc8] sm:$0x1]  ;;  %v1875_v6 = vrot.slane %v1873_v57, 4  ;;  %v1878_v2 = vrot.slane %v1876_v58, 5 }
 0x141   : > { %v1851_v35 = vrot.slane %v1849_v18, 4  ;;  %v1854_v36 = vrot.slane %v1852_v19, 5  ;;  %v1892_v14 = vshll.u32 %v4131_v5, 16 }
 0x142   : > { %1928 = vrot.lane.b32.xlu1 %v1717_v11, %s4550_s26  ;;  %v1792_v11 = vrot.slane %v1790_v59, 4  ;;  %v1798_v43 = vrot.slane %v1796_v26, 5  ;;  %v1862_v59 = vshrl.u32 %v4127_v31, 16  ;;  %v4133_v26 = vld [vmem:[%s4604_s22 + $0x10] sm:$0xf] }
 0x143   : > { %1926 = vrot.lane.b32.xlu0 %v1703_v16, %s4550_s26  ;;  %1924 = vrot.lane.b32.xlu2 %v1693_v24, %s4550_s26  ;;  %v1789_v16 = vsel %vm4615_vm2, %v1784_v1, %v1788_v61  ;;  %v1855_v50 = vor.u32 %v1854_v36, %v1851_v35  ;;  %v1884_v1 = vrot.slane %v1882_v51, 5  ;;  %v4136_v35 = vld [vmem:[%s4604_s22 + $0x1c] sm:$0xf]  ;;  %v2123_v36 = vrot.slane %v4133_v26, 5  ;;  %v4138_v51 = vld [vmem:[%s4604_s22 + $0x24] sm:$0xe] }
 0x144   : > { %v1348_v34 = vpop.permute.xlu1 %1347  ;;  %v1793_v24 = vor.u32 %v1792_v11, %v1788_v61  ;;  %v1888_v61 = vrot.slane %v1886_v52, 4  ;;  %v1864_v9 = vrot.slane %v1862_v59, 4  ;;  %v4128_v11 = vld [vmem:[%s4604_s22 + $0xbc] sm:$0x1]  ;;  %v2130_v39 = vrot.slane %v4136_v35, 5 }
 0x145   : > { %1438 = vst.msk [vmem:[#allocation2 + $0x18] sm:$0xf] %vm1431_vm9, %v1348_v34  ;;  %v1346_v41 = vpop.permute.xlu0 %1345  ;;  %v1362_v46 = vpop.permute.xlu2 %1361  ;;  %v4125_v34 = vld [vmem:[%s4604_s22 + $0xb0] sm:$0x1]  ;;  %v1856_v62 = vrot.slane %v1855_v50, 4  ;;  %v1868_v19 = vshll.u32 %v4128_v11, 16 }
 0x146   : > { %1437 = vst.msk [vmem:[#allocation2 + $0x14] sm:$0xf] %vm1431_vm9, %v1346_v41  ;;  %v1794_v42 = vrot.slane %v1793_v24, 4  ;;  %v1844_v55 = vshll.u32 %v4125_v34, 16  ;;  %v1865_v18 = vor.u32 %v1864_v9, %v1860_v0  ;;  %v4134_v34 = vld [vmem:[%s4604_s22 + $0x14] sm:$0x1] }
 0x147   : > { %1445 = vst.msk [vmem:[#allocation2 + $0x34] sm:$0xf] %vm1431_vm9, %v1362_v46  ;;  %v1823_v46 = vsel %vm4615_vm2, %v1818_v29, %v1822_v30  ;;  %v1861_v12 = vsel %vm4615_vm2, %v1856_v62, %v1860_v0  ;;  %v4140_v50 = vld [vmem:[%s4604_s22 + $0x2c] sm:$0x1]  ;;  %v4182_v59 = vrot.slane %v4138_v51, 9  ;;  %v2132_v62 = vrot.slane %v2130_v39, 4 }
 0x148   : > { %v1866_v27 = vrot.slane %v1865_v18, 4  ;;  %v2140_v57 = vrot.slane %v4140_v50, 5 }
 0x14a   : > { %1934 = vrot.lane.b32.xlu1 %v1751_v45, %s4550_s26  ;;  %v1830_v45 = vrot.slane %v1828_v28, 5  ;;  %v1870_v28 = vrot.slane %v1868_v19, 5 }
 0x14b   : > { %1932 = vrot.lane.b32.xlu0 %v1741_v53, %s4550_s26  ;;  %1930 = vrot.lane.b32.xlu2 %v1727_v56, %s4550_s26  ;;  %v1841_v53 = vor.u32 %v1840_v38, %v1836_v32  ;;  %v1799_v56 = vsel %vm4615_vm2, %v1794_v42, %v1798_v43  ;;  %v4181_v38 = vrot.slane %v4135_v33, 9  ;;  %v2126_v42 = vrot.slane %v4134_v34, 5  ;;  %v4139_v43 = vld [vmem:[%s4604_s22 + $0x28] sm:$0xf] }
 0x14c   : > { %v1354_v4 = vpop.permute.xlu1 %1353  ;;  %v1831_v60 = vor.u32 %v1830_v45, %v1827_v44 }
 0x14d   : > { %1441 = vst.msk [vmem:[#allocation2 + $0x24] sm:$0xf] %vm1431_vm9, %v1354_v4  ;;  %v1352_v8 = vpop.permute.xlu0 %1351  ;;  %v1368_v13 = vpop.permute.xlu2 %1367  ;;  %v1842_v3 = vrot.slane %v1841_v53, 4  ;;  %v1846_v4 = vrot.slane %v1844_v55, 5  ;;  %v2131_v47 = vsel %vm4789_vm5, %v4181_v38, %v2130_v39  ;;  %v4137_v53 = vld [vmem:[%s4604_s22 + $0x20] sm:$0x1] }
 0x14e   : > { %1440 = vst.msk [vmem:[#allocation2 + $0x20] sm:$0xf] %vm1431_vm9, %v1352_v8  ;;  %v1832_v8 = vrot.slane %v1831_v60, 4  ;;  %v4142_v60 = vld [vmem:[%s4604_s22 + $0x34] sm:$0xf]  ;;  %v2133_v0 = vrot.slane %v4137_v53, 5 }
 0x14f   : > { %1448 = vst.msk [vmem:[#allocation2 + $0x40] sm:$0xf] %vm1431_vm9, %v1368_v13  ;;  %v1889_v13 = vor.u32 %v1888_v61, %v1884_v1  ;;  %v1847_v15 = vsel %vm4615_vm2, %v1842_v3, %v1846_v4  ;;  %v4144_v3 = vld [vmem:[%s4604_s22 + $0x3c] sm:$0xe]  ;;  %v4145_v4 = vld [vmem:[%s4604_s22 + $0x40] sm:$0xf] }
 0x150   : > { %v1837_v17 = vsel %vm4615_vm2, %v1832_v8, %v1836_v32  ;;  %v4132_v32 = vld [vmem:[%s4604_s22 + $0xc] sm:$0xe]  ;;  %v2144_v5 = vrot.slane %v4142_v60, 5  ;;  %v4184_v8 = vrot.slane %v4144_v3, 9  ;;  %v2151_v9 = vrot.slane %v4145_v4, 5 }
 0x151   : > { %v4180_v45 = vrot.slane %v4132_v32, 9  ;;  %v4154_v32 = vld [vmem:[%s4604_s22 + $0x64] sm:$0xf]  ;;  %v4152_v39 = vld [vmem:[%s4604_s22 + $0x5c] sm:$0x1] }
 0x152   : > { %1940 = vrot.lane.b32.xlu1 %v1789_v16, %s4550_s26  ;;  %v1879_v16 = vor.u32 %v1878_v2, %v1875_v6  ;;  %v4143_v6 = vld [vmem:[%s4604_s22 + $0x38] sm:$0x1]  ;;  %v2134_v2 = vsel %vm4789_vm5, %v2132_v62, %v2133_v0  ;;  %v2146_v11 = vrot.slane %v2144_v5, 4 }
 0x153   : > { %1938 = vrot.lane.b32.xlu0 %v1775_v20, %s4550_s26  ;;  %1936 = vrot.lane.b32.xlu2 %v1765_v21, %s4550_s26  ;;  %v1890_v20 = vrot.slane %v1889_v13, 4  ;;  %v1894_v21 = vrot.slane %v1892_v14, 5  ;;  %v2124_v52 = vsel %vm4789_vm5, %v4180_v45, %v2123_v36  ;;  %v4148_v13 = vld [vmem:[%s4604_s22 + $0x4c] sm:$0xf] }
 0x154   : > { %v1360_v37 = vpop.permute.xlu1 %1359  ;;  %v1880_v23 = vrot.slane %v1879_v16, 4  ;;  %v2158_v18 = vrot.slane %v4148_v13, 5 }
 0x155   : > { %1444 = vst.msk [vmem:[#allocation2 + $0x30] sm:$0xf] %vm1431_vm9, %v1360_v37  ;;  %v1358_v41 = vpop.permute.xlu0 %1357  ;;  %v1374_v48 = vpop.permute.xlu2 %1373  ;;  %v1895_v30 = vsel %vm4615_vm2, %v1890_v20, %v1894_v21  ;;  %v1871_v37 = vsel %vm4615_vm2, %v1866_v27, %v1870_v28  ;;  %v4149_v20 = vld [vmem:[%s4604_s22 + $0x50] sm:$0x1]  ;;  %v4147_v21 = vld [vmem:[%s4604_s22 + $0x48] sm:$0xe] }
 0x156   : > { %1443 = vst.msk [vmem:[#allocation2 + $0x2c] sm:$0xf] %vm1431_vm9, %v1358_v41  ;;  %v1885_v31 = vsel %vm4615_vm2, %v1880_v23, %v1884_v1  ;;  %v2125_v41 = vrot.slane %v2123_v36, 4  ;;  %v4146_v23 = vld [vmem:[%s4604_s22 + $0x44] sm:$0x1]  ;;  %v2161_v26 = vrot.slane %v4149_v20, 5 }
 0x157   : > { %1451 = vst.msk [vmem:[#allocation2 + $0x4c] sm:$0xf] %vm1431_vm9, %v1374_v48  ;;  %v2137_v48 = vrot.slane %v4139_v43, 5  ;;  %v4185_v28 = vrot.slane %v4147_v21, 9  ;;  %v2154_v33 = vrot.slane %v4146_v23, 5  ;;  %v2172_v43 = vrot.slane %v4154_v32, 5 }
 0x159   : > { %v2139_v55 = vrot.slane %v2137_v48, 4  ;;  %v2159_v34 = vsel %vm4789_vm5, %v4185_v28, %v2158_v18  ;;  %v4164_v28 = vld [vmem:[%s4604_s22 + $0x8c] sm:$0x1] }
 0x15a   : > { %1946 = vrot.lane.b32.xlu1 %v1823_v46, %s4550_s26 }
 0x15b   : > { %1944 = vrot.lane.b32.xlu0 %v1813_v49, %s4550_s26  ;;  %1942 = vrot.lane.b32.xlu2 %v1799_v56, %s4550_s26  ;;  %v2127_v49 = vsel %vm4789_vm5, %v2125_v41, %v2126_v42  ;;  %v2141_v61 = vsel %vm4789_vm5, %v2139_v55, %v2140_v57  ;;  %v4150_v41 = vld [vmem:[%s4604_s22 + $0x54] sm:$0xe]  ;;  %v4158_v55 = vld [vmem:[%s4604_s22 + $0x74] sm:$0x1] }
 0x15c   : > { %v1366_v54 = vpop.permute.xlu1 %1365  ;;  %v4156_v57 = vld [vmem:[%s4604_s22 + $0x6c] sm:$0xe]  ;;  %v2182_v60 = vrot.slane %v4158_v55, 5  ;;  %v4228_v55 = vld [vmem:[%s4604_s22 + $0x18] sm:$0xf] }
 0x15d   : > { %1447 = vst.msk [vmem:[#allocation2 + $0x3c] sm:$0xf] %vm1431_vm9, %v1366_v54  ;;  %v1364_v7 = vpop.permute.xlu0 %1363  ;;  %v1380_v10 = vpop.permute.xlu2 %1379  ;;  %v2138_v54 = vsel %vm4789_vm5, %v4182_v59, %v2137_v48  ;;  %v4155_v59 = vld [vmem:[%s4604_s22 + $0x68] sm:$0x1]  ;;  %v4188_v0 = vrot.slane %v4156_v57, 9 }
 0x15e   : > { %1446 = vst.msk [vmem:[#allocation2 + $0x38] sm:$0xf] %vm1431_vm9, %v1364_v7  ;;  %v4141_v7 = vld [vmem:[%s4604_s22 + $0x30] sm:$0xe]  ;;  %v2175_v3 = vrot.slane %v4155_v59, 5 }
 0x15f   : > { %1454 = vst.msk [vmem:[#allocation2 + $0x58] sm:$0xf] %vm1431_vm9, %v1380_v10 }
 0x162   : > { %1952 = vrot.lane.b32.xlu1 %v1861_v12, %s4550_s26  ;;  %v2147_v12 = vrot.slane %v4143_v6, 5 }
 0x163   : > { %1950 = vrot.lane.b32.xlu0 %v1847_v15, %s4550_s26  ;;  %1948 = vrot.lane.b32.xlu2 %v1837_v17, %s4550_s26  ;;  %v4183_v15 = vrot.slane %v4141_v7, 9  ;;  %v2152_v17 = vsel %vm4789_vm5, %v4184_v8, %v2151_v9  ;;  %v4163_v7 = vld [vmem:[%s4604_s22 + $0x88] sm:$0xf] }
 0x164   : > { %v1372_v22 = vpop.permute.xlu1 %1371  ;;  %v2148_v19 = vsel %vm4789_vm5, %v2146_v11, %v2147_v12  ;;  %v4159_v11 = vld [vmem:[%s4604_s22 + $0x78] sm:$0xe]  ;;  %v2193_v13 = vrot.slane %v4163_v7, 5 }
 0x165   : > { %1450 = vst.msk [vmem:[#allocation2 + $0x48] sm:$0xf] %vm1431_vm9, %v1372_v22  ;;  %v1370_v24 = vpop.permute.xlu0 %1369  ;;  %v1386_v29 = vpop.permute.xlu2 %1385  ;;  %v2145_v22 = vsel %vm4789_vm5, %v4183_v15, %v2144_v5 }
 0x166   : > { %1449 = vst.msk [vmem:[#allocation2 + $0x44] sm:$0xf] %vm1431_vm9, %v1370_v24  ;;  %v2160_v24 = vrot.slane %v2158_v18, 4 }
 0x167   : > { %1457 = vst.msk [vmem:[#allocation2 + $0x64] sm:$0xf] %vm1431_vm9, %v1386_v29 }
 0x168   : > { %v2162_v36 = vsel %vm4789_vm5, %v2160_v24, %v2161_v26  ;;  %v4167_v24 = vld [vmem:[%s4604_s22 + $0x98] sm:$0x1]  ;;  %v4165_v26 = vld [vmem:[%s4604_s22 + $0x90] sm:$0xe] }
 0x16a   : > { %1958 = vrot.lane.b32.xlu1 %v1895_v30, %s4550_s26  ;;  %v4151_v30 = vld [vmem:[%s4604_s22 + $0x58] sm:$0xf] }
 0x16b   : > { %1956 = vrot.lane.b32.xlu0 %v1885_v31, %s4550_s26  ;;  %1954 = vrot.lane.b32.xlu2 %v1871_v37, %s4550_s26  ;;  %v2153_v31 = vrot.slane %v2151_v9, 4  ;;  %v4153_v37 = vld [vmem:[%s4604_s22 + $0x60] sm:$0xe]  ;;  %v2165_v38 = vrot.slane %v4151_v30, 5  ;;  %v4161_v9 = vld [vmem:[%s4604_s22 + $0x80] sm:$0x1] }
 0x16c   : > { %v1378_v40 = vpop.permute.xlu1 %1377  ;;  %v4187_v42 = vrot.slane %v4153_v37, 9  ;;  %v2203_v30 = vrot.slane %v4167_v24, 5  ;;  %v2196_v37 = vrot.slane %v4164_v28, 5 }
 0x16d   : > { %1453 = vst.msk [vmem:[#allocation2 + $0x54] sm:$0xf] %vm1431_vm9, %v1378_v40  ;;  %v1376_v44 = vpop.permute.xlu0 %1375  ;;  %v1392_v46 = vpop.permute.xlu2 %1391  ;;  %v2155_v40 = vsel %vm4789_vm5, %v2153_v31, %v2154_v33  ;;  %v2167_v45 = vrot.slane %v2165_v38, 4  ;;  %v4191_v33 = vrot.slane %v4165_v26, 9 }
 0x16e   : > { %1452 = vst.msk [vmem:[#allocation2 + $0x50] sm:$0xf] %vm1431_vm9, %v1376_v44  ;;  %v2173_v51 = vsel %vm4789_vm5, %v4187_v42, %v2172_v43 }
 0x16f   : > { %1460 = vst.msk [vmem:[#allocation2 + $0x70] sm:$0xf] %vm1431_vm9, %v1392_v46  ;;  %v2168_v46 = vrot.slane %v4152_v39, 5 }
 0x171   : > { %v2169_v53 = vsel %vm4789_vm5, %v2167_v45, %v2168_v46  ;;  %v4168_v45 = vld [vmem:[%s4604_s22 + $0x9c] sm:$0xe] }
 0x172   : > { %2237 = vrot.lane.b32.xlu1 %v2131_v47, %s4551_s27  ;;  %v4157_v47 = vld [vmem:[%s4604_s22 + $0x70] sm:$0xf] }
 0x173   : > { %2235 = vrot.lane.b32.xlu0 %v2127_v49, %s4551_s27  ;;  %2233 = vrot.lane.b32.xlu2 %v2124_v52, %s4551_s27  ;;  %v4186_v49 = vrot.slane %v4150_v41, 9  ;;  %v2179_v52 = vrot.slane %v4157_v47, 5  ;;  %v4172_v41 = vld [vmem:[%s4604_s22 + $0xac] sm:$0xf] }
 0x174   : > { %v1384_v58 = vpop.permute.xlu1 %1383  ;;  %v2214_v47 = vrot.slane %v4172_v41, 5  ;;  %v4232_v41 = vld [vmem:[%s4604_s22 + $0x28] sm:$0xf] }
 0x175   : > { %1456 = vst.msk [vmem:[#allocation2 + $0x60] sm:$0xf] %vm1431_vm9, %v1384_v58  ;;  %v1382_v56 = vpop.permute.xlu0 %1381  ;;  %v1398_v1 = vpop.permute.xlu2 %1397  ;;  %v2166_v58 = vsel %vm4789_vm5, %v4186_v49, %v2165_v38  ;;  %v2180_v6 = vsel %vm4789_vm5, %v4188_v0, %v2179_v52  ;;  %v2608_v0 = vshll.u32 %v4228_v55, 16 }
 0x176   : > { %1455 = vst.msk [vmem:[#allocation2 + $0x5c] sm:$0xf] %vm1431_vm9, %v1382_v56  ;;  %v2181_v56 = vrot.slane %v2179_v52, 4 }
 0x177   : > { %1463 = vst.msk [vmem:[#allocation2 + $0x7c] sm:$0xf] %vm1431_vm9, %v1398_v1 }
 0x178   : > { %v2183_v5 = vsel %vm4789_vm5, %v2181_v56, %v2182_v60 }
 0x17a   : > { %2243 = vrot.lane.b32.xlu1 %v2141_v61, %s4551_s27  ;;  %v4160_v61 = vld [vmem:[%s4604_s22 + $0x7c] sm:$0xf] }
 0x17b   : > { %2241 = vrot.lane.b32.xlu0 %v2138_v54, %s4551_s27  ;;  %2239 = vrot.lane.b32.xlu2 %v2134_v2, %s4551_s27  ;;  %v2174_v54 = vrot.slane %v2172_v43, 4  ;;  %v4162_v2 = vld [vmem:[%s4604_s22 + $0x84] sm:$0xe]  ;;  %v2186_v8 = vrot.slane %v4160_v61, 5  ;;  %v4170_v43 = vld [vmem:[%s4604_s22 + $0xa4] sm:$0x1] }
 0x17c   : > { %v1390_v10 = vpop.permute.xlu1 %1389  ;;  %v4190_v12 = vrot.slane %v4162_v2, 9  ;;  %v5506_v61 = vld [vmem:[%s4604_s22 + $0xb8] sm:$0xf] }
 0x17d   : > { %1459 = vst.msk [vmem:[#allocation2 + $0x6c] sm:$0xf] %vm1431_vm9, %v1390_v10  ;;  %v1388_v14 = vpop.permute.xlu0 %1387  ;;  %v1901_v16 = vpop.permute.xlu2 %1900  ;;  %v2176_v10 = vsel %vm4789_vm5, %v2174_v54, %v2175_v3  ;;  %v2188_v15 = vrot.slane %v2186_v8, 4  ;;  %v4173_v3 = vld [vmem:[%s4604_s22 + $0xb0] sm:$0x1]  ;;  %v2221_v7 = vrot.slane %v5506_v61, 5 }
 0x17e   : > { %1458 = vst.msk [vmem:[#allocation2 + $0x68] sm:$0xf] %vm1431_vm9, %v1388_v14  ;;  %v2194_v21 = vsel %vm4789_vm5, %v4190_v12, %v2193_v13  ;;  %v2216_v12 = vrot.slane %v2214_v47, 4 }
 0x17f   : > { %1995 = vst.msk [vmem:[#allocation2 + $0x8] sm:$0xf] %vm1992_vm10, %v1901_v16  ;;  %v2189_v16 = vrot.slane %v4161_v9, 5 }
 0x181   : > { %v2190_v23 = vsel %vm4789_vm5, %v2188_v15, %v2189_v16  ;;  %v4196_v15 = vld [vmem:[%s4604_s22 + $0x18] sm:$0xf] }
 0x182   : > { %2249 = vrot.lane.b32.xlu1 %v2152_v17, %s4551_s27  ;;  %v4166_v17 = vld [vmem:[%s4604_s22 + $0x94] sm:$0xf] }
 0x183   : > { %2247 = vrot.lane.b32.xlu0 %v2148_v19, %s4551_s27  ;;  %2245 = vrot.lane.b32.xlu2 %v2145_v22, %s4551_s27  ;;  %v4189_v19 = vrot.slane %v4159_v11, 9  ;;  %v2200_v22 = vrot.slane %v4166_v17, 5 }
 0x184   : > { %v1396_v27 = vpop.permute.xlu1 %1395 }
 0x185   : > { %1462 = vst.msk [vmem:[#allocation2 + $0x78] sm:$0xf] %vm1431_vm9, %v1396_v27  ;;  %v1394_v29 = vpop.permute.xlu0 %1393  ;;  %v1907_v35 = vpop.permute.xlu2 %1906  ;;  %v2187_v27 = vsel %vm4789_vm5, %v4189_v19, %v2186_v8  ;;  %v2201_v39 = vsel %vm4789_vm5, %v4191_v33, %v2200_v22  ;;  %v4230_v8 = vld [vmem:[%s4604_s22 + $0x20] sm:$0x1] }
 0x186   : > { %1461 = vst.msk [vmem:[#allocation2 + $0x74] sm:$0xf] %vm1431_vm9, %v1394_v29  ;;  %v2202_v29 = vrot.slane %v2200_v22, 4  ;;  %v2624_v17 = vshll.u32 %v4230_v8, 16  ;;  %v4278_v33 = vld [vmem:[%s4604_s22 + $0x20] sm:$0x1] }
 0x187   : > { %1998 = vst.msk [vmem:[#allocation2 + $0x14] sm:$0xf] %vm1992_vm10, %v1907_v35 }
 0x188   : > { %v2204_v38 = vsel %vm4789_vm5, %v2202_v29, %v2203_v30  ;;  %v2626_v22 = vrot.slane %v2624_v17, 5  ;;  %v4280_v17 = vld [vmem:[%s4604_s22 + $0x28] sm:$0xf] }
 0x18a   : > { %2255 = vrot.lane.b32.xlu1 %v2162_v36, %s4551_s27  ;;  %v4169_v36 = vld [vmem:[%s4604_s22 + $0xa0] sm:$0xf] }
 0x18b   : > { %2253 = vrot.lane.b32.xlu0 %v2159_v34, %s4551_s27  ;;  %2251 = vrot.lane.b32.xlu2 %v2155_v40, %s4551_s27  ;;  %v2195_v34 = vrot.slane %v2193_v13, 4  ;;  %v4171_v40 = vld [vmem:[%s4604_s22 + $0xa8] sm:$0xe]  ;;  %v2207_v42 = vrot.slane %v4169_v36, 5  ;;  %v2217_v13 = vrot.slane %v4173_v3, 5 }
 0x18c   : > { %v1899_v44 = vpop.permute.xlu1 %1898  ;;  %v4193_v46 = vrot.slane %v4171_v40, 9  ;;  %v4276_v36 = vld [vmem:[%s4604_s22 + $0x18] sm:$0xe]  ;;  %v4205_v3 = vld [vmem:[%s4604_s22 + $0x4c] sm:$0xf] }
 0x18d   : > { %1994 = vst.msk [vmem:[#allocation2 + $0x4] sm:$0xf] %vm1992_vm10, %v1899_v44  ;;  %v1897_v48 = vpop.permute.xlu0 %1896  ;;  %v1913_v50 = vpop.permute.xlu2 %1912  ;;  %v2197_v44 = vsel %vm4789_vm5, %v2195_v34, %v2196_v37  ;;  %v2209_v49 = vrot.slane %v2207_v42, 4  ;;  %v4324_v40 = vrot.slane %v4276_v36, 9 }
 0x18e   : > { %1993 = vst.msk [vmem:[#allocation2] sm:$0xf] %vm1992_vm10, %v1897_v48 }
 0x18f   : > { %2001 = vst.msk [vmem:[#allocation2 + $0x20] sm:$0xf] %vm1992_vm10, %v1913_v50  ;;  %v2210_v50 = vrot.slane %v4170_v43, 5  ;;  %v4231_v43 = vld [vmem:[%s4604_s22 + $0x24] sm:$0xf] }
 0x191   : > { %v2211_v60 = vsel %vm4789_vm5, %v2209_v49, %v2210_v50  ;;  %v2642_v49 = vshrl.u32 %v4232_v41, 16 }
 0x192   : > { %2261 = vrot.lane.b32.xlu1 %v2173_v51, %s4551_s27  ;;  %v4229_v51 = vld [vmem:[%s4604_s22 + $0x1c] sm:$0xf] }
 0x193   : > { %2259 = vrot.lane.b32.xlu0 %v2169_v53, %s4551_s27  ;;  %2257 = vrot.lane.b32.xlu2 %v2166_v58, %s4551_s27  ;;  %v4192_v53 = vrot.slane %v4168_v45, 9  ;;  %v2215_v58 = vsel %vm4789_vm5, %v4193_v46, %v2214_v47  ;;  %v2614_v59 = vshll.u32 %v4229_v51, 16  ;;  %v2618_v56 = vshrl.u32 %v4229_v51, 16 }
 0x194   : > { %v1905_v62 = vpop.permute.xlu1 %1904  ;;  %v2629_v51 = vshrl.u32 %v4231_v43, 16 }
 0x195   : > { %1997 = vst.msk [vmem:[#allocation2 + $0x10] sm:$0xf] %vm1992_vm10, %v1905_v62  ;;  %v1903_v1 = vpop.permute.xlu0 %1902  ;;  %v1919_v4 = vpop.permute.xlu2 %1918  ;;  %v2605_v62 = vshrl.u32 %v4228_v55, 16  ;;  %v2208_v54 = vsel %vm4789_vm5, %v4192_v53, %v2207_v42 }
 0x196   : > { %1996 = vst.msk [vmem:[#allocation2 + $0xc] sm:$0xf] %vm1992_vm10, %v1903_v1  ;;  %v4174_v1 = vld [vmem:[%s4604_s22 + $0xb4] sm:$0xe] }
 0x197   : > { %2004 = vst.msk [vmem:[#allocation2 + $0x2c] sm:$0xf] %vm1992_vm10, %v1919_v4  ;;  %v2616_v4 = vrot.slane %v2614_v59, 5  ;;  %v4194_v2 = vrot.slane %v4174_v1, 9  ;;  %v2607_v9 = vrot.slane %v2605_v62, 4 }
 0x198   : > { %v4233_v62 = vld [vmem:[%s4604_s22 + $0x2c] sm:$0x1] }
 0x199   : > { %v2648_v8 = vshll.u32 %v4233_v62, 16 }
 0x19a   : > { %2267 = vrot.lane.b32.xlu1 %v2183_v5, %s4551_s27  ;;  %v2620_v5 = vrot.slane %v2618_v56, 4  ;;  %v2644_v56 = vrot.slane %v2642_v49, 4 }
 0x19b   : > { %2265 = vrot.lane.b32.xlu0 %v2180_v6, %s4551_s27  ;;  %2263 = vrot.lane.b32.xlu2 %v2176_v10, %s4551_s27  ;;  %v2610_v10 = vrot.slane %v2608_v0, 5  ;;  %v2631_v0 = vrot.slane %v2629_v51, 4 }
 0x19c   : > { %v1911_v14 = vpop.permute.xlu1 %1910  ;;  %v2621_v16 = vor.u32 %v2620_v5, %v2616_v4 }
 0x19d   : > { %2000 = vst.msk [vmem:[#allocation2 + $0x1c] sm:$0xf] %vm1992_vm10, %v1911_v14  ;;  %v1909_v18 = vpop.permute.xlu0 %1908  ;;  %v1925_v20 = vpop.permute.xlu2 %1924  ;;  %v2611_v19 = vor.u32 %v2610_v10, %v2607_v9  ;;  %v4199_v10 = vld [vmem:[%s4604_s22 + $0x28] sm:$0xf] }
 0x19e   : > { %1999 = vst.msk [vmem:[#allocation2 + $0x18] sm:$0xf] %vm1992_vm10, %v1909_v18  ;;  %v2222_v18 = vsel %vm4789_vm5, %v4194_v2, %v2221_v7 }
 0x19f   : > { %2007 = vst.msk [vmem:[#allocation2 + $0x38] sm:$0xf] %vm1992_vm10, %v1925_v20  ;;  %v2218_v20 = vsel %vm4789_vm5, %v2216_v12, %v2217_v13  ;;  %v2612_v24 = vrot.slane %v2611_v19, 4 }
 0x1a1   : > { %v2617_v30 = vsel %vm4615_vm2, %v2612_v24, %v2616_v4  ;;  %v3222_v24 = vrot.slane %v4280_v17, 5 }
 0x1a2   : > { %2273 = vrot.lane.b32.xlu1 %v2194_v21, %s4551_s27  ;;  %v2622_v21 = vrot.slane %v2621_v16, 4  ;;  %v2650_v16 = vrot.slane %v2648_v8, 5 }
 0x1a3   : > { %2271 = vrot.lane.b32.xlu0 %v2190_v23, %s4551_s27  ;;  %2269 = vrot.lane.b32.xlu2 %v2187_v27, %s4551_s27  ;;  %v4277_v27 = vld [vmem:[%s4604_s22 + $0x1c] sm:$0xf] }
 0x1a4   : > { %v1917_v31 = vpop.permute.xlu1 %1916  ;;  %v2627_v29 = vsel %vm4615_vm2, %v2622_v21, %v2626_v22  ;;  %v4242_v22 = vld [vmem:[%s4604_s22 + $0x50] sm:$0x1] }
 0x1a5   : > { %2003 = vst.msk [vmem:[#allocation2 + $0x28] sm:$0xf] %vm1992_vm10, %v1917_v31  ;;  %v1915_v35 = vpop.permute.xlu0 %1914  ;;  %v1931_v32 = vpop.permute.xlu2 %1930  ;;  %v3215_v31 = vrot.slane %v4277_v27, 5  ;;  %v4281_v27 = vld [vmem:[%s4604_s22 + $0x2c] sm:$0x1] }
 0x1a6   : > { %2002 = vst.msk [vmem:[#allocation2 + $0x24] sm:$0xf] %vm1992_vm10, %v1915_v35  ;;  %v4197_v35 = vld [vmem:[%s4604_s22 + $0x1c] sm:$0xf] }
 0x1a7   : > { %2010 = vst.msk [vmem:[#allocation2 + $0x44] sm:$0xf] %vm1992_vm10, %v1931_v32  ;;  %v3217_v37 = vrot.slane %v3215_v31, 4  ;;  %v3218_v32 = vrot.slane %v4278_v33, 5  ;;  %v3216_v50 = vsel %vm4789_vm5, %v4324_v40, %v3215_v31  ;;  %v2720_v31 = vshll.u32 %v4242_v22, 16 }
 0x1a8   : > { %v3224_v33 = vrot.slane %v3222_v24, 4 }
 0x1a9   : > { %v3219_v47 = vsel %vm4789_vm5, %v3217_v37, %v3218_v32  ;;  %v4289_v37 = vld [vmem:[%s4604_s22 + $0x4c] sm:$0xf]  ;;  %v4253_v32 = vld [vmem:[%s4604_s22 + $0x7c] sm:$0xf]  ;;  %v2722_v40 = vrot.slane %v2720_v31, 5 }
 0x1aa   : > { %2279 = vrot.lane.b32.xlu1 %v2204_v38, %s4551_s27  ;;  %v4240_v38 = vld [vmem:[%s4604_s22 + $0x48] sm:$0xf]  ;;  %v4234_v31 = vld [vmem:[%s4604_s22 + $0x30] sm:$0xf] }
 0x1ab   : > { %2277 = vrot.lane.b32.xlu0 %v2201_v39, %s4551_s27  ;;  %2275 = vrot.lane.b32.xlu2 %v2197_v44, %s4551_s27  ;;  %v4198_v44 = vld [vmem:[%s4604_s22 + $0x24] sm:$0xf]  ;;  %v2701_v45 = vshrl.u32 %v4240_v38, 16  ;;  %v2704_v46 = vshll.u32 %v4240_v38, 16 }
 0x1ac   : > { %v1923_v48 = vpop.permute.xlu1 %1922 }
 0x1ad   : > { %2006 = vst.msk [vmem:[#allocation2 + $0x34] sm:$0xf] %vm1992_vm10, %v1923_v48  ;;  %v1921_v52 = vpop.permute.xlu0 %1920  ;;  %v1937_v57 = vpop.permute.xlu2 %1936  ;;  %v2638_v48 = vshll.u32 %v4232_v41, 16  ;;  %v2703_v53 = vrot.slane %v2701_v45, 4  ;;  %v2706_v55 = vrot.slane %v2704_v46, 5  ;;  %v2810_v45 = vshrl.u32 %v4253_v32, 16 }
 0x1ae   : > { %2005 = vst.msk [vmem:[#allocation2 + $0x30] sm:$0xf] %vm1992_vm10, %v1921_v52  ;;  %v2632_v52 = vshll.u32 %v4231_v43, 16  ;;  %v4252_v41 = vld [vmem:[%s4604_s22 + $0x78] sm:$0xf] }
 0x1af   : > { %2013 = vst.msk [vmem:[#allocation2 + $0x50] sm:$0xf] %vm1992_vm10, %v1937_v57  ;;  %v2640_v59 = vrot.slane %v2638_v48, 5  ;;  %v2707_v4 = vor.u32 %v2706_v55, %v2703_v53  ;;  %v2797_v48 = vshrl.u32 %v4252_v41, 16  ;;  %v2800_v49 = vshll.u32 %v4252_v41, 16 }
 0x1b0   : > { %v2634_v1 = vrot.slane %v2632_v52, 5  ;;  %v4288_v52 = vld [vmem:[%s4604_s22 + $0x48] sm:$0xe]  ;;  %v2812_v55 = vrot.slane %v2810_v45, 4 }
 0x1b1   : > { %v2645_v2 = vor.u32 %v2644_v56, %v2640_v59  ;;  %v2708_v12 = vrot.slane %v2707_v4, 4  ;;  %v4254_v56 = vld [vmem:[%s4604_s22 + $0x80] sm:$0x1]  ;;  %v2802_v62 = vrot.slane %v2800_v49, 5 }
 0x1b2   : > { %2285 = vrot.lane.b32.xlu1 %v2215_v58, %s4551_s27  ;;  %v4241_v58 = vld [vmem:[%s4604_s22 + $0x4c] sm:$0xf] }
 0x1b3   : > { %2283 = vrot.lane.b32.xlu0 %v2211_v60, %s4551_s27  ;;  %2281 = vrot.lane.b32.xlu2 %v2208_v54, %s4551_s27  ;;  %v2710_v5 = vshll.u32 %v4241_v58, 16  ;;  %v2714_v9 = vshrl.u32 %v4241_v58, 16 }
 0x1b4   : > { %v1929_v6 = vpop.permute.xlu1 %1928 }
 0x1b5   : > { %2009 = vst.msk [vmem:[#allocation2 + $0x40] sm:$0xf] %vm1992_vm10, %v1929_v6  ;;  %v1927_v11 = vpop.permute.xlu0 %1926  ;;  %v1943_v14 = vpop.permute.xlu2 %1942  ;;  %v4204_v6 = vld [vmem:[%s4604_s22 + $0x48] sm:$0xf]  ;;  %v2712_v13 = vrot.slane %v2710_v5, 5  ;;  %v2816_v5 = vshll.u32 %v4254_v56, 16 }
 0x1b6   : > { %2008 = vst.msk [vmem:[#allocation2 + $0x3c] sm:$0xf] %vm1992_vm10, %v1927_v11  ;;  %v2635_v11 = vor.u32 %v2634_v1, %v2631_v0  ;;  %v4328_v1 = vrot.slane %v4288_v52, 9  ;;  %v4207_v52 = vld [vmem:[%s4604_s22 + $0x58] sm:$0xf] }
 0x1b7   : > { %2016 = vst.msk [vmem:[#allocation2 + $0x5c] sm:$0xf] %vm1992_vm10, %v1943_v14 }
 0x1b8   : > { %v2636_v19 = vrot.slane %v2635_v11, 4 }
 0x1ba   : > { %2427 = vrot.lane.b32.xlu1 %v4196_v15, %s4552_s28  ;;  %v2646_v15 = vrot.slane %v2645_v2, 4 }
 0x1bb   : > { %2289 = vrot.lane.b32.xlu0 %v2222_v18, %s4551_s27  ;;  %2287 = vrot.lane.b32.xlu2 %v2218_v20, %s4551_s27  ;;  %v2716_v20 = vrot.slane %v2714_v9, 4 }
 0x1bc   : > { %v1935_v23 = vpop.permute.xlu1 %1934 }
 0x1bd   : > { %2012 = vst.msk [vmem:[#allocation2 + $0x4c] sm:$0xf] %vm1992_vm10, %v1935_v23  ;;  %v1933_v26 = vpop.permute.xlu0 %1932  ;;  %v1949_v28 = vpop.permute.xlu2 %1948  ;;  %v2713_v23 = vsel %vm4615_vm2, %v2708_v12, %v2712_v13 }
 0x1be   : > { %2011 = vst.msk [vmem:[#allocation2 + $0x48] sm:$0xf] %vm1992_vm10, %v1933_v26  ;;  %v2651_v26 = vsel %vm4615_vm2, %v2646_v15, %v2650_v16 }
 0x1bf   : > { %2019 = vst.msk [vmem:[#allocation2 + $0x68] sm:$0xf] %vm1992_vm10, %v1949_v28  ;;  %v4279_v28 = vld [vmem:[%s4604_s22 + $0x24] sm:$0xe] }
 0x1c2   : > { %2990 = vrot.lane.b32.xlu1 %v2627_v29, %s4553_s29  ;;  %v2641_v29 = vsel %vm4615_vm2, %v2636_v19, %v2640_v59  ;;  %v4302_v19 = vld [vmem:[%s4604_s22 + $0x80] sm:$0x1] }
 0x1c3   : > { %2988 = vrot.lane.b32.xlu0 %v2617_v30, %s4553_s29  ;;  %2429 = vrot.lane.b32.xlu2 %v4197_v35, %s4552_s28  ;;  %v2717_v30 = vor.u32 %v2716_v20, %v2712_v13  ;;  %v3225_v35 = vrot.slane %v4281_v27, 5  ;;  %v4213_v20 = vld [vmem:[%s4604_s22 + $0x7c] sm:$0xf] }
 0x1c4   : > { %v1941_v34 = vpop.permute.xlu1 %1940 }
 0x1c5   : > { %2015 = vst.msk [vmem:[#allocation2 + $0x58] sm:$0xf] %vm1992_vm10, %v1941_v34  ;;  %v1939_v39 = vpop.permute.xlu0 %1938  ;;  %v1955_v42 = vpop.permute.xlu2 %1954  ;;  %v4325_v34 = vrot.slane %v4279_v28, 9  ;;  %v3226_v43 = vsel %vm4789_vm5, %v3224_v33, %v3225_v35  ;;  %v4200_v33 = vld [vmem:[%s4604_s22 + $0x30] sm:$0xf] }
 0x1c6   : > { %2014 = vst.msk [vmem:[#allocation2 + $0x54] sm:$0xf] %vm1992_vm10, %v1939_v39  ;;  %v2718_v39 = vrot.slane %v2717_v30, 4 }
 0x1c7   : > { %2022 = vst.msk [vmem:[#allocation2 + $0x74] sm:$0xf] %vm1992_vm10, %v1955_v42  ;;  %v3223_v46 = vsel %vm4789_vm5, %v4325_v34, %v3222_v24  ;;  %v3274_v24 = vrot.slane %v4302_v19, 5 }
 0x1c8   : > { %v2723_v51 = vsel %vm4615_vm2, %v2718_v39, %v2722_v40  ;;  %v2653_v39 = vshrl.u32 %v4234_v31, 16  ;;  %v2656_v40 = vshll.u32 %v4234_v31, 16  ;;  %v4460_v31 = vld [vmem:[%s6202_s1 + $0x28] sm:$0xff] }
 0x1ca   : > { %2431 = vrot.lane.b32.xlu1 %v4198_v44, %s4552_s28  ;;  %v2806_v44 = vshll.u32 %v4253_v32, 16  ;;  %v2655_v49 = vrot.slane %v2653_v39, 4 }
 0x1cb   : > { %3327 = vrot.lane.b32.xlu0 %v3219_v47, %s4554_s30  ;;  %3325 = vrot.lane.b32.xlu2 %v3216_v50, %s4554_s30  ;;  %v3243_v47 = vrot.slane %v4289_v37, 5  ;;  %v4290_v50 = vld [vmem:[%s4604_s22 + $0x50] sm:$0x1] }
 0x1cc   : > { %v1947_v57 = vpop.permute.xlu1 %1946  ;;  %v2808_v53 = vrot.slane %v2806_v44, 5  ;;  %v3246_v59 = vrot.slane %v4290_v50, 5  ;;  %v4244_v44 = vld [vmem:[%s4604_s22 + $0x58] sm:$0xf]  ;;  %v2658_v50 = vrot.slane %v2656_v40, 5 }
 0x1cd   : > { %2018 = vst.msk [vmem:[#allocation2 + $0x64] sm:$0xf] %vm1992_vm10, %v1947_v57  ;;  %v1945_v60 = vpop.permute.xlu0 %1944  ;;  %v2234_v54 = vpop.permute.xlu2 %2233  ;;  %v3245_v58 = vrot.slane %v3243_v47, 4  ;;  %v3244_v8 = vsel %vm4789_vm5, %v4328_v1, %v3243_v47  ;;  %v2738_v56 = vshrl.u32 %v4244_v44, 16 }
 0x1ce   : > { %2017 = vst.msk [vmem:[#allocation2 + $0x60] sm:$0xf] %vm1992_vm10, %v1945_v60  ;;  %v2799_v60 = vrot.slane %v2797_v48, 4  ;;  %v2813_v4 = vor.u32 %v2812_v55, %v2808_v53  ;;  %v4236_v48 = vld [vmem:[%s4604_s22 + $0x38] sm:$0x1]  ;;  %v2734_v55 = vshll.u32 %v4244_v44, 16 }
 0x1cf   : > { %2330 = vst.msk [vmem:[#allocation2] sm:$0xf] %vm2329_vm11, %v2234_v54 }
 0x1d0   : > { %v2803_v2 = vor.u32 %v2802_v62, %v2799_v60  ;;  %v2814_v9 = vrot.slane %v2813_v4, 4  ;;  %v4201_v60 = vld [vmem:[%s4604_s22 + $0x34] sm:$0xf]  ;;  %v2659_v62 = vor.u32 %v2658_v50, %v2655_v49  ;;  %v2736_v1 = vrot.slane %v2734_v55, 5 }
 0x1d2   : > { %2445 = vrot.lane.b32.xlu1 %v4205_v3, %s4552_s28  ;;  %v4212_v3 = vld [vmem:[%s4604_s22 + $0x78] sm:$0xf]  ;;  %v2804_v12 = vrot.slane %v2803_v2, 4  ;;  %v2660_v2 = vrot.slane %v2659_v62, 4  ;;  %v4457_v62 = vld [vmem:[%s6202_s1 + $0x10] sm:$0xff] }
 0x1d3   : > { %2443 = vrot.lane.b32.xlu0 %v4204_v6, %s4552_s28  ;;  %2433 = vrot.lane.b32.xlu2 %v4199_v10, %s4552_s28  ;;  %v3247_v6 = vsel %vm4789_vm5, %v3245_v58, %v3246_v59  ;;  %v2818_v10 = vrot.slane %v2816_v5, 5  ;;  %v2672_v59 = vshll.u32 %v4236_v48, 16  ;;  %v4283_v5 = vld [vmem:[%s4604_s22 + $0x34] sm:$0xf]  ;;  %v4255_v48 = vld [vmem:[%s4604_s22 + $0x84] sm:$0xf] }
 0x1d4   : > { %v1953_v14 = vpop.permute.xlu1 %1952  ;;  %v2809_v17 = vsel %vm4615_vm2, %v2804_v12, %v2808_v53 }
 0x1d5   : > { %2021 = vst.msk [vmem:[#allocation2 + $0x70] sm:$0xf] %vm1992_vm10, %v1953_v14  ;;  %v1951_v18 = vpop.permute.xlu0 %1950  ;;  %v2240_v21 = vpop.permute.xlu2 %2239  ;;  %v4301_v14 = vld [vmem:[%s4604_s22 + $0x7c] sm:$0xf]  ;;  %v2819_v16 = vsel %vm4615_vm2, %v2814_v9, %v2818_v10  ;;  %v2674_v4 = vrot.slane %v2672_v59, 5  ;;  %v2824_v59 = vshll.u32 %v4255_v48, 16 }
 0x1d6   : > { %2020 = vst.msk [vmem:[#allocation2 + $0x6c] sm:$0xf] %vm1992_vm10, %v1951_v18  ;;  %v3271_v18 = vrot.slane %v4301_v14, 5  ;;  %v4245_v10 = vld [vmem:[%s4604_s22 + $0x5c] sm:$0x1] }
 0x1d7   : > { %2333 = vst.msk [vmem:[#allocation2 + $0xc] sm:$0xf] %vm2329_vm11, %v2240_v21  ;;  %v4300_v21 = vld [vmem:[%s4604_s22 + $0x78] sm:$0xe]  ;;  %v2744_v19 = vshll.u32 %v4245_v10, 16 }
 0x1d8   : > { %v4332_v28 = vrot.slane %v4300_v21, 9  ;;  %v4221_v10 = vld [vmem:[%s4604_s22 + $0xac] sm:$0xf] }
 0x1da   : > { %3004 = vrot.lane.b32.xlu1 %v2713_v23, %s4553_s29  ;;  %v3273_v23 = vrot.slane %v3271_v18, 4 }
 0x1db   : > { %2994 = vrot.lane.b32.xlu0 %v2651_v26, %s4553_s29  ;;  %2992 = vrot.lane.b32.xlu2 %v2641_v29, %s4553_s29  ;;  %v4243_v26 = vld [vmem:[%s4604_s22 + $0x54] sm:$0xf] }
 0x1dc   : > { %v1959_v36 = vpop.permute.xlu1 %1958  ;;  %v4235_v29 = vld [vmem:[%s4604_s22 + $0x34] sm:$0xf]  ;;  %v2725_v35 = vshrl.u32 %v4243_v26, 16  ;;  %v3275_v34 = vsel %vm4789_vm5, %v3273_v23, %v3274_v24 }
 0x1dd   : > { %2024 = vst.msk [vmem:[#allocation2 + $0x7c] sm:$0xf] %vm1992_vm10, %v1959_v36  ;;  %v1957_v38 = vpop.permute.xlu0 %1956  ;;  %v2246_v42 = vpop.permute.xlu2 %2245  ;;  %v2728_v36 = vshll.u32 %v4243_v26, 16  ;;  %v2662_v37 = vshll.u32 %v4235_v29, 16  ;;  %v2666_v32 = vshrl.u32 %v4235_v29, 16  ;;  %v2746_v29 = vrot.slane %v2744_v19, 5 }
 0x1de   : > { %2023 = vst.msk [vmem:[#allocation2 + $0x78] sm:$0xf] %vm1992_vm10, %v1957_v38  ;;  %v3272_v38 = vsel %vm4789_vm5, %v4332_v28, %v3271_v18  ;;  %v2727_v41 = vrot.slane %v2725_v35, 4 }
 0x1df   : > { %2336 = vst.msk [vmem:[#allocation2 + $0x18] sm:$0xf] %vm2329_vm11, %v2246_v42  ;;  %v2730_v42 = vrot.slane %v2728_v36, 5  ;;  %v2664_v45 = vrot.slane %v2662_v37, 5 }
 0x1e1   : > { %v2731_v53 = vor.u32 %v2730_v42, %v2727_v41  ;;  %v4264_v42 = vld [vmem:[%s4604_s22 + $0xa8] sm:$0xf] }
 0x1e2   : > { %3331 = vrot.lane.b32.xlu1 %v3226_v43, %s4554_s30  ;;  %v2893_v49 = vshrl.u32 %v4264_v42, 16  ;;  %v2896_v50 = vshll.u32 %v4264_v42, 16 }
 0x1e3   : > { %3329 = vrot.lane.b32.xlu0 %v3223_v46, %s4554_s30  ;;  %3006 = vrot.lane.b32.xlu2 %v2723_v51, %s4553_s29  ;;  %v2668_v46 = vrot.slane %v2666_v32, 4  ;;  %v4291_v32 = vld [vmem:[%s4604_s22 + $0x54] sm:$0xe] }
 0x1e4   : > { %v2238_v57 = vpop.permute.xlu1 %2237  ;;  %v4329_v44 = vrot.slane %v4291_v32, 9 }
 0x1e5   : > { %2332 = vst.msk [vmem:[#allocation2 + $0x8] sm:$0xf] %vm2329_vm11, %v2238_v57  ;;  %v2236_v0 = vpop.permute.xlu0 %2235  ;;  %v2252_v54 = vpop.permute.xlu2 %2251  ;;  %v4206_v57 = vld [vmem:[%s4604_s22 + $0x54] sm:$0xf]  ;;  %v2669_v58 = vor.u32 %v2668_v46, %v2664_v45  ;;  %v4214_v46 = vld [vmem:[%s4604_s22 + $0x84] sm:$0xf] }
 0x1e6   : > { %2331 = vst.msk [vmem:[#allocation2 + $0x4] sm:$0xf] %vm2329_vm11, %v2236_v0  ;;  %v2732_v0 = vrot.slane %v2731_v53, 4 }
 0x1e7   : > { %2339 = vst.msk [vmem:[#allocation2 + $0x24] sm:$0xf] %vm2329_vm11, %v2252_v54 }
 0x1e8   : > { %v2737_v12 = vsel %vm4615_vm2, %v2732_v0, %v2736_v1 }
 0x1ea   : > { %2459 = vrot.lane.b32.xlu1 %v4212_v3, %s4552_s28  ;;  %v2670_v3 = vrot.slane %v2669_v58, 4  ;;  %v2821_v58 = vshrl.u32 %v4255_v48, 16 }
 0x1eb   : > { %3343 = vrot.lane.b32.xlu0 %v3247_v6, %s4554_s30  ;;  %3341 = vrot.lane.b32.xlu2 %v3244_v8, %s4554_s30  ;;  %v2740_v8 = vrot.slane %v2738_v56, 4  ;;  %v2895_v56 = vrot.slane %v2893_v49, 4 }
 0x1ec   : > { %v2244_v11 = vpop.permute.xlu1 %2243  ;;  %v2675_v14 = vsel %vm4615_vm2, %v2670_v3, %v2674_v4 }
 0x1ed   : > { %2335 = vst.msk [vmem:[#allocation2 + $0x14] sm:$0xf] %vm2329_vm11, %v2244_v11  ;;  %v2242_v13 = vpop.permute.xlu0 %2241  ;;  %v2258_v15 = vpop.permute.xlu2 %2257  ;;  %v4462_v11 = vld [vmem:[%s6202_s1 + $0x38] sm:$0xff]  ;;  %v2741_v18 = vor.u32 %v2740_v8, %v2736_v1  ;;  %v4265_v1 = vld [vmem:[%s4604_s22 + $0xac] sm:$0xf] }
 0x1ee   : > { %2334 = vst.msk [vmem:[#allocation2 + $0x10] sm:$0xf] %vm2329_vm11, %v2242_v13  ;;  %v3229_v13 = vrot.slane %v4283_v5, 5  ;;  %3650 = vmatpush.bf16.msra.mxu0 %v4462_v11  ;;  %4463 = vmatpush.bf16.msra.mxu1 %v4462_v11  ;;  %v4257_v5 = vld [vmem:[%s4604_s22 + $0x8c] sm:$0x1] }
 0x1ef   : > { %2342 = vst.msk [vmem:[#allocation2 + $0x30] sm:$0xf] %vm2329_vm11, %v2258_v15  ;;  %v4284_v15 = vld [vmem:[%s4604_s22 + $0x38] sm:$0x1]  ;;  %4464 = vmatpush.bf16.msra.mxu2 %v4462_v11  ;;  %4465 = vmatpush.bf16.msra.mxu3 %v4462_v11  ;;  %v2742_v28 = vrot.slane %v2741_v18, 4 }
 0x1f0   : > { %v3232_v21 = vrot.slane %v4284_v15, 5  ;;  %v2840_v15 = vshll.u32 %v4257_v5, 16 }
 0x1f1   : > { %v2747_v37 = vsel %vm4615_vm2, %v2742_v28, %v2746_v29 }
 0x1f2   : > { %3022 = vrot.lane.b32.xlu1 %v2819_v16, %s4553_s29  ;;  %v4282_v16 = vld [vmem:[%s4604_s22 + $0x30] sm:$0xe] }
 0x1f3   : > { %3020 = vrot.lane.b32.xlu0 %v2809_v17, %s4553_s29  ;;  %2461 = vrot.lane.b32.xlu2 %v4213_v20, %s4552_s28  ;;  %v2665_v17 = vsel %vm4615_vm2, %v2660_v2, %v2664_v45  ;;  %v3231_v20 = vrot.slane %v3229_v13, 4  ;;  %v4326_v24 = vrot.slane %v4282_v16, 9  ;;  %v4256_v45 = vld [vmem:[%s4604_s22 + $0x88] sm:$0xf]  ;;  %v2826_v2 = vrot.slane %v2824_v59, 5 }
 0x1f4   : > { %v2250_v22 = vpop.permute.xlu1 %2249  ;;  %v2830_v53 = vshll.u32 %v4256_v45, 16  ;;  %v2834_v55 = vshrl.u32 %v4256_v45, 16  ;;  %v2906_v16 = vshrl.u32 %v4265_v1, 16  ;;  %v4313_v45 = vld [vmem:[%s4604_s22 + $0xac] sm:$0xf] }
 0x1f5   : > { %2338 = vst.msk [vmem:[#allocation2 + $0x20] sm:$0xf] %vm2329_vm11, %v2250_v22  ;;  %v2248_v27 = vpop.permute.xlu0 %2247  ;;  %v2264_v30 = vpop.permute.xlu2 %2263  ;;  %v4461_v22 = vld [vmem:[%s6202_s1 + $0x30] sm:$0xff]  ;;  %v3230_v35 = vsel %vm4789_vm5, %v4326_v24, %v3229_v13  ;;  %v4220_v13 = vld [vmem:[%s4604_s22 + $0xa8] sm:$0xf]  ;;  %v2842_v24 = vrot.slane %v2840_v15, 5 }
 0x1f6   : > { %2337 = vst.msk [vmem:[#allocation2 + $0x1c] sm:$0xf] %vm2329_vm11, %v2248_v27  ;;  %v4292_v27 = vld [vmem:[%s4604_s22 + $0x58] sm:$0xf]  ;;  %3651 = vmatpush.bf16.msra.mxu0 %v4461_v22  ;;  %4466 = vmatpush.bf16.msra.mxu1 %v4461_v22  ;;  %v2836_v3 = vrot.slane %v2834_v55, 4  ;;  %v2908_v29 = vrot.slane %v2906_v16, 4 }
 0x1f7   : > { %2345 = vst.msk [vmem:[#allocation2 + $0x3c] sm:$0xf] %vm2329_vm11, %v2264_v30  ;;  %4467 = vmatpush.bf16.msra.mxu2 %v4461_v22  ;;  %4468 = vmatpush.bf16.msra.mxu3 %v4461_v22  ;;  %v3250_v36 = vrot.slane %v4292_v27, 5  ;;  %v4312_v55 = vld [vmem:[%s4604_s22 + $0xa8] sm:$0xe] }
 0x1f8   : > { %v4247_v15 = vld [vmem:[%s4604_s22 + $0x64] sm:$0xf] }
 0x1f9   : > { %v3252_v40 = vrot.slane %v3250_v36, 4 }
 0x1fa   : > { %2435 = vrot.lane.b32.xlu1 %v4200_v33, %s4552_s28  ;;  %v3233_v33 = vsel %vm4789_vm5, %v3231_v20, %v3232_v21  ;;  %3652 = vmatpush.bf16.msra.mxu0 %v4460_v31  ;;  %v4455_v21 = vld [vmem:[%s6202_s1] sm:$0xff] }
 0x1fb   : > { %3359 = vrot.lane.b32.xlu0 %v3275_v34, %s4554_s30  ;;  %3357 = vrot.lane.b32.xlu2 %v3272_v38, %s4554_s30  ;;  %v4293_v34 = vld [vmem:[%s4604_s22 + $0x5c] sm:$0x1]  ;;  %v4459_v38 = vld [vmem:[%s6202_s1 + $0x20] sm:$0xff] }
 0x1fc   : > { %v2256_v43 = vpop.permute.xlu1 %2255  ;;  %4469 = vmatpush.bf16.msra.mxu1 %v4460_v31  ;;  %4470 = vmatpush.bf16.msra.mxu2 %v4460_v31  ;;  %v3253_v41 = vrot.slane %v4293_v34, 5  ;;  %v4305_v34 = vld [vmem:[%s4604_s22 + $0x8c] sm:$0x1] }
 0x1fd   : > { %2341 = vst.msk [vmem:[#allocation2 + $0x2c] sm:$0xf] %vm2329_vm11, %v2256_v43  ;;  %v2254_v47 = vpop.permute.xlu0 %2253  ;;  %v2270_v51 = vpop.permute.xlu2 %2269  ;;  %4471 = vmatpush.bf16.msra.mxu3 %v4460_v31  ;;  %v4266_v31 = vld [vmem:[%s4604_s22 + $0xb0] sm:$0x1] }
 0x1fe   : > { %2340 = vst.msk [vmem:[#allocation2 + $0x28] sm:$0xf] %vm2329_vm11, %v2254_v47  ;;  %3653 = vmatpush.bf16.msra.mxu0 %v4459_v38 }
 0x1ff   : > { %2348 = vst.msk [vmem:[#allocation2 + $0x48] sm:$0xf] %vm2329_vm11, %v2270_v51  ;;  %v4458_v51 = vld [vmem:[%s6202_s1 + $0x18] sm:$0xff] }
 0x200   : > { %4472 = vmatpush.bf16.msra.mxu1 %v4459_v38  ;;  %4473 = vmatpush.bf16.msra.mxu2 %v4459_v38 }
 0x201   : > { %4474 = vmatpush.bf16.msra.mxu3 %v4459_v38 }
 0x202   : > { %2449 = vrot.lane.b32.xlu1 %v4207_v52, %s4552_s28  ;;  %v3254_v52 = vsel %vm4789_vm5, %v3252_v40, %v3253_v41  ;;  %3654 = vmatpush.bf16.msra.mxu0 %v4458_v51  ;;  %v3281_v41 = vrot.slane %v4305_v34, 5 }
 0x203   : > { %2447 = vrot.lane.b32.xlu0 %v4206_v57, %s4552_s28  ;;  %2437 = vrot.lane.b32.xlu2 %v4201_v60, %s4552_s28  ;;  %v3251_v57 = vsel %vm4789_vm5, %v4329_v44, %v3250_v36  ;;  %v2898_v60 = vrot.slane %v2896_v50, 5 }
 0x204   : > { %v2262_v54 = vpop.permute.xlu1 %2261  ;;  %4475 = vmatpush.bf16.msra.mxu1 %v4458_v51  ;;  %4476 = vmatpush.bf16.msra.mxu2 %v4458_v51 }
 0x205   : > { %2344 = vst.msk [vmem:[#allocation2 + $0x38] sm:$0xf] %vm2329_vm11, %v2262_v54  ;;  %v2260_v6 = vpop.permute.xlu0 %2259  ;;  %v2276_v9 = vpop.permute.xlu2 %2275  ;;  %4477 = vmatpush.bf16.msra.mxu3 %v4458_v51  ;;  %v5716_v54 = vrot.slane %v2830_v53, 5  ;;  %v2899_v11 = vor.u32 %v2898_v60, %v2895_v56  ;;  %v3299_v51 = vrot.slane %v4313_v45, 5  ;;  %v4246_v56 = vld [vmem:[%s4604_s22 + $0x60] sm:$0xf] }
 0x206   : > { %2343 = vst.msk [vmem:[#allocation2 + $0x34] sm:$0xf] %vm2329_vm11, %v2260_v6  ;;  %v2823_v6 = vrot.slane %v2821_v58, 4  ;;  %3655 = vmatpush.bf16.msra.mxu0 %v4457_v62  ;;  %v2752_v5 = vshll.u32 %v4246_v56, 16 }
 0x207   : > { %2351 = vst.msk [vmem:[#allocation2 + $0x54] sm:$0xf] %vm2329_vm11, %v2276_v9  ;;  %v4456_v9 = vld [vmem:[%s6202_s1 + $0x8] sm:$0xff]  ;;  %v2900_v19 = vrot.slane %v2899_v11, 4  ;;  %v3301_v58 = vrot.slane %v3299_v51, 4 }
 0x208   : > { %4478 = vmatpush.bf16.msra.mxu1 %v4457_v62  ;;  %4479 = vmatpush.bf16.msra.mxu2 %v4457_v62  ;;  %v2827_v18 = vor.u32 %v2826_v2, %v2823_v6 }
 0x209   : > { %4480 = vmatpush.bf16.msra.mxu3 %v4457_v62  ;;  %v4336_v62 = vrot.slane %v4312_v55, 9 }
 0x20a   : > { %3008 = vrot.lane.b32.xlu1 %v2737_v12, %s4553_s29  ;;  %v2902_v12 = vshll.u32 %v4265_v1, 16  ;;  %3656 = vmatpush.bf16.msra.mxu0 %v4456_v9  ;;  %v2828_v28 = vrot.slane %v2827_v18, 4 }
 0x20b   : > { %2998 = vrot.lane.b32.xlu0 %v2675_v14, %s4553_s29  ;;  %2996 = vrot.lane.b32.xlu2 %v2665_v17, %s4553_s29  ;;  %v2837_v14 = vor.u32 %v2836_v3, %v5716_v54  ;;  %v4215_v17 = vld [vmem:[%s4604_s22 + $0x88] sm:$0xf]  ;;  %v4202_v3 = vld [vmem:[%s4604_s22 + $0x3c] sm:$0xf] }
 0x20c   : > { %v2268_v23 = vpop.permute.xlu1 %2267  ;;  %4481 = vmatpush.bf16.msra.mxu1 %v4456_v9  ;;  %4482 = vmatpush.bf16.msra.mxu2 %v4456_v9  ;;  %v2904_v20 = vrot.slane %v2902_v12, 5  ;;  %v2833_v32 = vsel %vm4615_vm2, %v2828_v28, %v5716_v54  ;;  %v4237_v54 = vld [vmem:[%s4604_s22 + $0x3c] sm:$0xf] }
 0x20d   : > { %2347 = vst.msk [vmem:[#allocation2 + $0x44] sm:$0xf] %vm2329_vm11, %v2268_v23  ;;  %v2266_v26 = vpop.permute.xlu0 %2265  ;;  %v2282_v30 = vpop.permute.xlu2 %2281  ;;  %4483 = vmatpush.bf16.msra.mxu3 %v4456_v9  ;;  %v2838_v23 = vrot.slane %v2837_v14, 4  ;;  %v3300_v9 = vsel %vm4789_vm5, %v4336_v62, %v3299_v51  ;;  %v2680_v11 = vshll.u32 %v4237_v54, 16 }
 0x20e   : > { %2346 = vst.msk [vmem:[#allocation2 + $0x40] sm:$0xf] %vm2329_vm11, %v2266_v26  ;;  %v4304_v26 = vld [vmem:[%s4604_s22 + $0x88] sm:$0xf]  ;;  %3657 = vmatpush.bf16.msra.mxu0 %v4455_v21  ;;  %v2909_v38 = vor.u32 %v2908_v29, %v2904_v20 }
 0x20f   : > { %2354 = vst.msk [vmem:[#allocation2 + $0x60] sm:$0xf] %vm2329_vm11, %v2282_v30  ;;  %v2843_v36 = vsel %vm4615_vm2, %v2838_v23, %v2842_v24  ;;  %v4209_v23 = vld [vmem:[%s4604_s22 + $0x64] sm:$0xf] }
 0x210   : > { %4484 = vmatpush.bf16.msra.mxu1 %v4455_v21  ;;  %4485 = vmatpush.bf16.msra.mxu2 %v4455_v21 }
 0x211   : > { %4486 = vmatpush.bf16.msra.mxu3 %v4455_v21  ;;  %v2682_v21 = vrot.slane %v2680_v11, 5 }
 0x212   : > { %3335 = vrot.lane.b32.xlu1 %v3233_v33, %s4554_s30  ;;  %v2905_v33 = vsel %vm4615_vm2, %v2900_v19, %v2904_v20  ;;  %v4239_v19 = vld [vmem:[%s4604_s22 + $0x44] sm:$0x1] }
 0x213   : > { %3333 = vrot.lane.b32.xlu0 %v3230_v35, %s4554_s30  ;;  %3010 = vrot.lane.b32.xlu2 %v2747_v37, %s4553_s29  ;;  %v3278_v35 = vrot.slane %v4304_v26, 5  ;;  %v4303_v37 = vld [vmem:[%s4604_s22 + $0x84] sm:$0xe]  ;;  %v2758_v26 = vshll.u32 %v4247_v15, 16  ;;  %v2696_v29 = vshll.u32 %v4239_v19, 16 }
 0x214   : > { %v2274_v39 = vpop.permute.xlu1 %2273 }
 0x215   : > { %2350 = vst.msk [vmem:[#allocation2 + $0x50] sm:$0xf] %vm2329_vm11, %v2274_v39  ;;  %v2272_v43 = vpop.permute.xlu0 %2271  ;;  %v2288_v47 = vpop.permute.xlu2 %2287  ;;  %v2912_v39 = vshll.u32 %v4266_v31, 16  ;;  %v3280_v40 = vrot.slane %v3278_v35, 4  ;;  %v4203_v31 = vld [vmem:[%s4604_s22 + $0x40] sm:$0xf] }
 0x216   : > { %2349 = vst.msk [vmem:[#allocation2 + $0x4c] sm:$0xf] %vm2329_vm11, %v2272_v43  ;;  %v4333_v43 = vrot.slane %v4303_v37, 9 }
 0x217   : > { %2357 = vst.msk [vmem:[#allocation2 + $0x6c] sm:$0xf] %vm2329_vm11, %v2288_v47  ;;  %v2914_v47 = vrot.slane %v2912_v39, 5  ;;  %v3282_v49 = vsel %vm4789_vm5, %v3280_v40, %v3281_v41 }
 0x218   : > { %v3279_v50 = vsel %vm4789_vm5, %v4333_v43, %v3278_v35 }
 0x21a   : > { %2463 = vrot.lane.b32.xlu1 %v4214_v46, %s4552_s28  ;;  %v2910_v46 = vrot.slane %v2909_v38, 4  ;;  %v4286_v38 = vld [vmem:[%s4604_s22 + $0x40] sm:$0xf] }
 0x21b   : > { %3347 = vrot.lane.b32.xlu0 %v3254_v52, %s4554_s30  ;;  %3345 = vrot.lane.b32.xlu2 %v3251_v57, %s4554_s30  ;;  %v4314_v52 = vld [vmem:[%s4604_s22 + $0xb0] sm:$0x1] }
 0x21c   : > { %v2280_v0 = vpop.permute.xlu1 %2279  ;;  %v2915_v53 = vsel %vm4615_vm2, %v2910_v46, %v2914_v47  ;;  %v3302_v59 = vrot.slane %v4314_v52, 5  ;;  %v3236_v46 = vrot.slane %v4286_v38, 5  ;;  %v4223_v38 = vld [vmem:[%s4604_s22 + $0xb8] sm:$0xf] }
 0x21d   : > { %2353 = vst.msk [vmem:[#allocation2 + $0x5c] sm:$0xf] %vm2329_vm11, %v2280_v0  ;;  %v2278_v4 = vpop.permute.xlu0 %2277  ;;  %v2430_v8 = vpop.permute.xlu2 %2429  ;;  %v4238_v0 = vld [vmem:[%s4604_s22 + $0x40] sm:$0xf] }
 0x21e   : > { %2352 = vst.msk [vmem:[#allocation2 + $0x58] sm:$0xf] %vm2329_vm11, %v2278_v4  ;;  %v2749_v4 = vshrl.u32 %v4246_v56, 16  ;;  %v3303_v6 = vsel %vm4789_vm5, %v3301_v58, %v3302_v59  ;;  %v2686_v2 = vshll.u32 %v4238_v0, 16  ;;  %v4295_v56 = vld [vmem:[%s4604_s22 + $0x64] sm:$0xf] }
 0x21f   : > { %2525 = vst.msk [vmem:[#allocation2 + $0x4] sm:$0xf] %vm2523_vm12, %v2430_v8  ;;  %v2690_v8 = vshrl.u32 %v4238_v0, 16 }
 0x220   : > { %v2751_v12 = vrot.slane %v2749_v4, 4  ;;  %v2688_v16 = vrot.slane %v2686_v2, 5  ;;  %v4296_v4 = vld [vmem:[%s4604_s22 + $0x68] sm:$0x1] }
 0x222   : > { %2477 = vrot.lane.b32.xlu1 %v4221_v10, %s4552_s28  ;;  %v2677_v10 = vshrl.u32 %v4237_v54, 16 }
 0x223   : > { %2475 = vrot.lane.b32.xlu0 %v4220_v13, %s4552_s28  ;;  %2465 = vrot.lane.b32.xlu2 %v4215_v17, %s4552_s28  ;;  %v2754_v13 = vrot.slane %v2752_v5, 5  ;;  %v2692_v17 = vrot.slane %v2690_v8, 4 }
 0x224   : > { %v2286_v22 = vpop.permute.xlu1 %2285  ;;  %v2679_v20 = vrot.slane %v2677_v10, 4  ;;  %v4267_v10 = vld [vmem:[%s4604_s22 + $0xb4] sm:$0xf] }
 0x225   : > { %2356 = vst.msk [vmem:[#allocation2 + $0x68] sm:$0xf] %vm2329_vm11, %v2286_v22  ;;  %v2284_v27 = vpop.permute.xlu0 %2283  ;;  %v3326_v30 = vpop.permute.xlu2 %3325  ;;  %v2755_v24 = vor.u32 %v2754_v13, %v2751_v12  ;;  %v2693_v28 = vor.u32 %v2692_v17, %v2688_v16  ;;  %v4259_v13 = vld [vmem:[%s4604_s22 + $0x94] sm:$0xf]  ;;  %v2917_v17 = vshrl.u32 %v4267_v10, 16 }
 0x226   : > { %2355 = vst.msk [vmem:[#allocation2 + $0x64] sm:$0xf] %vm2329_vm11, %v2284_v27  ;;  %v4208_v27 = vld [vmem:[%s4604_s22 + $0x60] sm:$0xf] }
 0x227   : > { %v2756_v35 = vrot.slane %v2755_v24, 4  ;;  %v2694_v37 = vrot.slane %v2693_v28, 4 }
 0x22a   : > { %3036 = vrot.lane.b32.xlu1 %v2905_v33, %s4553_s29  ;;  %v2683_v33 = vor.u32 %v2682_v21, %v2679_v20  ;;  %v2854_v20 = vshll.u32 %v4259_v13, 16  ;;  %v2858_v21 = vshrl.u32 %v4259_v13, 16 }
 0x22b   : > { %3026 = vrot.lane.b32.xlu0 %v2843_v36, %s4553_s29  ;;  %3024 = vrot.lane.b32.xlu2 %v2833_v32, %s4553_s29  ;;  %v2760_v36 = vrot.slane %v2758_v26, 5  ;;  %v2698_v32 = vrot.slane %v2696_v29, 5  ;;  %v2919_v26 = vrot.slane %v2917_v17, 4  ;;  %v4268_v29 = vld [vmem:[%s4604_s22 + $0xb8] sm:$0xf] }
 0x22c   : > { %v2428_v42 = vpop.permute.xlu1 %2427  ;;  %v2684_v41 = vrot.slane %v2683_v33, 4  ;;  %v2860_v33 = vrot.slane %v2858_v21, 4 }
 0x22d   : > { %2524 = vst.msk [vmem:[#allocation2] sm:$0xf] %vm2523_vm12, %v2428_v42  ;;  %v2290_v44 = vpop.permute.xlu0 %2289  ;;  %v2434_v48 = vpop.permute.xlu2 %2433  ;;  %v2761_v45 = vsel %vm4615_vm2, %v2756_v35, %v2760_v36  ;;  %v2699_v47 = vsel %vm4615_vm2, %v2694_v37, %v2698_v32 }
 0x22e   : > { %2358 = vst.msk [vmem:[#allocation2 + $0x70] sm:$0xf] %vm2329_vm11, %v2290_v44  ;;  %v4248_v44 = vld [vmem:[%s4604_s22 + $0x68] sm:$0x1] }
 0x22f   : > { %2527 = vst.msk [vmem:[#allocation2 + $0xc] sm:$0xf] %vm2523_vm12, %v2434_v48  ;;  %v4287_v48 = vld [vmem:[%s4604_s22 + $0x44] sm:$0x1]  ;;  %v2768_v52 = vshll.u32 %v4248_v44, 16  ;;  %v2930_v44 = vshrl.u32 %v4268_v29, 16 }
 0x230   : > { %v3239_v55 = vrot.slane %v4287_v48, 5 }
 0x231   : > { %v2770_v62 = vrot.slane %v2768_v52, 5  ;;  %v4307_v52 = vld [vmem:[%s4604_s22 + $0x94] sm:$0xf] }
 0x232   : > { %3363 = vrot.lane.b32.xlu1 %v3282_v49, %s4554_s30  ;;  %v4285_v49 = vld [vmem:[%s4604_s22 + $0x3c] sm:$0xe] }
 0x233   : > { %3361 = vrot.lane.b32.xlu0 %v3279_v50, %s4554_s30  ;;  %3038 = vrot.lane.b32.xlu2 %v2915_v53, %s4553_s29  ;;  %v2689_v50 = vsel %vm4615_vm2, %v2684_v41, %v2688_v16  ;;  %v3238_v53 = vrot.slane %v3236_v46, 4  ;;  %v4327_v58 = vrot.slane %v4285_v49, 9  ;;  %v4216_v16 = vld [vmem:[%s4604_s22 + $0x90] sm:$0xf]  ;;  %v4222_v41 = vld [vmem:[%s4604_s22 + $0xb4] sm:$0xf] }
 0x234   : > { %v2991_v57 = vpop.permute.xlu1 %2990 }
 0x235   : > { %3086 = vst.msk [vmem:[#allocation2 + $0x4] sm:$0xf] %vm3084_vm13, %v2991_v57  ;;  %v2989_v60 = vpop.permute.xlu0 %2988  ;;  %v2993_v1 = vpop.permute.xlu2 %2992  ;;  %v3237_v54 = vsel %vm4789_vm5, %v4327_v58, %v3236_v46  ;;  %v2932_v58 = vrot.slane %v2930_v44, 4 }
 0x236   : > { %3085 = vst.msk [vmem:[#allocation2] sm:$0xf] %vm3084_vm13, %v2989_v60 }
 0x237   : > { %3422 = vst.msk [vmem:[#allocation2] sm:$0xf] %vm3421_vm14, %v3326_v30  ;;  %v2762_v30 = vshrl.u32 %v4247_v15, 16  ;;  %v4258_v15 = vld [vmem:[%s4604_s22 + $0x90] sm:$0xf] }
 0x238   : > { %v2848_v24 = vshll.u32 %v4258_v15, 16 }
 0x239   : > { %v2764_v42 = vrot.slane %v2762_v30, 4  ;;  %v4260_v30 = vld [vmem:[%s4604_s22 + $0x98] sm:$0x1] }
 0x23a   : > { %2439 = vrot.lane.b32.xlu1 %v4202_v3, %s4552_s28  ;;  %v3257_v3 = vrot.slane %v4295_v56, 5  ;;  %v2850_v37 = vrot.slane %v2848_v24, 5  ;;  %v4269_v56 = vld [vmem:[%s4604_s22 + $0xbc] sm:$0x1] }
 0x23b   : > { %3375 = vrot.lane.b32.xlu0 %v3303_v6, %s4554_s30  ;;  %3373 = vrot.lane.b32.xlu2 %v3300_v9, %s4554_s30  ;;  %v2765_v51 = vor.u32 %v2764_v42, %v2760_v36  ;;  %v4294_v6 = vld [vmem:[%s4604_s22 + $0x60] sm:$0xe]  ;;  %v3260_v9 = vrot.slane %v4296_v4, 5  ;;  %v4317_v24 = vld [vmem:[%s4604_s22 + $0xbc] sm:$0x1] }
 0x23c   : > { %v2432_v14 = vpop.permute.xlu1 %2431  ;;  %v3259_v8 = vrot.slane %v3257_v3, 4  ;;  %v4330_v12 = vrot.slane %v4294_v6, 9 }
 0x23d   : > { %2526 = vst.msk [vmem:[#allocation2 + $0x8] sm:$0xf] %vm2523_vm12, %v2432_v14  ;;  %v3328_v18 = vpop.permute.xlu0 %3327  ;;  %v3007_v22 = vpop.permute.xlu2 %3006  ;;  %v2766_v60 = vrot.slane %v2765_v51, 4 }
 0x23e   : > { %3423 = vst.msk [vmem:[#allocation2 + $0x4] sm:$0xf] %vm3421_vm14, %v3328_v18  ;;  %v2920_v18 = vshll.u32 %v4267_v10, 16  ;;  %v3261_v19 = vsel %vm4789_vm5, %v3259_v8, %v3260_v9  ;;  %v4316_v10 = vld [vmem:[%s4604_s22 + $0xb8] sm:$0xf] }
 0x23f   : > { %3087 = vst.msk [vmem:[#allocation2 + $0x8] sm:$0xf] %vm3084_vm13, %v2993_v1  ;;  %v3240_v1 = vsel %vm4789_vm5, %v3238_v53, %v3239_v55  ;;  %v2771_v5 = vsel %vm4615_vm2, %v2766_v60, %v2770_v62  ;;  %v3285_v62 = vrot.slane %v4307_v52, 5  ;;  %v3306_v21 = vrot.slane %v4316_v10, 5 }
 0x241   : > { %v3287_v6 = vrot.slane %v3285_v62, 4 }
 0x242   : > { %2453 = vrot.lane.b32.xlu1 %v4209_v23, %s4552_s28  ;;  %v2845_v23 = vshrl.u32 %v4258_v15, 16  ;;  %v4249_v15 = vld [vmem:[%s4604_s22 + $0x6c] sm:$0xf] }
 0x243   : > { %2451 = vrot.lane.b32.xlu0 %v4208_v27, %s4552_s28  ;;  %2441 = vrot.lane.b32.xlu2 %v4203_v31, %s4552_s28  ;;  %v2922_v27 = vrot.slane %v2920_v18, 5  ;;  %v2856_v31 = vrot.slane %v2854_v20, 5 }
 0x244   : > { %v2446_v34 = vpop.permute.xlu1 %2445 }
 0x245   : > { %2533 = vst.msk [vmem:[#allocation2 + $0x24] sm:$0xf] %vm2523_vm12, %v2446_v34  ;;  %v2444_v39 = vpop.permute.xlu0 %2443  ;;  %v4439_v40 = vld [vmem:[#allocation2] sm:$0xff]  ;;  %v3342_v43 = vpop.permute.xlu2 %3341  ;;  %v2847_v34 = vrot.slane %v2845_v23, 4  ;;  %v2861_v42 = vor.u32 %v2860_v33, %v2856_v31  ;;  %v2776_v23 = vshll.u32 %v4249_v15, 16  ;;  %v3309_v33 = vrot.slane %v4317_v24, 5 }
 0x246   : > { %2532 = vst.msk [vmem:[#allocation2 + $0x20] sm:$0xf] %vm2523_vm12, %v2444_v39  ;;  %3658 = vmatmul.bf16.vlgmr.msra.gmra.mxu0 %v4439_v40  ;;  %v2923_v39 = vor.u32 %v2922_v27, %v2919_v26  ;;  %v2926_v40 = vshll.u32 %v4268_v29, 16  ;;  %v4315_v27 = vld [vmem:[%s4604_s22 + $0xb4] sm:$0xe] }
 0x247   : > { %3094 = vst.msk [vmem:[#allocation2 + $0x24] sm:$0xf] %vm3084_vm13, %v3007_v22  ;;  %v3258_v22 = vsel %vm4789_vm5, %v4330_v12, %v3257_v3  ;;  %v2851_v46 = vor.u32 %v2850_v37, %v2847_v34  ;;  %v2778_v34 = vrot.slane %v2776_v23, 5  ;;  %v4270_v24 = vld [vmem:[%s4604_s22 + $0xc0] sm:$0xf] }
 0x248   : > { %v2928_v48 = vrot.slane %v2926_v40, 5  ;;  %v4210_v40 = vld [vmem:[%s4604_s22 + $0x6c] sm:$0xf] }
 0x24a   : > { %3012 = vrot.lane.b32.xlu1 %v2761_v45, %s4553_s29  ;;  %v4217_v45 = vld [vmem:[%s4604_s22 + $0x94] sm:$0xf]  ;;  %v2933_v4 = vor.u32 %v2932_v58, %v2928_v48 }
 0x24b   : > { %3002 = vrot.lane.b32.xlu0 %v2699_v47, %s4553_s29  ;;  %3000 = vrot.lane.b32.xlu2 %v2689_v50, %s4553_s29  ;;  %v2924_v47 = vrot.slane %v2923_v39, 4  ;;  %v2862_v50 = vrot.slane %v2861_v42, 4 }
 0x24c   : > { %v3005_v57 = vpop.permute.xlu1 %3004  ;;  %v2934_v13 = vrot.slane %v2933_v4, 4  ;;  %v4262_v4 = vld [vmem:[%s4604_s22 + $0xa0] sm:$0xf] }
 0x24d   : > { %3093 = vst.msk [vmem:[#allocation2 + $0x20] sm:$0xf] %vm3084_vm13, %v3005_v57  ;;  %v2995_v59 = vpop.permute.xlu0 %2994  ;;  %v2462_v0 = vpop.permute.xlu2 %2461  ;;  %v2852_v57 = vrot.slane %v2851_v46, 4  ;;  %v2929_v60 = vsel %vm4615_vm2, %v2924_v47, %v2928_v48 }
 0x24e   : > { %3088 = vst.msk [vmem:[#allocation2 + $0xc] sm:$0xf] %vm3084_vm13, %v2995_v59 }
 0x24f   : > { %3430 = vst.msk [vmem:[#allocation2 + $0x20] sm:$0xf] %vm3421_vm14, %v3342_v43  ;;  %v2864_v43 = vshll.u32 %v4260_v30, 16  ;;  %v2857_v3 = vsel %vm4615_vm2, %v2852_v57, %v2856_v31  ;;  %v3308_v31 = vrot.slane %v3306_v21, 4  ;;  %v4176_v57 = vld [vmem:[%s4604_s22 + $0xbc] sm:$0x1] }
 0x250   : > { %2541 = vst.msk [vmem:[#allocation2 + $0x44] sm:$0xf] %vm2523_vm12, %v2462_v0 }
 0x251   : > { %v2866_v51 = vrot.slane %v2864_v43, 5  ;;  %v3310_v43 = vsel %vm4789_vm5, %v3308_v31, %v3309_v33 }
 0x252   : > { %3339 = vrot.lane.b32.xlu1 %v3240_v1, %s4554_s30  ;;  %v4308_v1 = vld [vmem:[%s4604_s22 + $0x98] sm:$0x1] }
 0x253   : > { %3337 = vrot.lane.b32.xlu0 %v3237_v54, %s4554_s30  ;;  %3014 = vrot.lane.b32.xlu2 %v2771_v5, %s4553_s29  ;;  %v2867_v0 = vsel %vm4615_vm2, %v2862_v50, %v2866_v51  ;;  %v4306_v54 = vld [vmem:[%s4604_s22 + $0x90] sm:$0xe]  ;;  %v2936_v5 = vshll.u32 %v4269_v56, 16 }
 0x254   : > { %v3332_v2 = vpop.permute.xlu1 %3331  ;;  %v4334_v9 = vrot.slane %v4306_v54, 9  ;;  %v4298_v51 = vld [vmem:[%s4604_s22 + $0x70] sm:$0xf] }
 0x255   : > { %3425 = vst.msk [vmem:[#allocation2 + $0xc] sm:$0xf] %vm3421_vm14, %v3332_v2  ;;  %v3330_v11 = vpop.permute.xlu0 %3329  ;;  %v3358_v14 = vpop.permute.xlu2 %3357  ;;  %v3288_v2 = vrot.slane %v4308_v1, 5  ;;  %v3264_v58 = vrot.slane %v4298_v51, 5  ;;  %v4211_v56 = vld [vmem:[%s4604_s22 + $0x70] sm:$0xf] }
 0x256   : > { %3424 = vst.msk [vmem:[#allocation2 + $0x8] sm:$0xf] %vm3421_vm14, %v3330_v11  ;;  %v4250_v11 = vld [vmem:[%s4604_s22 + $0x70] sm:$0xf]  ;;  %v3286_v20 = vsel %vm4789_vm5, %v4334_v9, %v3285_v62  ;;  %v2223_v62 = vrot.slane %v2221_v7, 4  ;;  %v2878_v7 = vshll.u32 %v4262_v4, 16 }
 0x257   : > { %v3289_v17 = vsel %vm4789_vm5, %v3287_v6, %v3288_v2  ;;  %v2782_v18 = vshll.u32 %v4250_v11, 16  ;;  %v3266_v54 = vrot.slane %v3264_v58, 4  ;;  %v4261_v2 = vld [vmem:[%s4604_s22 + $0x9c] sm:$0xf]  ;;  %v2882_v9 = vshrl.u32 %v4262_v4, 16 }
 0x258   : > { %v4310_v51 = vld [vmem:[%s4604_s22 + $0xa0] sm:$0xf] }
 0x25a   : > { %2467 = vrot.lane.b32.xlu1 %v4216_v16, %s4552_s28 }
 0x25b   : > { %3351 = vrot.lane.b32.xlu0 %v3261_v19, %s4554_s30  ;;  %3349 = vrot.lane.b32.xlu2 %v3258_v22, %s4554_s30  ;;  %v2786_v19 = vshrl.u32 %v4250_v11, 16  ;;  %v2773_v22 = vshrl.u32 %v4249_v15, 16  ;;  %v2869_v11 = vshrl.u32 %v4261_v2, 16  ;;  %v2884_v15 = vrot.slane %v2882_v9, 4 }
 0x25c   : > { %v2460_v28 = vpop.permute.xlu1 %2459 }
 0x25d   : > { %2540 = vst.msk [vmem:[#allocation2 + $0x40] sm:$0xf] %vm2523_vm12, %v2460_v28  ;;  %v3344_v35 = vpop.permute.xlu0 %3343  ;;  %v4440_v36 = vld [vmem:[#allocation2 + $0x8] sm:$0xff]  ;;  %v2438_v32 = vpop.permute.xlu2 %2437  ;;  %v2784_v28 = vrot.slane %v2782_v18, 5  ;;  %v2788_v29 = vrot.slane %v2786_v19, 4  ;;  %v2871_v18 = vrot.slane %v2869_v11, 4 }
 0x25e   : > { %3431 = vst.msk [vmem:[#allocation2 + $0x24] sm:$0xf] %vm3421_vm14, %v3344_v35  ;;  %3663 = vmatmul.bf16.gmra.mxu0 %v4440_v36  ;;  %v4251_v35 = vld [vmem:[%s4604_s22 + $0x74] sm:$0x1]  ;;  %v2775_v36 = vrot.slane %v2773_v22, 4 }
 0x25f   : > { %2529 = vst.msk [vmem:[#allocation2 + $0x14] sm:$0xf] %vm2523_vm12, %v2438_v32  ;;  %v2792_v42 = vshll.u32 %v4251_v35, 16  ;;  %v4271_v22 = vld [vmem:[%s4604_s22 + $0xc4] sm:$0xf] }
 0x260   : > { %v2779_v44 = vor.u32 %v2778_v34, %v2775_v36  ;;  %v2950_v31 = vshll.u32 %v4271_v22, 16  ;;  %v2954_v33 = vshrl.u32 %v4271_v22, 16  ;;  %v4218_v35 = vld [vmem:[%s4604_s22 + $0x9c] sm:$0xf]  ;;  %v2941_v36 = vshrl.u32 %v4270_v24, 16 }
 0x261   : > { %v2794_v47 = vrot.slane %v2792_v42, 5  ;;  %v2944_v34 = vshll.u32 %v4270_v24, 16 }
 0x262   : > { %2481 = vrot.lane.b32.xlu1 %v4223_v38, %s4552_s28  ;;  %v4337_v38 = vrot.slane %v4315_v27, 9  ;;  %v2956_v42 = vrot.slane %v2954_v33, 4 }
 0x263   : > { %2479 = vrot.lane.b32.xlu0 %v4222_v41, %s4552_s28  ;;  %2469 = vrot.lane.b32.xlu2 %v4217_v45, %s4552_s28  ;;  %v2789_v41 = vor.u32 %v2788_v29, %v2784_v28  ;;  %v4219_v29 = vld [vmem:[%s4604_s22 + $0xa0] sm:$0xf] }
 0x264   : > { %v3023_v49 = vpop.permute.xlu1 %3022  ;;  %v3307_v45 = vsel %vm4789_vm5, %v4337_v38, %v3306_v21 }
 0x265   : > { %3102 = vst.msk [vmem:[#allocation2 + $0x44] sm:$0xf] %vm3084_vm13, %v3023_v49  ;;  %v3021_v53 = vpop.permute.xlu0 %3020  ;;  %v4443_v55 = vld [vmem:[#allocation2 + $0x20] sm:$0xff]  ;;  %v2997_v59 = vpop.permute.xlu2 %2996  ;;  %v2790_v46 = vrot.slane %v2789_v41, 4  ;;  %v2780_v49 = vrot.slane %v2779_v44, 4  ;;  %v2952_v41 = vrot.slane %v2950_v31, 5 }
 0x266   : > { %3101 = vst.msk [vmem:[#allocation2 + $0x40] sm:$0xf] %vm3084_vm13, %v3021_v53  ;;  %3678 = vmatmul.bf16.vlgmr.msra.gmra.mxu1 %v4443_v55 }
 0x267   : > { %3438 = vst.msk [vmem:[#allocation2 + $0x40] sm:$0xf] %vm3421_vm14, %v3358_v14  ;;  %v2938_v14 = vrot.slane %v2936_v5, 5  ;;  %v2795_v53 = vsel %vm4615_vm2, %v2790_v46, %v2794_v47  ;;  %v2785_v55 = vsel %vm4615_vm2, %v2780_v49, %v2784_v28  ;;  %v2946_v46 = vrot.slane %v2944_v34, 5 }
 0x269   : > { %v2939_v26 = vsel %vm4615_vm2, %v2934_v13, %v2938_v14  ;;  %v2880_v14 = vrot.slane %v2878_v7, 5  ;;  %v4311_v7 = vld [vmem:[%s4604_s22 + $0xa4] sm:$0x1] }
 0x26a   : > { %3040 = vrot.lane.b32.xlu1 %v2929_v60, %s4553_s29  ;;  %v4297_v60 = vld [vmem:[%s4604_s22 + $0x6c] sm:$0xe] }
 0x26b   : > { %3030 = vrot.lane.b32.xlu0 %v2867_v0, %s4553_s29  ;;  %3028 = vrot.lane.b32.xlu2 %v2857_v3, %s4553_s29  ;;  %v2224_v0 = vrot.slane %v4176_v57, 5  ;;  %v4331_v6 = vrot.slane %v4297_v60, 9  ;;  %v2885_v27 = vor.u32 %v2884_v15, %v2880_v14 }
 0x26c   : > { %v2436_v8 = vpop.permute.xlu1 %2435 }
 0x26d   : > { %2528 = vst.msk [vmem:[#allocation2 + $0x10] sm:$0xf] %vm2523_vm12, %v2436_v8  ;;  %v3360_v12 = vpop.permute.xlu0 %3359  ;;  %v3011_v16 = vpop.permute.xlu2 %3010  ;;  %v2225_v61 = vsel %vm4789_vm5, %v2223_v62, %v2224_v0  ;;  %v3265_v13 = vsel %vm4789_vm5, %v4331_v6, %v3264_v58  ;;  %v4319_v0 = vld [vmem:[%s4604_s22 + $0xc4] sm:$0xf] }
 0x26e   : > { %3439 = vst.msk [vmem:[#allocation2 + $0x44] sm:$0xf] %vm3421_vm14, %v3360_v12  ;;  %v2872_v12 = vshll.u32 %v4261_v2, 16  ;;  %v4320_v2 = vld [vmem:[%s4604_s22 + $0xc8] sm:$0x1] }
 0x26f   : > { %3089 = vst.msk [vmem:[#allocation2 + $0x10] sm:$0xf] %vm3084_vm13, %v2997_v59  ;;  %v4299_v59 = vld [vmem:[%s4604_s22 + $0x74] sm:$0x1] }
 0x270   : > { %v3267_v3 = vrot.slane %v4299_v59, 5  ;;  %v2874_v19 = vrot.slane %v2872_v12, 5  ;;  %v3292_v59 = vrot.slane %v4310_v51, 5 }
 0x272   : > { %3367 = vrot.lane.b32.xlu1 %v3289_v17, %s4554_s30  ;;  %v3268_v10 = vsel %vm4789_vm5, %v3266_v54, %v3267_v3  ;;  %v4263_v17 = vld [vmem:[%s4604_s22 + $0xa4] sm:$0x1]  ;;  %v3294_v15 = vrot.slane %v3292_v59, 4 }
 0x273   : > { %3365 = vrot.lane.b32.xlu0 %v3286_v20, %s4554_s30  ;;  %3042 = vrot.lane.b32.xlu2 %v2939_v26, %s4553_s29  ;;  %v4224_v26 = vld [vmem:[%s4604_s22 + $0xc0] sm:$0xf]  ;;  %v2888_v28 = vshll.u32 %v4263_v17, 16  ;;  %v4273_v17 = vld [vmem:[%s4604_s22 + $0xcc] sm:$0xf] }
 0x274   : > { %v2450_v30 = vpop.permute.xlu1 %2449  ;;  %v2965_v24 = vshrl.u32 %v4273_v17, 16 }
 0x275   : > { %2535 = vst.msk [vmem:[#allocation2 + $0x2c] sm:$0xf] %vm2523_vm12, %v2450_v30  ;;  %v2448_v37 = vpop.permute.xlu0 %2447  ;;  %v4447_v32 = vld [vmem:[#allocation2 + $0x40] sm:$0xff]  ;;  %v3346_v39 = vpop.permute.xlu2 %3345  ;;  %v2875_v30 = vor.u32 %v2874_v19, %v2871_v18  ;;  %v4274_v19 = vld [vmem:[%s4604_s22 + $0xd0] sm:$0xf] }
 0x276   : > { %2534 = vst.msk [vmem:[#allocation2 + $0x28] sm:$0xf] %vm2523_vm12, %v2448_v37  ;;  %3698 = vmatmul.bf16.vlgmr.msra.gmra.mxu2 %v4447_v32  ;;  %v2886_v37 = vrot.slane %v2885_v27, 4  ;;  %v2890_v32 = vrot.slane %v2888_v28, 5  ;;  %v4179_v27 = vld [vmem:[%s4604_s22 + $0xc8] sm:$0x1] }
 0x277   : > { %3096 = vst.msk [vmem:[#allocation2 + $0x2c] sm:$0xf] %vm3084_vm13, %v3011_v16  ;;  %v2967_v34 = vrot.slane %v2965_v24, 4 }
 0x27a   : > { %2455 = vrot.lane.b32.xlu1 %v4210_v40, %s4552_s28  ;;  %v4272_v40 = vld [vmem:[%s4604_s22 + $0xc8] sm:$0x1] }
 0x27b   : > { %3379 = vrot.lane.b32.xlu0 %v3310_v43, %s4554_s30  ;;  %3377 = vrot.lane.b32.xlu2 %v3307_v45, %s4554_s30  ;;  %v2943_v45 = vrot.slane %v2941_v36, 4  ;;  %v2231_v36 = vrot.slane %v4179_v27, 5 }
 0x27c   : > { %v3009_v48 = vpop.permute.xlu1 %3008 }
 0x27d   : > { %3095 = vst.msk [vmem:[#allocation2 + $0x28] sm:$0xf] %vm3084_vm13, %v3009_v48  ;;  %v2999_v50 = vpop.permute.xlu0 %2998  ;;  %v2466_v52 = vpop.permute.xlu2 %2465  ;;  %v2891_v48 = vsel %vm4615_vm2, %v2886_v37, %v2890_v32  ;;  %v2947_v57 = vor.u32 %v2946_v46, %v2943_v45  ;;  %v4275_v32 = vld [vmem:[%s4604_s22 + $0xd4] sm:$0x1] }
 0x27e   : > { %3090 = vst.msk [vmem:[#allocation2 + $0x14] sm:$0xf] %vm3084_vm13, %v2999_v50  ;;  %v4309_v50 = vld [vmem:[%s4604_s22 + $0x9c] sm:$0xe]  ;;  %v2984_v45 = vshll.u32 %v4275_v32, 16 }
 0x27f   : > { %3432 = vst.msk [vmem:[#allocation2 + $0x28] sm:$0xf] %vm3421_vm14, %v3346_v39  ;;  %v2876_v39 = vrot.slane %v2875_v30, 4  ;;  %v4335_v58 = vrot.slane %v4309_v50, 9  ;;  %v2948_v54 = vrot.slane %v2947_v57, 4 }
 0x280   : > { %2543 = vst.msk [vmem:[#allocation2 + $0x4c] sm:$0xf] %vm2523_vm12, %v2466_v52  ;;  %v2957_v52 = vor.u32 %v2956_v42, %v2952_v41  ;;  %v4177_v30 = vld [vmem:[%s4604_s22 + $0xc0] sm:$0xe]  ;;  %v2986_v50 = vrot.slane %v2984_v45, 5 }
 0x281   : > { %v2881_v49 = vsel %vm4615_vm2, %v2876_v39, %v2880_v14  ;;  %v3293_v4 = vsel %vm4789_vm5, %v4335_v58, %v3292_v59  ;;  %v4322_v57 = vld [vmem:[%s4604_s22 + $0xd0] sm:$0xf] }
 0x282   : > { %3018 = vrot.lane.b32.xlu1 %v2795_v53, %s4553_s29  ;;  %v2960_v53 = vshll.u32 %v4272_v40, 16  ;;  %v2958_v60 = vrot.slane %v2957_v52, 4 }
 0x283   : > { %3016 = vrot.lane.b32.xlu0 %v2785_v55, %s4553_s29  ;;  %2457 = vrot.lane.b32.xlu2 %v4211_v56, %s4552_s28  ;;  %v4225_v55 = vld [vmem:[%s4604_s22 + $0xc4] sm:$0xf] }
 0x284   : > { %v3336_v1 = vpop.permute.xlu1 %3335  ;;  %v2962_v62 = vrot.slane %v2960_v53, 5 }
 0x285   : > { %3427 = vst.msk [vmem:[#allocation2 + $0x14] sm:$0xf] %vm3421_vm14, %v3336_v1  ;;  %v3334_v5 = vpop.permute.xlu0 %3333  ;;  %v3025_v8 = vpop.permute.xlu2 %3024 }
 0x286   : > { %3426 = vst.msk [vmem:[#allocation2 + $0x10] sm:$0xf] %vm3421_vm14, %v3334_v5  ;;  %v3313_v5 = vrot.slane %v4319_v0, 5  ;;  %v2963_v6 = vsel %vm4615_vm2, %v2958_v60, %v2962_v62  ;;  %v3320_v60 = vrot.slane %v4322_v57, 5  ;;  %v4323_v62 = vld [vmem:[%s4604_s22 + $0xd4] sm:$0x1] }
 0x287   : > { %v4227_v0 = vld [vmem:[%s4604_s22 + $0xd0] sm:$0xf] }
 0x288   : > { %v3315_v9 = vrot.slane %v3313_v5, 4 }
 0x28a   : > { %2291 = vrot.lane.b32.xlu1 %v2225_v61, %s4551_s27  ;;  %v2953_v61 = vsel %vm4615_vm2, %v2948_v54, %v2952_v41  ;;  %v4195_v41 = vrot.slane %v4177_v30, 9 }
 0x28b   : > { %3355 = vrot.lane.b32.xlu0 %v3268_v10, %s4554_s30  ;;  %3353 = vrot.lane.b32.xlu2 %v3265_v13, %s4554_s30  ;;  %v3316_v10 = vrot.slane %v4320_v2, 5  ;;  %v4178_v13 = vld [vmem:[%s4604_s22 + $0xc4] sm:$0xf] }
 0x28c   : > { %v2464_v16 = vpop.permute.xlu1 %2463 }
 0x28d   : > { %2542 = vst.msk [vmem:[#allocation2 + $0x48] sm:$0xf] %vm2523_vm12, %v2464_v16  ;;  %v3348_v20 = vpop.permute.xlu0 %3347  ;;  %v4441_v21 = vld [vmem:[#allocation2 + $0x10] sm:$0xff]  ;;  %v3039_v23 = vpop.permute.xlu2 %3038  ;;  %v3295_v16 = vrot.slane %v4311_v7, 5 }
 0x28e   : > { %3433 = vst.msk [vmem:[#allocation2 + $0x2c] sm:$0xf] %vm3421_vm14, %v3348_v20  ;;  %3668 = vmatmul.bf16.gmra.mxu0 %v4441_v21  ;;  %v3317_v20 = vsel %vm4789_vm5, %v3315_v9, %v3316_v10  ;;  %v2978_v21 = vshrl.u32 %v4274_v19, 16 }
 0x28f   : > { %3103 = vst.msk [vmem:[#allocation2 + $0x48] sm:$0xf] %vm3084_vm13, %v3025_v8  ;;  %v4318_v8 = vld [vmem:[%s4604_s22 + $0xc0] sm:$0xe]  ;;  %v3296_v28 = vsel %vm4789_vm5, %v3294_v15, %v3295_v16 }
 0x290   : > { %v4338_v12 = vrot.slane %v4318_v8, 9  ;;  %v2980_v31 = vrot.slane %v2978_v21, 4  ;;  %v6018_v8 = vld [vmem:[%s6203_s2] ss:$0 sm:$0xff] }
 0x292   : > { %2483 = vrot.lane.b32.xlu1 %v4224_v26, %s4552_s28  ;;  %v3314_v22 = vsel %vm4789_vm5, %v4338_v12, %v3313_v5  ;;  %v2968_v26 = vshll.u32 %v4273_v17, 16 }
 0x293   : > { %2473 = vrot.lane.b32.xlu0 %v4219_v29, %s4552_s28  ;;  %2471 = vrot.lane.b32.xlu2 %v4218_v35, %s4552_s28  ;;  %v2974_v29 = vshll.u32 %v4274_v19, 16 }
 0x294   : > { %v2478_v38 = vpop.permute.xlu1 %2477  ;;  %v2970_v37 = vrot.slane %v2968_v26, 5 }
 0x295   : > { %2549 = vst.msk [vmem:[#allocation2 + $0x64] sm:$0xf] %vm2523_vm12, %v2478_v38  ;;  %v2476_v43 = vpop.permute.xlu0 %2475  ;;  %v4444_v44 = vld [vmem:[#allocation2 + $0x28] sm:$0xff]  ;;  %v3374_v47 = vpop.permute.xlu2 %3373  ;;  %v2976_v40 = vrot.slane %v2974_v29, 5 }
 0x296   : > { %2548 = vst.msk [vmem:[#allocation2 + $0x60] sm:$0xf] %vm2523_vm12, %v2476_v43  ;;  %3683 = vmatmul.bf16.gmra.mxu1 %v4444_v44  ;;  %v4226_v43 = vld [vmem:[%s4604_s22 + $0xcc] sm:$0xf] }
 0x297   : > { %3110 = vst.msk [vmem:[#allocation2 + $0x64] sm:$0xf] %vm3084_vm13, %v3039_v23  ;;  %v2228_v23 = vrot.slane %v4178_v13, 5  ;;  %v2981_v44 = vor.u32 %v2980_v31, %v2976_v40 }
 0x299   : > { %v2230_v35 = vrot.slane %v2228_v23, 4 }
 0x29a   : > { %3034 = vrot.lane.b32.xlu1 %v2891_v48, %s4553_s29  ;;  %v2229_v48 = vsel %vm4789_vm5, %v4195_v41, %v2228_v23 }
 0x29b   : > { %3032 = vrot.lane.b32.xlu0 %v2881_v49, %s4553_s29  ;;  %2485 = vrot.lane.b32.xlu2 %v4225_v55, %s4552_s28  ;;  %v2232_v46 = vsel %vm4789_vm5, %v2230_v35, %v2231_v36  ;;  %v2982_v49 = vrot.slane %v2981_v44, 4 }
 0x29c   : > { %v3037_v56 = vpop.permute.xlu1 %3036 }
 0x29d   : > { %3109 = vst.msk [vmem:[#allocation2 + $0x60] sm:$0xf] %vm3084_vm13, %v3037_v56  ;;  %v3027_v1 = vpop.permute.xlu0 %3026  ;;  %v2442_v3 = vpop.permute.xlu2 %2441  ;;  %v2987_v59 = vsel %vm4615_vm2, %v2982_v49, %v2986_v50 }
 0x29e   : > { %3104 = vst.msk [vmem:[#allocation2 + $0x4c] sm:$0xf] %vm3084_vm13, %v3027_v1  ;;  %v4321_v1 = vld [vmem:[%s4604_s22 + $0xcc] sm:$0xe]  ;;  %s4438_s22 = sshll.u32 %s6215_s15, 8 }
 0x29f   : > { %3446 = vst.msk [vmem:[#allocation2 + $0x60] sm:$0xf] %vm3421_vm14, %v3374_v47  ;;  %v2971_v47 = vor.u32 %v2970_v37, %v2967_v34  ;;  %s6026_s5 = scalar_lea.vmem %s6204_s3, %s4438_s22 }
 0x2a0   : > { %2531 = vst.msk [vmem:[#allocation2 + $0x1c] sm:$0xf] %vm2523_vm12, %v2442_v3  ;;  %v3322_v3 = vrot.slane %v3320_v60, 4 }
 0x2a1   : > { %v2972_v52 = vrot.slane %v2971_v47, 4 }
 0x2a2   : > { %3369 = vrot.lane.b32.xlu1 %v3293_v4, %s4554_s30  ;;  %v3323_v4 = vrot.slane %v4323_v62, 5 }
 0x2a3   : > { %3046 = vrot.lane.b32.xlu0 %v2963_v6, %s4553_s29  ;;  %3044 = vrot.lane.b32.xlu2 %v2953_v61, %s4553_s29  ;;  %v2977_v56 = vsel %vm4615_vm2, %v2972_v52, %v2976_v40  ;;  %v4339_v6 = vrot.slane %v4321_v1, 9 }
 0x2a4   : > { %v3364_v11 = vpop.permute.xlu1 %3363  ;;  %v3324_v2 = vsel %vm4789_vm5, %v3322_v3, %v3323_v4 }
 0x2a5   : > { %3441 = vst.msk [vmem:[#allocation2 + $0x4c] sm:$0xf] %vm3421_vm14, %v3364_v11  ;;  %v3362_v14 = vpop.permute.xlu0 %3361  ;;  %v3001_v18 = vpop.permute.xlu2 %3000  ;;  %v3321_v61 = vsel %vm4789_vm5, %v4339_v6, %v3320_v60 }
 0x2a6   : > { %3440 = vst.msk [vmem:[#allocation2 + $0x48] sm:$0xf] %vm3421_vm14, %v3362_v14 }
 0x2aa   : > { %3383 = vrot.lane.b32.xlu1 %v3317_v20, %s4554_s30 }
 0x2ab   : > { %3381 = vrot.lane.b32.xlu0 %v3314_v22, %s4554_s30  ;;  %3371 = vrot.lane.b32.xlu2 %v3296_v28, %s4554_s30 }
 0x2ac   : > { %v2440_v33 = vpop.permute.xlu1 %2439 }
 0x2ad   : > { %2530 = vst.msk [vmem:[#allocation2 + $0x18] sm:$0xf] %vm2523_vm12, %v2440_v33  ;;  %v3376_v38 = vpop.permute.xlu0 %3375  ;;  %v4448_v39 = vld [vmem:[#allocation2 + $0x48] sm:$0xff]  ;;  %v3015_v42 = vpop.permute.xlu2 %3014 }
 0x2ae   : > { %3447 = vst.msk [vmem:[#allocation2 + $0x64] sm:$0xf] %vm3421_vm14, %v3376_v38  ;;  %3703 = vmatmul.bf16.gmra.mxu2 %v4448_v39 }
 0x2af   : > { %3091 = vst.msk [vmem:[#allocation2 + $0x18] sm:$0xf] %vm3084_vm13, %v3001_v18 }
 0x2b2   : > { %2487 = vrot.lane.b32.xlu1 %v4226_v43, %s4552_s28 }
 0x2b3   : > { %2295 = vrot.lane.b32.xlu0 %v2232_v46, %s4551_s27  ;;  %2293 = vrot.lane.b32.xlu2 %v2229_v48, %s4551_s27 }
 0x2b4   : > { %v2454_v51 = vpop.permute.xlu1 %2453 }
 0x2b5   : > { %2537 = vst.msk [vmem:[#allocation2 + $0x34] sm:$0xf] %vm2523_vm12, %v2454_v51  ;;  %v2452_v53 = vpop.permute.xlu0 %2451  ;;  %v4451_v55 = vld [vmem:[#allocation2 + $0x60] sm:$0xff]  ;;  %v3350_v58 = vpop.permute.xlu2 %3349 }
 0x2b6   : > { %2536 = vst.msk [vmem:[#allocation2 + $0x30] sm:$0xf] %vm2523_vm12, %v2452_v53  ;;  %3718 = vmatmul.bf16.vlgmr.msra.gmra.mxu3 %v4451_v55 }
 0x2b7   : > { %3098 = vst.msk [vmem:[#allocation2 + $0x34] sm:$0xf] %vm3084_vm13, %v3015_v42 }
 0x2ba   : > { %3050 = vrot.lane.b32.xlu1 %v2987_v59, %s4553_s29 }
 0x2bb   : > { %3048 = vrot.lane.b32.xlu0 %v2977_v56, %s4553_s29  ;;  %2489 = vrot.lane.b32.xlu2 %v4227_v0, %s4552_s28 }
 0x2bc   : > { %v3013_v54 = vpop.permute.xlu1 %3012 }
 0x2bd   : > { %3097 = vst.msk [vmem:[#allocation2 + $0x30] sm:$0xf] %vm3084_vm13, %v3013_v54  ;;  %v3003_v5 = vpop.permute.xlu0 %3002  ;;  %v2470_v25 = vpop.permute.xlu2 %2469 }
 0x2be   : > { %3092 = vst.msk [vmem:[#allocation2 + $0x1c] sm:$0xf] %vm3084_vm13, %v3003_v5 }
 0x2bf   : > { %3434 = vst.msk [vmem:[#allocation2 + $0x30] sm:$0xf] %vm3421_vm14, %v3350_v58 }
 0x2c0   : > { %2545 = vst.msk [vmem:[#allocation2 + $0x54] sm:$0xf] %vm2523_vm12, %v2470_v25 }
 0x2c3   : > { %3387 = vrot.lane.b32.xlu0 %v3324_v2, %s4554_s30  ;;  %v3659_v9 = vpop.f32.mrf.mxu0  ;;  %3385 = vrot.lane.b32.xlu2 %v3321_v61, %s4554_s30  ;;  %s4035_s30 = sshll.u32 %s6215_s15, 1 }
 0x2c4   : > { %v3340_v7 = vpop.permute.xlu1 %3339  ;;  %v3660_v11 = vadd.f32 %v6018_v8, %v3659_v9  ;;  %s267_s8 = scalar_lea.vmem %s6205_s4, %s4035_s30 }
 0x2c5   : > { %3429 = vst.msk [vmem:[#allocation2 + $0x1c] sm:$0xf] %vm3421_vm14, %v3340_v7  ;;  %v3338_v10 = vpop.permute.xlu0 %3337  ;;  %v3029_v63 = vpop.permute.xlu2 %3028 }
 0x2c6   : > { %3428 = vst.msk [vmem:[#allocation2 + $0x18] sm:$0xf] %vm3421_vm14, %v3338_v10  ;;  %v3809_v18 = vmul.f32 %v3660_v11, %v3660_v11 }
 0x2c7   : > { %3739 = vst [vmem:[%s6026_s5] sm:$0xff] %v3660_v11 }
 0x2cb   : > { %v3661_v13 = vpop.f32.mrf.mxu0 }
 0x2cc   : > { %v2468_v12 = vpop.permute.xlu1 %2467  ;;  %v3662_v15 = vadd.f32 %v6018_v8, %v3661_v13 }
 0x2cd   : > { %2544 = vst.msk [vmem:[#allocation2 + $0x50] sm:$0xf] %vm2523_vm12, %v2468_v12  ;;  %v3352_v14 = vpop.permute.xlu0 %3351  ;;  %v4442_v16 = vld [vmem:[#allocation2 + $0x18] sm:$0xff]  ;;  %v3043_v17 = vpop.permute.xlu2 %3042 }
 0x2ce   : > { %3435 = vst.msk [vmem:[#allocation2 + $0x34] sm:$0xf] %vm3421_vm14, %v3352_v14  ;;  %v3771_v19 = vadd.f32 %v3662_v15, %v3660_v11  ;;  %v3810_v20 = vmul.f32 %v3662_v15, %v3662_v15  ;;  %3673 = vmatmul.bf16.gmra.mxu0 %v4442_v16 }
 0x2cf   : > { %3740 = vst [vmem:[%s6026_s5 + $0x8] sm:$0xff] %v3662_v15 }
 0x2d0   : > { %3105 = vst.msk [vmem:[#allocation2 + $0x50] sm:$0xf] %vm3084_vm13, %v3029_v63  ;;  %v3841_v21 = vadd.f32 %v3810_v20, %v3809_v18 }
 0x2d4   : > { %v2482_v22 = vpop.permute.xlu1 %2481 }
 0x2d5   : > { %2551 = vst.msk [vmem:[#allocation2 + $0x6c] sm:$0xf] %vm2523_vm12, %v2482_v22  ;;  %v2480_v23 = vpop.permute.xlu0 %2479  ;;  %v4445_v24 = vld [vmem:[#allocation2 + $0x30] sm:$0xff]  ;;  %v3378_v26 = vpop.permute.xlu2 %3377 }
 0x2d6   : > { %2550 = vst.msk [vmem:[#allocation2 + $0x68] sm:$0xf] %vm2523_vm12, %v2480_v23  ;;  %3688 = vmatmul.bf16.gmra.mxu1 %v4445_v24 }
 0x2d7   : > { %3112 = vst.msk [vmem:[#allocation2 + $0x6c] sm:$0xf] %vm3084_vm13, %v3043_v17 }
 0x2db   : > { %v3664_v28 = vpop.f32.mrf.mxu0 }
 0x2dc   : > { %v3041_v27 = vpop.permute.xlu1 %3040  ;;  %v3665_v30 = vadd.f32 %v6018_v8, %v3664_v28 }
 0x2dd   : > { %3111 = vst.msk [vmem:[#allocation2 + $0x68] sm:$0xf] %vm3084_vm13, %v3041_v27  ;;  %v3031_v29 = vpop.permute.xlu0 %3030  ;;  %v2458_v31 = vpop.permute.xlu2 %2457 }
 0x2de   : > { %3106 = vst.msk [vmem:[#allocation2 + $0x54] sm:$0xf] %vm3084_vm13, %v3031_v29  ;;  %v3772_v33 = vadd.f32 %v3771_v19, %v3665_v30  ;;  %v3811_v35 = vmul.f32 %v3665_v30, %v3665_v30 }
 0x2df   : > { %3741 = vst [vmem:[%s6026_s5 + $0x10] sm:$0xff] %v3665_v30 }
 0x2e0   : > { %3448 = vst.msk [vmem:[#allocation2 + $0x68] sm:$0xf] %vm3421_vm14, %v3378_v26  ;;  %v3842_v36 = vadd.f32 %v3841_v21, %v3811_v35 }
 0x2e1   : > { %2539 = vst.msk [vmem:[#allocation2 + $0x3c] sm:$0xf] %vm2523_vm12, %v2458_v31 }
 0x2e3   : > { %v3666_v37 = vpop.f32.mrf.mxu0  ;;  %v3679_v39 = vpop.f32.mrf.mxu1 }
 0x2e4   : > { %v3368_v34 = vpop.permute.xlu1 %3367  ;;  %v3667_v38 = vadd.f32 %v6018_v8, %v3666_v37  ;;  %v6051_v40 = vadd.f32 %v6018_v8, %v3679_v39 }
 0x2e5   : > { %3443 = vst.msk [vmem:[#allocation2 + $0x54] sm:$0xf] %vm3421_vm14, %v3368_v34  ;;  %v3366_v32 = vpop.permute.xlu0 %3365  ;;  %v3354_v41 = vpop.permute.xlu2 %3353 }
 0x2e6   : > { %3442 = vst.msk [vmem:[#allocation2 + $0x50] sm:$0xf] %vm3421_vm14, %v3366_v32  ;;  %v3773_v42 = vadd.f32 %v3772_v33, %v3667_v38  ;;  %v3812_v43 = vmul.f32 %v3667_v38, %v3667_v38 }
 0x2e7   : > { %3742 = vst [vmem:[%s6026_s5 + $0x18] sm:$0xff] %v3667_v38 }
 0x2e8   : > { %3747 = vst [vmem:[%s6026_s5 + $0x40] sm:$0xff] %v6051_v40  ;;  %v3843_v44 = vadd.f32 %v3842_v36, %v3812_v43 }
 0x2eb   : > { %v3681_v47 = vpop.f32.mrf.mxu1 }
 0x2ec   : > { %v2456_v45 = vpop.permute.xlu1 %2455  ;;  %v6059_v49 = vadd.f32 %v6018_v8, %v3681_v47 }
 0x2ed   : > { %2538 = vst.msk [vmem:[#allocation2 + $0x38] sm:$0xf] %vm2523_vm12, %v2456_v45  ;;  %v3380_v46 = vpop.permute.xlu0 %3379  ;;  %v4449_v48 = vld [vmem:[#allocation2 + $0x50] sm:$0xff]  ;;  %v2472_v50 = vpop.permute.xlu2 %2471 }
 0x2ee   : > { %3449 = vst.msk [vmem:[#allocation2 + $0x6c] sm:$0xf] %vm3421_vm14, %v3380_v46  ;;  %3708 = vmatmul.bf16.gmra.mxu2 %v4449_v48 }
 0x2ef   : > { %2546 = vst.msk [vmem:[#allocation2 + $0x58] sm:$0xf] %vm2523_vm12, %v2472_v50 }
 0x2f0   : > { %3748 = vst [vmem:[%s6026_s5 + $0x48] sm:$0xff] %v6059_v49 }
 0x2f4   : > { %v3019_v51 = vpop.permute.xlu1 %3018 }
 0x2f5   : > { %3100 = vst.msk [vmem:[#allocation2 + $0x3c] sm:$0xf] %vm3084_vm13, %v3019_v51  ;;  %v3017_v52 = vpop.permute.xlu0 %3016  ;;  %v4452_v53 = vld [vmem:[#allocation2 + $0x68] sm:$0xff]  ;;  %v2486_v55 = vpop.permute.xlu2 %2485 }
 0x2f6   : > { %3099 = vst.msk [vmem:[#allocation2 + $0x38] sm:$0xf] %vm3084_vm13, %v3017_v52  ;;  %3723 = vmatmul.bf16.gmra.mxu3 %v4452_v53 }
 0x2f7   : > { %3436 = vst.msk [vmem:[#allocation2 + $0x38] sm:$0xf] %vm3421_vm14, %v3354_v41 }
 0x2f9   : > { %v3699_v57 = vpop.f32.mrf.mxu2 }
 0x2fa   : > { %v6068_v58 = vadd.f32 %v6018_v8, %v3699_v57  ;;  %v3817_v57 = vmul.f32 %v6051_v40, %v6051_v40 }
 0x2fc   : > { %v2292_v59 = vpop.permute.xlu1 %2291  ;;  %3755 = vst [vmem:[%s6026_s5 + $0x80] sm:$0xff] %v6068_v58 }
 0x2fd   : > { %v3356_v56 = vpop.permute.xlu0 %3355  ;;  %2359 = vst.msk [vmem:[#allocation2 + $0x74] sm:$0xf] %vm2329_vm11, %v2292_v59  ;;  %v3045_v60 = vpop.permute.xlu2 %3044 }
 0x2fe   : > { %3437 = vst.msk [vmem:[#allocation2 + $0x3c] sm:$0xf] %vm3421_vm14, %v3356_v56 }
 0x2ff   : > { %2553 = vst.msk [vmem:[#allocation2 + $0x74] sm:$0xf] %vm2523_vm12, %v2486_v55 }
 0x301   : > { %v3701_v62 = vpop.f32.mrf.mxu2 }
 0x302   : > { %v6076_v0 = vadd.f32 %v6018_v8, %v3701_v62 }
 0x304   : > { %v2484_v1 = vpop.permute.xlu1 %2483  ;;  %3756 = vst [vmem:[%s6026_s5 + $0x88] sm:$0xff] %v6076_v0 }
 0x305   : > { %v2474_v54 = vpop.permute.xlu0 %2473  ;;  %2552 = vst.msk [vmem:[#allocation2 + $0x70] sm:$0xf] %vm2523_vm12, %v2484_v1  ;;  %v4446_v3 = vld [vmem:[#allocation2 + $0x38] sm:$0xff]  ;;  %v3372_v4 = vpop.permute.xlu2 %3371 }
 0x306   : > { %2547 = vst.msk [vmem:[#allocation2 + $0x5c] sm:$0xf] %vm2523_vm12, %v2474_v54  ;;  %3693 = vmatmul.bf16.gmra.mxu1 %v4446_v3 }
 0x307   : > { %3113 = vst.msk [vmem:[#allocation2 + $0x70] sm:$0xf] %vm3084_vm13, %v3045_v60  ;;  %v3818_v60 = vmul.f32 %v6059_v49, %v6059_v49 }
 0x30b   : > { %v3669_v6 = vpop.f32.mrf.mxu0 }
 0x30c   : > { %v3035_v5 = vpop.permute.xlu1 %3034  ;;  %v3670_v2 = vadd.f32 %v6018_v8, %v3669_v6 }
 0x30d   : > { %3108 = vst.msk [vmem:[#allocation2 + $0x5c] sm:$0xf] %vm3084_vm13, %v3035_v5  ;;  %v3033_v25 = vpop.permute.xlu0 %3032  ;;  %v2294_v61 = vpop.permute.xlu2 %2293 }
 0x30e   : > { %3107 = vst.msk [vmem:[#allocation2 + $0x58] sm:$0xf] %vm3084_vm13, %v3033_v25  ;;  %v3774_v7 = vadd.f32 %v3773_v42, %v3670_v2  ;;  %v3813_v9 = vmul.f32 %v3670_v2, %v3670_v2 }
 0x30f   : > { %3743 = vst [vmem:[%s6026_s5 + $0x20] sm:$0xff] %v3670_v2 }
 0x310   : > { %3445 = vst.msk [vmem:[#allocation2 + $0x5c] sm:$0xf] %vm3421_vm14, %v3372_v4  ;;  %v3844_v10 = vadd.f32 %v3843_v44, %v3813_v9 }
 0x311   : > { %2360 = vst.msk [vmem:[#allocation2 + $0x78] sm:$0xf] %vm2329_vm11, %v2294_v61 }
 0x313   : > { %v3671_v63 = vpop.f32.mrf.mxu0  ;;  %v3684_v14 = vpop.f32.mrf.mxu1 }
 0x314   : > { %v3370_v11 = vpop.permute.xlu1 %3369  ;;  %v3672_v13 = vadd.f32 %v6018_v8, %v3671_v63  ;;  %v6093_v15 = vadd.f32 %v6018_v8, %v3684_v14 }
 0x315   : > { %3444 = vst.msk [vmem:[#allocation2 + $0x58] sm:$0xf] %vm3421_vm14, %v3370_v11  ;;  %v3047_v12 = vpop.permute.xlu0 %3046  ;;  %v2490_v24 = vpop.permute.xlu2 %2489 }
 0x316   : > { %3114 = vst.msk [vmem:[#allocation2 + $0x74] sm:$0xf] %vm3084_vm13, %v3047_v12  ;;  %v3775_v16 = vadd.f32 %v3774_v7, %v3672_v13  ;;  %v3814_v17 = vmul.f32 %v3672_v13, %v3672_v13  ;;  %v3819_v3 = vmul.f32 %v6093_v15, %v6093_v15 }
 0x317   : > { %3744 = vst [vmem:[%s6026_s5 + $0x28] sm:$0xff] %v3672_v13 }
 0x318   : > { %3749 = vst [vmem:[%s6026_s5 + $0x50] sm:$0xff] %v6093_v15  ;;  %v3845_v18 = vadd.f32 %v3844_v10, %v3814_v17 }
 0x31b   : > { %v3686_v22 = vpop.f32.mrf.mxu1 }
 0x31c   : > { %v3384_v19 = vpop.permute.xlu1 %3383  ;;  %v4450_v20 = vld [vmem:[#allocation2 + $0x58] sm:$0xff]  ;;  %v3687_v23 = vadd.f32 %v6018_v8, %v3686_v22 }
 0x31d   : > { %3451 = vst.msk [vmem:[#allocation2 + $0x74] sm:$0xf] %vm3421_vm14, %v3384_v19  ;;  %v3382_v21 = vpop.permute.xlu0 %3381  ;;  %3713 = vmatmul.bf16.gmra.mxu2 %v4450_v20  ;;  %v3386_v30 = vpop.permute.xlu2 %3385 }
 0x31e   : > { %3450 = vst.msk [vmem:[#allocation2 + $0x70] sm:$0xf] %vm3421_vm14, %v3382_v21  ;;  %v3820_v25 = vmul.f32 %v3687_v23, %v3687_v23 }
 0x31f   : > { %3750 = vst [vmem:[%s6026_s5 + $0x58] sm:$0xff] %v3687_v23 }
 0x324   : > { %v2488_v26 = vpop.permute.xlu1 %2487 }
 0x325   : > { %v2296_v27 = vpop.permute.xlu0 %2295  ;;  %v4453_v28 = vld [vmem:[#allocation2 + $0x70] sm:$0xff]  ;;  %2554 = vst.msk [vmem:[#allocation2 + $0x78] sm:$0xf] %vm2523_vm12, %v2488_v26 }
 0x326   : > { %2361 = vst.msk [vmem:[#allocation2 + $0x7c] sm:$0xf] %vm2329_vm11, %v2296_v27  ;;  %3728 = vmatmul.bf16.gmra.mxu3 %v4453_v28 }
 0x327   : > { %2555 = vst.msk [vmem:[#allocation2 + $0x7c] sm:$0xf] %vm2523_vm12, %v2490_v24 }
 0x32c   : > { %v3051_v29 = vpop.permute.xlu1 %3050 }
 0x32d   : > { %v3049_v31 = vpop.permute.xlu0 %3048  ;;  %3116 = vst.msk [vmem:[#allocation2 + $0x7c] sm:$0xf] %vm3084_vm13, %v3051_v29 }
 0x32e   : > { %3115 = vst.msk [vmem:[#allocation2 + $0x78] sm:$0xf] %vm3084_vm13, %v3049_v31 }
 0x32f   : > { %3452 = vst.msk [vmem:[#allocation2 + $0x78] sm:$0xf] %vm3421_vm14, %v3386_v30  ;;  %v3825_v30 = vmul.f32 %v6068_v58, %v6068_v58 }
 0x331   : > { %v3704_v33 = vpop.f32.mrf.mxu2 }
 0x332   : > { %v6109_v35 = vadd.f32 %v6018_v8, %v3704_v33 }
 0x334   : > { %3757 = vst [vmem:[%s6026_s5 + $0x90] sm:$0xff] %v6109_v35 }
 0x335   : > { %v3388_v36 = vpop.permute.xlu0 %3387 }
 0x336   : > { %3453 = vst.msk [vmem:[#allocation2 + $0x7c] sm:$0xf] %vm3421_vm14, %v3388_v36  ;;  %v3826_v36 = vmul.f32 %v6076_v0, %v6076_v0 }
 0x339   : > { %v3706_v34 = vpop.f32.mrf.mxu2  ;;  %v3719_v37 = vpop.f32.mrf.mxu3 }
 0x33a   : > { %v6115_v32 = vadd.f32 %v6018_v8, %v3706_v34  ;;  %v6118_v38 = vadd.f32 %v6018_v8, %v3719_v37 }
 0x33c   : > { %3758 = vst [vmem:[%s6026_s5 + $0x98] sm:$0xff] %v6115_v32 }
 0x33d   : > { %v4454_v39 = vld [vmem:[#allocation2 + $0x78] sm:$0xff]  ;;  %3763 = vst [vmem:[%s6026_s5 + $0xc0] sm:$0xff] %v6118_v38 }
 0x33e   : > { %3733 = vmatmul.bf16.gmra.mxu3 %v4454_v39  ;;  %v3827_v39 = vmul.f32 %v6109_v35, %v6109_v35 }
 0x341   : > { %v3721_v41 = vpop.f32.mrf.mxu3 }
 0x342   : > { %v6125_v42 = vadd.f32 %v6018_v8, %v3721_v41 }
 0x344   : > { %3764 = vst [vmem:[%s6026_s5 + $0xc8] sm:$0xff] %v6125_v42 }
 0x34b   : > { %v3674_v43 = vpop.f32.mrf.mxu0 }
 0x34c   : > { %v3675_v44 = vadd.f32 %v6018_v8, %v3674_v43 }
 0x34e   : > { %3745 = vst [vmem:[%s6026_s5 + $0x30] sm:$0xff] %v3675_v44  ;;  %v3776_v45 = vadd.f32 %v3775_v16, %v3675_v44  ;;  %v3815_v46 = vmul.f32 %v3675_v44, %v3675_v44  ;;  %v3828_v44 = vmul.f32 %v6115_v32, %v6115_v32 }
 0x350   : > { %v3846_v47 = vadd.f32 %v3845_v18, %v3815_v46 }
 0x353   : > { %v3676_v48 = vpop.f32.mrf.mxu0  ;;  %v3689_v50 = vpop.f32.mrf.mxu1 }
 0x354   : > { %v3677_v51 = vadd.f32 %v6018_v8, %v3676_v48  ;;  %v3690_v52 = vadd.f32 %v6018_v8, %v3689_v50 }
 0x356   : > { %3746 = vst [vmem:[%s6026_s5 + $0x38] sm:$0xff] %v3677_v51  ;;  %v3777_v53 = vadd.f32 %v3776_v45, %v3677_v51  ;;  %v3816_v55 = vmul.f32 %v3677_v51, %v3677_v51  ;;  %v3821_v7 = vmul.f32 %v3690_v52, %v3690_v52 }
 0x357   : > { %3751 = vst [vmem:[%s6026_s5 + $0x60] sm:$0xff] %v3690_v52 }
 0x358   : > { %v3778_v59 = vadd.f32 %v3777_v53, %v6051_v40  ;;  %v3847_v56 = vadd.f32 %v3846_v47, %v3816_v55 }
 0x35a   : > { %v3779_v62 = vadd.f32 %v3778_v59, %v6059_v49  ;;  %v3848_v1 = vadd.f32 %v3847_v56, %v3817_v57 }
 0x35b   : > { %v3691_v54 = vpop.f32.mrf.mxu1 }
 0x35c   : > { %v3849_v4 = vadd.f32 %v3848_v1, %v3818_v60  ;;  %v3780_v5 = vadd.f32 %v3779_v62, %v6093_v15  ;;  %v3692_v6 = vadd.f32 %v6018_v8, %v3691_v54 }
 0x35e   : > { %v3781_v2 = vadd.f32 %v3780_v5, %v3687_v23  ;;  %v3850_v40 = vadd.f32 %v3849_v4, %v3819_v3  ;;  %3752 = vst [vmem:[%s6026_s5 + $0x68] sm:$0xff] %v3692_v6  ;;  %v3822_v11 = vmul.f32 %v3692_v6, %v3692_v6  ;;  %v3833_v3 = vmul.f32 %v6118_v38, %v6118_v38 }
 0x360   : > { %v3782_v61 = vadd.f32 %v3781_v2, %v3690_v52  ;;  %v3851_v49 = vadd.f32 %v3850_v40, %v3820_v25 }
 0x362   : > { %v3852_v9 = vadd.f32 %v3851_v49, %v3821_v7  ;;  %v3783_v10 = vadd.f32 %v3782_v61, %v3692_v6  ;;  %v3834_v6 = vmul.f32 %v6125_v42, %v6125_v42 }
 0x364   : > { %v3853_v63 = vadd.f32 %v3852_v9, %v3822_v11 }
 0x371   : > { %v3709_v12 = vpop.f32.mrf.mxu2 }
 0x372   : > { %v3710_v13 = vadd.f32 %v6018_v8, %v3709_v12 }
 0x374   : > { %3759 = vst [vmem:[%s6026_s5 + $0xa0] sm:$0xff] %v3710_v13  ;;  %v3829_v46 = vmul.f32 %v3710_v13, %v3710_v13 }
 0x379   : > { %v3711_v14 = vpop.f32.mrf.mxu2  ;;  %v3724_v15 = vpop.f32.mrf.mxu3 }
 0x37a   : > { %v3712_v16 = vadd.f32 %v6018_v8, %v3711_v14  ;;  %v3725_v17 = vadd.f32 %v6018_v8, %v3724_v15 }
 0x37c   : > { %3760 = vst [vmem:[%s6026_s5 + $0xa8] sm:$0xff] %v3712_v16  ;;  %v3830_v52 = vmul.f32 %v3712_v16, %v3712_v16  ;;  %v3835_v40 = vmul.f32 %v3725_v17, %v3725_v17 }
 0x37d   : > { %3765 = vst [vmem:[%s6026_s5 + $0xd0] sm:$0xff] %v3725_v17 }
 0x381   : > { %v3726_v18 = vpop.f32.mrf.mxu3 }
 0x382   : > { %v3727_v19 = vadd.f32 %v6018_v8, %v3726_v18 }
 0x383   : > { %v3694_v20 = vpop.f32.mrf.mxu1 }
 0x384   : > { %3766 = vst [vmem:[%s6026_s5 + $0xd8] sm:$0xff] %v3727_v19  ;;  %v3695_v21 = vadd.f32 %v6018_v8, %v3694_v20 }
 0x386   : > { %3753 = vst [vmem:[%s6026_s5 + $0x70] sm:$0xff] %v3695_v21  ;;  %v3823_v22 = vmul.f32 %v3695_v21, %v3695_v21  ;;  %v3784_v24 = vadd.f32 %v3783_v10, %v3695_v21  ;;  %v3836_v10 = vmul.f32 %v3727_v19, %v3727_v19 }
 0x388   : > { %v3854_v27 = vadd.f32 %v3853_v63, %v3823_v22 }
 0x38b   : > { %v3696_v23 = vpop.f32.mrf.mxu1 }
 0x38c   : > { %v3697_v26 = vadd.f32 %v6018_v8, %v3696_v23 }
 0x38e   : > { %3754 = vst [vmem:[%s6026_s5 + $0x78] sm:$0xff] %v3697_v26  ;;  %v3785_v28 = vadd.f32 %v3784_v24, %v3697_v26  ;;  %v3824_v29 = vmul.f32 %v3697_v26, %v3697_v26 }
 0x390   : > { %v3786_v31 = vadd.f32 %v3785_v28, %v6068_v58  ;;  %v3855_v33 = vadd.f32 %v3854_v27, %v3824_v29 }
 0x392   : > { %v3787_v34 = vadd.f32 %v3786_v31, %v6076_v0  ;;  %v3856_v37 = vadd.f32 %v3855_v33, %v3825_v30 }
 0x394   : > { %v3788_v41 = vadd.f32 %v3787_v34, %v6109_v35  ;;  %v3857_v43 = vadd.f32 %v3856_v37, %v3826_v36 }
 0x396   : > { %v3858_v45 = vadd.f32 %v3857_v43, %v3827_v39  ;;  %v3789_v58 = vadd.f32 %v3788_v41, %v6115_v32 }
 0x398   : > { %v3790_v47 = vadd.f32 %v3789_v58, %v3710_v13  ;;  %v3859_v48 = vadd.f32 %v3858_v45, %v3828_v44 }
 0x39a   : > { %v3860_v50 = vadd.f32 %v3859_v48, %v3829_v46  ;;  %v3791_v53 = vadd.f32 %v3790_v47, %v3712_v16 }
 0x39c   : > { %v3861_v59 = vadd.f32 %v3860_v50, %v3830_v52 }
 0x3a0   : > { %v3714_v51 = vpop.f32.mrf.mxu2 }
 0x3a1   : > { %v3715_v0 = vadd.f32 %v6018_v8, %v3714_v51 }
 0x3a3   : > { %3761 = vst [vmem:[%s6026_s5 + $0xb0] sm:$0xff] %v3715_v0  ;;  %v3831_v35 = vmul.f32 %v3715_v0, %v3715_v0  ;;  %v3792_v57 = vadd.f32 %v3791_v53, %v3715_v0 }
 0x3a5   : > { %v3862_v62 = vadd.f32 %v3861_v59, %v3831_v35 }
 0x3a8   : > { %v3716_v55 = vpop.f32.mrf.mxu2 }
 0x3a9   : > { %v3717_v56 = vadd.f32 %v6018_v8, %v3716_v55  ;;  %v3729_v60 = vpop.f32.mrf.mxu3 }
 0x3aa   : > { %v3730_v32 = vadd.f32 %v6018_v8, %v3729_v60 }
 0x3ab   : > { %3762 = vst [vmem:[%s6026_s5 + $0xb8] sm:$0xff] %v3717_v56  ;;  %v3793_v1 = vadd.f32 %v3792_v57, %v3717_v56  ;;  %v3832_v54 = vmul.f32 %v3717_v56, %v3717_v56 }
 0x3ac   : > { %3767 = vst [vmem:[%s6026_s5 + $0xe0] sm:$0xff] %v3730_v32  ;;  %v3837_v15 = vmul.f32 %v3730_v32, %v3730_v32 }
 0x3ad   : > { %v3794_v4 = vadd.f32 %v3793_v1, %v6118_v38  ;;  %v3863_v5 = vadd.f32 %v3862_v62, %v3832_v54 }
 0x3af   : > { %v3795_v25 = vadd.f32 %v3794_v4, %v6125_v42  ;;  %v3864_v2 = vadd.f32 %v3863_v5, %v3833_v3 }
 0x3b1   : > { %v3865_v61 = vadd.f32 %v3864_v2, %v3834_v6  ;;  %v3796_v7 = vadd.f32 %v3795_v25, %v3725_v17  ;;  %v3731_v49 = vpop.f32.mrf.mxu3 }
 0x3b2   : > { %v3732_v9 = vadd.f32 %v6018_v8, %v3731_v49 }
 0x3b3   : > { %v3797_v11 = vadd.f32 %v3796_v7, %v3727_v19  ;;  %v3866_v63 = vadd.f32 %v3865_v61, %v3835_v40 }
 0x3b4   : > { %3768 = vst [vmem:[%s6026_s5 + $0xe8] sm:$0xff] %v3732_v9  ;;  %v3838_v18 = vmul.f32 %v3732_v9, %v3732_v9 }
 0x3b5   : > { %v3867_v38 = vadd.f32 %v3866_v63, %v3836_v10  ;;  %v3798_v14 = vadd.f32 %v3797_v11, %v3730_v32 }
 0x3b7   : > { %v3868_v42 = vadd.f32 %v3867_v38, %v3837_v15  ;;  %v3799_v16 = vadd.f32 %v3798_v14, %v3732_v9 }
 0x3b9   : > { %v3869_v21 = vadd.f32 %v3868_v42, %v3838_v18 }
 0x3c1   : > { %v3734_v12 = vpop.f32.mrf.mxu3 }
 0x3c2   : > { %v3735_v13 = vadd.f32 %v6018_v8, %v3734_v12 }
 0x3c4   : > { %3769 = vst [vmem:[%s6026_s5 + $0xf0] sm:$0xff] %v3735_v13  ;;  %v3839_v17 = vmul.f32 %v3735_v13, %v3735_v13  ;;  %v3800_v22 = vadd.f32 %v3799_v16, %v3735_v13 }
 0x3c6   : > { %v3870_v23 = vadd.f32 %v3869_v21, %v3839_v17 }
 0x3c9   : > { %v3736_v20 = vpop.f32.mrf.mxu3 }
 0x3ca   : > { %v3737_v19 = vadd.f32 %v6018_v8, %v3736_v20 }
 0x3cc   : > { %3770 = vst [vmem:[%s6026_s5 + $0xf8] sm:$0xff] %v3737_v19  ;;  %v3801_v24 = vadd.f32 %v3800_v22, %v3737_v19  ;;  %v3840_v26 = vmul.f32 %v3737_v19, %v3737_v19 }
 0x3ce   : > { %v3802_v27 = vrot.slane %v3801_v24, 4  ;;  %v3871_v28 = vadd.f32 %v3870_v23, %v3840_v26 }
 0x3d0   : > { %v3803_v29 = vadd.f32 %v3802_v27, %v3801_v24  ;;  %v3872_v30 = vrot.slane %v3871_v28, 4 }
 0x3d2   : > { %v3804_v31 = vrot.slane %v3803_v29, 2  ;;  %v3873_v33 = vadd.f32 %v3872_v30, %v3871_v28 }
 0x3d4   : > { %v3805_v36 = vadd.f32 %v3804_v31, %v3803_v29  ;;  %v3874_v34 = vrot.slane %v3873_v33, 2 }
 0x3d6   : > { %v3806_v37 = vrot.slane %v3805_v36, 1  ;;  %v3875_v39 = vadd.f32 %v3874_v34, %v3873_v33 }
 0x3d8   : > { %v3807_v8 = vadd.f32 %v3806_v37, %v3805_v36  ;;  %v3876_v41 = vrot.slane %v3875_v39, 1 }
 0x3da   : > { %3808 = vst [vmem:[%s267_s8] sm:$0x1] %v3807_v8  ;;  %v3877_v43 = vadd.f32 %v3876_v41, %v3875_v39 }
 0x3dc   : > { %3878 = vst [vmem:[%s267_s8 + $0x1] sm:$0x1] %v3877_v43 }
 0x3dd PF: > { %s15_s17 = sadd.s32 1, %s4544_s17   ;;  %s6210_s15 = smov %s4540_s16 }
 0x3de   : > { %p12_p5 = scmp.ge.s32.totalorder %s15_s17, 4   ;;  %s6211_s16 = smov %s6213_s18 }
 0x3e0   :  { %14 = sbr.rel (!%p12_p5) target bundleno = 2 (0x2), region = 82 }

// kernel: conv_block_forward.6
= control target key start
LH: loop header
LB: loop body
LE: loop exit
PB: predicated region body
PF: predicated region fallthrough
CT: control target
= control target key end

     0   :  { %s4580_s15 = smov 0   ;;  %s4582_s16 = smov 0   ;;  %s6201_s0 = inlined_call_operand.vmem [shape: bf16[2,18,18,8], index: 0, kind: input, shape index: {}]   ;;  %s6202_s1 = inlined_call_operand.vmem [shape: bf16[128,128], index: 1, kind: input, shape index: {}]   ;;  %s6203_s2 = inlined_call_operand.vmem [shape: f32[1,128], index: 2, kind: input, shape index: {}]   ;;  %s6204_s3 = inlined_call_operand.vmem [shape: f32[2,256,128], index: 3, kind: output, shape index: {0}]   ;;  %s6205_s4 = inlined_call_operand.vmem [shape: f32[2,2,128], index: 4, kind: output, shape index: {1}]  }
   0x1   :  { %s4584_s17 = smov 0  }
   0x2 LB: > { %s27_s18 = sadd.s32 1, %s4540_s16  ;;  %p4031_p0 = scmp.ge.s32.totalorder %s4544_s17, 1  ;;  %s4544_s17 = sphi %s4584_s17, %s15_s17   ;;  %s4540_s16 = sphi %s4582_s16, %s6211_s16   ;;  %s4536_s15 = sphi %s4580_s15, %s6210_s15  }
   0x3   : > { %p29_p1 = scmp.ge.s32.totalorder %s27_s18, 2  ;;  %p198_p2 = scmp.lt.s32.totalorder %s4544_s17, 3 }
   0x5   : > { %s6213_s18 = smov (%p29_p1, %s27_s18), 0  ;;  %p199_p3 = pnand %p4031_p0, %p198_p2 }
   0x6   : > { %p241_p4 = scmp.lt.s32.totalorder (!%p199_p3), %s4536_s15, 1  ;;  %s4546_s23 = smov (!%p199_p3), 8  }
   0x7   : > { %202 = sbr.rel (%p199_p3) target bundleno = 989 (0x3dd), region = 32  ;;  %s4548_s24 = smov (!%p199_p3), 16  }
   0x8   : > { %s4549_s25 = smov (!%p199_p3), 24   ;;  %s4550_s26 = smov (!%p199_p3), 32  }
   0x9   : > { %s4551_s27 = smov (!%p199_p3), 40   ;;  %s4552_s28 = smov (!%p199_p3), 48  }
   0xa   : > { %s4553_s29 = smov (!%p199_p3), 56   ;;  %s4554_s30 = smov (!%p199_p3), 64  }
   0xc   : > { %s6215_s15 = smov (!%p241_p4, %s4536_s15), 1  ;;  %vm414_vm0 = vsmask.f32 3328  ;;  %vm415_vm1 = vsmask.f32 7440  ;;  %vm1026_vm3 = vcmask 1042432  }
   0xd   : > { %s4487_s19 = smul.u32 216, %s6215_s15  ;;  %vm4615_vm2 = vmor %vm414_vm0, %vm415_vm1  ;;  %vm1027_vm4 = vcmask 1046532   ;;  %vm333_vm6 = vcmask 60416   ;;  %vm897_vm7 = vcmask 126016   ;;  %vm1237_vm8 = vcmask 191616  }
   0xe   : > { %vm4789_vm5 = vmor %vm1026_vm3, %vm1027_vm4  ;;  %vm1431_vm9 = vcmask 257216   ;;  %vm1992_vm10 = vcmask 322816   ;;  %vm2329_vm11 = vcmask 388416   ;;  %vm2523_vm12 = vcmask 454016  }
   0xf   : > { %s4604_s22 = scalar_lea.vmem %s6201_s0, %s4487_s19  ;;  %vm3084_vm13 = vcmask 519616   ;;  %vm3421_vm14 = vcmask 585216  }
  0x10   : > { %v369_v0 = vld [vmem:[%s4604_s22 + $0xc] sm:$0xf]  ;;  %v370_v1 = vld [vmem:[%s4604_s22 + $0x10] sm:$0xf]  ;;  %v366_v2 = vld [vmem:[%s4604_s22] sm:$0xf] }
  0x11   : > { %v442_v3 = vshrl.u32 %v369_v0, 16  ;;  %v445_v4 = vshll.u32 %v369_v0, 16  ;;  %v451_v5 = vshll.u32 %v370_v1, 16  ;;  %v455_v6 = vshrl.u32 %v370_v1, 16  ;;  %v367_v7 = vld [vmem:[%s4604_s22 + $0x4] sm:$0xf] }
  0x12   : > { %v418_v8 = vshrl.u32 %v366_v2, 16  ;;  %v421_v9 = vshll.u32 %v366_v2, 16  ;;  %v427_v10 = vshll.u32 %v367_v7, 16  ;;  %v431_v11 = vshrl.u32 %v367_v7, 16  ;;  %v371_v12 = vld [vmem:[%s4604_s22 + $0x14] sm:$0x1] }
  0x13   : > { %v444_v13 = vrot.slane %v442_v3, 4  ;;  %v447_v14 = vrot.slane %v445_v4, 5  ;;  %v453_v15 = vrot.slane %v451_v5, 5  ;;  %v457_v16 = vrot.slane %v455_v6, 4  ;;  %v368_v17 = vld [vmem:[%s4604_s22 + $0x8] sm:$0x1] }
  0x14   : > { %v420_v18 = vrot.slane %v418_v8, 4  ;;  %v423_v19 = vrot.slane %v421_v9, 5  ;;  %v433_v20 = vrot.slane %v431_v11, 4  ;;  %v376_v21 = vld [vmem:[%s4604_s22 + $0x28] sm:$0xf]  ;;  %v461_v24 = vshll.u32 %v371_v12, 16 }
  0x15   : > { %v448_v22 = vor.u32 %v447_v14, %v444_v13  ;;  %v458_v23 = vor.u32 %v457_v16, %v453_v15  ;;  %v429_v27 = vrot.slane %v427_v10, 5  ;;  %v499_v28 = vshll.u32 %v376_v21, 16  ;;  %v375_v30 = vld [vmem:[%s4604_s22 + $0x24] sm:$0xf]  ;;  %v372_v35 = vld [vmem:[%s4604_s22 + $0x18] sm:$0xf] }
  0x16   : > { %v424_v26 = vor.u32 %v423_v19, %v420_v18  ;;  %v503_v29 = vshrl.u32 %v376_v21, 16  ;;  %v437_v32 = vshll.u32 %v368_v17, 16  ;;  %v463_v38 = vrot.slane %v461_v24, 5  ;;  %v373_v40 = vld [vmem:[%s4604_s22 + $0x1c] sm:$0xf] }
  0x17   : > { %v449_v31 = vrot.slane %v448_v22, 4  ;;  %v434_v34 = vor.u32 %v433_v20, %v429_v27  ;;  %v459_v37 = vrot.slane %v458_v23, 4  ;;  %v490_v39 = vshrl.u32 %v375_v30, 16  ;;  %v377_v42 = vld [vmem:[%s4604_s22 + $0x2c] sm:$0x1] }
  0x18   : > { %v425_v33 = vrot.slane %v424_v26, 4  ;;  %v4628_v43 = vrot.slane %v499_v28, 5  ;;  %v505_v44 = vrot.slane %v503_v29, 4  ;;  %v493_v45 = vshll.u32 %v375_v30, 16  ;;  %v381_v50 = vld [vmem:[%s4604_s22 + $0x3c] sm:$0xf] }
  0x19   : > { %v454_v36 = vsel %vm4615_vm2, %v449_v31, %v453_v15  ;;  %v439_v46 = vrot.slane %v437_v32, 5  ;;  %v492_v47 = vrot.slane %v490_v39, 4  ;;  %v466_v48 = vshrl.u32 %v372_v35, 16  ;;  %v379_v58 = vld [vmem:[%s4604_s22 + $0x34] sm:$0xf] }
  0x1a   : > { %805 = vrot.lane.b32.xlu1 %v454_v36, %s4546_s23  ;;  %v430_v41 = vsel %vm4615_vm2, %v425_v33, %v429_v27  ;;  %v469_v49 = vshll.u32 %v372_v35, 16  ;;  %v435_v51 = vrot.slane %v434_v34, 4  ;;  %v495_v52 = vrot.slane %v493_v45, 5  ;;  %v374_v6 = vld [vmem:[%s4604_s22 + $0x20] sm:$0x1] }
  0x1b   : > { %801 = vrot.lane.b32.xlu0 %v430_v41, %s4546_s23  ;;  %v475_v53 = vshll.u32 %v373_v40, 16  ;;  %v479_v54 = vshrl.u32 %v373_v40, 16  ;;  %v509_v55 = vshll.u32 %v377_v42, 16  ;;  %v468_v56 = vrot.slane %v466_v48, 4  ;;  %v382_v15 = vld [vmem:[%s4604_s22 + $0x40] sm:$0xf] }
  0x1c   : > { %v471_v57 = vrot.slane %v469_v49, 5  ;;  %v506_v59 = vor.u32 %v505_v44, %v4628_v43  ;;  %v538_v61 = vshrl.u32 %v381_v50, 16  ;;  %v541_v62 = vshll.u32 %v381_v50, 16  ;;  %v380_v16 = vld [vmem:[%s4604_s22 + $0x38] sm:$0x1] }
  0x1d   : > { %v481_v60 = vrot.slane %v479_v54, 4  ;;  %v464_v63 = vsel %vm4615_vm2, %v459_v37, %v463_v38  ;;  %v496_v0 = vor.u32 %v495_v52, %v492_v47  ;;  %v477_v2 = vrot.slane %v475_v53, 5  ;;  %v385_v20 = vld [vmem:[%s4604_s22 + $0x4c] sm:$0xf]  ;;  %v378_v21 = vld [vmem:[%s4604_s22 + $0x30] sm:$0xf] }
  0x1e   : > { %v472_v1 = vor.u32 %v471_v57, %v468_v56  ;;  %v440_v3 = vsel %vm4615_vm2, %v435_v51, %v439_v46  ;;  %v523_v4 = vshll.u32 %v379_v58, 16  ;;  %v527_v5 = vshrl.u32 %v379_v58, 16  ;;  %v384_v24 = vld [vmem:[%s4604_s22 + $0x48] sm:$0xf]  ;;  %v390_v47 = vld [vmem:[%s4604_s22 + $0x60] sm:$0xf] }
  0x1f   : > { %v511_v7 = vrot.slane %v509_v55, 5  ;;  %v507_v9 = vrot.slane %v506_v59, 4  ;;  %v540_v10 = vrot.slane %v538_v61, 4  ;;  %v543_v11 = vrot.slane %v541_v62, 5  ;;  %v386_v49 = vld [vmem:[%s4604_s22 + $0x50] sm:$0x1] }
  0x20   : > { %v473_v8 = vrot.slane %v472_v1, 4  ;;  %v482_v12 = vor.u32 %v481_v60, %v477_v2  ;;  %v497_v13 = vrot.slane %v496_v0, 4  ;;  %v485_v17 = vshll.u32 %v374_v6, 16  ;;  %v388_v53 = vld [vmem:[%s4604_s22 + $0x58] sm:$0xf] }
  0x21   : > { %v4646_v18 = vrot.slane %v523_v4, 5  ;;  %v529_v19 = vrot.slane %v527_v5, 4  ;;  %v512_v26 = vsel %vm4615_vm2, %v507_v9, %v511_v7  ;;  %v544_v27 = vor.u32 %v543_v11, %v540_v10  ;;  %v383_v58 = vld [vmem:[%s4604_s22 + $0x44] sm:$0x1]  ;;  %v394_v11 = vld [vmem:[%s4604_s22 + $0x70] sm:$0xf] }
  0x22   : > { %807 = vrot.lane.b32.xlu1 %v464_v63, %s4546_s23  ;;  %v478_v14 = vsel %vm4615_vm2, %v473_v8, %v477_v2  ;;  %v483_v22 = vrot.slane %v482_v12, 4  ;;  %v487_v23 = vrot.slane %v485_v17, 5  ;;  %v547_v28 = vshll.u32 %v382_v15, 16  ;;  %v387_v2 = vld [vmem:[%s4604_s22 + $0x54] sm:$0xf] }
  0x23   : > { %803 = vrot.lane.b32.xlu0 %v440_v3, %s4546_s23  ;;  %809 = vrot.lane.b32.xlu2 %v478_v14, %s4546_s23  ;;  %v533_v29 = vshll.u32 %v380_v16, 16  ;;  %v502_v30 = vsel %vm4615_vm2, %v497_v13, %v4628_v43  ;;  %v571_v31 = vshll.u32 %v385_v20, 16  ;;  %v575_v32 = vshrl.u32 %v385_v20, 16  ;;  %v391_v6 = vld [vmem:[%s4604_s22 + $0x64] sm:$0xf] }
  0x24   : > { %v514_v33 = vshrl.u32 %v378_v21, 16  ;;  %v530_v34 = vor.u32 %v529_v19, %v4646_v18  ;;  %v562_v35 = vshrl.u32 %v384_v24, 16  ;;  %v565_v36 = vshll.u32 %v384_v24, 16  ;;  %v393_v20 = vld [vmem:[%s4604_s22 + $0x6c] sm:$0xf] }
  0x25   : > { %v517_v37 = vshll.u32 %v378_v21, 16  ;;  %v551_v38 = vshrl.u32 %v382_v15, 16  ;;  %v488_v39 = vsel %vm4615_vm2, %v483_v22, %v487_v23  ;;  %v549_v41 = vrot.slane %v547_v28, 5  ;;  %v389_v15 = vld [vmem:[%s4604_s22 + $0x5c] sm:$0x1] }
  0x26   : > { %v516_v40 = vrot.slane %v514_v33, 4  ;;  %v545_v43 = vrot.slane %v544_v27, 4  ;;  %v535_v44 = vrot.slane %v533_v29, 5  ;;  %v4661_v45 = vrot.slane %v571_v31, 5 }
  0x27   : > { %v519_v42 = vrot.slane %v517_v37, 5  ;;  %v577_v46 = vrot.slane %v575_v32, 4  ;;  %v531_v48 = vrot.slane %v530_v34, 4  ;;  %v564_v50 = vrot.slane %v562_v35, 4 }
  0x28   : > { %v567_v51 = vrot.slane %v565_v36, 5  ;;  %v553_v54 = vrot.slane %v551_v38, 4  ;;  %v610_v56 = vshrl.u32 %v390_v47, 16  ;;  %v613_v57 = vshll.u32 %v390_v47, 16  ;;  %v397_v47 = vld [vmem:[%s4604_s22 + $0x7c] sm:$0xf] }
  0x29   : > { %v520_v52 = vor.u32 %v519_v42, %v516_v40  ;;  %v550_v59 = vsel %vm4615_vm2, %v545_v43, %v549_v41  ;;  %v578_v60 = vor.u32 %v577_v46, %v4661_v45  ;;  %v581_v61 = vshll.u32 %v386_v49, 16  ;;  %v399_v42 = vld [vmem:[%s4604_s22 + $0x84] sm:$0xf]  ;;  %v392_v49 = vld [vmem:[%s4604_s22 + $0x68] sm:$0x1] }
  0x2a   : > { %815 = vrot.lane.b32.xlu1 %v512_v26, %s4546_s23  ;;  %v536_v62 = vsel %vm4615_vm2, %v531_v48, %v535_v44  ;;  %v568_v63 = vor.u32 %v567_v51, %v564_v50  ;;  %v595_v0 = vshll.u32 %v388_v53, 16  ;;  %v599_v1 = vshrl.u32 %v388_v53, 16 }
  0x2b   : > { %813 = vrot.lane.b32.xlu0 %v502_v30, %s4546_s23  ;;  %811 = vrot.lane.b32.xlu2 %v488_v39, %s4546_s23  ;;  %v521_v55 = vrot.slane %v520_v52, 4  ;;  %v554_v4 = vor.u32 %v553_v54, %v549_v41  ;;  %v557_v5 = vshll.u32 %v383_v58, 16  ;;  %v612_v7 = vrot.slane %v610_v56, 4  ;;  %v395_v41 = vld [vmem:[%s4604_s22 + $0x74] sm:$0x1] }
  0x2c   : > { %v615_v8 = vrot.slane %v613_v57, 5  ;;  %v579_v9 = vrot.slane %v578_v60, 4  ;;  %v583_v10 = vrot.slane %v581_v61, 5  ;;  %v586_v12 = vshrl.u32 %v387_v2, 16  ;;  %v396_v54 = vld [vmem:[%s4604_s22 + $0x78] sm:$0xf] }
  0x2d   : > { %v526_v3 = vsel %vm4615_vm2, %v521_v55, %v4646_v18  ;;  %v589_v13 = vshll.u32 %v387_v2, 16  ;;  %v569_v14 = vrot.slane %v568_v63, 4  ;;  %v4683_v16 = vrot.slane %v595_v0, 5 }
  0x2e   : > { %v601_v17 = vrot.slane %v599_v1, 4  ;;  %v555_v18 = vrot.slane %v554_v4, 4  ;;  %v559_v19 = vrot.slane %v557_v5, 5  ;;  %v588_v21 = vrot.slane %v586_v12, 4  ;;  %v400_v4 = vld [vmem:[%s4604_s22 + $0x88] sm:$0xf] }
  0x2f   : > { %v591_v22 = vrot.slane %v589_v13, 5  ;;  %v616_v23 = vor.u32 %v615_v8, %v612_v7  ;;  %v619_v24 = vshll.u32 %v391_v6, 16  ;;  %v643_v26 = vshll.u32 %v394_v11, 16 }
  0x30   : > { %v647_v27 = vshrl.u32 %v394_v11, 16  ;;  %v584_v28 = vsel %vm4615_vm2, %v579_v9, %v583_v10  ;;  %v605_v29 = vshll.u32 %v389_v15, 16  ;;  %v574_v30 = vsel %vm4615_vm2, %v569_v14, %v4661_v45  ;;  %v403_v9 = vld [vmem:[%s4604_s22 + $0x94] sm:$0xf]  ;;  %v398_v11 = vld [vmem:[%s4604_s22 + $0x80] sm:$0x1] }
  0x31   : > { %v602_v31 = vor.u32 %v601_v17, %v4683_v16  ;;  %v634_v32 = vshrl.u32 %v393_v20, 16  ;;  %v637_v33 = vshll.u32 %v393_v20, 16  ;;  %v623_v34 = vshrl.u32 %v391_v6, 16  ;;  %v402_v14 = vld [vmem:[%s4604_s22 + $0x90] sm:$0xf] }
  0x32   : > { %821 = vrot.lane.b32.xlu1 %v550_v59, %s4546_s23  ;;  %v560_v35 = vsel %vm4615_vm2, %v555_v18, %v559_v19  ;;  %v592_v36 = vor.u32 %v591_v22, %v588_v21  ;;  %v617_v37 = vrot.slane %v616_v23, 4  ;;  %v621_v38 = vrot.slane %v619_v24, 5 }
  0x33   : > { %819 = vrot.lane.b32.xlu0 %v536_v62, %s4546_s23  ;;  %817 = vrot.lane.b32.xlu2 %v526_v3, %s4546_s23  ;;  %v4695_v39 = vrot.slane %v643_v26, 5  ;;  %v649_v40 = vrot.slane %v647_v27, 4  ;;  %v603_v43 = vrot.slane %v602_v31, 4  ;;  %v607_v44 = vrot.slane %v605_v29, 5 }
  0x34   : > { %v636_v45 = vrot.slane %v634_v32, 4  ;;  %v639_v46 = vrot.slane %v637_v33, 5  ;;  %v593_v48 = vrot.slane %v592_v36, 4  ;;  %v625_v50 = vrot.slane %v623_v34, 4 }
  0x35   : > { %v622_v51 = vsel %vm4615_vm2, %v617_v37, %v621_v38  ;;  %v650_v52 = vor.u32 %v649_v40, %v4695_v39  ;;  %v653_v53 = vshll.u32 %v395_v41, 16  ;;  %v682_v55 = vshrl.u32 %v399_v42, 16  ;;  %v404_v37 = vld [vmem:[%s4604_s22 + $0x98] sm:$0x1]  ;;  %v408_v40 = vld [vmem:[%s4604_s22 + $0xa8] sm:$0xf] }
  0x36   : > { %v685_v56 = vshll.u32 %v399_v42, 16  ;;  %v667_v57 = vshll.u32 %v397_v47, 16  ;;  %v671_v58 = vshrl.u32 %v397_v47, 16  ;;  %v608_v59 = vsel %vm4615_vm2, %v603_v43, %v607_v44  ;;  %v406_v42 = vld [vmem:[%s4604_s22 + $0xa0] sm:$0xf] }
  0x37   : > { %v640_v60 = vor.u32 %v639_v46, %v636_v45  ;;  %v629_v61 = vshll.u32 %v392_v49, 16  ;;  %v598_v62 = vsel %vm4615_vm2, %v593_v48, %v4683_v16  ;;  %v626_v63 = vor.u32 %v625_v50, %v621_v38  ;;  %v401_v43 = vld [vmem:[%s4604_s22 + $0x8c] sm:$0x1]  ;;  %v405_v47 = vld [vmem:[%s4604_s22 + $0x9c] sm:$0xf] }
  0x38   : > { %v658_v0 = vshrl.u32 %v396_v54, 16  ;;  %v661_v1 = vshll.u32 %v396_v54, 16  ;;  %v651_v2 = vrot.slane %v650_v52, 4  ;;  %v655_v3 = vrot.slane %v653_v53, 5 }
  0x39   : > { %v684_v5 = vrot.slane %v682_v55, 4  ;;  %v687_v6 = vrot.slane %v685_v56, 5  ;;  %v4715_v7 = vrot.slane %v667_v57, 5  ;;  %v673_v8 = vrot.slane %v671_v58, 4 }
  0x3a   : > { %827 = vrot.lane.b32.xlu1 %v584_v28, %s4546_s23  ;;  %v641_v10 = vrot.slane %v640_v60, 4  ;;  %v627_v12 = vrot.slane %v626_v63, 4  ;;  %v631_v13 = vrot.slane %v629_v61, 5  ;;  %v660_v15 = vrot.slane %v658_v0, 4 }
  0x3b   : > { %825 = vrot.lane.b32.xlu0 %v574_v30, %s4546_s23  ;;  %823 = vrot.lane.b32.xlu2 %v560_v35, %s4546_s23  ;;  %v663_v16 = vrot.slane %v661_v1, 5  ;;  %v691_v17 = vshll.u32 %v400_v4, 16  ;;  %v715_v18 = vshll.u32 %v403_v9, 16  ;;  %v719_v19 = vshrl.u32 %v403_v9, 16  ;;  %v407_v1 = vld [vmem:[%s4604_s22 + $0xa4] sm:$0x1] }
  0x3c   : > { %v656_v20 = vsel %vm4615_vm2, %v651_v2, %v655_v3  ;;  %v688_v21 = vor.u32 %v687_v6, %v684_v5  ;;  %v674_v22 = vor.u32 %v673_v8, %v4715_v7  ;;  %v677_v23 = vshll.u32 %v398_v11, 16  ;;  %v412_v5 = vld [vmem:[%s4604_s22 + $0xb8] sm:$0xf]  ;;  %v411_v8 = vld [vmem:[%s4604_s22 + $0xb4] sm:$0xf] }
  0x3d   : > { %v646_v24 = vsel %vm4615_vm2, %v641_v10, %v4695_v39  ;;  %v706_v26 = vshrl.u32 %v402_v14, 16  ;;  %v709_v27 = vshll.u32 %v402_v14, 16  ;;  %v695_v28 = vshrl.u32 %v400_v4, 16 }
  0x3e   : > { %v632_v29 = vsel %vm4615_vm2, %v627_v12, %v631_v13  ;;  %v664_v30 = vor.u32 %v663_v16, %v660_v15  ;;  %v4730_v31 = vrot.slane %v715_v18, 5  ;;  %v721_v32 = vrot.slane %v719_v19, 4 }
  0x3f   : > { %v689_v33 = vrot.slane %v688_v21, 4  ;;  %v693_v34 = vrot.slane %v691_v17, 5  ;;  %v675_v35 = vrot.slane %v674_v22, 4  ;;  %v679_v36 = vrot.slane %v677_v23, 5 }
  0x40   : > { %v708_v38 = vrot.slane %v706_v26, 4  ;;  %v711_v39 = vrot.slane %v709_v27, 5  ;;  %v665_v41 = vrot.slane %v664_v30, 4  ;;  %v697_v44 = vrot.slane %v695_v28, 4 }
  0x41   : > { %v722_v45 = vor.u32 %v721_v32, %v4730_v31  ;;  %v725_v46 = vshll.u32 %v404_v37, 16  ;;  %v694_v48 = vsel %vm4615_vm2, %v689_v33, %v693_v34  ;;  %v680_v49 = vsel %vm4615_vm2, %v675_v35, %v679_v36  ;;  %v410_v36 = vld [vmem:[%s4604_s22 + $0xb0] sm:$0x1] }
  0x42   : > { %833 = vrot.lane.b32.xlu1 %v622_v51, %s4546_s23  ;;  %v754_v50 = vshrl.u32 %v408_v40, 16  ;;  %v757_v51 = vshll.u32 %v408_v40, 16  ;;  %v712_v52 = vor.u32 %v711_v39, %v708_v38  ;;  %v739_v53 = vshll.u32 %v406_v42, 16 }
  0x43   : > { %831 = vrot.lane.b32.xlu0 %v608_v59, %s4546_s23  ;;  %829 = vrot.lane.b32.xlu2 %v598_v62, %s4546_s23  ;;  %v743_v54 = vshrl.u32 %v406_v42, 16  ;;  %v701_v55 = vshll.u32 %v401_v43, 16  ;;  %v670_v56 = vsel %vm4615_vm2, %v665_v41, %v4715_v7  ;;  %v698_v57 = vor.u32 %v697_v44, %v693_v34  ;;  %v409_v62 = vld [vmem:[%s4604_s22 + $0xac] sm:$0xf] }
  0x44   : > { %v730_v58 = vshrl.u32 %v405_v47, 16  ;;  %v733_v59 = vshll.u32 %v405_v47, 16  ;;  %v723_v60 = vrot.slane %v722_v45, 4  ;;  %v727_v61 = vrot.slane %v725_v46, 5 }
  0x45   : > { %v756_v63 = vrot.slane %v754_v50, 4  ;;  %v759_v0 = vrot.slane %v757_v51, 5  ;;  %v713_v2 = vrot.slane %v712_v52, 4  ;;  %v741_v3 = vrot.slane %v739_v53, 5  ;;  %v933_v52 = vld [vmem:[%s4604_s22 + $0xc] sm:$0xe] }
  0x46   : > { %v745_v4 = vrot.slane %v743_v54, 4  ;;  %v699_v6 = vrot.slane %v698_v57, 4  ;;  %v703_v7 = vrot.slane %v701_v55, 5  ;;  %v732_v9 = vrot.slane %v730_v58, 4  ;;  %v934_v54 = vld [vmem:[%s4604_s22 + $0x10] sm:$0xf] }
  0x47   : > { %v735_v10 = vrot.slane %v733_v59, 5  ;;  %v728_v11 = vsel %vm4615_vm2, %v723_v60, %v727_v61  ;;  %v763_v12 = vshll.u32 %v409_v62, 16  ;;  %v760_v13 = vor.u32 %v759_v0, %v756_v63  ;;  %v932_v55 = vld [vmem:[%s4604_s22 + $0x8] sm:$0x1]  ;;  %v930_v58 = vld [vmem:[%s4604_s22] sm:$0xe] }
  0x48   : > { %v749_v14 = vshll.u32 %v407_v1, 16  ;;  %v787_v15 = vshll.u32 %v412_v5, 16  ;;  %v791_v16 = vshrl.u32 %v412_v5, 16  ;;  %v718_v17 = vsel %vm4615_vm2, %v713_v2, %v4730_v31  ;;  %v413_v31 = vld [vmem:[%s4604_s22 + $0xbc] sm:$0x1] }
  0x49   : > { %v746_v18 = vor.u32 %v745_v4, %v741_v3  ;;  %v778_v19 = vshrl.u32 %v411_v8, 16  ;;  %v767_v21 = vshrl.u32 %v409_v62, 16  ;;  %v704_v22 = vsel %vm4615_vm2, %v699_v6, %v703_v7  ;;  %v305_v62 = vld [vmem:[%s4604_s22 + $0x18] sm:$0xf]  ;;  %v937_v1 = vld [vmem:[%s4604_s22 + $0x1c] sm:$0xf] }
  0x4a   : > { %839 = vrot.lane.b32.xlu1 %v656_v20, %s4546_s23  ;;  %v781_v20 = vshll.u32 %v411_v8, 16  ;;  %v736_v23 = vor.u32 %v735_v10, %v732_v9  ;;  %v765_v26 = vrot.slane %v763_v12, 5  ;;  %v789_v27 = vrot.slane %v787_v15, 5  ;;  %v938_v7 = vld [vmem:[%s4604_s22 + $0x20] sm:$0x1] }
  0x4b   : > { %837 = vrot.lane.b32.xlu0 %v646_v24, %s4546_s23  ;;  %835 = vrot.lane.b32.xlu2 %v632_v29, %s4546_s23  ;;  %v761_v24 = vrot.slane %v760_v13, 4  ;;  %v793_v28 = vrot.slane %v791_v16, 4  ;;  %v747_v29 = vrot.slane %v746_v18, 4  ;;  %v751_v30 = vrot.slane %v749_v14, 5  ;;  %v936_v8 = vld [vmem:[%s4604_s22 + $0x18] sm:$0xe] }
  0x4c   : > { %v780_v32 = vrot.slane %v778_v19, 4  ;;  %v783_v33 = vrot.slane %v781_v20, 5  ;;  %v737_v34 = vrot.slane %v736_v23, 4  ;;  %v769_v35 = vrot.slane %v767_v21, 4  ;;  %v935_v10 = vld [vmem:[%s4604_s22 + $0x14] sm:$0x1] }
  0x4d   : > { %v766_v37 = vsel %vm4615_vm2, %v761_v24, %v765_v26  ;;  %v794_v38 = vor.u32 %v793_v28, %v789_v27  ;;  %v797_v39 = vshll.u32 %v413_v31, 16  ;;  %v752_v40 = vsel %vm4615_vm2, %v747_v29, %v751_v30  ;;  %v940_v14 = vld [vmem:[%s4604_s22 + $0x28] sm:$0xf]  ;;  %v942_v18 = vld [vmem:[%s4604_s22 + $0x30] sm:$0xe] }
  0x4e   : > { %v784_v41 = vor.u32 %v783_v33, %v780_v32  ;;  %v742_v42 = vsel %vm4615_vm2, %v737_v34, %v741_v3  ;;  %v770_v43 = vor.u32 %v769_v35, %v765_v26  ;;  %v773_v44 = vshll.u32 %v410_v36, 16  ;;  %v943_v20 = vld [vmem:[%s4604_s22 + $0x34] sm:$0xf]  ;;  %v939_v24 = vld [vmem:[%s4604_s22 + $0x24] sm:$0xe] }
  0x4f   : > { %v795_v45 = vrot.slane %v794_v38, 4  ;;  %v799_v46 = vrot.slane %v797_v39, 5  ;;  %v4037_v59 = vrot.slane %v933_v52, 9  ;;  %v1038_v60 = vrot.slane %v934_v54, 5  ;;  %v946_v30 = vld [vmem:[%s4604_s22 + $0x40] sm:$0xf] }
  0x50   : > { %v785_v47 = vrot.slane %v784_v41, 4  ;;  %v775_v50 = vrot.slane %v773_v44, 5  ;;  %v1034_v61 = vrot.slane %v932_v55, 5  ;;  %v4547_v2 = vmov 0   ;;  %v947_v36 = vld [vmem:[%s4604_s22 + $0x44] sm:$0x1] }
  0x51   : > { %v800_v51 = vsel %vm4615_vm2, %v795_v45, %v799_v46  ;;  %273 = vst [vmem:[#allocation2 + $0x10] sm:$0xf] %v4547_v2  ;;  %v4036_v3 = vrot.slane %v930_v58, 9  ;;  %v1039_v4 = vsel %vm4789_vm5, %v4037_v59, %v1038_v60  ;;  %v1045_v5 = vrot.slane %v937_v1, 5  ;;  %v944_v39 = vld [vmem:[%s4604_s22 + $0x38] sm:$0x1] }
  0x52   : > { %845 = vrot.lane.b32.xlu1 %v694_v48, %s4546_s23  ;;  %v931_v48 = vld [vmem:[%s4604_s22 + $0x4] sm:$0xf]  ;;  %v790_v53 = vsel %vm4615_vm2, %v785_v47, %v789_v27  ;;  %338 = vst.msk [vmem:[#allocation2 + $0x10] sm:$0xf] %vm333_vm6, %v305_v62  ;;  %v1048_v12 = vrot.slane %v938_v7, 5  ;;  %v4038_v13 = vrot.slane %v936_v8, 9 }
  0x53   : > { %843 = vrot.lane.b32.xlu0 %v680_v49, %s4546_s23  ;;  %841 = vrot.lane.b32.xlu2 %v670_v56, %s4546_s23  ;;  %v771_v49 = vrot.slane %v770_v43, 4  ;;  %v1031_v56 = vrot.slane %v931_v48, 5  ;;  %269 = vst [vmem:[#allocation2] sm:$0xf] %v4547_v2  ;;  %v1040_v15 = vrot.slane %v1038_v60, 4  ;;  %v1041_v16 = vrot.slane %v935_v10, 5 }
  0x54   : > { %270 = vst [vmem:[#allocation2 + $0x4] sm:$0xf] %v4547_v2  ;;  %v1046_v19 = vsel %vm4789_vm5, %v4038_v13, %v1045_v5  ;;  %v1052_v21 = vrot.slane %v940_v14, 5  ;;  %v4040_v26 = vrot.slane %v942_v18, 9  ;;  %v1059_v27 = vrot.slane %v943_v20, 5 }
  0x55   : > { %v776_v57 = vsel %vm4615_vm2, %v771_v49, %v775_v50  ;;  %v1033_v0 = vrot.slane %v1031_v56, 4  ;;  %271 = vst [vmem:[#allocation2 + $0x8] sm:$0xf] %v4547_v2  ;;  %v1032_v9 = vsel %vm4789_vm5, %v4036_v3, %v1031_v56  ;;  %v1042_v23 = vsel %vm4789_vm5, %v1040_v15, %v1041_v16  ;;  %v949_v43 = vld [vmem:[%s4604_s22 + $0x4c] sm:$0xf] }
  0x56   : > { %272 = vst [vmem:[#allocation2 + $0xc] sm:$0xf] %v4547_v2  ;;  %v1054_v28 = vrot.slane %v1052_v21, 4  ;;  %v4039_v31 = vrot.slane %v939_v24, 9  ;;  %v1060_v33 = vsel %vm4789_vm5, %v4040_v26, %v1059_v27  ;;  %v1066_v34 = vrot.slane %v946_v30, 5 }
  0x57   : > { %v1035_v6 = vsel %vm4789_vm5, %v1033_v0, %v1034_v61  ;;  %274 = vst [vmem:[#allocation2 + $0x14] sm:$0xf] %v4547_v2  ;;  %v1069_v41 = vrot.slane %v947_v36, 5  ;;  %v1061_v44 = vrot.slane %v1059_v27, 4  ;;  %v1062_v45 = vrot.slane %v944_v39, 5 }
  0x58   : > { %275 = vst [vmem:[#allocation2 + $0x18] sm:$0xf] %v4547_v2  ;;  %v1053_v38 = vsel %vm4789_vm5, %v4039_v31, %v1052_v21  ;;  %v951_v48 = vld [vmem:[%s4604_s22 + $0x54] sm:$0xe]  ;;  %v952_v50 = vld [vmem:[%s4604_s22 + $0x58] sm:$0xf] }
  0x59   : > { %276 = vst [vmem:[#allocation2 + $0x1c] sm:$0xf] %v4547_v2  ;;  %v950_v52 = vld [vmem:[%s4604_s22 + $0x50] sm:$0x1]  ;;  %v948_v54 = vld [vmem:[%s4604_s22 + $0x48] sm:$0xe] }
  0x5a   : > { %851 = vrot.lane.b32.xlu1 %v728_v11, %s4546_s23  ;;  %v1047_v11 = vrot.slane %v1045_v5, 4  ;;  %277 = vst [vmem:[#allocation2 + $0x20] sm:$0xf] %v4547_v2  ;;  %v303_v55 = vld [vmem:[%s4604_s22 + $0xc] sm:$0xf]  ;;  %v4043_v56 = vrot.slane %v951_v48, 9 }
  0x5b   : > { %849 = vrot.lane.b32.xlu0 %v718_v17, %s4546_s23  ;;  %847 = vrot.lane.b32.xlu2 %v704_v22, %s4546_s23  ;;  %278 = vst [vmem:[#allocation2 + $0x24] sm:$0xf] %v4547_v2  ;;  %v941_v22 = vld [vmem:[%s4604_s22 + $0x2c] sm:$0x1]  ;;  %v1076_v60 = vrot.slane %v950_v52, 5  ;;  %v4042_v1 = vrot.slane %v948_v54, 9 }
  0x5c   : > { %v1049_v17 = vsel %vm4789_vm5, %v1047_v11, %v1048_v12  ;;  %279 = vst [vmem:[#allocation2 + $0x28] sm:$0xf] %v4547_v2  ;;  %v1055_v29 = vrot.slane %v941_v22, 5  ;;  %v955_v61 = vld [vmem:[%s4604_s22 + $0x64] sm:$0xf] }
  0x5d   : > { %280 = vst [vmem:[#allocation2 + $0x2c] sm:$0xf] %v4547_v2  ;;  %v301_v0 = vld [vmem:[%s4604_s22] sm:$0xf]  ;;  %v306_v5 = vld [vmem:[%s4604_s22 + $0x1c] sm:$0xf] }
  0x5e   : > { %281 = vst [vmem:[#allocation2 + $0x30] sm:$0xf] %v4547_v2  ;;  %v1056_v35 = vsel %vm4789_vm5, %v1054_v28, %v1055_v29  ;;  %v956_v7 = vld [vmem:[%s4604_s22 + $0x68] sm:$0x1]  ;;  %v304_v8 = vld [vmem:[%s4604_s22 + $0x10] sm:$0xf] }
  0x5f   : > { %282 = vst [vmem:[#allocation2 + $0x34] sm:$0xf] %v4547_v2  ;;  %v953_v11 = vld [vmem:[%s4604_s22 + $0x5c] sm:$0x1]  ;;  %v302_v12 = vld [vmem:[%s4604_s22 + $0x4] sm:$0xf] }
  0x60   : > { %283 = vst [vmem:[#allocation2 + $0x38] sm:$0xf] %v4547_v2  ;;  %v1090_v14 = vrot.slane %v956_v7, 5  ;;  %v1083_v21 = vrot.slane %v953_v11, 5  ;;  %v308_v22 = vld [vmem:[%s4604_s22 + $0x28] sm:$0xf] }
  0x61   : > { %284 = vst [vmem:[#allocation2 + $0x3c] sm:$0xf] %v4547_v2  ;;  %v307_v26 = vld [vmem:[%s4604_s22 + $0x24] sm:$0xf]  ;;  %v960_v27 = vld [vmem:[%s4604_s22 + $0x78] sm:$0xe] }
  0x62   : > { %857 = vrot.lane.b32.xlu1 %v766_v37, %s4546_s23  ;;  %285 = vst [vmem:[#allocation2 + $0x40] sm:$0xf] %v4547_v2  ;;  %v945_v37 = vld [vmem:[%s4604_s22 + $0x3c] sm:$0xe]  ;;  %v959_v31 = vld [vmem:[%s4604_s22 + $0x74] sm:$0x1] }
  0x63   : > { %855 = vrot.lane.b32.xlu0 %v752_v40, %s4546_s23  ;;  %853 = vrot.lane.b32.xlu2 %v742_v42, %s4546_s23  ;;  %286 = vst [vmem:[#allocation2 + $0x44] sm:$0xf] %v4547_v2  ;;  %v1068_v40 = vrot.slane %v1066_v34, 4  ;;  %v4041_v42 = vrot.slane %v945_v37, 9  ;;  %v961_v29 = vld [vmem:[%s4604_s22 + $0x7c] sm:$0xf] }
  0x64   : > { %287 = vst [vmem:[#allocation2 + $0x48] sm:$0xf] %v4547_v2  ;;  %v1101_v36 = vrot.slane %v961_v29, 5  ;;  %v1097_v39 = vrot.slane %v959_v31, 5  ;;  %v315_v48 = vld [vmem:[%s4604_s22 + $0x54] sm:$0xf] }
  0x65   : > { %288 = vst [vmem:[#allocation2 + $0x4c] sm:$0xf] %v4547_v2  ;;  %v1070_v47 = vsel %vm4789_vm5, %v1068_v40, %v1069_v41  ;;  %v1067_v49 = vsel %vm4789_vm5, %v4041_v42, %v1066_v34  ;;  %v957_v34 = vld [vmem:[%s4604_s22 + $0x6c] sm:$0xe]  ;;  %v964_v40 = vld [vmem:[%s4604_s22 + $0x88] sm:$0xf] }
  0x66   : > { %289 = vst [vmem:[#allocation2 + $0x50] sm:$0xf] %v4547_v2  ;;  %v311_v42 = vld [vmem:[%s4604_s22 + $0x3c] sm:$0xf]  ;;  %v314_v52 = vld [vmem:[%s4604_s22 + $0x4c] sm:$0xf] }
  0x67   : > { %290 = vst [vmem:[#allocation2 + $0x54] sm:$0xf] %v4547_v2  ;;  %v962_v54 = vld [vmem:[%s4604_s22 + $0x80] sm:$0x1]  ;;  %v323_v31 = vld [vmem:[%s4604_s22 + $0x84] sm:$0xf] }
  0x68   : > { %291 = vst [vmem:[#allocation2 + $0x58] sm:$0xf] %v4547_v2 }
  0x69   : > { %292 = vst [vmem:[#allocation2 + $0x5c] sm:$0xf] %v4547_v2 }
  0x6a   : > { %863 = vrot.lane.b32.xlu1 %v800_v51, %s4546_s23  ;;  %293 = vst [vmem:[#allocation2 + $0x60] sm:$0xf] %v4547_v2  ;;  %v1073_v51 = vrot.slane %v949_v43, 5  ;;  %v4045_v43 = vrot.slane %v957_v34, 9  ;;  %v322_v34 = vld [vmem:[%s4604_s22 + $0x7c] sm:$0xf] }
  0x6b   : > { %861 = vrot.lane.b32.xlu0 %v790_v53, %s4546_s23  ;;  %859 = vrot.lane.b32.xlu2 %v776_v57, %s4546_s23  ;;  %294 = vst [vmem:[#allocation2 + $0x64] sm:$0xf] %v4547_v2  ;;  %v1063_v53 = vsel %vm4789_vm5, %v1061_v44, %v1062_v45  ;;  %v1080_v57 = vrot.slane %v952_v50, 5  ;;  %v310_v44 = vld [vmem:[%s4604_s22 + $0x34] sm:$0xf] }
  0x6c   : > { %295 = vst [vmem:[#allocation2 + $0x68] sm:$0xf] %v4547_v2  ;;  %v1075_v59 = vrot.slane %v1073_v51, 4  ;;  %v1074_v10 = vsel %vm4789_vm5, %v4042_v1, %v1073_v51  ;;  %v965_v50 = vld [vmem:[%s4604_s22 + $0x8c] sm:$0x1]  ;;  %v1104_v1 = vrot.slane %v962_v54, 5 }
  0x6d   : > { %296 = vst [vmem:[#allocation2 + $0x6c] sm:$0xf] %v4547_v2  ;;  %v1082_v20 = vrot.slane %v1080_v57, 4  ;;  %v963_v51 = vld [vmem:[%s4604_s22 + $0x84] sm:$0xe] }
  0x6e   : > { %297 = vst [vmem:[#allocation2 + $0x70] sm:$0xf] %v4547_v2  ;;  %v329_v54 = vld [vmem:[%s4604_s22 + $0xa8] sm:$0xf] }
  0x6f   : > { %298 = vst [vmem:[#allocation2 + $0x74] sm:$0xf] %v4547_v2 }
  0x70   : > { %299 = vst [vmem:[#allocation2 + $0x78] sm:$0xf] %v4547_v2 }
  0x71   : > { %300 = vst [vmem:[#allocation2 + $0x7c] sm:$0xf] %v4547_v2  ;;  %v1077_v2 = vsel %vm4789_vm5, %v1075_v59, %v1076_v60  ;;  %v313_v59 = vld [vmem:[%s4604_s22 + $0x48] sm:$0xf]  ;;  %v967_v60 = vld [vmem:[%s4604_s22 + $0x94] sm:$0xf] }
  0x72   : > { %1145 = vrot.lane.b32.xlu1 %v1039_v4, %s4548_s24  ;;  %336 = vst.msk [vmem:[#allocation2 + $0x8] sm:$0xf] %vm333_vm6, %v303_v55  ;;  %v1081_v4 = vsel %vm4789_vm5, %v4043_v56, %v1080_v57  ;;  %v1111_v56 = vrot.slane %v965_v50, 5  ;;  %v4047_v57 = vrot.slane %v963_v51, 9  ;;  %v330_v51 = vld [vmem:[%s4604_s22 + $0xac] sm:$0xf] }
  0x73   : > { %1143 = vrot.lane.b32.xlu0 %v1035_v6, %s4548_s24  ;;  %1141 = vrot.lane.b32.xlu2 %v1032_v9, %s4548_s24  ;;  %v1087_v6 = vrot.slane %v955_v61, 5  ;;  %334 = vst.msk [vmem:[#allocation2] sm:$0xf] %vm333_vm6, %v301_v0  ;;  %v954_v9 = vld [vmem:[%s4604_s22 + $0x60] sm:$0xe]  ;;  %v1103_v0 = vrot.slane %v1101_v36, 4 }
  0x74   : > { %339 = vst.msk [vmem:[#allocation2 + $0x14] sm:$0xf] %vm333_vm6, %v306_v5  ;;  %v4044_v16 = vrot.slane %v954_v9, 9  ;;  %v316_v9 = vld [vmem:[%s4604_s22 + $0x58] sm:$0xf] }
  0x75   : > { %v1089_v13 = vrot.slane %v1087_v6, 4  ;;  %337 = vst.msk [vmem:[#allocation2 + $0xc] sm:$0xf] %vm333_vm6, %v304_v8  ;;  %v1115_v8 = vrot.slane %v967_v60, 5  ;;  %v1105_v11 = vsel %vm4789_vm5, %v1103_v0, %v1104_v1  ;;  %v332_v0 = vld [vmem:[%s4604_s22 + $0xb8] sm:$0xf] }
  0x76   : > { %335 = vst.msk [vmem:[#allocation2 + $0x4] sm:$0xf] %vm333_vm6, %v302_v12  ;;  %v1088_v28 = vsel %vm4789_vm5, %v4044_v16, %v1087_v6  ;;  %v970_v6 = vld [vmem:[%s4604_s22 + $0xa0] sm:$0xf]  ;;  %v321_v12 = vld [vmem:[%s4604_s22 + $0x78] sm:$0xf] }
  0x77   : > { %v1091_v24 = vsel %vm4789_vm5, %v1089_v13, %v1090_v14  ;;  %341 = vst.msk [vmem:[#allocation2 + $0x1c] sm:$0xf] %vm333_vm6, %v308_v22  ;;  %v966_v13 = vld [vmem:[%s4604_s22 + $0x90] sm:$0xe]  ;;  %v4052_v1 = vld [vmem:[%s4604_s22 + $0xc] sm:$0xf] }
  0x78   : > { %340 = vst.msk [vmem:[#allocation2 + $0x18] sm:$0xf] %vm333_vm6, %v307_v26  ;;  %v4048_v22 = vrot.slane %v966_v13, 9 }
  0x79   : > { %344 = vst.msk [vmem:[#allocation2 + $0x28] sm:$0xf] %vm333_vm6, %v311_v42 }
  0x7a   : > { %1151 = vrot.lane.b32.xlu1 %v1049_v17, %s4548_s24  ;;  %v309_v17 = vld [vmem:[%s4604_s22 + $0x30] sm:$0xf]  ;;  %343 = vst.msk [vmem:[#allocation2 + $0x24] sm:$0xf] %vm333_vm6, %v310_v44  ;;  %v327_v44 = vld [vmem:[%s4604_s22 + $0x9c] sm:$0xf] }
  0x7b   : > { %1149 = vrot.lane.b32.xlu0 %v1046_v19, %s4548_s24  ;;  %1147 = vrot.lane.b32.xlu2 %v1042_v23, %s4548_s24  ;;  %v958_v19 = vld [vmem:[%s4604_s22 + $0x70] sm:$0xf]  ;;  %342 = vst.msk [vmem:[#allocation2 + $0x20] sm:$0xf] %vm333_vm6, %v309_v17  ;;  %v1117_v17 = vrot.slane %v1115_v8, 4 }
  0x7c   : > { %v1094_v30 = vrot.slane %v958_v19, 5  ;;  %348 = vst.msk [vmem:[#allocation2 + $0x38] sm:$0xf] %vm333_vm6, %v315_v48  ;;  %v973_v19 = vld [vmem:[%s4604_s22 + $0xac] sm:$0xf] }
  0x7d   : > { %v810_v32 = vpop.permute.xlu2 %809  ;;  %347 = vst.msk [vmem:[#allocation2 + $0x34] sm:$0xf] %vm333_vm6, %v314_v52  ;;  %v325_v48 = vld [vmem:[%s4604_s22 + $0x90] sm:$0xf]  ;;  %v977_v52 = vld [vmem:[%s4604_s22 + $0xbc] sm:$0x1] }
  0x7e   : > { %902 = vst.msk [vmem:[#allocation2 + $0x10] sm:$0xf] %vm897_vm7, %v810_v32  ;;  %v312_v32 = vld [vmem:[%s4604_s22 + $0x40] sm:$0xf] }
  0x7f   : > { %345 = vst.msk [vmem:[#allocation2 + $0x2c] sm:$0xf] %vm333_vm6, %v312_v32  ;;  %v972_v32 = vld [vmem:[%s4604_s22 + $0xa8] sm:$0xe] }
  0x80   : > { %346 = vst.msk [vmem:[#allocation2 + $0x30] sm:$0xf] %vm333_vm6, %v313_v59 }
  0x81   : > { %349 = vst.msk [vmem:[#allocation2 + $0x3c] sm:$0xf] %vm333_vm6, %v316_v9  ;;  %v4054_v9 = vld [vmem:[%s4604_s22 + $0x18] sm:$0xf] }
  0x82   : > { %1157 = vrot.lane.b32.xlu1 %v1060_v33, %s4548_s24  ;;  %v1084_v33 = vsel %vm4789_vm5, %v1082_v20, %v1083_v21  ;;  %354 = vst.msk [vmem:[#allocation2 + $0x50] sm:$0xf] %vm333_vm6, %v321_v12  ;;  %v320_v21 = vld [vmem:[%s4604_s22 + $0x70] sm:$0xf] }
  0x83   : > { %1155 = vrot.lane.b32.xlu0 %v1056_v35, %s4548_s24  ;;  %1153 = vrot.lane.b32.xlu2 %v1053_v38, %s4548_s24  ;;  %v4046_v35 = vrot.slane %v960_v27, 9  ;;  %v1096_v38 = vrot.slane %v1094_v30, 4  ;;  %v1129_v27 = vrot.slane %v973_v19, 5  ;;  %353 = vst.msk [vmem:[#allocation2 + $0x4c] sm:$0xf] %vm333_vm6, %v320_v21 }
  0x84   : > { %356 = vst.msk [vmem:[#allocation2 + $0x58] sm:$0xf] %vm333_vm6, %v323_v31  ;;  %v4060_v21 = vld [vmem:[%s4604_s22 + $0x3c] sm:$0xf] }
  0x85   : > { %v812_v46 = vpop.permute.xlu2 %811  ;;  %355 = vst.msk [vmem:[#allocation2 + $0x54] sm:$0xf] %vm333_vm6, %v322_v34  ;;  %v4066_v34 = vld [vmem:[%s4604_s22 + $0x60] sm:$0xf] }
  0x86   : > { %903 = vst.msk [vmem:[#allocation2 + $0x14] sm:$0xf] %vm897_vm7, %v812_v46  ;;  %v1102_v46 = vsel %vm4789_vm5, %v4046_v35, %v1101_v36  ;;  %v971_v35 = vld [vmem:[%s4604_s22 + $0xa4] sm:$0x1]  ;;  %v1131_v36 = vrot.slane %v1129_v27, 4 }
  0x87   : > { %360 = vst.msk [vmem:[#allocation2 + $0x68] sm:$0xf] %vm333_vm6, %v327_v44 }
  0x88   : > { %358 = vst.msk [vmem:[#allocation2 + $0x60] sm:$0xf] %vm333_vm6, %v325_v48 }
  0x89   : > { %363 = vst.msk [vmem:[#allocation2 + $0x74] sm:$0xf] %vm333_vm6, %v330_v51  ;;  %v4076_v51 = vld [vmem:[%s4604_s22 + $0x9c] sm:$0xf] }
  0x8a   : > { %1163 = vrot.lane.b32.xlu1 %v1070_v47, %s4548_s24  ;;  %v1108_v47 = vrot.slane %v964_v40, 5  ;;  %v976_v40 = vld [vmem:[%s4604_s22 + $0xb8] sm:$0xf]  ;;  %362 = vst.msk [vmem:[#allocation2 + $0x70] sm:$0xf] %vm333_vm6, %v329_v54 }
  0x8b   : > { %1161 = vrot.lane.b32.xlu0 %v1067_v49, %s4548_s24  ;;  %1159 = vrot.lane.b32.xlu2 %v1063_v53, %s4548_s24  ;;  %v1098_v49 = vsel %vm4789_vm5, %v1096_v38, %v1097_v39  ;;  %v1095_v53 = vsel %vm4789_vm5, %v4045_v43, %v1094_v30  ;;  %v974_v30 = vld [vmem:[%s4604_s22 + $0xb0] sm:$0x1]  ;;  %v4050_v39 = vrot.slane %v972_v32, 9  ;;  %v1125_v43 = vrot.slane %v971_v35, 5  ;;  %365 = vst.msk [vmem:[#allocation2 + $0x7c] sm:$0xf] %vm333_vm6, %v332_v0 }
  0x8c   : > { %v806_v58 = vpop.permute.xlu1 %805  ;;  %v1110_v55 = vrot.slane %v1108_v47, 4  ;;  %v1109_v7 = vsel %vm4789_vm5, %v4047_v57, %v1108_v47  ;;  %v1136_v50 = vrot.slane %v976_v40, 5  ;;  %v4065_v35 = vld [vmem:[%s4604_s22 + $0x58] sm:$0xf]  ;;  %v4069_v40 = vld [vmem:[%s4604_s22 + $0x70] sm:$0xf] }
  0x8d   : > { %v802_v62 = vpop.permute.xlu0 %801  ;;  %v818_v3 = vpop.permute.xlu2 %817  ;;  %900 = vst.msk [vmem:[#allocation2 + $0x8] sm:$0xf] %vm897_vm7, %v806_v58  ;;  %v4085_v54 = vld [vmem:[%s4604_s22 + $0x10] sm:$0xf] }
  0x8e   : > { %898 = vst.msk [vmem:[#allocation2] sm:$0xf] %vm897_vm7, %v802_v62  ;;  %v318_v62 = vld [vmem:[%s4604_s22 + $0x64] sm:$0xf]  ;;  %v1112_v5 = vsel %vm4789_vm5, %v1110_v55, %v1111_v56  ;;  %v975_v55 = vld [vmem:[%s4604_s22 + $0xb4] sm:$0xe] }
  0x8f   : > { %906 = vst.msk [vmem:[#allocation2 + $0x20] sm:$0xf] %vm897_vm7, %v818_v3  ;;  %v969_v3 = vld [vmem:[%s4604_s22 + $0x9c] sm:$0xe]  ;;  %v1138_v57 = vrot.slane %v1136_v50, 4  ;;  %v4051_v60 = vrot.slane %v975_v55, 9 }
  0x90   : > { %351 = vst.msk [vmem:[#allocation2 + $0x44] sm:$0xf] %vm333_vm6, %v318_v62  ;;  %v4049_v14 = vrot.slane %v969_v3, 9  ;;  %v331_v3 = vld [vmem:[%s4604_s22 + $0xb4] sm:$0xf] }
  0x91   : > { %364 = vst.msk [vmem:[#allocation2 + $0x78] sm:$0xf] %vm333_vm6, %v331_v3  ;;  %v4077_v3 = vld [vmem:[%s4604_s22 + $0xa0] sm:$0xf] }
  0x92   : > { %1169 = vrot.lane.b32.xlu1 %v1081_v4, %s4548_s24 }
  0x93   : > { %1167 = vrot.lane.b32.xlu0 %v1077_v2, %s4548_s24  ;;  %1165 = vrot.lane.b32.xlu2 %v1074_v10, %s4548_s24  ;;  %v317_v2 = vld [vmem:[%s4604_s22 + $0x60] sm:$0xf]  ;;  %v968_v10 = vld [vmem:[%s4604_s22 + $0x98] sm:$0x1] }
  0x94   : > { %v808_v15 = vpop.permute.xlu1 %807  ;;  %350 = vst.msk [vmem:[#allocation2 + $0x40] sm:$0xf] %vm333_vm6, %v317_v2 }
  0x95   : > { %901 = vst.msk [vmem:[#allocation2 + $0xc] sm:$0xf] %vm897_vm7, %v808_v15  ;;  %v804_v18 = vpop.permute.xlu0 %803  ;;  %v824_v23 = vpop.permute.xlu2 %823  ;;  %v1122_v15 = vrot.slane %v970_v6, 5 }
  0x96   : > { %899 = vst.msk [vmem:[#allocation2 + $0x4] sm:$0xf] %vm897_vm7, %v804_v18  ;;  %v1118_v18 = vrot.slane %v968_v10, 5  ;;  %v4053_v10 = vld [vmem:[%s4604_s22 + $0x10] sm:$0xf] }
  0x97   : > { %909 = vst.msk [vmem:[#allocation2 + $0x2c] sm:$0xf] %vm897_vm7, %v824_v23  ;;  %v1123_v26 = vsel %vm4789_vm5, %v4049_v14, %v1122_v15  ;;  %v1124_v42 = vrot.slane %v1122_v15, 4  ;;  %v4058_v14 = vld [vmem:[%s4604_s22 + $0x30] sm:$0xf] }
  0x98   : > { %v1119_v29 = vsel %vm4789_vm5, %v1117_v17, %v1118_v18  ;;  %v4057_v15 = vld [vmem:[%s4604_s22 + $0x28] sm:$0xf] }
  0x9a   : > { %1175 = vrot.lane.b32.xlu1 %v1091_v24, %s4548_s24  ;;  %v319_v24 = vld [vmem:[%s4604_s22 + $0x6c] sm:$0xf] }
  0x9b   : > { %1173 = vrot.lane.b32.xlu0 %v1088_v28, %s4548_s24  ;;  %1171 = vrot.lane.b32.xlu2 %v1084_v33, %s4548_s24  ;;  %v324_v28 = vld [vmem:[%s4604_s22 + $0x88] sm:$0xf]  ;;  %352 = vst.msk [vmem:[#allocation2 + $0x48] sm:$0xf] %vm333_vm6, %v319_v24  ;;  %v1116_v33 = vsel %vm4789_vm5, %v4048_v22, %v1115_v8  ;;  %v4055_v8 = vld [vmem:[%s4604_s22 + $0x1c] sm:$0xf] }
  0x9c   : > { %v816_v37 = vpop.permute.xlu1 %815  ;;  %357 = vst.msk [vmem:[#allocation2 + $0x5c] sm:$0xf] %vm333_vm6, %v324_v28  ;;  %v4059_v22 = vld [vmem:[%s4604_s22 + $0x34] sm:$0xf]  ;;  %v4063_v28 = vld [vmem:[%s4604_s22 + $0x4c] sm:$0xf] }
  0x9d   : > { %905 = vst.msk [vmem:[#allocation2 + $0x1c] sm:$0xf] %vm897_vm7, %v816_v37  ;;  %v814_v41 = vpop.permute.xlu0 %813  ;;  %v830_v45 = vpop.permute.xlu2 %829  ;;  %v1132_v37 = vrot.slane %v974_v30, 5 }
  0x9e   : > { %904 = vst.msk [vmem:[#allocation2 + $0x18] sm:$0xf] %vm897_vm7, %v814_v41 }
  0x9f   : > { %912 = vst.msk [vmem:[#allocation2 + $0x38] sm:$0xf] %vm897_vm7, %v830_v45  ;;  %v1133_v47 = vsel %vm4789_vm5, %v1131_v36, %v1132_v37 }
  0xa2   : > { %1181 = vrot.lane.b32.xlu1 %v1102_v46, %s4548_s24  ;;  %v326_v46 = vld [vmem:[%s4604_s22 + $0x94] sm:$0xf] }
  0xa3   : > { %1179 = vrot.lane.b32.xlu0 %v1098_v49, %s4548_s24  ;;  %1177 = vrot.lane.b32.xlu2 %v1095_v53, %s4548_s24  ;;  %v1130_v49 = vsel %vm4789_vm5, %v4050_v39, %v1129_v27  ;;  %v1126_v53 = vsel %vm4789_vm5, %v1124_v42, %v1125_v43  ;;  %359 = vst.msk [vmem:[#allocation2 + $0x64] sm:$0xf] %vm333_vm6, %v326_v46  ;;  %v4064_v27 = vld [vmem:[%s4604_s22 + $0x54] sm:$0xf]  ;;  %v4070_v39 = vld [vmem:[%s4604_s22 + $0x78] sm:$0xf] }
  0xa4   : > { %v822_v58 = vpop.permute.xlu1 %821  ;;  %v4072_v46 = vld [vmem:[%s4604_s22 + $0x84] sm:$0xf] }
  0xa5   : > { %908 = vst.msk [vmem:[#allocation2 + $0x28] sm:$0xf] %vm897_vm7, %v822_v58  ;;  %v820_v61 = vpop.permute.xlu0 %819  ;;  %v836_v4 = vpop.permute.xlu2 %835  ;;  %v1139_v58 = vrot.slane %v977_v52, 5  ;;  %v4075_v52 = vld [vmem:[%s4604_s22 + $0x94] sm:$0xf] }
  0xa6   : > { %907 = vst.msk [vmem:[#allocation2 + $0x24] sm:$0xf] %vm897_vm7, %v820_v61  ;;  %v328_v61 = vld [vmem:[%s4604_s22 + $0xa0] sm:$0xf] }
  0xa7   : > { %915 = vst.msk [vmem:[#allocation2 + $0x44] sm:$0xf] %vm897_vm7, %v836_v4  ;;  %v1140_v4 = vsel %vm4789_vm5, %v1138_v57, %v1139_v58  ;;  %v4084_v57 = vld [vmem:[%s4604_s22 + $0xc] sm:$0xf] }
  0xa8   : > { %361 = vst.msk [vmem:[#allocation2 + $0x6c] sm:$0xf] %vm333_vm6, %v328_v61  ;;  %v4079_v61 = vld [vmem:[%s4604_s22 + $0xac] sm:$0xf]  ;;  %v1513_v0 = vshrl.u32 %v4084_v57, 16 }
  0xaa   : > { %1187 = vrot.lane.b32.xlu1 %v1112_v5, %s4548_s24  ;;  %v1137_v5 = vsel %vm4789_vm5, %v4051_v60, %v1136_v50  ;;  %v1526_v60 = vshrl.u32 %v4085_v54, 16 }
  0xab   : > { %1185 = vrot.lane.b32.xlu0 %v1109_v7, %s4548_s24  ;;  %1183 = vrot.lane.b32.xlu2 %v1105_v11, %s4548_s24 }
  0xac   : > { %v828_v16 = vpop.permute.xlu1 %827 }
  0xad   : > { %911 = vst.msk [vmem:[#allocation2 + $0x34] sm:$0xf] %vm897_vm7, %v828_v16  ;;  %v826_v20 = vpop.permute.xlu0 %825  ;;  %v842_v23 = vpop.permute.xlu2 %841  ;;  %v4056_v16 = vld [vmem:[%s4604_s22 + $0x24] sm:$0xf] }
  0xae   : > { %910 = vst.msk [vmem:[#allocation2 + $0x30] sm:$0xf] %vm897_vm7, %v826_v20  ;;  %v4061_v20 = vld [vmem:[%s4604_s22 + $0x40] sm:$0xf] }
  0xaf   : > { %918 = vst.msk [vmem:[#allocation2 + $0x50] sm:$0xf] %vm897_vm7, %v842_v23 }
  0xb2   : > { %1193 = vrot.lane.b32.xlu1 %v1123_v26, %s4548_s24 }
  0xb3   : > { %1191 = vrot.lane.b32.xlu0 %v1119_v29, %s4548_s24  ;;  %1189 = vrot.lane.b32.xlu2 %v1116_v33, %s4548_s24  ;;  %v4062_v29 = vld [vmem:[%s4604_s22 + $0x48] sm:$0xf]  ;;  %v4067_v33 = vld [vmem:[%s4604_s22 + $0x64] sm:$0xf] }
  0xb4   : > { %v834_v38 = vpop.permute.xlu1 %833 }
  0xb5   : > { %914 = vst.msk [vmem:[#allocation2 + $0x40] sm:$0xf] %vm897_vm7, %v834_v38  ;;  %v832_v41 = vpop.permute.xlu0 %831  ;;  %v848_v45 = vpop.permute.xlu2 %847 }
  0xb6   : > { %913 = vst.msk [vmem:[#allocation2 + $0x3c] sm:$0xf] %vm897_vm7, %v832_v41  ;;  %v4068_v41 = vld [vmem:[%s4604_s22 + $0x6c] sm:$0xf] }
  0xb7   : > { %921 = vst.msk [vmem:[#allocation2 + $0x5c] sm:$0xf] %vm897_vm7, %v848_v45  ;;  %v4073_v45 = vld [vmem:[%s4604_s22 + $0x88] sm:$0xf] }
  0xba   : > { %1199 = vrot.lane.b32.xlu1 %v1133_v47, %s4548_s24  ;;  %v4071_v47 = vld [vmem:[%s4604_s22 + $0x7c] sm:$0xf] }
  0xbb   : > { %1197 = vrot.lane.b32.xlu0 %v1130_v49, %s4548_s24  ;;  %1195 = vrot.lane.b32.xlu2 %v1126_v53, %s4548_s24  ;;  %v4074_v53 = vld [vmem:[%s4604_s22 + $0x90] sm:$0xf] }
  0xbc   : > { %v840_v56 = vpop.permute.xlu1 %839 }
  0xbd   : > { %917 = vst.msk [vmem:[#allocation2 + $0x4c] sm:$0xf] %vm897_vm7, %v840_v56  ;;  %v838_v59 = vpop.permute.xlu0 %837  ;;  %v854_v62 = vpop.permute.xlu2 %853 }
  0xbe   : > { %916 = vst.msk [vmem:[#allocation2 + $0x48] sm:$0xf] %vm897_vm7, %v838_v59  ;;  %v1522_v59 = vshll.u32 %v4085_v54, 16  ;;  %v4083_v54 = vld [vmem:[%s4604_s22 + $0xc4] sm:$0xf] }
  0xbf   : > { %924 = vst.msk [vmem:[#allocation2 + $0x68] sm:$0xf] %vm897_vm7, %v854_v62  ;;  %v4078_v62 = vld [vmem:[%s4604_s22 + $0xa8] sm:$0xf] }
  0xc2   : > { %1335 = vrot.lane.b32.xlu1 %v4052_v1, %s4549_s25  ;;  %v1516_v1 = vshll.u32 %v4084_v57, 16 }
  0xc3   : > { %1203 = vrot.lane.b32.xlu0 %v1140_v4, %s4548_s24  ;;  %1201 = vrot.lane.b32.xlu2 %v1137_v5, %s4548_s24  ;;  %v5134_v4 = vrot.slane %v1522_v59, 5  ;;  %v1528_v5 = vrot.slane %v1526_v60, 4 }
  0xc4   : > { %v846_v6 = vpop.permute.xlu1 %845 }
  0xc5   : > { %920 = vst.msk [vmem:[#allocation2 + $0x58] sm:$0xf] %vm897_vm7, %v846_v6  ;;  %v844_v2 = vpop.permute.xlu0 %843  ;;  %v860_v7 = vpop.permute.xlu2 %859  ;;  %v4086_v6 = vld [vmem:[%s4604_s22 + $0x14] sm:$0x1] }
  0xc6   : > { %919 = vst.msk [vmem:[#allocation2 + $0x54] sm:$0xf] %vm897_vm7, %v844_v2 }
  0xc7   : > { %927 = vst.msk [vmem:[#allocation2 + $0x74] sm:$0xf] %vm897_vm7, %v860_v7  ;;  %v1515_v7 = vrot.slane %v1513_v0, 4  ;;  %v4099_v0 = vld [vmem:[%s4604_s22 + $0x48] sm:$0xf] }
  0xca   : > { %1341 = vrot.lane.b32.xlu1 %v4055_v8, %s4549_s25  ;;  %v1518_v8 = vrot.slane %v1516_v1, 5 }
  0xcb   : > { %1339 = vrot.lane.b32.xlu0 %v4054_v9, %s4549_s25  ;;  %1337 = vrot.lane.b32.xlu2 %v4053_v10, %s4549_s25  ;;  %v4090_v9 = vld [vmem:[%s4604_s22 + $0x24] sm:$0xf] }
  0xcc   : > { %v852_v11 = vpop.permute.xlu1 %851 }
  0xcd   : > { %923 = vst.msk [vmem:[#allocation2 + $0x64] sm:$0xf] %vm897_vm7, %v852_v11  ;;  %v850_v12 = vpop.permute.xlu0 %849  ;;  %v1142_v13 = vpop.permute.xlu2 %1141  ;;  %v4088_v11 = vld [vmem:[%s4604_s22 + $0x1c] sm:$0xf] }
  0xce   : > { %922 = vst.msk [vmem:[#allocation2 + $0x60] sm:$0xf] %vm897_vm7, %v850_v12  ;;  %v1529_v12 = vor.u32 %v1528_v5, %v5134_v4  ;;  %v4097_v5 = vld [vmem:[%s4604_s22 + $0x40] sm:$0xf] }
  0xcf   : > { %1238 = vst.msk [vmem:[#allocation2] sm:$0xf] %vm1237_vm8, %v1142_v13  ;;  %v1532_v13 = vshll.u32 %v4086_v6, 16 }
  0xd2   : > { %1347 = vrot.lane.b32.xlu1 %v4058_v14, %s4549_s25 }
  0xd3   : > { %1345 = vrot.lane.b32.xlu0 %v4057_v15, %s4549_s25  ;;  %1343 = vrot.lane.b32.xlu2 %v4056_v16, %s4549_s25  ;;  %v4087_v15 = vld [vmem:[%s4604_s22 + $0x18] sm:$0xf]  ;;  %v4082_v16 = vld [vmem:[%s4604_s22 + $0xc0] sm:$0xf] }
  0xd4   : > { %v858_v17 = vpop.permute.xlu1 %857 }
  0xd5   : > { %926 = vst.msk [vmem:[#allocation2 + $0x70] sm:$0xf] %vm897_vm7, %v858_v17  ;;  %v856_v18 = vpop.permute.xlu0 %855  ;;  %v1148_v19 = vpop.permute.xlu2 %1147  ;;  %v1561_v17 = vshrl.u32 %v4090_v9, 16 }
  0xd6   : > { %925 = vst.msk [vmem:[#allocation2 + $0x6c] sm:$0xf] %vm897_vm7, %v856_v18  ;;  %v1564_v18 = vshll.u32 %v4090_v9, 16 }
  0xd7   : > { %1241 = vst.msk [vmem:[#allocation2 + $0xc] sm:$0xf] %vm1237_vm8, %v1148_v19  ;;  %v4081_v19 = vld [vmem:[%s4604_s22 + $0xb8] sm:$0xf] }
  0xda   : > { %1353 = vrot.lane.b32.xlu1 %v4061_v20, %s4549_s25  ;;  %v1519_v20 = vor.u32 %v1518_v8, %v1515_v7  ;;  %v4096_v8 = vld [vmem:[%s4604_s22 + $0x3c] sm:$0xf] }
  0xdb   : > { %1351 = vrot.lane.b32.xlu0 %v4060_v21, %s4549_s25  ;;  %1349 = vrot.lane.b32.xlu2 %v4059_v22, %s4549_s25  ;;  %v1546_v21 = vshll.u32 %v4088_v11, 16  ;;  %v1550_v22 = vshrl.u32 %v4088_v11, 16 }
  0xdc   : > { %v864_v23 = vpop.permute.xlu1 %863 }
  0xdd   : > { %929 = vst.msk [vmem:[#allocation2 + $0x7c] sm:$0xf] %vm897_vm7, %v864_v23  ;;  %v862_v24 = vpop.permute.xlu0 %861  ;;  %v1154_v26 = vpop.permute.xlu2 %1153  ;;  %v4080_v23 = vld [vmem:[%s4604_s22 + $0xb4] sm:$0xf] }
  0xde   : > { %928 = vst.msk [vmem:[#allocation2 + $0x78] sm:$0xf] %vm897_vm7, %v862_v24  ;;  %v1537_v24 = vshrl.u32 %v4087_v15, 16 }
  0xdf   : > { %1244 = vst.msk [vmem:[#allocation2 + $0x18] sm:$0xf] %vm1237_vm8, %v1154_v26  ;;  %v1540_v26 = vshll.u32 %v4087_v15, 16 }
  0xe2   : > { %1359 = vrot.lane.b32.xlu1 %v4064_v27, %s4549_s25  ;;  %v1530_v27 = vrot.slane %v1529_v12, 4 }
  0xe3   : > { %1357 = vrot.lane.b32.xlu0 %v4063_v28, %s4549_s25  ;;  %1355 = vrot.lane.b32.xlu2 %v4062_v29, %s4549_s25  ;;  %v1534_v28 = vrot.slane %v1532_v13, 5  ;;  %v1563_v29 = vrot.slane %v1561_v17, 4  ;;  %v1633_v13 = vshrl.u32 %v4099_v0, 16  ;;  %v1618_v17 = vshll.u32 %v4097_v5, 16 }
  0xe4   : > { %v1146_v30 = vpop.permute.xlu1 %1145 }
  0xe5   : > { %1240 = vst.msk [vmem:[#allocation2 + $0x8] sm:$0xf] %vm1237_vm8, %v1146_v30  ;;  %v1144_v31 = vpop.permute.xlu0 %1143  ;;  %v1160_v32 = vpop.permute.xlu2 %1159  ;;  %v1566_v30 = vrot.slane %v1564_v18, 5  ;;  %v1622_v18 = vshrl.u32 %v4097_v5, 16 }
  0xe6   : > { %1239 = vst.msk [vmem:[#allocation2 + $0x4] sm:$0xf] %vm1237_vm8, %v1144_v31  ;;  %v4094_v31 = vld [vmem:[%s4604_s22 + $0x34] sm:$0xf] }
  0xe7   : > { %1247 = vst.msk [vmem:[#allocation2 + $0x24] sm:$0xf] %vm1237_vm8, %v1160_v32  ;;  %v4093_v32 = vld [vmem:[%s4604_s22 + $0x30] sm:$0xf] }
  0xea   : > { %1365 = vrot.lane.b32.xlu1 %v4067_v33, %s4549_s25 }
  0xeb   : > { %1363 = vrot.lane.b32.xlu0 %v4066_v34, %s4549_s25  ;;  %1361 = vrot.lane.b32.xlu2 %v4065_v35, %s4549_s25  ;;  %v1520_v34 = vrot.slane %v1519_v20, 4  ;;  %v4091_v35 = vld [vmem:[%s4604_s22 + $0x28] sm:$0xf]  ;;  %v1609_v20 = vshrl.u32 %v4096_v8, 16 }
  0xec   : > { %v1152_v36 = vpop.permute.xlu1 %1151 }
  0xed   : > { %1243 = vst.msk [vmem:[#allocation2 + $0x14] sm:$0xf] %vm1237_vm8, %v1152_v36  ;;  %v1150_v37 = vpop.permute.xlu0 %1149  ;;  %v1166_v38 = vpop.permute.xlu2 %1165  ;;  %v5155_v36 = vrot.slane %v1546_v21, 5  ;;  %v1612_v21 = vshll.u32 %v4096_v8, 16  ;;  %v4106_v8 = vld [vmem:[%s4604_s22 + $0x64] sm:$0xf] }
  0xee   : > { %1242 = vst.msk [vmem:[#allocation2 + $0x10] sm:$0xf] %vm1237_vm8, %v1150_v37  ;;  %v1552_v37 = vrot.slane %v1550_v22, 4 }
  0xef   : > { %1250 = vst.msk [vmem:[#allocation2 + $0x30] sm:$0xf] %vm1237_vm8, %v1166_v38 }
  0xf2   : > { %1371 = vrot.lane.b32.xlu1 %v4070_v39, %s4549_s25  ;;  %v4089_v39 = vld [vmem:[%s4604_s22 + $0x20] sm:$0x1] }
  0xf3   : > { %1369 = vrot.lane.b32.xlu0 %v4069_v40, %s4549_s25  ;;  %1367 = vrot.lane.b32.xlu2 %v4068_v41, %s4549_s25  ;;  %v1539_v40 = vrot.slane %v1537_v24, 4  ;;  %v1542_v41 = vrot.slane %v1540_v26, 5  ;;  %v4103_v26 = vld [vmem:[%s4604_s22 + $0x58] sm:$0xf] }
  0xf4   : > { %v1158_v42 = vpop.permute.xlu1 %1157 }
  0xf5   : > { %1246 = vst.msk [vmem:[#allocation2 + $0x20] sm:$0xf] %vm1237_vm8, %v1158_v42  ;;  %v1156_v43 = vpop.permute.xlu0 %1155  ;;  %v1172_v44 = vpop.permute.xlu2 %1171 }
  0xf6   : > { %1245 = vst.msk [vmem:[#allocation2 + $0x1c] sm:$0xf] %vm1237_vm8, %v1156_v43  ;;  %v1594_v43 = vshll.u32 %v4094_v31, 16 }
  0xf7   : > { %1253 = vst.msk [vmem:[#allocation2 + $0x3c] sm:$0xf] %vm1237_vm8, %v1172_v44  ;;  %v1598_v44 = vshrl.u32 %v4094_v31, 16  ;;  %v1635_v31 = vrot.slane %v1633_v13, 4 }
  0xf9   : > { %v1600_v57 = vrot.slane %v1598_v44, 4 }
  0xfa   : > { %1377 = vrot.lane.b32.xlu1 %v4073_v45, %s4549_s25  ;;  %v1585_v45 = vshrl.u32 %v4093_v32, 16 }
  0xfb   : > { %1375 = vrot.lane.b32.xlu0 %v4072_v46, %s4549_s25  ;;  %1373 = vrot.lane.b32.xlu2 %v4071_v47, %s4549_s25  ;;  %v1588_v46 = vshll.u32 %v4093_v32, 16  ;;  %v1535_v47 = vsel %vm4615_vm2, %v1530_v27, %v1534_v28 }
  0xfc   : > { %v1164_v48 = vpop.permute.xlu1 %1163 }
  0xfd   : > { %1249 = vst.msk [vmem:[#allocation2 + $0x2c] sm:$0xf] %vm1237_vm8, %v1164_v48  ;;  %v1162_v49 = vpop.permute.xlu0 %1161  ;;  %v1178_v50 = vpop.permute.xlu2 %1177  ;;  %v1567_v48 = vor.u32 %v1566_v30, %v1563_v29  ;;  %v1590_v59 = vrot.slane %v1588_v46, 5  ;;  %v4100_v30 = vld [vmem:[%s4604_s22 + $0x4c] sm:$0xf] }
  0xfe   : > { %1248 = vst.msk [vmem:[#allocation2 + $0x28] sm:$0xf] %vm1237_vm8, %v1162_v49  ;;  %v1570_v49 = vshll.u32 %v4091_v35, 16 }
  0xff   : > { %1256 = vst.msk [vmem:[#allocation2 + $0x48] sm:$0xf] %vm1237_vm8, %v1178_v50  ;;  %v1525_v50 = vsel %vm4615_vm2, %v1520_v34, %v5134_v4  ;;  %v1568_v60 = vrot.slane %v1567_v48, 4  ;;  %v5194_v34 = vrot.slane %v1618_v17, 5 }
 0x102   : > { %1383 = vrot.lane.b32.xlu1 %v4076_v51, %s4549_s25  ;;  %v1553_v51 = vor.u32 %v1552_v37, %v5155_v36  ;;  %v1666_v37 = vshll.u32 %v4103_v26, 16 }
 0x103   : > { %1381 = vrot.lane.b32.xlu0 %v4075_v52, %s4549_s25  ;;  %1379 = vrot.lane.b32.xlu2 %v4074_v53, %s4549_s25  ;;  %v1556_v52 = vshll.u32 %v4089_v39, 16  ;;  %v1574_v53 = vshrl.u32 %v4091_v35, 16  ;;  %v1624_v35 = vrot.slane %v1622_v18, 4  ;;  %v4102_v39 = vld [vmem:[%s4604_s22 + $0x54] sm:$0xf]  ;;  %v1690_v18 = vshll.u32 %v4106_v8, 16 }
 0x104   : > { %v1170_v55 = vpop.permute.xlu1 %1169 }
 0x105   : > { %1252 = vst.msk [vmem:[#allocation2 + $0x38] sm:$0xf] %vm1237_vm8, %v1170_v55  ;;  %v1168_v56 = vpop.permute.xlu0 %1167  ;;  %v1184_v58 = vpop.permute.xlu2 %1183  ;;  %v1543_v55 = vor.u32 %v1542_v41, %v1539_v40  ;;  %v1558_v4 = vrot.slane %v1556_v52, 5  ;;  %v1576_v7 = vrot.slane %v1574_v53, 4  ;;  %v1611_v40 = vrot.slane %v1609_v20, 4 }
 0x106   : > { %1251 = vst.msk [vmem:[#allocation2 + $0x34] sm:$0xf] %vm1237_vm8, %v1168_v56  ;;  %v5169_v56 = vrot.slane %v1594_v43, 5  ;;  %v1614_v41 = vrot.slane %v1612_v21, 5  ;;  %v1657_v52 = vshrl.u32 %v4102_v39, 16 }
 0x107   : > { %1259 = vst.msk [vmem:[#allocation2 + $0x54] sm:$0xf] %vm1237_vm8, %v1184_v58  ;;  %v1587_v58 = vrot.slane %v1585_v45, 4  ;;  %v4104_v53 = vld [vmem:[%s4604_s22 + $0x5c] sm:$0x1] }
 0x108   : > { %v1601_v9 = vor.u32 %v1600_v57, %v5169_v56  ;;  %v1660_v57 = vshll.u32 %v4102_v39, 16  ;;  %v4111_v39 = vld [vmem:[%s4604_s22 + $0x78] sm:$0xf] }
 0x109   : > { %v1591_v11 = vor.u32 %v1590_v59, %v1587_v58  ;;  %v1615_v58 = vor.u32 %v1614_v41, %v1611_v40  ;;  %v1646_v59 = vshrl.u32 %v4100_v30, 16 }
 0x10a   : > { %1389 = vrot.lane.b32.xlu1 %v4079_v61, %s4549_s25  ;;  %v1572_v61 = vrot.slane %v1570_v49, 5  ;;  %v1602_v27 = vrot.slane %v1601_v9, 4 }
 0x10b   : > { %1387 = vrot.lane.b32.xlu0 %v4078_v62, %s4549_s25  ;;  %1385 = vrot.lane.b32.xlu2 %v4077_v3, %s4549_s25  ;;  %v4095_v62 = vld [vmem:[%s4604_s22 + $0x38] sm:$0x1]  ;;  %v1554_v3 = vrot.slane %v1553_v51, 4  ;;  %v1592_v29 = vrot.slane %v1591_v11, 4 }
 0x10c   : > { %v1176_v2 = vpop.permute.xlu1 %1175  ;;  %v1573_v15 = vsel %vm4615_vm2, %v1568_v60, %v1572_v61 }
 0x10d   : > { %1255 = vst.msk [vmem:[#allocation2 + $0x44] sm:$0xf] %vm1237_vm8, %v1176_v2  ;;  %v1174_v10 = vpop.permute.xlu0 %1173  ;;  %v1190_v14 = vpop.permute.xlu2 %1189  ;;  %v1544_v2 = vrot.slane %v1543_v55, 4  ;;  %v1597_v46 = vsel %vm4615_vm2, %v1592_v29, %v5169_v56 }
 0x10e   : > { %1254 = vst.msk [vmem:[#allocation2 + $0x40] sm:$0xf] %vm1237_vm8, %v1174_v10  ;;  %v1604_v10 = vshll.u32 %v4095_v62, 16 }
 0x10f   : > { %1262 = vst.msk [vmem:[#allocation2 + $0x60] sm:$0xf] %vm1237_vm8, %v1190_v14  ;;  %v4092_v14 = vld [vmem:[%s4604_s22 + $0x2c] sm:$0x1]  ;;  %v1549_v22 = vsel %vm4615_vm2, %v1544_v2, %v5155_v36  ;;  %v1662_v2 = vrot.slane %v1660_v57, 5 }
 0x110   : > { %v1580_v24 = vshll.u32 %v4092_v14, 16  ;;  %v1606_v28 = vrot.slane %v1604_v10, 5  ;;  %v4101_v14 = vld [vmem:[%s4604_s22 + $0x50] sm:$0x1] }
 0x112   : > { %1395 = vrot.lane.b32.xlu1 %v4082_v16, %s4549_s25  ;;  %v1636_v16 = vshll.u32 %v4099_v0, 16  ;;  %v1582_v44 = vrot.slane %v1580_v24, 5  ;;  %v1607_v45 = vsel %vm4615_vm2, %v1602_v27, %v1606_v28 }
 0x113   : > { %1393 = vrot.lane.b32.xlu0 %v4081_v19, %s4549_s25  ;;  %1391 = vrot.lane.b32.xlu2 %v4080_v23, %s4549_s25  ;;  %v1559_v19 = vsel %vm4615_vm2, %v1554_v3, %v1558_v4  ;;  %v1577_v23 = vor.u32 %v1576_v7, %v1572_v61  ;;  %v4108_v61 = vld [vmem:[%s4604_s22 + $0x6c] sm:$0xf]  ;;  %v1676_v3 = vshll.u32 %v4104_v53, 16  ;;  %v1616_v7 = vrot.slane %v1615_v58, 4 }
 0x114   : > { %v1182_v33 = vpop.permute.xlu1 %1181  ;;  %v1638_v32 = vrot.slane %v1636_v16, 5  ;;  %v1705_v10 = vshrl.u32 %v4108_v61, 16  ;;  %v1708_v11 = vshll.u32 %v4108_v61, 16  ;;  %v1732_v53 = vshll.u32 %v4111_v39, 16 }
 0x115   : > { %1258 = vst.msk [vmem:[#allocation2 + $0x50] sm:$0xf] %vm1237_vm8, %v1182_v33  ;;  %v1180_v38 = vpop.permute.xlu0 %1179  ;;  %v1196_v42 = vpop.permute.xlu2 %1195  ;;  %v4098_v33 = vld [vmem:[%s4604_s22 + $0x44] sm:$0x1]  ;;  %v1578_v43 = vrot.slane %v1577_v23, 4  ;;  %v1678_v21 = vrot.slane %v1676_v3, 5  ;;  %v1621_v23 = vsel %vm4615_vm2, %v1616_v7, %v5194_v34 }
 0x116   : > { %1257 = vst.msk [vmem:[#allocation2 + $0x4c] sm:$0xf] %vm1237_vm8, %v1180_v38  ;;  %v1670_v38 = vshrl.u32 %v4103_v26, 16  ;;  %v1639_v49 = vor.u32 %v1638_v32, %v1635_v31  ;;  %v1628_v51 = vshll.u32 %v4098_v33, 16  ;;  %v1652_v26 = vshll.u32 %v4101_v14, 16 }
 0x117   : > { %1265 = vst.msk [vmem:[#allocation2 + $0x6c] sm:$0xf] %vm1237_vm8, %v1196_v42  ;;  %v1583_v56 = vsel %vm4615_vm2, %v1578_v43, %v1582_v44  ;;  %v1707_v29 = vrot.slane %v1705_v10, 4  ;;  %v4109_v31 = vld [vmem:[%s4604_s22 + $0x70] sm:$0xf]  ;;  %v5233_v32 = vrot.slane %v1690_v18, 5 }
 0x118   : > { %v1672_v55 = vrot.slane %v1670_v38, 4  ;;  %v1640_v62 = vrot.slane %v1639_v49, 4  ;;  %v4107_v38 = vld [vmem:[%s4604_s22 + $0x68] sm:$0x1]  ;;  %v1718_v57 = vshrl.u32 %v4109_v31, 16 }
 0x119   : > { %v4114_v10 = vld [vmem:[%s4604_s22 + $0x84] sm:$0xf] }
 0x11a   : > { %1898 = vrot.lane.b32.xlu1 %v1535_v47, %s4550_s26  ;;  %v1642_v47 = vshll.u32 %v4100_v30, 16  ;;  %v1710_v30 = vrot.slane %v1708_v11, 5 }
 0x11b   : > { %1896 = vrot.lane.b32.xlu0 %v1525_v50, %s4550_s26  ;;  %1397 = vrot.lane.b32.xlu2 %v4083_v54, %s4549_s25  ;;  %v1625_v50 = vor.u32 %v1624_v35, %v5194_v34  ;;  %v5208_v54 = vrot.slane %v1666_v37, 5  ;;  %v4112_v35 = vld [vmem:[%s4604_s22 + $0x7c] sm:$0xf] }
 0x11c   : > { %v1188_v1 = vpop.permute.xlu1 %1187  ;;  %v1644_v60 = vrot.slane %v1642_v47, 5  ;;  %v1742_v49 = vshrl.u32 %v4112_v35, 16 }
 0x11d   : > { %1261 = vst.msk [vmem:[#allocation2 + $0x5c] sm:$0xf] %vm1237_vm8, %v1188_v1  ;;  %v1186_v6 = vpop.permute.xlu0 %1185  ;;  %v1202_v12 = vpop.permute.xlu2 %1201  ;;  %v1626_v0 = vrot.slane %v1625_v50, 4  ;;  %v1630_v1 = vrot.slane %v1628_v51, 5  ;;  %v1673_v5 = vor.u32 %v1672_v55, %v5208_v54  ;;  %v1700_v51 = vshll.u32 %v4107_v38, 16 }
 0x11e   : > { %1260 = vst.msk [vmem:[#allocation2 + $0x58] sm:$0xf] %vm1237_vm8, %v1186_v6  ;;  %v1659_v6 = vrot.slane %v1657_v52, 4  ;;  %v1645_v16 = vsel %vm4615_vm2, %v1640_v62, %v1644_v60  ;;  %v1729_v52 = vshrl.u32 %v4111_v39, 16  ;;  %v1744_v62 = vrot.slane %v1742_v49, 4 }
 0x11f   : > { %1268 = vst.msk [vmem:[#allocation2 + $0x78] sm:$0xf] %vm1237_vm8, %v1202_v12  ;;  %v1648_v12 = vrot.slane %v1646_v59, 4  ;;  %v1631_v17 = vsel %vm4615_vm2, %v1626_v0, %v1630_v1  ;;  %v1674_v20 = vrot.slane %v1673_v5, 4  ;;  %v1702_v1 = vrot.slane %v1700_v51, 5 }
 0x120   : > { %v1731_v3 = vrot.slane %v1729_v52, 4  ;;  %v4120_v38 = vld [vmem:[%s4604_s22 + $0x9c] sm:$0xf] }
 0x121   : > { %v1649_v24 = vor.u32 %v1648_v12, %v1644_v60  ;;  %v1679_v34 = vsel %vm4615_vm2, %v1674_v20, %v1678_v21  ;;  %v1801_v51 = vshrl.u32 %v4120_v38, 16  ;;  %v1804_v52 = vshll.u32 %v4120_v38, 16 }
 0x122   : > { %1904 = vrot.lane.b32.xlu1 %v1573_v15, %s4550_s26  ;;  %v4105_v15 = vld [vmem:[%s4604_s22 + $0x60] sm:$0xf] }
 0x123   : > { %1902 = vrot.lane.b32.xlu0 %v1559_v19, %s4550_s26  ;;  %1900 = vrot.lane.b32.xlu2 %v1549_v22, %s4550_s26  ;;  %v1694_v19 = vshrl.u32 %v4106_v8, 16  ;;  %v1663_v22 = vor.u32 %v1662_v2, %v1659_v6  ;;  %v1681_v27 = vshrl.u32 %v4105_v15, 16  ;;  %v1684_v28 = vshll.u32 %v4105_v15, 16  ;;  %v4117_v6 = vld [vmem:[%s4604_s22 + $0x90] sm:$0xf] }
 0x124   : > { %v1194_v36 = vpop.permute.xlu1 %1193  ;;  %v1650_v41 = vrot.slane %v1649_v24, 4  ;;  %v4115_v2 = vld [vmem:[%s4604_s22 + $0x88] sm:$0xf]  ;;  %v4110_v15 = vld [vmem:[%s4604_s22 + $0x74] sm:$0x1]  ;;  %v1777_v18 = vshrl.u32 %v4117_v6, 16 }
 0x125   : > { %1264 = vst.msk [vmem:[#allocation2 + $0x68] sm:$0xf] %vm1237_vm8, %v1194_v36  ;;  %v1192_v42 = vpop.permute.xlu0 %1191  ;;  %v1338_v48 = vpop.permute.xlu2 %1337  ;;  %v1696_v33 = vrot.slane %v1694_v19, 4  ;;  %v1664_v37 = vrot.slane %v1663_v22, 4  ;;  %v1683_v43 = vrot.slane %v1681_v27, 4  ;;  %v1686_v44 = vrot.slane %v1684_v28, 5 }
 0x126   : > { %1263 = vst.msk [vmem:[#allocation2 + $0x64] sm:$0xf] %vm1237_vm8, %v1192_v42  ;;  %v1654_v42 = vrot.slane %v1652_v26, 5  ;;  %v1780_v19 = vshll.u32 %v4117_v6, 16  ;;  %v1762_v20 = vshll.u32 %v4115_v2, 16  ;;  %v1766_v21 = vshrl.u32 %v4115_v2, 16 }
 0x127   : > { %1433 = vst.msk [vmem:[#allocation2 + $0x4] sm:$0xf] %vm1431_vm9, %v1338_v48  ;;  %v1738_v48 = vshll.u32 %v4112_v35, 16  ;;  %v1697_v50 = vor.u32 %v1696_v33, %v5233_v32  ;;  %v1669_v55 = vsel %vm4615_vm2, %v1664_v37, %v5208_v54  ;;  %v1687_v59 = vor.u32 %v1686_v44, %v1683_v43  ;;  %v4113_v54 = vld [vmem:[%s4604_s22 + $0x80] sm:$0x1] }
 0x128   : > { %v1655_v58 = vsel %vm4615_vm2, %v1650_v41, %v1654_v42  ;;  %v1753_v22 = vshrl.u32 %v4114_v10, 16  ;;  %v1724_v27 = vshll.u32 %v4110_v15, 16  ;;  %v1779_v33 = vrot.slane %v1777_v18, 4  ;;  %v4116_v42 = vld [vmem:[%s4604_s22 + $0x8c] sm:$0x1] }
 0x129   : > { %v5251_v61 = vrot.slane %v1738_v48, 5  ;;  %v1698_v0 = vrot.slane %v1697_v50, 4  ;;  %v1688_v8 = vrot.slane %v1687_v59, 4  ;;  %v1782_v35 = vrot.slane %v1780_v19, 5  ;;  %v4123_v15 = vld [vmem:[%s4604_s22 + $0xa8] sm:$0xf] }
 0x12a   : > { %1910 = vrot.lane.b32.xlu1 %v1607_v45, %s4550_s26  ;;  %v1711_v45 = vor.u32 %v1710_v30, %v1707_v29  ;;  %v4118_v30 = vld [vmem:[%s4604_s22 + $0x94] sm:$0xf]  ;;  %v5276_v37 = vrot.slane %v1762_v20, 5  ;;  %v1755_v39 = vrot.slane %v1753_v22, 4  ;;  %v1726_v44 = vrot.slane %v1724_v27, 5 }
 0x12b   : > { %1908 = vrot.lane.b32.xlu0 %v1597_v46, %s4550_s26  ;;  %1906 = vrot.lane.b32.xlu2 %v1583_v56, %s4550_s26  ;;  %v1714_v46 = vshll.u32 %v4109_v31, 16  ;;  %v1745_v12 = vor.u32 %v1744_v62, %v5251_v61  ;;  %v1693_v24 = vsel %vm4615_vm2, %v1688_v8, %v5233_v32  ;;  %v1768_v32 = vrot.slane %v1766_v21, 4 }
 0x12c   : > { %v1200_v4 = vpop.permute.xlu1 %1199  ;;  %v1712_v56 = vrot.slane %v1711_v45, 4  ;;  %v1783_v49 = vor.u32 %v1782_v35, %v1779_v33  ;;  %v1786_v50 = vshll.u32 %v4118_v30, 16  ;;  %v1790_v59 = vshrl.u32 %v4118_v30, 16 }
 0x12d   : > { %1267 = vst.msk [vmem:[#allocation2 + $0x74] sm:$0xf] %vm1237_vm8, %v1200_v4  ;;  %v1198_v9 = vpop.permute.xlu0 %1197  ;;  %v1344_v13 = vpop.permute.xlu2 %1343  ;;  %v1716_v60 = vrot.slane %v1714_v46, 5  ;;  %v1734_v4 = vrot.slane %v1732_v53, 5  ;;  %v1746_v28 = vrot.slane %v1745_v12, 4  ;;  %v1825_v27 = vshrl.u32 %v4123_v15, 16 }
 0x12e   : > { %1266 = vst.msk [vmem:[#allocation2 + $0x70] sm:$0xf] %vm1237_vm8, %v1198_v9  ;;  %v1720_v9 = vrot.slane %v1718_v57, 4  ;;  %v1772_v57 = vshll.u32 %v4116_v42, 16 }
 0x12f   : > { %1436 = vst.msk [vmem:[#allocation2 + $0x10] sm:$0xf] %vm1431_vm9, %v1344_v13  ;;  %v1717_v11 = vsel %vm4615_vm2, %v1712_v56, %v1716_v60  ;;  %v1748_v13 = vshll.u32 %v4113_v54, 16  ;;  %v1803_v54 = vrot.slane %v1801_v51, 4 }
 0x130   : > { %v1721_v26 = vor.u32 %v1720_v9, %v1716_v60  ;;  %v4122_v60 = vld [vmem:[%s4604_s22 + $0xa4] sm:$0x1]  ;;  %v1774_v6 = vrot.slane %v1772_v57, 5 }
 0x131   : > { %v1750_v29 = vrot.slane %v1748_v13, 5  ;;  %v1820_v9 = vshll.u32 %v4122_v60, 16 }
 0x132   : > { %1916 = vrot.lane.b32.xlu1 %v1645_v16, %s4550_s26  ;;  %v1703_v16 = vsel %vm4615_vm2, %v1698_v0, %v1702_v1  ;;  %v1722_v43 = vrot.slane %v1721_v26, 4  ;;  %v1784_v1 = vrot.slane %v1783_v49, 4 }
 0x133   : > { %1914 = vrot.lane.b32.xlu0 %v1631_v17, %s4550_s26  ;;  %1912 = vrot.lane.b32.xlu2 %v1621_v23, %s4550_s26  ;;  %v1735_v17 = vor.u32 %v1734_v4, %v1731_v3  ;;  %v1756_v23 = vshll.u32 %v4114_v10, 16  ;;  %v1751_v45 = vsel %vm4615_vm2, %v1746_v28, %v1750_v29  ;;  %v1806_v3 = vrot.slane %v1804_v52, 5  ;;  %v4124_v10 = vld [vmem:[%s4604_s22 + $0xac] sm:$0xf] }
 0x134   : > { %v1336_v36 = vpop.permute.xlu1 %1335  ;;  %v1727_v56 = vsel %vm4615_vm2, %v1722_v43, %v1726_v44  ;;  %v1834_v22 = vshll.u32 %v4124_v10, 16  ;;  %v1828_v28 = vshll.u32 %v4123_v15, 16  ;;  %v1822_v30 = vrot.slane %v1820_v9, 5 }
 0x135   : > { %1432 = vst.msk [vmem:[#allocation2] sm:$0xf] %vm1431_vm9, %v1336_v36  ;;  %v1204_v40 = vpop.permute.xlu0 %1203  ;;  %v1350_v47 = vpop.permute.xlu2 %1349  ;;  %v1736_v31 = vrot.slane %v1735_v17, 4  ;;  %v4121_v36 = vld [vmem:[%s4604_s22 + $0xa0] sm:$0xf]  ;;  %v1807_v17 = vor.u32 %v1806_v3, %v1803_v54  ;;  %v1827_v44 = vrot.slane %v1825_v27, 4 }
 0x136   : > { %1269 = vst.msk [vmem:[#allocation2 + $0x7c] sm:$0xf] %vm1237_vm8, %v1204_v40  ;;  %v1758_v40 = vrot.slane %v1756_v23, 5  ;;  %v1814_v48 = vshrl.u32 %v4121_v36, 16  ;;  %v1838_v23 = vshrl.u32 %v4124_v10, 16 }
 0x137   : > { %1439 = vst.msk [vmem:[#allocation2 + $0x1c] sm:$0xf] %vm1431_vm9, %v1350_v47  ;;  %v1810_v47 = vshll.u32 %v4121_v36, 16  ;;  %v1741_v53 = vsel %vm4615_vm2, %v1736_v31, %v5251_v61  ;;  %v1788_v61 = vrot.slane %v1786_v50, 5  ;;  %v4127_v31 = vld [vmem:[%s4604_s22 + $0xb8] sm:$0xf] }
 0x138   : > { %v1816_v0 = vrot.slane %v1814_v48, 4  ;;  %v1808_v33 = vrot.slane %v1807_v17, 4  ;;  %v1840_v38 = vrot.slane %v1838_v23, 4 }
 0x139   : > { %v5293_v62 = vrot.slane %v1810_v47, 5  ;;  %v1858_v47 = vshll.u32 %v4127_v31, 16 }
 0x13a   : > { %1922 = vrot.lane.b32.xlu1 %v1679_v34, %s4550_s26 }
 0x13b   : > { %1920 = vrot.lane.b32.xlu0 %v1669_v55, %s4550_s26  ;;  %1918 = vrot.lane.b32.xlu2 %v1655_v58, %s4550_s26  ;;  %v1769_v55 = vor.u32 %v1768_v32, %v5276_v37  ;;  %v1759_v58 = vor.u32 %v1758_v40, %v1755_v39  ;;  %v1817_v12 = vor.u32 %v1816_v0, %v5293_v62  ;;  %v1836_v32 = vrot.slane %v1834_v22, 5  ;;  %v4130_v39 = vld [vmem:[%s4604_s22 + $0xc4] sm:$0xf]  ;;  %v4129_v40 = vld [vmem:[%s4604_s22 + $0xc0] sm:$0xf] }
 0x13c   : > { %v1342_v5 = vpop.permute.xlu1 %1341  ;;  %v1813_v49 = vsel %vm4615_vm2, %v1808_v33, %v5293_v62  ;;  %v1882_v51 = vshll.u32 %v4130_v39, 16  ;;  %v1886_v52 = vshrl.u32 %v4130_v39, 16  ;;  %v1873_v57 = vshrl.u32 %v4129_v40, 16  ;;  %v4135_v33 = vld [vmem:[%s4604_s22 + $0x18] sm:$0xe] }
 0x13d   : > { %1435 = vst.msk [vmem:[#allocation2 + $0xc] sm:$0xf] %vm1431_vm9, %v1342_v5  ;;  %v1340_v7 = vpop.permute.xlu0 %1339  ;;  %v1356_v14 = vpop.permute.xlu2 %1355  ;;  %v1770_v5 = vrot.slane %v1769_v55, 4  ;;  %v1760_v2 = vrot.slane %v1759_v58, 4  ;;  %v1818_v29 = vrot.slane %v1817_v12, 4  ;;  %v1876_v58 = vshll.u32 %v4129_v40, 16 }
 0x13e   : > { %1434 = vst.msk [vmem:[#allocation2 + $0x8] sm:$0xf] %vm1431_vm9, %v1340_v7  ;;  %v4126_v7 = vld [vmem:[%s4604_s22 + $0xb4] sm:$0xf]  ;;  %v1860_v0 = vrot.slane %v1858_v47, 5 }
 0x13f   : > { %1442 = vst.msk [vmem:[#allocation2 + $0x28] sm:$0xf] %vm1431_vm9, %v1356_v14  ;;  %v4119_v14 = vld [vmem:[%s4604_s22 + $0x98] sm:$0x1]  ;;  %v1849_v18 = vshrl.u32 %v4126_v7, 16  ;;  %v1852_v19 = vshll.u32 %v4126_v7, 16  ;;  %v1775_v20 = vsel %vm4615_vm2, %v1770_v5, %v1774_v6  ;;  %v1765_v21 = vsel %vm4615_vm2, %v1760_v2, %v5276_v37 }
 0x140   : > { %v1796_v26 = vshll.u32 %v4119_v14, 16  ;;  %v4131_v5 = vld [vmem:[%s4604_s22 + $0xc8] sm:$0x1]  ;;  %v1875_v6 = vrot.slane %v1873_v57, 4  ;;  %v1878_v2 = vrot.slane %v1876_v58, 5 }
 0x141   : > { %v1851_v35 = vrot.slane %v1849_v18, 4  ;;  %v1854_v36 = vrot.slane %v1852_v19, 5  ;;  %v1892_v14 = vshll.u32 %v4131_v5, 16 }
 0x142   : > { %1928 = vrot.lane.b32.xlu1 %v1717_v11, %s4550_s26  ;;  %v1792_v11 = vrot.slane %v1790_v59, 4  ;;  %v1798_v43 = vrot.slane %v1796_v26, 5  ;;  %v1862_v59 = vshrl.u32 %v4127_v31, 16  ;;  %v4133_v26 = vld [vmem:[%s4604_s22 + $0x10] sm:$0xf] }
 0x143   : > { %1926 = vrot.lane.b32.xlu0 %v1703_v16, %s4550_s26  ;;  %1924 = vrot.lane.b32.xlu2 %v1693_v24, %s4550_s26  ;;  %v1789_v16 = vsel %vm4615_vm2, %v1784_v1, %v1788_v61  ;;  %v1855_v50 = vor.u32 %v1854_v36, %v1851_v35  ;;  %v1884_v1 = vrot.slane %v1882_v51, 5  ;;  %v4136_v35 = vld [vmem:[%s4604_s22 + $0x1c] sm:$0xf]  ;;  %v2123_v36 = vrot.slane %v4133_v26, 5  ;;  %v4138_v51 = vld [vmem:[%s4604_s22 + $0x24] sm:$0xe] }
 0x144   : > { %v1348_v34 = vpop.permute.xlu1 %1347  ;;  %v1793_v24 = vor.u32 %v1792_v11, %v1788_v61  ;;  %v1888_v61 = vrot.slane %v1886_v52, 4  ;;  %v1864_v9 = vrot.slane %v1862_v59, 4  ;;  %v4128_v11 = vld [vmem:[%s4604_s22 + $0xbc] sm:$0x1]  ;;  %v2130_v39 = vrot.slane %v4136_v35, 5 }
 0x145   : > { %1438 = vst.msk [vmem:[#allocation2 + $0x18] sm:$0xf] %vm1431_vm9, %v1348_v34  ;;  %v1346_v41 = vpop.permute.xlu0 %1345  ;;  %v1362_v46 = vpop.permute.xlu2 %1361  ;;  %v4125_v34 = vld [vmem:[%s4604_s22 + $0xb0] sm:$0x1]  ;;  %v1856_v62 = vrot.slane %v1855_v50, 4  ;;  %v1868_v19 = vshll.u32 %v4128_v11, 16 }
 0x146   : > { %1437 = vst.msk [vmem:[#allocation2 + $0x14] sm:$0xf] %vm1431_vm9, %v1346_v41  ;;  %v1794_v42 = vrot.slane %v1793_v24, 4  ;;  %v1844_v55 = vshll.u32 %v4125_v34, 16  ;;  %v1865_v18 = vor.u32 %v1864_v9, %v1860_v0  ;;  %v4134_v34 = vld [vmem:[%s4604_s22 + $0x14] sm:$0x1] }
 0x147   : > { %1445 = vst.msk [vmem:[#allocation2 + $0x34] sm:$0xf] %vm1431_vm9, %v1362_v46  ;;  %v1823_v46 = vsel %vm4615_vm2, %v1818_v29, %v1822_v30  ;;  %v1861_v12 = vsel %vm4615_vm2, %v1856_v62, %v1860_v0  ;;  %v4140_v50 = vld [vmem:[%s4604_s22 + $0x2c] sm:$0x1]  ;;  %v4182_v59 = vrot.slane %v4138_v51, 9  ;;  %v2132_v62 = vrot.slane %v2130_v39, 4 }
 0x148   : > { %v1866_v27 = vrot.slane %v1865_v18, 4  ;;  %v2140_v57 = vrot.slane %v4140_v50, 5 }
 0x14a   : > { %1934 = vrot.lane.b32.xlu1 %v1751_v45, %s4550_s26  ;;  %v1830_v45 = vrot.slane %v1828_v28, 5  ;;  %v1870_v28 = vrot.slane %v1868_v19, 5 }
 0x14b   : > { %1932 = vrot.lane.b32.xlu0 %v1741_v53, %s4550_s26  ;;  %1930 = vrot.lane.b32.xlu2 %v1727_v56, %s4550_s26  ;;  %v1841_v53 = vor.u32 %v1840_v38, %v1836_v32  ;;  %v1799_v56 = vsel %vm4615_vm2, %v1794_v42, %v1798_v43  ;;  %v4181_v38 = vrot.slane %v4135_v33, 9  ;;  %v2126_v42 = vrot.slane %v4134_v34, 5  ;;  %v4139_v43 = vld [vmem:[%s4604_s22 + $0x28] sm:$0xf] }
 0x14c   : > { %v1354_v4 = vpop.permute.xlu1 %1353  ;;  %v1831_v60 = vor.u32 %v1830_v45, %v1827_v44 }
 0x14d   : > { %1441 = vst.msk [vmem:[#allocation2 + $0x24] sm:$0xf] %vm1431_vm9, %v1354_v4  ;;  %v1352_v8 = vpop.permute.xlu0 %1351  ;;  %v1368_v13 = vpop.permute.xlu2 %1367  ;;  %v1842_v3 = vrot.slane %v1841_v53, 4  ;;  %v1846_v4 = vrot.slane %v1844_v55, 5  ;;  %v2131_v47 = vsel %vm4789_vm5, %v4181_v38, %v2130_v39  ;;  %v4137_v53 = vld [vmem:[%s4604_s22 + $0x20] sm:$0x1] }
 0x14e   : > { %1440 = vst.msk [vmem:[#allocation2 + $0x20] sm:$0xf] %vm1431_vm9, %v1352_v8  ;;  %v1832_v8 = vrot.slane %v1831_v60, 4  ;;  %v4142_v60 = vld [vmem:[%s4604_s22 + $0x34] sm:$0xf]  ;;  %v2133_v0 = vrot.slane %v4137_v53, 5 }
 0x14f   : > { %1448 = vst.msk [vmem:[#allocation2 + $0x40] sm:$0xf] %vm1431_vm9, %v1368_v13  ;;  %v1889_v13 = vor.u32 %v1888_v61, %v1884_v1  ;;  %v1847_v15 = vsel %vm4615_vm2, %v1842_v3, %v1846_v4  ;;  %v4144_v3 = vld [vmem:[%s4604_s22 + $0x3c] sm:$0xe]  ;;  %v4145_v4 = vld [vmem:[%s4604_s22 + $0x40] sm:$0xf] }
 0x150   : > { %v1837_v17 = vsel %vm4615_vm2, %v1832_v8, %v1836_v32  ;;  %v4132_v32 = vld [vmem:[%s4604_s22 + $0xc] sm:$0xe]  ;;  %v2144_v5 = vrot.slane %v4142_v60, 5  ;;  %v4184_v8 = vrot.slane %v4144_v3, 9  ;;  %v2151_v9 = vrot.slane %v4145_v4, 5 }
 0x151   : > { %v4180_v45 = vrot.slane %v4132_v32, 9  ;;  %v4154_v32 = vld [vmem:[%s4604_s22 + $0x64] sm:$0xf]  ;;  %v4152_v39 = vld [vmem:[%s4604_s22 + $0x5c] sm:$0x1] }
 0x152   : > { %1940 = vrot.lane.b32.xlu1 %v1789_v16, %s4550_s26  ;;  %v1879_v16 = vor.u32 %v1878_v2, %v1875_v6  ;;  %v4143_v6 = vld [vmem:[%s4604_s22 + $0x38] sm:$0x1]  ;;  %v2134_v2 = vsel %vm4789_vm5, %v2132_v62, %v2133_v0  ;;  %v2146_v11 = vrot.slane %v2144_v5, 4 }
 0x153   : > { %1938 = vrot.lane.b32.xlu0 %v1775_v20, %s4550_s26  ;;  %1936 = vrot.lane.b32.xlu2 %v1765_v21, %s4550_s26  ;;  %v1890_v20 = vrot.slane %v1889_v13, 4  ;;  %v1894_v21 = vrot.slane %v1892_v14, 5  ;;  %v2124_v52 = vsel %vm4789_vm5, %v4180_v45, %v2123_v36  ;;  %v4148_v13 = vld [vmem:[%s4604_s22 + $0x4c] sm:$0xf] }
 0x154   : > { %v1360_v37 = vpop.permute.xlu1 %1359  ;;  %v1880_v23 = vrot.slane %v1879_v16, 4  ;;  %v2158_v18 = vrot.slane %v4148_v13, 5 }
 0x155   : > { %1444 = vst.msk [vmem:[#allocation2 + $0x30] sm:$0xf] %vm1431_vm9, %v1360_v37  ;;  %v1358_v41 = vpop.permute.xlu0 %1357  ;;  %v1374_v48 = vpop.permute.xlu2 %1373  ;;  %v1895_v30 = vsel %vm4615_vm2, %v1890_v20, %v1894_v21  ;;  %v1871_v37 = vsel %vm4615_vm2, %v1866_v27, %v1870_v28  ;;  %v4149_v20 = vld [vmem:[%s4604_s22 + $0x50] sm:$0x1]  ;;  %v4147_v21 = vld [vmem:[%s4604_s22 + $0x48] sm:$0xe] }
 0x156   : > { %1443 = vst.msk [vmem:[#allocation2 + $0x2c] sm:$0xf] %vm1431_vm9, %v1358_v41  ;;  %v1885_v31 = vsel %vm4615_vm2, %v1880_v23, %v1884_v1  ;;  %v2125_v41 = vrot.slane %v2123_v36, 4  ;;  %v4146_v23 = vld [vmem:[%s4604_s22 + $0x44] sm:$0x1]  ;;  %v2161_v26 = vrot.slane %v4149_v20, 5 }
 0x157   : > { %1451 = vst.msk [vmem:[#allocation2 + $0x4c] sm:$0xf] %vm1431_vm9, %v1374_v48  ;;  %v2137_v48 = vrot.slane %v4139_v43, 5  ;;  %v4185_v28 = vrot.slane %v4147_v21, 9  ;;  %v2154_v33 = vrot.slane %v4146_v23, 5  ;;  %v2172_v43 = vrot.slane %v4154_v32, 5 }
 0x159   : > { %v2139_v55 = vrot.slane %v2137_v48, 4  ;;  %v2159_v34 = vsel %vm4789_vm5, %v4185_v28, %v2158_v18  ;;  %v4164_v28 = vld [vmem:[%s4604_s22 + $0x8c] sm:$0x1] }
 0x15a   : > { %1946 = vrot.lane.b32.xlu1 %v1823_v46, %s4550_s26 }
 0x15b   : > { %1944 = vrot.lane.b32.xlu0 %v1813_v49, %s4550_s26  ;;  %1942 = vrot.lane.b32.xlu2 %v1799_v56, %s4550_s26  ;;  %v2127_v49 = vsel %vm4789_vm5, %v2125_v41, %v2126_v42  ;;  %v2141_v61 = vsel %vm4789_vm5, %v2139_v55, %v2140_v57  ;;  %v4150_v41 = vld [vmem:[%s4604_s22 + $0x54] sm:$0xe]  ;;  %v4158_v55 = vld [vmem:[%s4604_s22 + $0x74] sm:$0x1] }
 0x15c   : > { %v1366_v54 = vpop.permute.xlu1 %1365  ;;  %v4156_v57 = vld [vmem:[%s4604_s22 + $0x6c] sm:$0xe]  ;;  %v2182_v60 = vrot.slane %v4158_v55, 5  ;;  %v4228_v55 = vld [vmem:[%s4604_s22 + $0x18] sm:$0xf] }
 0x15d   : > { %1447 = vst.msk [vmem:[#allocation2 + $0x3c] sm:$0xf] %vm1431_vm9, %v1366_v54  ;;  %v1364_v7 = vpop.permute.xlu0 %1363  ;;  %v1380_v10 = vpop.permute.xlu2 %1379  ;;  %v2138_v54 = vsel %vm4789_vm5, %v4182_v59, %v2137_v48  ;;  %v4155_v59 = vld [vmem:[%s4604_s22 + $0x68] sm:$0x1]  ;;  %v4188_v0 = vrot.slane %v4156_v57, 9 }
 0x15e   : > { %1446 = vst.msk [vmem:[#allocation2 + $0x38] sm:$0xf] %vm1431_vm9, %v1364_v7  ;;  %v4141_v7 = vld [vmem:[%s4604_s22 + $0x30] sm:$0xe]  ;;  %v2175_v3 = vrot.slane %v4155_v59, 5 }
 0x15f   : > { %1454 = vst.msk [vmem:[#allocation2 + $0x58] sm:$0xf] %vm1431_vm9, %v1380_v10 }
 0x162   : > { %1952 = vrot.lane.b32.xlu1 %v1861_v12, %s4550_s26  ;;  %v2147_v12 = vrot.slane %v4143_v6, 5 }
 0x163   : > { %1950 = vrot.lane.b32.xlu0 %v1847_v15, %s4550_s26  ;;  %1948 = vrot.lane.b32.xlu2 %v1837_v17, %s4550_s26  ;;  %v4183_v15 = vrot.slane %v4141_v7, 9  ;;  %v2152_v17 = vsel %vm4789_vm5, %v4184_v8, %v2151_v9  ;;  %v4163_v7 = vld [vmem:[%s4604_s22 + $0x88] sm:$0xf] }
 0x164   : > { %v1372_v22 = vpop.permute.xlu1 %1371  ;;  %v2148_v19 = vsel %vm4789_vm5, %v2146_v11, %v2147_v12  ;;  %v4159_v11 = vld [vmem:[%s4604_s22 + $0x78] sm:$0xe]  ;;  %v2193_v13 = vrot.slane %v4163_v7, 5 }
 0x165   : > { %1450 = vst.msk [vmem:[#allocation2 + $0x48] sm:$0xf] %vm1431_vm9, %v1372_v22  ;;  %v1370_v24 = vpop.permute.xlu0 %1369  ;;  %v1386_v29 = vpop.permute.xlu2 %1385  ;;  %v2145_v22 = vsel %vm4789_vm5, %v4183_v15, %v2144_v5 }
 0x166   : > { %1449 = vst.msk [vmem:[#allocation2 + $0x44] sm:$0xf] %vm1431_vm9, %v1370_v24  ;;  %v2160_v24 = vrot.slane %v2158_v18, 4 }
 0x167   : > { %1457 = vst.msk [vmem:[#allocation2 + $0x64] sm:$0xf] %vm1431_vm9, %v1386_v29 }
 0x168   : > { %v2162_v36 = vsel %vm4789_vm5, %v2160_v24, %v2161_v26  ;;  %v4167_v24 = vld [vmem:[%s4604_s22 + $0x98] sm:$0x1]  ;;  %v4165_v26 = vld [vmem:[%s4604_s22 + $0x90] sm:$0xe] }
 0x16a   : > { %1958 = vrot.lane.b32.xlu1 %v1895_v30, %s4550_s26  ;;  %v4151_v30 = vld [vmem:[%s4604_s22 + $0x58] sm:$0xf] }
 0x16b   : > { %1956 = vrot.lane.b32.xlu0 %v1885_v31, %s4550_s26  ;;  %1954 = vrot.lane.b32.xlu2 %v1871_v37, %s4550_s26  ;;  %v2153_v31 = vrot.slane %v2151_v9, 4  ;;  %v4153_v37 = vld [vmem:[%s4604_s22 + $0x60] sm:$0xe]  ;;  %v2165_v38 = vrot.slane %v4151_v30, 5  ;;  %v4161_v9 = vld [vmem:[%s4604_s22 + $0x80] sm:$0x1] }
 0x16c   : > { %v1378_v40 = vpop.permute.xlu1 %1377  ;;  %v4187_v42 = vrot.slane %v4153_v37, 9  ;;  %v2203_v30 = vrot.slane %v4167_v24, 5  ;;  %v2196_v37 = vrot.slane %v4164_v28, 5 }
 0x16d   : > { %1453 = vst.msk [vmem:[#allocation2 + $0x54] sm:$0xf] %vm1431_vm9, %v1378_v40  ;;  %v1376_v44 = vpop.permute.xlu0 %1375  ;;  %v1392_v46 = vpop.permute.xlu2 %1391  ;;  %v2155_v40 = vsel %vm4789_vm5, %v2153_v31, %v2154_v33  ;;  %v2167_v45 = vrot.slane %v2165_v38, 4  ;;  %v4191_v33 = vrot.slane %v4165_v26, 9 }
 0x16e   : > { %1452 = vst.msk [vmem:[#allocation2 + $0x50] sm:$0xf] %vm1431_vm9, %v1376_v44  ;;  %v2173_v51 = vsel %vm4789_vm5, %v4187_v42, %v2172_v43 }
 0x16f   : > { %1460 = vst.msk [vmem:[#allocation2 + $0x70] sm:$0xf] %vm1431_vm9, %v1392_v46  ;;  %v2168_v46 = vrot.slane %v4152_v39, 5 }
 0x171   : > { %v2169_v53 = vsel %vm4789_vm5, %v2167_v45, %v2168_v46  ;;  %v4168_v45 = vld [vmem:[%s4604_s22 + $0x9c] sm:$0xe] }
 0x172   : > { %2237 = vrot.lane.b32.xlu1 %v2131_v47, %s4551_s27  ;;  %v4157_v47 = vld [vmem:[%s4604_s22 + $0x70] sm:$0xf] }
 0x173   : > { %2235 = vrot.lane.b32.xlu0 %v2127_v49, %s4551_s27  ;;  %2233 = vrot.lane.b32.xlu2 %v2124_v52, %s4551_s27  ;;  %v4186_v49 = vrot.slane %v4150_v41, 9  ;;  %v2179_v52 = vrot.slane %v4157_v47, 5  ;;  %v4172_v41 = vld [vmem:[%s4604_s22 + $0xac] sm:$0xf] }
 0x174   : > { %v1384_v58 = vpop.permute.xlu1 %1383  ;;  %v2214_v47 = vrot.slane %v4172_v41, 5  ;;  %v4232_v41 = vld [vmem:[%s4604_s22 + $0x28] sm:$0xf] }
 0x175   : > { %1456 = vst.msk [vmem:[#allocation2 + $0x60] sm:$0xf] %vm1431_vm9, %v1384_v58  ;;  %v1382_v56 = vpop.permute.xlu0 %1381  ;;  %v1398_v1 = vpop.permute.xlu2 %1397  ;;  %v2166_v58 = vsel %vm4789_vm5, %v4186_v49, %v2165_v38  ;;  %v2180_v6 = vsel %vm4789_vm5, %v4188_v0, %v2179_v52  ;;  %v2608_v0 = vshll.u32 %v4228_v55, 16 }
 0x176   : > { %1455 = vst.msk [vmem:[#allocation2 + $0x5c] sm:$0xf] %vm1431_vm9, %v1382_v56  ;;  %v2181_v56 = vrot.slane %v2179_v52, 4 }
 0x177   : > { %1463 = vst.msk [vmem:[#allocation2 + $0x7c] sm:$0xf] %vm1431_vm9, %v1398_v1 }
 0x178   : > { %v2183_v5 = vsel %vm4789_vm5, %v2181_v56, %v2182_v60 }
 0x17a   : > { %2243 = vrot.lane.b32.xlu1 %v2141_v61, %s4551_s27  ;;  %v4160_v61 = vld [vmem:[%s4604_s22 + $0x7c] sm:$0xf] }
 0x17b   : > { %2241 = vrot.lane.b32.xlu0 %v2138_v54, %s4551_s27  ;;  %2239 = vrot.lane.b32.xlu2 %v2134_v2, %s4551_s27  ;;  %v2174_v54 = vrot.slane %v2172_v43, 4  ;;  %v4162_v2 = vld [vmem:[%s4604_s22 + $0x84] sm:$0xe]  ;;  %v2186_v8 = vrot.slane %v4160_v61, 5  ;;  %v4170_v43 = vld [vmem:[%s4604_s22 + $0xa4] sm:$0x1] }
 0x17c   : > { %v1390_v10 = vpop.permute.xlu1 %1389  ;;  %v4190_v12 = vrot.slane %v4162_v2, 9  ;;  %v5506_v61 = vld [vmem:[%s4604_s22 + $0xb8] sm:$0xf] }
 0x17d   : > { %1459 = vst.msk [vmem:[#allocation2 + $0x6c] sm:$0xf] %vm1431_vm9, %v1390_v10  ;;  %v1388_v14 = vpop.permute.xlu0 %1387  ;;  %v1901_v16 = vpop.permute.xlu2 %1900  ;;  %v2176_v10 = vsel %vm4789_vm5, %v2174_v54, %v2175_v3  ;;  %v2188_v15 = vrot.slane %v2186_v8, 4  ;;  %v4173_v3 = vld [vmem:[%s4604_s22 + $0xb0] sm:$0x1]  ;;  %v2221_v7 = vrot.slane %v5506_v61, 5 }
 0x17e   : > { %1458 = vst.msk [vmem:[#allocation2 + $0x68] sm:$0xf] %vm1431_vm9, %v1388_v14  ;;  %v2194_v21 = vsel %vm4789_vm5, %v4190_v12, %v2193_v13  ;;  %v2216_v12 = vrot.slane %v2214_v47, 4 }
 0x17f   : > { %1995 = vst.msk [vmem:[#allocation2 + $0x8] sm:$0xf] %vm1992_vm10, %v1901_v16  ;;  %v2189_v16 = vrot.slane %v4161_v9, 5 }
 0x181   : > { %v2190_v23 = vsel %vm4789_vm5, %v2188_v15, %v2189_v16  ;;  %v4196_v15 = vld [vmem:[%s4604_s22 + $0x18] sm:$0xf] }
 0x182   : > { %2249 = vrot.lane.b32.xlu1 %v2152_v17, %s4551_s27  ;;  %v4166_v17 = vld [vmem:[%s4604_s22 + $0x94] sm:$0xf] }
 0x183   : > { %2247 = vrot.lane.b32.xlu0 %v2148_v19, %s4551_s27  ;;  %2245 = vrot.lane.b32.xlu2 %v2145_v22, %s4551_s27  ;;  %v4189_v19 = vrot.slane %v4159_v11, 9  ;;  %v2200_v22 = vrot.slane %v4166_v17, 5 }
 0x184   : > { %v1396_v27 = vpop.permute.xlu1 %1395 }
 0x185   : > { %1462 = vst.msk [vmem:[#allocation2 + $0x78] sm:$0xf] %vm1431_vm9, %v1396_v27  ;;  %v1394_v29 = vpop.permute.xlu0 %1393  ;;  %v1907_v35 = vpop.permute.xlu2 %1906  ;;  %v2187_v27 = vsel %vm4789_vm5, %v4189_v19, %v2186_v8  ;;  %v2201_v39 = vsel %vm4789_vm5, %v4191_v33, %v2200_v22  ;;  %v4230_v8 = vld [vmem:[%s4604_s22 + $0x20] sm:$0x1] }
 0x186   : > { %1461 = vst.msk [vmem:[#allocation2 + $0x74] sm:$0xf] %vm1431_vm9, %v1394_v29  ;;  %v2202_v29 = vrot.slane %v2200_v22, 4  ;;  %v2624_v17 = vshll.u32 %v4230_v8, 16  ;;  %v4278_v33 = vld [vmem:[%s4604_s22 + $0x20] sm:$0x1] }
 0x187   : > { %1998 = vst.msk [vmem:[#allocation2 + $0x14] sm:$0xf] %vm1992_vm10, %v1907_v35 }
 0x188   : > { %v2204_v38 = vsel %vm4789_vm5, %v2202_v29, %v2203_v30  ;;  %v2626_v22 = vrot.slane %v2624_v17, 5  ;;  %v4280_v17 = vld [vmem:[%s4604_s22 + $0x28] sm:$0xf] }
 0x18a   : > { %2255 = vrot.lane.b32.xlu1 %v2162_v36, %s4551_s27  ;;  %v4169_v36 = vld [vmem:[%s4604_s22 + $0xa0] sm:$0xf] }
 0x18b   : > { %2253 = vrot.lane.b32.xlu0 %v2159_v34, %s4551_s27  ;;  %2251 = vrot.lane.b32.xlu2 %v2155_v40, %s4551_s27  ;;  %v2195_v34 = vrot.slane %v2193_v13, 4  ;;  %v4171_v40 = vld [vmem:[%s4604_s22 + $0xa8] sm:$0xe]  ;;  %v2207_v42 = vrot.slane %v4169_v36, 5  ;;  %v2217_v13 = vrot.slane %v4173_v3, 5 }
 0x18c   : > { %v1899_v44 = vpop.permute.xlu1 %1898  ;;  %v4193_v46 = vrot.slane %v4171_v40, 9  ;;  %v4276_v36 = vld [vmem:[%s4604_s22 + $0x18] sm:$0xe]  ;;  %v4205_v3 = vld [vmem:[%s4604_s22 + $0x4c] sm:$0xf] }
 0x18d   : > { %1994 = vst.msk [vmem:[#allocation2 + $0x4] sm:$0xf] %vm1992_vm10, %v1899_v44  ;;  %v1897_v48 = vpop.permute.xlu0 %1896  ;;  %v1913_v50 = vpop.permute.xlu2 %1912  ;;  %v2197_v44 = vsel %vm4789_vm5, %v2195_v34, %v2196_v37  ;;  %v2209_v49 = vrot.slane %v2207_v42, 4  ;;  %v4324_v40 = vrot.slane %v4276_v36, 9 }
 0x18e   : > { %1993 = vst.msk [vmem:[#allocation2] sm:$0xf] %vm1992_vm10, %v1897_v48 }
 0x18f   : > { %2001 = vst.msk [vmem:[#allocation2 + $0x20] sm:$0xf] %vm1992_vm10, %v1913_v50  ;;  %v2210_v50 = vrot.slane %v4170_v43, 5  ;;  %v4231_v43 = vld [vmem:[%s4604_s22 + $0x24] sm:$0xf] }
 0x191   : > { %v2211_v60 = vsel %vm4789_vm5, %v2209_v49, %v2210_v50  ;;  %v2642_v49 = vshrl.u32 %v4232_v41, 16 }
 0x192   : > { %2261 = vrot.lane.b32.xlu1 %v2173_v51, %s4551_s27  ;;  %v4229_v51 = vld [vmem:[%s4604_s22 + $0x1c] sm:$0xf] }
 0x193   : > { %2259 = vrot.lane.b32.xlu0 %v2169_v53, %s4551_s27  ;;  %2257 = vrot.lane.b32.xlu2 %v2166_v58, %s4551_s27  ;;  %v4192_v53 = vrot.slane %v4168_v45, 9  ;;  %v2215_v58 = vsel %vm4789_vm5, %v4193_v46, %v2214_v47  ;;  %v2614_v59 = vshll.u32 %v4229_v51, 16  ;;  %v2618_v56 = vshrl.u32 %v4229_v51, 16 }
 0x194   : > { %v1905_v62 = vpop.permute.xlu1 %1904  ;;  %v2629_v51 = vshrl.u32 %v4231_v43, 16 }
 0x195   : > { %1997 = vst.msk [vmem:[#allocation2 + $0x10] sm:$0xf] %vm1992_vm10, %v1905_v62  ;;  %v1903_v1 = vpop.permute.xlu0 %1902  ;;  %v1919_v4 = vpop.permute.xlu2 %1918  ;;  %v2605_v62 = vshrl.u32 %v4228_v55, 16  ;;  %v2208_v54 = vsel %vm4789_vm5, %v4192_v53, %v2207_v42 }
 0x196   : > { %1996 = vst.msk [vmem:[#allocation2 + $0xc] sm:$0xf] %vm1992_vm10, %v1903_v1  ;;  %v4174_v1 = vld [vmem:[%s4604_s22 + $0xb4] sm:$0xe] }
 0x197   : > { %2004 = vst.msk [vmem:[#allocation2 + $0x2c] sm:$0xf] %vm1992_vm10, %v1919_v4  ;;  %v2616_v4 = vrot.slane %v2614_v59, 5  ;;  %v4194_v2 = vrot.slane %v4174_v1, 9  ;;  %v2607_v9 = vrot.slane %v2605_v62, 4 }
 0x198   : > { %v4233_v62 = vld [vmem:[%s4604_s22 + $0x2c] sm:$0x1] }
 0x199   : > { %v2648_v8 = vshll.u32 %v4233_v62, 16 }
 0x19a   : > { %2267 = vrot.lane.b32.xlu1 %v2183_v5, %s4551_s27  ;;  %v2620_v5 = vrot.slane %v2618_v56, 4  ;;  %v2644_v56 = vrot.slane %v2642_v49, 4 }
 0x19b   : > { %2265 = vrot.lane.b32.xlu0 %v2180_v6, %s4551_s27  ;;  %2263 = vrot.lane.b32.xlu2 %v2176_v10, %s4551_s27  ;;  %v2610_v10 = vrot.slane %v2608_v0, 5  ;;  %v2631_v0 = vrot.slane %v2629_v51, 4 }
 0x19c   : > { %v1911_v14 = vpop.permute.xlu1 %1910  ;;  %v2621_v16 = vor.u32 %v2620_v5, %v2616_v4 }
 0x19d   : > { %2000 = vst.msk [vmem:[#allocation2 + $0x1c] sm:$0xf] %vm1992_vm10, %v1911_v14  ;;  %v1909_v18 = vpop.permute.xlu0 %1908  ;;  %v1925_v20 = vpop.permute.xlu2 %1924  ;;  %v2611_v19 = vor.u32 %v2610_v10, %v2607_v9  ;;  %v4199_v10 = vld [vmem:[%s4604_s22 + $0x28] sm:$0xf] }
 0x19e   : > { %1999 = vst.msk [vmem:[#allocation2 + $0x18] sm:$0xf] %vm1992_vm10, %v1909_v18  ;;  %v2222_v18 = vsel %vm4789_vm5, %v4194_v2, %v2221_v7 }
 0x19f   : > { %2007 = vst.msk [vmem:[#allocation2 + $0x38] sm:$0xf] %vm1992_vm10, %v1925_v20  ;;  %v2218_v20 = vsel %vm4789_vm5, %v2216_v12, %v2217_v13  ;;  %v2612_v24 = vrot.slane %v2611_v19, 4 }
 0x1a1   : > { %v2617_v30 = vsel %vm4615_vm2, %v2612_v24, %v2616_v4  ;;  %v3222_v24 = vrot.slane %v4280_v17, 5 }
 0x1a2   : > { %2273 = vrot.lane.b32.xlu1 %v2194_v21, %s4551_s27  ;;  %v2622_v21 = vrot.slane %v2621_v16, 4  ;;  %v2650_v16 = vrot.slane %v2648_v8, 5 }
 0x1a3   : > { %2271 = vrot.lane.b32.xlu0 %v2190_v23, %s4551_s27  ;;  %2269 = vrot.lane.b32.xlu2 %v2187_v27, %s4551_s27  ;;  %v4277_v27 = vld [vmem:[%s4604_s22 + $0x1c] sm:$0xf] }
 0x1a4   : > { %v1917_v31 = vpop.permute.xlu1 %1916  ;;  %v2627_v29 = vsel %vm4615_vm2, %v2622_v21, %v2626_v22  ;;  %v4242_v22 = vld [vmem:[%s4604_s22 + $0x50] sm:$0x1] }
 0x1a5   : > { %2003 = vst.msk [vmem:[#allocation2 + $0x28] sm:$0xf] %vm1992_vm10, %v1917_v31  ;;  %v1915_v35 = vpop.permute.xlu0 %1914  ;;  %v1931_v32 = vpop.permute.xlu2 %1930  ;;  %v3215_v31 = vrot.slane %v4277_v27, 5  ;;  %v4281_v27 = vld [vmem:[%s4604_s22 + $0x2c] sm:$0x1] }
 0x1a6   : > { %2002 = vst.msk [vmem:[#allocation2 + $0x24] sm:$0xf] %vm1992_vm10, %v1915_v35  ;;  %v4197_v35 = vld [vmem:[%s4604_s22 + $0x1c] sm:$0xf] }
 0x1a7   : > { %2010 = vst.msk [vmem:[#allocation2 + $0x44] sm:$0xf] %vm1992_vm10, %v1931_v32  ;;  %v3217_v37 = vrot.slane %v3215_v31, 4  ;;  %v3218_v32 = vrot.slane %v4278_v33, 5  ;;  %v3216_v50 = vsel %vm4789_vm5, %v4324_v40, %v3215_v31  ;;  %v2720_v31 = vshll.u32 %v4242_v22, 16 }
 0x1a8   : > { %v3224_v33 = vrot.slane %v3222_v24, 4 }
 0x1a9   : > { %v3219_v47 = vsel %vm4789_vm5, %v3217_v37, %v3218_v32  ;;  %v4289_v37 = vld [vmem:[%s4604_s22 + $0x4c] sm:$0xf]  ;;  %v4253_v32 = vld [vmem:[%s4604_s22 + $0x7c] sm:$0xf]  ;;  %v2722_v40 = vrot.slane %v2720_v31, 5 }
 0x1aa   : > { %2279 = vrot.lane.b32.xlu1 %v2204_v38, %s4551_s27  ;;  %v4240_v38 = vld [vmem:[%s4604_s22 + $0x48] sm:$0xf]  ;;  %v4234_v31 = vld [vmem:[%s4604_s22 + $0x30] sm:$0xf] }
 0x1ab   : > { %2277 = vrot.lane.b32.xlu0 %v2201_v39, %s4551_s27  ;;  %2275 = vrot.lane.b32.xlu2 %v2197_v44, %s4551_s27  ;;  %v4198_v44 = vld [vmem:[%s4604_s22 + $0x24] sm:$0xf]  ;;  %v2701_v45 = vshrl.u32 %v4240_v38, 16  ;;  %v2704_v46 = vshll.u32 %v4240_v38, 16 }
 0x1ac   : > { %v1923_v48 = vpop.permute.xlu1 %1922 }
 0x1ad   : > { %2006 = vst.msk [vmem:[#allocation2 + $0x34] sm:$0xf] %vm1992_vm10, %v1923_v48  ;;  %v1921_v52 = vpop.permute.xlu0 %1920  ;;  %v1937_v57 = vpop.permute.xlu2 %1936  ;;  %v2638_v48 = vshll.u32 %v4232_v41, 16  ;;  %v2703_v53 = vrot.slane %v2701_v45, 4  ;;  %v2706_v55 = vrot.slane %v2704_v46, 5  ;;  %v2810_v45 = vshrl.u32 %v4253_v32, 16 }
 0x1ae   : > { %2005 = vst.msk [vmem:[#allocation2 + $0x30] sm:$0xf] %vm1992_vm10, %v1921_v52  ;;  %v2632_v52 = vshll.u32 %v4231_v43, 16  ;;  %v4252_v41 = vld [vmem:[%s4604_s22 + $0x78] sm:$0xf] }
 0x1af   : > { %2013 = vst.msk [vmem:[#allocation2 + $0x50] sm:$0xf] %vm1992_vm10, %v1937_v57  ;;  %v2640_v59 = vrot.slane %v2638_v48, 5  ;;  %v2707_v4 = vor.u32 %v2706_v55, %v2703_v53  ;;  %v2797_v48 = vshrl.u32 %v4252_v41, 16  ;;  %v2800_v49 = vshll.u32 %v4252_v41, 16 }
 0x1b0   : > { %v2634_v1 = vrot.slane %v2632_v52, 5  ;;  %v4288_v52 = vld [vmem:[%s4604_s22 + $0x48] sm:$0xe]  ;;  %v2812_v55 = vrot.slane %v2810_v45, 4 }
 0x1b1   : > { %v2645_v2 = vor.u32 %v2644_v56, %v2640_v59  ;;  %v2708_v12 = vrot.slane %v2707_v4, 4  ;;  %v4254_v56 = vld [vmem:[%s4604_s22 + $0x80] sm:$0x1]  ;;  %v2802_v62 = vrot.slane %v2800_v49, 5 }
 0x1b2   : > { %2285 = vrot.lane.b32.xlu1 %v2215_v58, %s4551_s27  ;;  %v4241_v58 = vld [vmem:[%s4604_s22 + $0x4c] sm:$0xf] }
 0x1b3   : > { %2283 = vrot.lane.b32.xlu0 %v2211_v60, %s4551_s27  ;;  %2281 = vrot.lane.b32.xlu2 %v2208_v54, %s4551_s27  ;;  %v2710_v5 = vshll.u32 %v4241_v58, 16  ;;  %v2714_v9 = vshrl.u32 %v4241_v58, 16 }
 0x1b4   : > { %v1929_v6 = vpop.permute.xlu1 %1928 }
 0x1b5   : > { %2009 = vst.msk [vmem:[#allocation2 + $0x40] sm:$0xf] %vm1992_vm10, %v1929_v6  ;;  %v1927_v11 = vpop.permute.xlu0 %1926  ;;  %v1943_v14 = vpop.permute.xlu2 %1942  ;;  %v4204_v6 = vld [vmem:[%s4604_s22 + $0x48] sm:$0xf]  ;;  %v2712_v13 = vrot.slane %v2710_v5, 5  ;;  %v2816_v5 = vshll.u32 %v4254_v56, 16 }
 0x1b6   : > { %2008 = vst.msk [vmem:[#allocation2 + $0x3c] sm:$0xf] %vm1992_vm10, %v1927_v11  ;;  %v2635_v11 = vor.u32 %v2634_v1, %v2631_v0  ;;  %v4328_v1 = vrot.slane %v4288_v52, 9  ;;  %v4207_v52 = vld [vmem:[%s4604_s22 + $0x58] sm:$0xf] }
 0x1b7   : > { %2016 = vst.msk [vmem:[#allocation2 + $0x5c] sm:$0xf] %vm1992_vm10, %v1943_v14 }
 0x1b8   : > { %v2636_v19 = vrot.slane %v2635_v11, 4 }
 0x1ba   : > { %2427 = vrot.lane.b32.xlu1 %v4196_v15, %s4552_s28  ;;  %v2646_v15 = vrot.slane %v2645_v2, 4 }
 0x1bb   : > { %2289 = vrot.lane.b32.xlu0 %v2222_v18, %s4551_s27  ;;  %2287 = vrot.lane.b32.xlu2 %v2218_v20, %s4551_s27  ;;  %v2716_v20 = vrot.slane %v2714_v9, 4 }
 0x1bc   : > { %v1935_v23 = vpop.permute.xlu1 %1934 }
 0x1bd   : > { %2012 = vst.msk [vmem:[#allocation2 + $0x4c] sm:$0xf] %vm1992_vm10, %v1935_v23  ;;  %v1933_v26 = vpop.permute.xlu0 %1932  ;;  %v1949_v28 = vpop.permute.xlu2 %1948  ;;  %v2713_v23 = vsel %vm4615_vm2, %v2708_v12, %v2712_v13 }
 0x1be   : > { %2011 = vst.msk [vmem:[#allocation2 + $0x48] sm:$0xf] %vm1992_vm10, %v1933_v26  ;;  %v2651_v26 = vsel %vm4615_vm2, %v2646_v15, %v2650_v16 }
 0x1bf   : > { %2019 = vst.msk [vmem:[#allocation2 + $0x68] sm:$0xf] %vm1992_vm10, %v1949_v28  ;;  %v4279_v28 = vld [vmem:[%s4604_s22 + $0x24] sm:$0xe] }
 0x1c2   : > { %2990 = vrot.lane.b32.xlu1 %v2627_v29, %s4553_s29  ;;  %v2641_v29 = vsel %vm4615_vm2, %v2636_v19, %v2640_v59  ;;  %v4302_v19 = vld [vmem:[%s4604_s22 + $0x80] sm:$0x1] }
 0x1c3   : > { %2988 = vrot.lane.b32.xlu0 %v2617_v30, %s4553_s29  ;;  %2429 = vrot.lane.b32.xlu2 %v4197_v35, %s4552_s28  ;;  %v2717_v30 = vor.u32 %v2716_v20, %v2712_v13  ;;  %v3225_v35 = vrot.slane %v4281_v27, 5  ;;  %v4213_v20 = vld [vmem:[%s4604_s22 + $0x7c] sm:$0xf] }
 0x1c4   : > { %v1941_v34 = vpop.permute.xlu1 %1940 }
 0x1c5   : > { %2015 = vst.msk [vmem:[#allocation2 + $0x58] sm:$0xf] %vm1992_vm10, %v1941_v34  ;;  %v1939_v39 = vpop.permute.xlu0 %1938  ;;  %v1955_v42 = vpop.permute.xlu2 %1954  ;;  %v4325_v34 = vrot.slane %v4279_v28, 9  ;;  %v3226_v43 = vsel %vm4789_vm5, %v3224_v33, %v3225_v35  ;;  %v4200_v33 = vld [vmem:[%s4604_s22 + $0x30] sm:$0xf] }
 0x1c6   : > { %2014 = vst.msk [vmem:[#allocation2 + $0x54] sm:$0xf] %vm1992_vm10, %v1939_v39  ;;  %v2718_v39 = vrot.slane %v2717_v30, 4 }
 0x1c7   : > { %2022 = vst.msk [vmem:[#allocation2 + $0x74] sm:$0xf] %vm1992_vm10, %v1955_v42  ;;  %v3223_v46 = vsel %vm4789_vm5, %v4325_v34, %v3222_v24  ;;  %v3274_v24 = vrot.slane %v4302_v19, 5 }
 0x1c8   : > { %v2723_v51 = vsel %vm4615_vm2, %v2718_v39, %v2722_v40  ;;  %v2653_v39 = vshrl.u32 %v4234_v31, 16  ;;  %v2656_v40 = vshll.u32 %v4234_v31, 16  ;;  %v4460_v31 = vld [vmem:[%s6202_s1 + $0x28] sm:$0xff] }
 0x1ca   : > { %2431 = vrot.lane.b32.xlu1 %v4198_v44, %s4552_s28  ;;  %v2806_v44 = vshll.u32 %v4253_v32, 16  ;;  %v2655_v49 = vrot.slane %v2653_v39, 4 }
 0x1cb   : > { %3327 = vrot.lane.b32.xlu0 %v3219_v47, %s4554_s30  ;;  %3325 = vrot.lane.b32.xlu2 %v3216_v50, %s4554_s30  ;;  %v3243_v47 = vrot.slane %v4289_v37, 5  ;;  %v4290_v50 = vld [vmem:[%s4604_s22 + $0x50] sm:$0x1] }
 0x1cc   : > { %v1947_v57 = vpop.permute.xlu1 %1946  ;;  %v2808_v53 = vrot.slane %v2806_v44, 5  ;;  %v3246_v59 = vrot.slane %v4290_v50, 5  ;;  %v4244_v44 = vld [vmem:[%s4604_s22 + $0x58] sm:$0xf]  ;;  %v2658_v50 = vrot.slane %v2656_v40, 5 }
 0x1cd   : > { %2018 = vst.msk [vmem:[#allocation2 + $0x64] sm:$0xf] %vm1992_vm10, %v1947_v57  ;;  %v1945_v60 = vpop.permute.xlu0 %1944  ;;  %v2234_v54 = vpop.permute.xlu2 %2233  ;;  %v3245_v58 = vrot.slane %v3243_v47, 4  ;;  %v3244_v8 = vsel %vm4789_vm5, %v4328_v1, %v3243_v47  ;;  %v2738_v56 = vshrl.u32 %v4244_v44, 16 }
 0x1ce   : > { %2017 = vst.msk [vmem:[#allocation2 + $0x60] sm:$0xf] %vm1992_vm10, %v1945_v60  ;;  %v2799_v60 = vrot.slane %v2797_v48, 4  ;;  %v2813_v4 = vor.u32 %v2812_v55, %v2808_v53  ;;  %v4236_v48 = vld [vmem:[%s4604_s22 + $0x38] sm:$0x1]  ;;  %v2734_v55 = vshll.u32 %v4244_v44, 16 }
 0x1cf   : > { %2330 = vst.msk [vmem:[#allocation2] sm:$0xf] %vm2329_vm11, %v2234_v54 }
 0x1d0   : > { %v2803_v2 = vor.u32 %v2802_v62, %v2799_v60  ;;  %v2814_v9 = vrot.slane %v2813_v4, 4  ;;  %v4201_v60 = vld [vmem:[%s4604_s22 + $0x34] sm:$0xf]  ;;  %v2659_v62 = vor.u32 %v2658_v50, %v2655_v49  ;;  %v2736_v1 = vrot.slane %v2734_v55, 5 }
 0x1d2   : > { %2445 = vrot.lane.b32.xlu1 %v4205_v3, %s4552_s28  ;;  %v4212_v3 = vld [vmem:[%s4604_s22 + $0x78] sm:$0xf]  ;;  %v2804_v12 = vrot.slane %v2803_v2, 4  ;;  %v2660_v2 = vrot.slane %v2659_v62, 4  ;;  %v4457_v62 = vld [vmem:[%s6202_s1 + $0x10] sm:$0xff] }
 0x1d3   : > { %2443 = vrot.lane.b32.xlu0 %v4204_v6, %s4552_s28  ;;  %2433 = vrot.lane.b32.xlu2 %v4199_v10, %s4552_s28  ;;  %v3247_v6 = vsel %vm4789_vm5, %v3245_v58, %v3246_v59  ;;  %v2818_v10 = vrot.slane %v2816_v5, 5  ;;  %v2672_v59 = vshll.u32 %v4236_v48, 16  ;;  %v4283_v5 = vld [vmem:[%s4604_s22 + $0x34] sm:$0xf]  ;;  %v4255_v48 = vld [vmem:[%s4604_s22 + $0x84] sm:$0xf] }
 0x1d4   : > { %v1953_v14 = vpop.permute.xlu1 %1952  ;;  %v2809_v17 = vsel %vm4615_vm2, %v2804_v12, %v2808_v53 }
 0x1d5   : > { %2021 = vst.msk [vmem:[#allocation2 + $0x70] sm:$0xf] %vm1992_vm10, %v1953_v14  ;;  %v1951_v18 = vpop.permute.xlu0 %1950  ;;  %v2240_v21 = vpop.permute.xlu2 %2239  ;;  %v4301_v14 = vld [vmem:[%s4604_s22 + $0x7c] sm:$0xf]  ;;  %v2819_v16 = vsel %vm4615_vm2, %v2814_v9, %v2818_v10  ;;  %v2674_v4 = vrot.slane %v2672_v59, 5  ;;  %v2824_v59 = vshll.u32 %v4255_v48, 16 }
 0x1d6   : > { %2020 = vst.msk [vmem:[#allocation2 + $0x6c] sm:$0xf] %vm1992_vm10, %v1951_v18  ;;  %v3271_v18 = vrot.slane %v4301_v14, 5  ;;  %v4245_v10 = vld [vmem:[%s4604_s22 + $0x5c] sm:$0x1] }
 0x1d7   : > { %2333 = vst.msk [vmem:[#allocation2 + $0xc] sm:$0xf] %vm2329_vm11, %v2240_v21  ;;  %v4300_v21 = vld [vmem:[%s4604_s22 + $0x78] sm:$0xe]  ;;  %v2744_v19 = vshll.u32 %v4245_v10, 16 }
 0x1d8   : > { %v4332_v28 = vrot.slane %v4300_v21, 9  ;;  %v4221_v10 = vld [vmem:[%s4604_s22 + $0xac] sm:$0xf] }
 0x1da   : > { %3004 = vrot.lane.b32.xlu1 %v2713_v23, %s4553_s29  ;;  %v3273_v23 = vrot.slane %v3271_v18, 4 }
 0x1db   : > { %2994 = vrot.lane.b32.xlu0 %v2651_v26, %s4553_s29  ;;  %2992 = vrot.lane.b32.xlu2 %v2641_v29, %s4553_s29  ;;  %v4243_v26 = vld [vmem:[%s4604_s22 + $0x54] sm:$0xf] }
 0x1dc   : > { %v1959_v36 = vpop.permute.xlu1 %1958  ;;  %v4235_v29 = vld [vmem:[%s4604_s22 + $0x34] sm:$0xf]  ;;  %v2725_v35 = vshrl.u32 %v4243_v26, 16  ;;  %v3275_v34 = vsel %vm4789_vm5, %v3273_v23, %v3274_v24 }
 0x1dd   : > { %2024 = vst.msk [vmem:[#allocation2 + $0x7c] sm:$0xf] %vm1992_vm10, %v1959_v36  ;;  %v1957_v38 = vpop.permute.xlu0 %1956  ;;  %v2246_v42 = vpop.permute.xlu2 %2245  ;;  %v2728_v36 = vshll.u32 %v4243_v26, 16  ;;  %v2662_v37 = vshll.u32 %v4235_v29, 16  ;;  %v2666_v32 = vshrl.u32 %v4235_v29, 16  ;;  %v2746_v29 = vrot.slane %v2744_v19, 5 }
 0x1de   : > { %2023 = vst.msk [vmem:[#allocation2 + $0x78] sm:$0xf] %vm1992_vm10, %v1957_v38  ;;  %v3272_v38 = vsel %vm4789_vm5, %v4332_v28, %v3271_v18  ;;  %v2727_v41 = vrot.slane %v2725_v35, 4 }
 0x1df   : > { %2336 = vst.msk [vmem:[#allocation2 + $0x18] sm:$0xf] %vm2329_vm11, %v2246_v42  ;;  %v2730_v42 = vrot.slane %v2728_v36, 5  ;;  %v2664_v45 = vrot.slane %v2662_v37, 5 }
 0x1e1   : > { %v2731_v53 = vor.u32 %v2730_v42, %v2727_v41  ;;  %v4264_v42 = vld [vmem:[%s4604_s22 + $0xa8] sm:$0xf] }
 0x1e2   : > { %3331 = vrot.lane.b32.xlu1 %v3226_v43, %s4554_s30  ;;  %v2893_v49 = vshrl.u32 %v4264_v42, 16  ;;  %v2896_v50 = vshll.u32 %v4264_v42, 16 }
 0x1e3   : > { %3329 = vrot.lane.b32.xlu0 %v3223_v46, %s4554_s30  ;;  %3006 = vrot.lane.b32.xlu2 %v2723_v51, %s4553_s29  ;;  %v2668_v46 = vrot.slane %v2666_v32, 4  ;;  %v4291_v32 = vld [vmem:[%s4604_s22 + $0x54] sm:$0xe] }
 0x1e4   : > { %v2238_v57 = vpop.permute.xlu1 %2237  ;;  %v4329_v44 = vrot.slane %v4291_v32, 9 }
 0x1e5   : > { %2332 = vst.msk [vmem:[#allocation2 + $0x8] sm:$0xf] %vm2329_vm11, %v2238_v57  ;;  %v2236_v0 = vpop.permute.xlu0 %2235  ;;  %v2252_v54 = vpop.permute.xlu2 %2251  ;;  %v4206_v57 = vld [vmem:[%s4604_s22 + $0x54] sm:$0xf]  ;;  %v2669_v58 = vor.u32 %v2668_v46, %v2664_v45  ;;  %v4214_v46 = vld [vmem:[%s4604_s22 + $0x84] sm:$0xf] }
 0x1e6   : > { %2331 = vst.msk [vmem:[#allocation2 + $0x4] sm:$0xf] %vm2329_vm11, %v2236_v0  ;;  %v2732_v0 = vrot.slane %v2731_v53, 4 }
 0x1e7   : > { %2339 = vst.msk [vmem:[#allocation2 + $0x24] sm:$0xf] %vm2329_vm11, %v2252_v54 }
 0x1e8   : > { %v2737_v12 = vsel %vm4615_vm2, %v2732_v0, %v2736_v1 }
 0x1ea   : > { %2459 = vrot.lane.b32.xlu1 %v4212_v3, %s4552_s28  ;;  %v2670_v3 = vrot.slane %v2669_v58, 4  ;;  %v2821_v58 = vshrl.u32 %v4255_v48, 16 }
 0x1eb   : > { %3343 = vrot.lane.b32.xlu0 %v3247_v6, %s4554_s30  ;;  %3341 = vrot.lane.b32.xlu2 %v3244_v8, %s4554_s30  ;;  %v2740_v8 = vrot.slane %v2738_v56, 4  ;;  %v2895_v56 = vrot.slane %v2893_v49, 4 }
 0x1ec   : > { %v2244_v11 = vpop.permute.xlu1 %2243  ;;  %v2675_v14 = vsel %vm4615_vm2, %v2670_v3, %v2674_v4 }
 0x1ed   : > { %2335 = vst.msk [vmem:[#allocation2 + $0x14] sm:$0xf] %vm2329_vm11, %v2244_v11  ;;  %v2242_v13 = vpop.permute.xlu0 %2241  ;;  %v2258_v15 = vpop.permute.xlu2 %2257  ;;  %v4462_v11 = vld [vmem:[%s6202_s1 + $0x38] sm:$0xff]  ;;  %v2741_v18 = vor.u32 %v2740_v8, %v2736_v1  ;;  %v4265_v1 = vld [vmem:[%s4604_s22 + $0xac] sm:$0xf] }
 0x1ee   : > { %2334 = vst.msk [vmem:[#allocation2 + $0x10] sm:$0xf] %vm2329_vm11, %v2242_v13  ;;  %v3229_v13 = vrot.slane %v4283_v5, 5  ;;  %3650 = vmatpush.bf16.msra.mxu0 %v4462_v11  ;;  %4463 = vmatpush.bf16.msra.mxu1 %v4462_v11  ;;  %v4257_v5 = vld [vmem:[%s4604_s22 + $0x8c] sm:$0x1] }
 0x1ef   : > { %2342 = vst.msk [vmem:[#allocation2 + $0x30] sm:$0xf] %vm2329_vm11, %v2258_v15  ;;  %v4284_v15 = vld [vmem:[%s4604_s22 + $0x38] sm:$0x1]  ;;  %4464 = vmatpush.bf16.msra.mxu2 %v4462_v11  ;;  %4465 = vmatpush.bf16.msra.mxu3 %v4462_v11  ;;  %v2742_v28 = vrot.slane %v2741_v18, 4 }
 0x1f0   : > { %v3232_v21 = vrot.slane %v4284_v15, 5  ;;  %v2840_v15 = vshll.u32 %v4257_v5, 16 }
 0x1f1   : > { %v2747_v37 = vsel %vm4615_vm2, %v2742_v28, %v2746_v29 }
 0x1f2   : > { %3022 = vrot.lane.b32.xlu1 %v2819_v16, %s4553_s29  ;;  %v4282_v16 = vld [vmem:[%s4604_s22 + $0x30] sm:$0xe] }
 0x1f3   : > { %3020 = vrot.lane.b32.xlu0 %v2809_v17, %s4553_s29  ;;  %2461 = vrot.lane.b32.xlu2 %v4213_v20, %s4552_s28  ;;  %v2665_v17 = vsel %vm4615_vm2, %v2660_v2, %v2664_v45  ;;  %v3231_v20 = vrot.slane %v3229_v13, 4  ;;  %v4326_v24 = vrot.slane %v4282_v16, 9  ;;  %v4256_v45 = vld [vmem:[%s4604_s22 + $0x88] sm:$0xf]  ;;  %v2826_v2 = vrot.slane %v2824_v59, 5 }
 0x1f4   : > { %v2250_v22 = vpop.permute.xlu1 %2249  ;;  %v2830_v53 = vshll.u32 %v4256_v45, 16  ;;  %v2834_v55 = vshrl.u32 %v4256_v45, 16  ;;  %v2906_v16 = vshrl.u32 %v4265_v1, 16  ;;  %v4313_v45 = vld [vmem:[%s4604_s22 + $0xac] sm:$0xf] }
 0x1f5   : > { %2338 = vst.msk [vmem:[#allocation2 + $0x20] sm:$0xf] %vm2329_vm11, %v2250_v22  ;;  %v2248_v27 = vpop.permute.xlu0 %2247  ;;  %v2264_v30 = vpop.permute.xlu2 %2263  ;;  %v4461_v22 = vld [vmem:[%s6202_s1 + $0x30] sm:$0xff]  ;;  %v3230_v35 = vsel %vm4789_vm5, %v4326_v24, %v3229_v13  ;;  %v4220_v13 = vld [vmem:[%s4604_s22 + $0xa8] sm:$0xf]  ;;  %v2842_v24 = vrot.slane %v2840_v15, 5 }
 0x1f6   : > { %2337 = vst.msk [vmem:[#allocation2 + $0x1c] sm:$0xf] %vm2329_vm11, %v2248_v27  ;;  %v4292_v27 = vld [vmem:[%s4604_s22 + $0x58] sm:$0xf]  ;;  %3651 = vmatpush.bf16.msra.mxu0 %v4461_v22  ;;  %4466 = vmatpush.bf16.msra.mxu1 %v4461_v22  ;;  %v2836_v3 = vrot.slane %v2834_v55, 4  ;;  %v2908_v29 = vrot.slane %v2906_v16, 4 }
 0x1f7   : > { %2345 = vst.msk [vmem:[#allocation2 + $0x3c] sm:$0xf] %vm2329_vm11, %v2264_v30  ;;  %4467 = vmatpush.bf16.msra.mxu2 %v4461_v22  ;;  %4468 = vmatpush.bf16.msra.mxu3 %v4461_v22  ;;  %v3250_v36 = vrot.slane %v4292_v27, 5  ;;  %v4312_v55 = vld [vmem:[%s4604_s22 + $0xa8] sm:$0xe] }
 0x1f8   : > { %v4247_v15 = vld [vmem:[%s4604_s22 + $0x64] sm:$0xf] }
 0x1f9   : > { %v3252_v40 = vrot.slane %v3250_v36, 4 }
 0x1fa   : > { %2435 = vrot.lane.b32.xlu1 %v4200_v33, %s4552_s28  ;;  %v3233_v33 = vsel %vm4789_vm5, %v3231_v20, %v3232_v21  ;;  %3652 = vmatpush.bf16.msra.mxu0 %v4460_v31  ;;  %v4455_v21 = vld [vmem:[%s6202_s1] sm:$0xff] }
 0x1fb   : > { %3359 = vrot.lane.b32.xlu0 %v3275_v34, %s4554_s30  ;;  %3357 = vrot.lane.b32.xlu2 %v3272_v38, %s4554_s30  ;;  %v4293_v34 = vld [vmem:[%s4604_s22 + $0x5c] sm:$0x1]  ;;  %v4459_v38 = vld [vmem:[%s6202_s1 + $0x20] sm:$0xff] }
 0x1fc   : > { %v2256_v43 = vpop.permute.xlu1 %2255  ;;  %4469 = vmatpush.bf16.msra.mxu1 %v4460_v31  ;;  %4470 = vmatpush.bf16.msra.mxu2 %v4460_v31  ;;  %v3253_v41 = vrot.slane %v4293_v34, 5  ;;  %v4305_v34 = vld [vmem:[%s4604_s22 + $0x8c] sm:$0x1] }
 0x1fd   : > { %2341 = vst.msk [vmem:[#allocation2 + $0x2c] sm:$0xf] %vm2329_vm11, %v2256_v43  ;;  %v2254_v47 = vpop.permute.xlu0 %2253  ;;  %v2270_v51 = vpop.permute.xlu2 %2269  ;;  %4471 = vmatpush.bf16.msra.mxu3 %v4460_v31  ;;  %v4266_v31 = vld [vmem:[%s4604_s22 + $0xb0] sm:$0x1] }
 0x1fe   : > { %2340 = vst.msk [vmem:[#allocation2 + $0x28] sm:$0xf] %vm2329_vm11, %v2254_v47  ;;  %3653 = vmatpush.bf16.msra.mxu0 %v4459_v38 }
 0x1ff   : > { %2348 = vst.msk [vmem:[#allocation2 + $0x48] sm:$0xf] %vm2329_vm11, %v2270_v51  ;;  %v4458_v51 = vld [vmem:[%s6202_s1 + $0x18] sm:$0xff] }
 0x200   : > { %4472 = vmatpush.bf16.msra.mxu1 %v4459_v38  ;;  %4473 = vmatpush.bf16.msra.mxu2 %v4459_v38 }
 0x201   : > { %4474 = vmatpush.bf16.msra.mxu3 %v4459_v38 }
 0x202   : > { %2449 = vrot.lane.b32.xlu1 %v4207_v52, %s4552_s28  ;;  %v3254_v52 = vsel %vm4789_vm5, %v3252_v40, %v3253_v41  ;;  %3654 = vmatpush.bf16.msra.mxu0 %v4458_v51  ;;  %v3281_v41 = vrot.slane %v4305_v34, 5 }
 0x203   : > { %2447 = vrot.lane.b32.xlu0 %v4206_v57, %s4552_s28  ;;  %2437 = vrot.lane.b32.xlu2 %v4201_v60, %s4552_s28  ;;  %v3251_v57 = vsel %vm4789_vm5, %v4329_v44, %v3250_v36  ;;  %v2898_v60 = vrot.slane %v2896_v50, 5 }
 0x204   : > { %v2262_v54 = vpop.permute.xlu1 %2261  ;;  %4475 = vmatpush.bf16.msra.mxu1 %v4458_v51  ;;  %4476 = vmatpush.bf16.msra.mxu2 %v4458_v51 }
 0x205   : > { %2344 = vst.msk [vmem:[#allocation2 + $0x38] sm:$0xf] %vm2329_vm11, %v2262_v54  ;;  %v2260_v6 = vpop.permute.xlu0 %2259  ;;  %v2276_v9 = vpop.permute.xlu2 %2275  ;;  %4477 = vmatpush.bf16.msra.mxu3 %v4458_v51  ;;  %v5716_v54 = vrot.slane %v2830_v53, 5  ;;  %v2899_v11 = vor.u32 %v2898_v60, %v2895_v56  ;;  %v3299_v51 = vrot.slane %v4313_v45, 5  ;;  %v4246_v56 = vld [vmem:[%s4604_s22 + $0x60] sm:$0xf] }
 0x206   : > { %2343 = vst.msk [vmem:[#allocation2 + $0x34] sm:$0xf] %vm2329_vm11, %v2260_v6  ;;  %v2823_v6 = vrot.slane %v2821_v58, 4  ;;  %3655 = vmatpush.bf16.msra.mxu0 %v4457_v62  ;;  %v2752_v5 = vshll.u32 %v4246_v56, 16 }
 0x207   : > { %2351 = vst.msk [vmem:[#allocation2 + $0x54] sm:$0xf] %vm2329_vm11, %v2276_v9  ;;  %v4456_v9 = vld [vmem:[%s6202_s1 + $0x8] sm:$0xff]  ;;  %v2900_v19 = vrot.slane %v2899_v11, 4  ;;  %v3301_v58 = vrot.slane %v3299_v51, 4 }
 0x208   : > { %4478 = vmatpush.bf16.msra.mxu1 %v4457_v62  ;;  %4479 = vmatpush.bf16.msra.mxu2 %v4457_v62  ;;  %v2827_v18 = vor.u32 %v2826_v2, %v2823_v6 }
 0x209   : > { %4480 = vmatpush.bf16.msra.mxu3 %v4457_v62  ;;  %v4336_v62 = vrot.slane %v4312_v55, 9 }
 0x20a   : > { %3008 = vrot.lane.b32.xlu1 %v2737_v12, %s4553_s29  ;;  %v2902_v12 = vshll.u32 %v4265_v1, 16  ;;  %3656 = vmatpush.bf16.msra.mxu0 %v4456_v9  ;;  %v2828_v28 = vrot.slane %v2827_v18, 4 }
 0x20b   : > { %2998 = vrot.lane.b32.xlu0 %v2675_v14, %s4553_s29  ;;  %2996 = vrot.lane.b32.xlu2 %v2665_v17, %s4553_s29  ;;  %v2837_v14 = vor.u32 %v2836_v3, %v5716_v54  ;;  %v4215_v17 = vld [vmem:[%s4604_s22 + $0x88] sm:$0xf]  ;;  %v4202_v3 = vld [vmem:[%s4604_s22 + $0x3c] sm:$0xf] }
 0x20c   : > { %v2268_v23 = vpop.permute.xlu1 %2267  ;;  %4481 = vmatpush.bf16.msra.mxu1 %v4456_v9  ;;  %4482 = vmatpush.bf16.msra.mxu2 %v4456_v9  ;;  %v2904_v20 = vrot.slane %v2902_v12, 5  ;;  %v2833_v32 = vsel %vm4615_vm2, %v2828_v28, %v5716_v54  ;;  %v4237_v54 = vld [vmem:[%s4604_s22 + $0x3c] sm:$0xf] }
 0x20d   : > { %2347 = vst.msk [vmem:[#allocation2 + $0x44] sm:$0xf] %vm2329_vm11, %v2268_v23  ;;  %v2266_v26 = vpop.permute.xlu0 %2265  ;;  %v2282_v30 = vpop.permute.xlu2 %2281  ;;  %4483 = vmatpush.bf16.msra.mxu3 %v4456_v9  ;;  %v2838_v23 = vrot.slane %v2837_v14, 4  ;;  %v3300_v9 = vsel %vm4789_vm5, %v4336_v62, %v3299_v51  ;;  %v2680_v11 = vshll.u32 %v4237_v54, 16 }
 0x20e   : > { %2346 = vst.msk [vmem:[#allocation2 + $0x40] sm:$0xf] %vm2329_vm11, %v2266_v26  ;;  %v4304_v26 = vld [vmem:[%s4604_s22 + $0x88] sm:$0xf]  ;;  %3657 = vmatpush.bf16.msra.mxu0 %v4455_v21  ;;  %v2909_v38 = vor.u32 %v2908_v29, %v2904_v20 }
 0x20f   : > { %2354 = vst.msk [vmem:[#allocation2 + $0x60] sm:$0xf] %vm2329_vm11, %v2282_v30  ;;  %v2843_v36 = vsel %vm4615_vm2, %v2838_v23, %v2842_v24  ;;  %v4209_v23 = vld [vmem:[%s4604_s22 + $0x64] sm:$0xf] }
 0x210   : > { %4484 = vmatpush.bf16.msra.mxu1 %v4455_v21  ;;  %4485 = vmatpush.bf16.msra.mxu2 %v4455_v21 }
 0x211   : > { %4486 = vmatpush.bf16.msra.mxu3 %v4455_v21  ;;  %v2682_v21 = vrot.slane %v2680_v11, 5 }
 0x212   : > { %3335 = vrot.lane.b32.xlu1 %v3233_v33, %s4554_s30  ;;  %v2905_v33 = vsel %vm4615_vm2, %v2900_v19, %v2904_v20  ;;  %v4239_v19 = vld [vmem:[%s4604_s22 + $0x44] sm:$0x1] }
 0x213   : > { %3333 = vrot.lane.b32.xlu0 %v3230_v35, %s4554_s30  ;;  %3010 = vrot.lane.b32.xlu2 %v2747_v37, %s4553_s29  ;;  %v3278_v35 = vrot.slane %v4304_v26, 5  ;;  %v4303_v37 = vld [vmem:[%s4604_s22 + $0x84] sm:$0xe]  ;;  %v2758_v26 = vshll.u32 %v4247_v15, 16  ;;  %v2696_v29 = vshll.u32 %v4239_v19, 16 }
 0x214   : > { %v2274_v39 = vpop.permute.xlu1 %2273 }
 0x215   : > { %2350 = vst.msk [vmem:[#allocation2 + $0x50] sm:$0xf] %vm2329_vm11, %v2274_v39  ;;  %v2272_v43 = vpop.permute.xlu0 %2271  ;;  %v2288_v47 = vpop.permute.xlu2 %2287  ;;  %v2912_v39 = vshll.u32 %v4266_v31, 16  ;;  %v3280_v40 = vrot.slane %v3278_v35, 4  ;;  %v4203_v31 = vld [vmem:[%s4604_s22 + $0x40] sm:$0xf] }
 0x216   : > { %2349 = vst.msk [vmem:[#allocation2 + $0x4c] sm:$0xf] %vm2329_vm11, %v2272_v43  ;;  %v4333_v43 = vrot.slane %v4303_v37, 9 }
 0x217   : > { %2357 = vst.msk [vmem:[#allocation2 + $0x6c] sm:$0xf] %vm2329_vm11, %v2288_v47  ;;  %v2914_v47 = vrot.slane %v2912_v39, 5  ;;  %v3282_v49 = vsel %vm4789_vm5, %v3280_v40, %v3281_v41 }
 0x218   : > { %v3279_v50 = vsel %vm4789_vm5, %v4333_v43, %v3278_v35 }
 0x21a   : > { %2463 = vrot.lane.b32.xlu1 %v4214_v46, %s4552_s28  ;;  %v2910_v46 = vrot.slane %v2909_v38, 4  ;;  %v4286_v38 = vld [vmem:[%s4604_s22 + $0x40] sm:$0xf] }
 0x21b   : > { %3347 = vrot.lane.b32.xlu0 %v3254_v52, %s4554_s30  ;;  %3345 = vrot.lane.b32.xlu2 %v3251_v57, %s4554_s30  ;;  %v4314_v52 = vld [vmem:[%s4604_s22 + $0xb0] sm:$0x1] }
 0x21c   : > { %v2280_v0 = vpop.permute.xlu1 %2279  ;;  %v2915_v53 = vsel %vm4615_vm2, %v2910_v46, %v2914_v47  ;;  %v3302_v59 = vrot.slane %v4314_v52, 5  ;;  %v3236_v46 = vrot.slane %v4286_v38, 5  ;;  %v4223_v38 = vld [vmem:[%s4604_s22 + $0xb8] sm:$0xf] }
 0x21d   : > { %2353 = vst.msk [vmem:[#allocation2 + $0x5c] sm:$0xf] %vm2329_vm11, %v2280_v0  ;;  %v2278_v4 = vpop.permute.xlu0 %2277  ;;  %v2430_v8 = vpop.permute.xlu2 %2429  ;;  %v4238_v0 = vld [vmem:[%s4604_s22 + $0x40] sm:$0xf] }
 0x21e   : > { %2352 = vst.msk [vmem:[#allocation2 + $0x58] sm:$0xf] %vm2329_vm11, %v2278_v4  ;;  %v2749_v4 = vshrl.u32 %v4246_v56, 16  ;;  %v3303_v6 = vsel %vm4789_vm5, %v3301_v58, %v3302_v59  ;;  %v2686_v2 = vshll.u32 %v4238_v0, 16  ;;  %v4295_v56 = vld [vmem:[%s4604_s22 + $0x64] sm:$0xf] }
 0x21f   : > { %2525 = vst.msk [vmem:[#allocation2 + $0x4] sm:$0xf] %vm2523_vm12, %v2430_v8  ;;  %v2690_v8 = vshrl.u32 %v4238_v0, 16 }
 0x220   : > { %v2751_v12 = vrot.slane %v2749_v4, 4  ;;  %v2688_v16 = vrot.slane %v2686_v2, 5  ;;  %v4296_v4 = vld [vmem:[%s4604_s22 + $0x68] sm:$0x1] }
 0x222   : > { %2477 = vrot.lane.b32.xlu1 %v4221_v10, %s4552_s28  ;;  %v2677_v10 = vshrl.u32 %v4237_v54, 16 }
 0x223   : > { %2475 = vrot.lane.b32.xlu0 %v4220_v13, %s4552_s28  ;;  %2465 = vrot.lane.b32.xlu2 %v4215_v17, %s4552_s28  ;;  %v2754_v13 = vrot.slane %v2752_v5, 5  ;;  %v2692_v17 = vrot.slane %v2690_v8, 4 }
 0x224   : > { %v2286_v22 = vpop.permute.xlu1 %2285  ;;  %v2679_v20 = vrot.slane %v2677_v10, 4  ;;  %v4267_v10 = vld [vmem:[%s4604_s22 + $0xb4] sm:$0xf] }
 0x225   : > { %2356 = vst.msk [vmem:[#allocation2 + $0x68] sm:$0xf] %vm2329_vm11, %v2286_v22  ;;  %v2284_v27 = vpop.permute.xlu0 %2283  ;;  %v3326_v30 = vpop.permute.xlu2 %3325  ;;  %v2755_v24 = vor.u32 %v2754_v13, %v2751_v12  ;;  %v2693_v28 = vor.u32 %v2692_v17, %v2688_v16  ;;  %v4259_v13 = vld [vmem:[%s4604_s22 + $0x94] sm:$0xf]  ;;  %v2917_v17 = vshrl.u32 %v4267_v10, 16 }
 0x226   : > { %2355 = vst.msk [vmem:[#allocation2 + $0x64] sm:$0xf] %vm2329_vm11, %v2284_v27  ;;  %v4208_v27 = vld [vmem:[%s4604_s22 + $0x60] sm:$0xf] }
 0x227   : > { %v2756_v35 = vrot.slane %v2755_v24, 4  ;;  %v2694_v37 = vrot.slane %v2693_v28, 4 }
 0x22a   : > { %3036 = vrot.lane.b32.xlu1 %v2905_v33, %s4553_s29  ;;  %v2683_v33 = vor.u32 %v2682_v21, %v2679_v20  ;;  %v2854_v20 = vshll.u32 %v4259_v13, 16  ;;  %v2858_v21 = vshrl.u32 %v4259_v13, 16 }
 0x22b   : > { %3026 = vrot.lane.b32.xlu0 %v2843_v36, %s4553_s29  ;;  %3024 = vrot.lane.b32.xlu2 %v2833_v32, %s4553_s29  ;;  %v2760_v36 = vrot.slane %v2758_v26, 5  ;;  %v2698_v32 = vrot.slane %v2696_v29, 5  ;;  %v2919_v26 = vrot.slane %v2917_v17, 4  ;;  %v4268_v29 = vld [vmem:[%s4604_s22 + $0xb8] sm:$0xf] }
 0x22c   : > { %v2428_v42 = vpop.permute.xlu1 %2427  ;;  %v2684_v41 = vrot.slane %v2683_v33, 4  ;;  %v2860_v33 = vrot.slane %v2858_v21, 4 }
 0x22d   : > { %2524 = vst.msk [vmem:[#allocation2] sm:$0xf] %vm2523_vm12, %v2428_v42  ;;  %v2290_v44 = vpop.permute.xlu0 %2289  ;;  %v2434_v48 = vpop.permute.xlu2 %2433  ;;  %v2761_v45 = vsel %vm4615_vm2, %v2756_v35, %v2760_v36  ;;  %v2699_v47 = vsel %vm4615_vm2, %v2694_v37, %v2698_v32 }
 0x22e   : > { %2358 = vst.msk [vmem:[#allocation2 + $0x70] sm:$0xf] %vm2329_vm11, %v2290_v44  ;;  %v4248_v44 = vld [vmem:[%s4604_s22 + $0x68] sm:$0x1] }
 0x22f   : > { %2527 = vst.msk [vmem:[#allocation2 + $0xc] sm:$0xf] %vm2523_vm12, %v2434_v48  ;;  %v4287_v48 = vld [vmem:[%s4604_s22 + $0x44] sm:$0x1]  ;;  %v2768_v52 = vshll.u32 %v4248_v44, 16  ;;  %v2930_v44 = vshrl.u32 %v4268_v29, 16 }
 0x230   : > { %v3239_v55 = vrot.slane %v4287_v48, 5 }
 0x231   : > { %v2770_v62 = vrot.slane %v2768_v52, 5  ;;  %v4307_v52 = vld [vmem:[%s4604_s22 + $0x94] sm:$0xf] }
 0x232   : > { %3363 = vrot.lane.b32.xlu1 %v3282_v49, %s4554_s30  ;;  %v4285_v49 = vld [vmem:[%s4604_s22 + $0x3c] sm:$0xe] }
 0x233   : > { %3361 = vrot.lane.b32.xlu0 %v3279_v50, %s4554_s30  ;;  %3038 = vrot.lane.b32.xlu2 %v2915_v53, %s4553_s29  ;;  %v2689_v50 = vsel %vm4615_vm2, %v2684_v41, %v2688_v16  ;;  %v3238_v53 = vrot.slane %v3236_v46, 4  ;;  %v4327_v58 = vrot.slane %v4285_v49, 9  ;;  %v4216_v16 = vld [vmem:[%s4604_s22 + $0x90] sm:$0xf]  ;;  %v4222_v41 = vld [vmem:[%s4604_s22 + $0xb4] sm:$0xf] }
 0x234   : > { %v2991_v57 = vpop.permute.xlu1 %2990 }
 0x235   : > { %3086 = vst.msk [vmem:[#allocation2 + $0x4] sm:$0xf] %vm3084_vm13, %v2991_v57  ;;  %v2989_v60 = vpop.permute.xlu0 %2988  ;;  %v2993_v1 = vpop.permute.xlu2 %2992  ;;  %v3237_v54 = vsel %vm4789_vm5, %v4327_v58, %v3236_v46  ;;  %v2932_v58 = vrot.slane %v2930_v44, 4 }
 0x236   : > { %3085 = vst.msk [vmem:[#allocation2] sm:$0xf] %vm3084_vm13, %v2989_v60 }
 0x237   : > { %3422 = vst.msk [vmem:[#allocation2] sm:$0xf] %vm3421_vm14, %v3326_v30  ;;  %v2762_v30 = vshrl.u32 %v4247_v15, 16  ;;  %v4258_v15 = vld [vmem:[%s4604_s22 + $0x90] sm:$0xf] }
 0x238   : > { %v2848_v24 = vshll.u32 %v4258_v15, 16 }
 0x239   : > { %v2764_v42 = vrot.slane %v2762_v30, 4  ;;  %v4260_v30 = vld [vmem:[%s4604_s22 + $0x98] sm:$0x1] }
 0x23a   : > { %2439 = vrot.lane.b32.xlu1 %v4202_v3, %s4552_s28  ;;  %v3257_v3 = vrot.slane %v4295_v56, 5  ;;  %v2850_v37 = vrot.slane %v2848_v24, 5  ;;  %v4269_v56 = vld [vmem:[%s4604_s22 + $0xbc] sm:$0x1] }
 0x23b   : > { %3375 = vrot.lane.b32.xlu0 %v3303_v6, %s4554_s30  ;;  %3373 = vrot.lane.b32.xlu2 %v3300_v9, %s4554_s30  ;;  %v2765_v51 = vor.u32 %v2764_v42, %v2760_v36  ;;  %v4294_v6 = vld [vmem:[%s4604_s22 + $0x60] sm:$0xe]  ;;  %v3260_v9 = vrot.slane %v4296_v4, 5  ;;  %v4317_v24 = vld [vmem:[%s4604_s22 + $0xbc] sm:$0x1] }
 0x23c   : > { %v2432_v14 = vpop.permute.xlu1 %2431  ;;  %v3259_v8 = vrot.slane %v3257_v3, 4  ;;  %v4330_v12 = vrot.slane %v4294_v6, 9 }
 0x23d   : > { %2526 = vst.msk [vmem:[#allocation2 + $0x8] sm:$0xf] %vm2523_vm12, %v2432_v14  ;;  %v3328_v18 = vpop.permute.xlu0 %3327  ;;  %v3007_v22 = vpop.permute.xlu2 %3006  ;;  %v2766_v60 = vrot.slane %v2765_v51, 4 }
 0x23e   : > { %3423 = vst.msk [vmem:[#allocation2 + $0x4] sm:$0xf] %vm3421_vm14, %v3328_v18  ;;  %v2920_v18 = vshll.u32 %v4267_v10, 16  ;;  %v3261_v19 = vsel %vm4789_vm5, %v3259_v8, %v3260_v9  ;;  %v4316_v10 = vld [vmem:[%s4604_s22 + $0xb8] sm:$0xf] }
 0x23f   : > { %3087 = vst.msk [vmem:[#allocation2 + $0x8] sm:$0xf] %vm3084_vm13, %v2993_v1  ;;  %v3240_v1 = vsel %vm4789_vm5, %v3238_v53, %v3239_v55  ;;  %v2771_v5 = vsel %vm4615_vm2, %v2766_v60, %v2770_v62  ;;  %v3285_v62 = vrot.slane %v4307_v52, 5  ;;  %v3306_v21 = vrot.slane %v4316_v10, 5 }
 0x241   : > { %v3287_v6 = vrot.slane %v3285_v62, 4 }
 0x242   : > { %2453 = vrot.lane.b32.xlu1 %v4209_v23, %s4552_s28  ;;  %v2845_v23 = vshrl.u32 %v4258_v15, 16  ;;  %v4249_v15 = vld [vmem:[%s4604_s22 + $0x6c] sm:$0xf] }
 0x243   : > { %2451 = vrot.lane.b32.xlu0 %v4208_v27, %s4552_s28  ;;  %2441 = vrot.lane.b32.xlu2 %v4203_v31, %s4552_s28  ;;  %v2922_v27 = vrot.slane %v2920_v18, 5  ;;  %v2856_v31 = vrot.slane %v2854_v20, 5 }
 0x244   : > { %v2446_v34 = vpop.permute.xlu1 %2445 }
 0x245   : > { %2533 = vst.msk [vmem:[#allocation2 + $0x24] sm:$0xf] %vm2523_vm12, %v2446_v34  ;;  %v2444_v39 = vpop.permute.xlu0 %2443  ;;  %v4439_v40 = vld [vmem:[#allocation2] sm:$0xff]  ;;  %v3342_v43 = vpop.permute.xlu2 %3341  ;;  %v2847_v34 = vrot.slane %v2845_v23, 4  ;;  %v2861_v42 = vor.u32 %v2860_v33, %v2856_v31  ;;  %v2776_v23 = vshll.u32 %v4249_v15, 16  ;;  %v3309_v33 = vrot.slane %v4317_v24, 5 }
 0x246   : > { %2532 = vst.msk [vmem:[#allocation2 + $0x20] sm:$0xf] %vm2523_vm12, %v2444_v39  ;;  %3658 = vmatmul.bf16.vlgmr.msra.gmra.mxu0 %v4439_v40  ;;  %v2923_v39 = vor.u32 %v2922_v27, %v2919_v26  ;;  %v2926_v40 = vshll.u32 %v4268_v29, 16  ;;  %v4315_v27 = vld [vmem:[%s4604_s22 + $0xb4] sm:$0xe] }
 0x247   : > { %3094 = vst.msk [vmem:[#allocation2 + $0x24] sm:$0xf] %vm3084_vm13, %v3007_v22  ;;  %v3258_v22 = vsel %vm4789_vm5, %v4330_v12, %v3257_v3  ;;  %v2851_v46 = vor.u32 %v2850_v37, %v2847_v34  ;;  %v2778_v34 = vrot.slane %v2776_v23, 5  ;;  %v4270_v24 = vld [vmem:[%s4604_s22 + $0xc0] sm:$0xf] }
 0x248   : > { %v2928_v48 = vrot.slane %v2926_v40, 5  ;;  %v4210_v40 = vld [vmem:[%s4604_s22 + $0x6c] sm:$0xf] }
 0x24a   : > { %3012 = vrot.lane.b32.xlu1 %v2761_v45, %s4553_s29  ;;  %v4217_v45 = vld [vmem:[%s4604_s22 + $0x94] sm:$0xf]  ;;  %v2933_v4 = vor.u32 %v2932_v58, %v2928_v48 }
 0x24b   : > { %3002 = vrot.lane.b32.xlu0 %v2699_v47, %s4553_s29  ;;  %3000 = vrot.lane.b32.xlu2 %v2689_v50, %s4553_s29  ;;  %v2924_v47 = vrot.slane %v2923_v39, 4  ;;  %v2862_v50 = vrot.slane %v2861_v42, 4 }
 0x24c   : > { %v3005_v57 = vpop.permute.xlu1 %3004  ;;  %v2934_v13 = vrot.slane %v2933_v4, 4  ;;  %v4262_v4 = vld [vmem:[%s4604_s22 + $0xa0] sm:$0xf] }
 0x24d   : > { %3093 = vst.msk [vmem:[#allocation2 + $0x20] sm:$0xf] %vm3084_vm13, %v3005_v57  ;;  %v2995_v59 = vpop.permute.xlu0 %2994  ;;  %v2462_v0 = vpop.permute.xlu2 %2461  ;;  %v2852_v57 = vrot.slane %v2851_v46, 4  ;;  %v2929_v60 = vsel %vm4615_vm2, %v2924_v47, %v2928_v48 }
 0x24e   : > { %3088 = vst.msk [vmem:[#allocation2 + $0xc] sm:$0xf] %vm3084_vm13, %v2995_v59 }
 0x24f   : > { %3430 = vst.msk [vmem:[#allocation2 + $0x20] sm:$0xf] %vm3421_vm14, %v3342_v43  ;;  %v2864_v43 = vshll.u32 %v4260_v30, 16  ;;  %v2857_v3 = vsel %vm4615_vm2, %v2852_v57, %v2856_v31  ;;  %v3308_v31 = vrot.slane %v3306_v21, 4  ;;  %v4176_v57 = vld [vmem:[%s4604_s22 + $0xbc] sm:$0x1] }
 0x250   : > { %2541 = vst.msk [vmem:[#allocation2 + $0x44] sm:$0xf] %vm2523_vm12, %v2462_v0 }
 0x251   : > { %v2866_v51 = vrot.slane %v2864_v43, 5  ;;  %v3310_v43 = vsel %vm4789_vm5, %v3308_v31, %v3309_v33 }
 0x252   : > { %3339 = vrot.lane.b32.xlu1 %v3240_v1, %s4554_s30  ;;  %v4308_v1 = vld [vmem:[%s4604_s22 + $0x98] sm:$0x1] }
 0x253   : > { %3337 = vrot.lane.b32.xlu0 %v3237_v54, %s4554_s30  ;;  %3014 = vrot.lane.b32.xlu2 %v2771_v5, %s4553_s29  ;;  %v2867_v0 = vsel %vm4615_vm2, %v2862_v50, %v2866_v51  ;;  %v4306_v54 = vld [vmem:[%s4604_s22 + $0x90] sm:$0xe]  ;;  %v2936_v5 = vshll.u32 %v4269_v56, 16 }
 0x254   : > { %v3332_v2 = vpop.permute.xlu1 %3331  ;;  %v4334_v9 = vrot.slane %v4306_v54, 9  ;;  %v4298_v51 = vld [vmem:[%s4604_s22 + $0x70] sm:$0xf] }
 0x255   : > { %3425 = vst.msk [vmem:[#allocation2 + $0xc] sm:$0xf] %vm3421_vm14, %v3332_v2  ;;  %v3330_v11 = vpop.permute.xlu0 %3329  ;;  %v3358_v14 = vpop.permute.xlu2 %3357  ;;  %v3288_v2 = vrot.slane %v4308_v1, 5  ;;  %v3264_v58 = vrot.slane %v4298_v51, 5  ;;  %v4211_v56 = vld [vmem:[%s4604_s22 + $0x70] sm:$0xf] }
 0x256   : > { %3424 = vst.msk [vmem:[#allocation2 + $0x8] sm:$0xf] %vm3421_vm14, %v3330_v11  ;;  %v4250_v11 = vld [vmem:[%s4604_s22 + $0x70] sm:$0xf]  ;;  %v3286_v20 = vsel %vm4789_vm5, %v4334_v9, %v3285_v62  ;;  %v2223_v62 = vrot.slane %v2221_v7, 4  ;;  %v2878_v7 = vshll.u32 %v4262_v4, 16 }
 0x257   : > { %v3289_v17 = vsel %vm4789_vm5, %v3287_v6, %v3288_v2  ;;  %v2782_v18 = vshll.u32 %v4250_v11, 16  ;;  %v3266_v54 = vrot.slane %v3264_v58, 4  ;;  %v4261_v2 = vld [vmem:[%s4604_s22 + $0x9c] sm:$0xf]  ;;  %v2882_v9 = vshrl.u32 %v4262_v4, 16 }
 0x258   : > { %v4310_v51 = vld [vmem:[%s4604_s22 + $0xa0] sm:$0xf] }
 0x25a   : > { %2467 = vrot.lane.b32.xlu1 %v4216_v16, %s4552_s28 }
 0x25b   : > { %3351 = vrot.lane.b32.xlu0 %v3261_v19, %s4554_s30  ;;  %3349 = vrot.lane.b32.xlu2 %v3258_v22, %s4554_s30  ;;  %v2786_v19 = vshrl.u32 %v4250_v11, 16  ;;  %v2773_v22 = vshrl.u32 %v4249_v15, 16  ;;  %v2869_v11 = vshrl.u32 %v4261_v2, 16  ;;  %v2884_v15 = vrot.slane %v2882_v9, 4 }
 0x25c   : > { %v2460_v28 = vpop.permute.xlu1 %2459 }
 0x25d   : > { %2540 = vst.msk [vmem:[#allocation2 + $0x40] sm:$0xf] %vm2523_vm12, %v2460_v28  ;;  %v3344_v35 = vpop.permute.xlu0 %3343  ;;  %v4440_v36 = vld [vmem:[#allocation2 + $0x8] sm:$0xff]  ;;  %v2438_v32 = vpop.permute.xlu2 %2437  ;;  %v2784_v28 = vrot.slane %v2782_v18, 5  ;;  %v2788_v29 = vrot.slane %v2786_v19, 4  ;;  %v2871_v18 = vrot.slane %v2869_v11, 4 }
 0x25e   : > { %3431 = vst.msk [vmem:[#allocation2 + $0x24] sm:$0xf] %vm3421_vm14, %v3344_v35  ;;  %3663 = vmatmul.bf16.gmra.mxu0 %v4440_v36  ;;  %v4251_v35 = vld [vmem:[%s4604_s22 + $0x74] sm:$0x1]  ;;  %v2775_v36 = vrot.slane %v2773_v22, 4 }
 0x25f   : > { %2529 = vst.msk [vmem:[#allocation2 + $0x14] sm:$0xf] %vm2523_vm12, %v2438_v32  ;;  %v2792_v42 = vshll.u32 %v4251_v35, 16  ;;  %v4271_v22 = vld [vmem:[%s4604_s22 + $0xc4] sm:$0xf] }
 0x260   : > { %v2779_v44 = vor.u32 %v2778_v34, %v2775_v36  ;;  %v2950_v31 = vshll.u32 %v4271_v22, 16  ;;  %v2954_v33 = vshrl.u32 %v4271_v22, 16  ;;  %v4218_v35 = vld [vmem:[%s4604_s22 + $0x9c] sm:$0xf]  ;;  %v2941_v36 = vshrl.u32 %v4270_v24, 16 }
 0x261   : > { %v2794_v47 = vrot.slane %v2792_v42, 5  ;;  %v2944_v34 = vshll.u32 %v4270_v24, 16 }
 0x262   : > { %2481 = vrot.lane.b32.xlu1 %v4223_v38, %s4552_s28  ;;  %v4337_v38 = vrot.slane %v4315_v27, 9  ;;  %v2956_v42 = vrot.slane %v2954_v33, 4 }
 0x263   : > { %2479 = vrot.lane.b32.xlu0 %v4222_v41, %s4552_s28  ;;  %2469 = vrot.lane.b32.xlu2 %v4217_v45, %s4552_s28  ;;  %v2789_v41 = vor.u32 %v2788_v29, %v2784_v28  ;;  %v4219_v29 = vld [vmem:[%s4604_s22 + $0xa0] sm:$0xf] }
 0x264   : > { %v3023_v49 = vpop.permute.xlu1 %3022  ;;  %v3307_v45 = vsel %vm4789_vm5, %v4337_v38, %v3306_v21 }
 0x265   : > { %3102 = vst.msk [vmem:[#allocation2 + $0x44] sm:$0xf] %vm3084_vm13, %v3023_v49  ;;  %v3021_v53 = vpop.permute.xlu0 %3020  ;;  %v4443_v55 = vld [vmem:[#allocation2 + $0x20] sm:$0xff]  ;;  %v2997_v59 = vpop.permute.xlu2 %2996  ;;  %v2790_v46 = vrot.slane %v2789_v41, 4  ;;  %v2780_v49 = vrot.slane %v2779_v44, 4  ;;  %v2952_v41 = vrot.slane %v2950_v31, 5 }
 0x266   : > { %3101 = vst.msk [vmem:[#allocation2 + $0x40] sm:$0xf] %vm3084_vm13, %v3021_v53  ;;  %3678 = vmatmul.bf16.vlgmr.msra.gmra.mxu1 %v4443_v55 }
 0x267   : > { %3438 = vst.msk [vmem:[#allocation2 + $0x40] sm:$0xf] %vm3421_vm14, %v3358_v14  ;;  %v2938_v14 = vrot.slane %v2936_v5, 5  ;;  %v2795_v53 = vsel %vm4615_vm2, %v2790_v46, %v2794_v47  ;;  %v2785_v55 = vsel %vm4615_vm2, %v2780_v49, %v2784_v28  ;;  %v2946_v46 = vrot.slane %v2944_v34, 5 }
 0x269   : > { %v2939_v26 = vsel %vm4615_vm2, %v2934_v13, %v2938_v14  ;;  %v2880_v14 = vrot.slane %v2878_v7, 5  ;;  %v4311_v7 = vld [vmem:[%s4604_s22 + $0xa4] sm:$0x1] }
 0x26a   : > { %3040 = vrot.lane.b32.xlu1 %v2929_v60, %s4553_s29  ;;  %v4297_v60 = vld [vmem:[%s4604_s22 + $0x6c] sm:$0xe] }
 0x26b   : > { %3030 = vrot.lane.b32.xlu0 %v2867_v0, %s4553_s29  ;;  %3028 = vrot.lane.b32.xlu2 %v2857_v3, %s4553_s29  ;;  %v2224_v0 = vrot.slane %v4176_v57, 5  ;;  %v4331_v6 = vrot.slane %v4297_v60, 9  ;;  %v2885_v27 = vor.u32 %v2884_v15, %v2880_v14 }
 0x26c   : > { %v2436_v8 = vpop.permute.xlu1 %2435 }
 0x26d   : > { %2528 = vst.msk [vmem:[#allocation2 + $0x10] sm:$0xf] %vm2523_vm12, %v2436_v8  ;;  %v3360_v12 = vpop.permute.xlu0 %3359  ;;  %v3011_v16 = vpop.permute.xlu2 %3010  ;;  %v2225_v61 = vsel %vm4789_vm5, %v2223_v62, %v2224_v0  ;;  %v3265_v13 = vsel %vm4789_vm5, %v4331_v6, %v3264_v58  ;;  %v4319_v0 = vld [vmem:[%s4604_s22 + $0xc4] sm:$0xf] }
 0x26e   : > { %3439 = vst.msk [vmem:[#allocation2 + $0x44] sm:$0xf] %vm3421_vm14, %v3360_v12  ;;  %v2872_v12 = vshll.u32 %v4261_v2, 16  ;;  %v4320_v2 = vld [vmem:[%s4604_s22 + $0xc8] sm:$0x1] }
 0x26f   : > { %3089 = vst.msk [vmem:[#allocation2 + $0x10] sm:$0xf] %vm3084_vm13, %v2997_v59  ;;  %v4299_v59 = vld [vmem:[%s4604_s22 + $0x74] sm:$0x1] }
 0x270   : > { %v3267_v3 = vrot.slane %v4299_v59, 5  ;;  %v2874_v19 = vrot.slane %v2872_v12, 5  ;;  %v3292_v59 = vrot.slane %v4310_v51, 5 }
 0x272   : > { %3367 = vrot.lane.b32.xlu1 %v3289_v17, %s4554_s30  ;;  %v3268_v10 = vsel %vm4789_vm5, %v3266_v54, %v3267_v3  ;;  %v4263_v17 = vld [vmem:[%s4604_s22 + $0xa4] sm:$0x1]  ;;  %v3294_v15 = vrot.slane %v3292_v59, 4 }
 0x273   : > { %3365 = vrot.lane.b32.xlu0 %v3286_v20, %s4554_s30  ;;  %3042 = vrot.lane.b32.xlu2 %v2939_v26, %s4553_s29  ;;  %v4224_v26 = vld [vmem:[%s4604_s22 + $0xc0] sm:$0xf]  ;;  %v2888_v28 = vshll.u32 %v4263_v17, 16  ;;  %v4273_v17 = vld [vmem:[%s4604_s22 + $0xcc] sm:$0xf] }
 0x274   : > { %v2450_v30 = vpop.permute.xlu1 %2449  ;;  %v2965_v24 = vshrl.u32 %v4273_v17, 16 }
 0x275   : > { %2535 = vst.msk [vmem:[#allocation2 + $0x2c] sm:$0xf] %vm2523_vm12, %v2450_v30  ;;  %v2448_v37 = vpop.permute.xlu0 %2447  ;;  %v4447_v32 = vld [vmem:[#allocation2 + $0x40] sm:$0xff]  ;;  %v3346_v39 = vpop.permute.xlu2 %3345  ;;  %v2875_v30 = vor.u32 %v2874_v19, %v2871_v18  ;;  %v4274_v19 = vld [vmem:[%s4604_s22 + $0xd0] sm:$0xf] }
 0x276   : > { %2534 = vst.msk [vmem:[#allocation2 + $0x28] sm:$0xf] %vm2523_vm12, %v2448_v37  ;;  %3698 = vmatmul.bf16.vlgmr.msra.gmra.mxu2 %v4447_v32  ;;  %v2886_v37 = vrot.slane %v2885_v27, 4  ;;  %v2890_v32 = vrot.slane %v2888_v28, 5  ;;  %v4179_v27 = vld [vmem:[%s4604_s22 + $0xc8] sm:$0x1] }
 0x277   : > { %3096 = vst.msk [vmem:[#allocation2 + $0x2c] sm:$0xf] %vm3084_vm13, %v3011_v16  ;;  %v2967_v34 = vrot.slane %v2965_v24, 4 }
 0x27a   : > { %2455 = vrot.lane.b32.xlu1 %v4210_v40, %s4552_s28  ;;  %v4272_v40 = vld [vmem:[%s4604_s22 + $0xc8] sm:$0x1] }
 0x27b   : > { %3379 = vrot.lane.b32.xlu0 %v3310_v43, %s4554_s30  ;;  %3377 = vrot.lane.b32.xlu2 %v3307_v45, %s4554_s30  ;;  %v2943_v45 = vrot.slane %v2941_v36, 4  ;;  %v2231_v36 = vrot.slane %v4179_v27, 5 }
 0x27c   : > { %v3009_v48 = vpop.permute.xlu1 %3008 }
 0x27d   : > { %3095 = vst.msk [vmem:[#allocation2 + $0x28] sm:$0xf] %vm3084_vm13, %v3009_v48  ;;  %v2999_v50 = vpop.permute.xlu0 %2998  ;;  %v2466_v52 = vpop.permute.xlu2 %2465  ;;  %v2891_v48 = vsel %vm4615_vm2, %v2886_v37, %v2890_v32  ;;  %v2947_v57 = vor.u32 %v2946_v46, %v2943_v45  ;;  %v4275_v32 = vld [vmem:[%s4604_s22 + $0xd4] sm:$0x1] }
 0x27e   : > { %3090 = vst.msk [vmem:[#allocation2 + $0x14] sm:$0xf] %vm3084_vm13, %v2999_v50  ;;  %v4309_v50 = vld [vmem:[%s4604_s22 + $0x9c] sm:$0xe]  ;;  %v2984_v45 = vshll.u32 %v4275_v32, 16 }
 0x27f   : > { %3432 = vst.msk [vmem:[#allocation2 + $0x28] sm:$0xf] %vm3421_vm14, %v3346_v39  ;;  %v2876_v39 = vrot.slane %v2875_v30, 4  ;;  %v4335_v58 = vrot.slane %v4309_v50, 9  ;;  %v2948_v54 = vrot.slane %v2947_v57, 4 }
 0x280   : > { %2543 = vst.msk [vmem:[#allocation2 + $0x4c] sm:$0xf] %vm2523_vm12, %v2466_v52  ;;  %v2957_v52 = vor.u32 %v2956_v42, %v2952_v41  ;;  %v4177_v30 = vld [vmem:[%s4604_s22 + $0xc0] sm:$0xe]  ;;  %v2986_v50 = vrot.slane %v2984_v45, 5 }
 0x281   : > { %v2881_v49 = vsel %vm4615_vm2, %v2876_v39, %v2880_v14  ;;  %v3293_v4 = vsel %vm4789_vm5, %v4335_v58, %v3292_v59  ;;  %v4322_v57 = vld [vmem:[%s4604_s22 + $0xd0] sm:$0xf] }
 0x282   : > { %3018 = vrot.lane.b32.xlu1 %v2795_v53, %s4553_s29  ;;  %v2960_v53 = vshll.u32 %v4272_v40, 16  ;;  %v2958_v60 = vrot.slane %v2957_v52, 4 }
 0x283   : > { %3016 = vrot.lane.b32.xlu0 %v2785_v55, %s4553_s29  ;;  %2457 = vrot.lane.b32.xlu2 %v4211_v56, %s4552_s28  ;;  %v4225_v55 = vld [vmem:[%s4604_s22 + $0xc4] sm:$0xf] }
 0x284   : > { %v3336_v1 = vpop.permute.xlu1 %3335  ;;  %v2962_v62 = vrot.slane %v2960_v53, 5 }
 0x285   : > { %3427 = vst.msk [vmem:[#allocation2 + $0x14] sm:$0xf] %vm3421_vm14, %v3336_v1  ;;  %v3334_v5 = vpop.permute.xlu0 %3333  ;;  %v3025_v8 = vpop.permute.xlu2 %3024 }
 0x286   : > { %3426 = vst.msk [vmem:[#allocation2 + $0x10] sm:$0xf] %vm3421_vm14, %v3334_v5  ;;  %v3313_v5 = vrot.slane %v4319_v0, 5  ;;  %v2963_v6 = vsel %vm4615_vm2, %v2958_v60, %v2962_v62  ;;  %v3320_v60 = vrot.slane %v4322_v57, 5  ;;  %v4323_v62 = vld [vmem:[%s4604_s22 + $0xd4] sm:$0x1] }
 0x287   : > { %v4227_v0 = vld [vmem:[%s4604_s22 + $0xd0] sm:$0xf] }
 0x288   : > { %v3315_v9 = vrot.slane %v3313_v5, 4 }
 0x28a   : > { %2291 = vrot.lane.b32.xlu1 %v2225_v61, %s4551_s27  ;;  %v2953_v61 = vsel %vm4615_vm2, %v2948_v54, %v2952_v41  ;;  %v4195_v41 = vrot.slane %v4177_v30, 9 }
 0x28b   : > { %3355 = vrot.lane.b32.xlu0 %v3268_v10, %s4554_s30  ;;  %3353 = vrot.lane.b32.xlu2 %v3265_v13, %s4554_s30  ;;  %v3316_v10 = vrot.slane %v4320_v2, 5  ;;  %v4178_v13 = vld [vmem:[%s4604_s22 + $0xc4] sm:$0xf] }
 0x28c   : > { %v2464_v16 = vpop.permute.xlu1 %2463 }
 0x28d   : > { %2542 = vst.msk [vmem:[#allocation2 + $0x48] sm:$0xf] %vm2523_vm12, %v2464_v16  ;;  %v3348_v20 = vpop.permute.xlu0 %3347  ;;  %v4441_v21 = vld [vmem:[#allocation2 + $0x10] sm:$0xff]  ;;  %v3039_v23 = vpop.permute.xlu2 %3038  ;;  %v3295_v16 = vrot.slane %v4311_v7, 5 }
 0x28e   : > { %3433 = vst.msk [vmem:[#allocation2 + $0x2c] sm:$0xf] %vm3421_vm14, %v3348_v20  ;;  %3668 = vmatmul.bf16.gmra.mxu0 %v4441_v21  ;;  %v3317_v20 = vsel %vm4789_vm5, %v3315_v9, %v3316_v10  ;;  %v2978_v21 = vshrl.u32 %v4274_v19, 16 }
 0x28f   : > { %3103 = vst.msk [vmem:[#allocation2 + $0x48] sm:$0xf] %vm3084_vm13, %v3025_v8  ;;  %v4318_v8 = vld [vmem:[%s4604_s22 + $0xc0] sm:$0xe]  ;;  %v3296_v28 = vsel %vm4789_vm5, %v3294_v15, %v3295_v16 }
 0x290   : > { %v4338_v12 = vrot.slane %v4318_v8, 9  ;;  %v2980_v31 = vrot.slane %v2978_v21, 4  ;;  %v6018_v8 = vld [vmem:[%s6203_s2] ss:$0 sm:$0xff] }
 0x292   : > { %2483 = vrot.lane.b32.xlu1 %v4224_v26, %s4552_s28  ;;  %v3314_v22 = vsel %vm4789_vm5, %v4338_v12, %v3313_v5  ;;  %v2968_v26 = vshll.u32 %v4273_v17, 16 }
 0x293   : > { %2473 = vrot.lane.b32.xlu0 %v4219_v29, %s4552_s28  ;;  %2471 = vrot.lane.b32.xlu2 %v4218_v35, %s4552_s28  ;;  %v2974_v29 = vshll.u32 %v4274_v19, 16 }
 0x294   : > { %v2478_v38 = vpop.permute.xlu1 %2477  ;;  %v2970_v37 = vrot.slane %v2968_v26, 5 }
 0x295   : > { %2549 = vst.msk [vmem:[#allocation2 + $0x64] sm:$0xf] %vm2523_vm12, %v2478_v38  ;;  %v2476_v43 = vpop.permute.xlu0 %2475  ;;  %v4444_v44 = vld [vmem:[#allocation2 + $0x28] sm:$0xff]  ;;  %v3374_v47 = vpop.permute.xlu2 %3373  ;;  %v2976_v40 = vrot.slane %v2974_v29, 5 }
 0x296   : > { %2548 = vst.msk [vmem:[#allocation2 + $0x60] sm:$0xf] %vm2523_vm12, %v2476_v43  ;;  %3683 = vmatmul.bf16.gmra.mxu1 %v4444_v44  ;;  %v4226_v43 = vld [vmem:[%s4604_s22 + $0xcc] sm:$0xf] }
 0x297   : > { %3110 = vst.msk [vmem:[#allocation2 + $0x64] sm:$0xf] %vm3084_vm13, %v3039_v23  ;;  %v2228_v23 = vrot.slane %v4178_v13, 5  ;;  %v2981_v44 = vor.u32 %v2980_v31, %v2976_v40 }
 0x299   : > { %v2230_v35 = vrot.slane %v2228_v23, 4 }
 0x29a   : > { %3034 = vrot.lane.b32.xlu1 %v2891_v48, %s4553_s29  ;;  %v2229_v48 = vsel %vm4789_vm5, %v4195_v41, %v2228_v23 }
 0x29b   : > { %3032 = vrot.lane.b32.xlu0 %v2881_v49, %s4553_s29  ;;  %2485 = vrot.lane.b32.xlu2 %v4225_v55, %s4552_s28  ;;  %v2232_v46 = vsel %vm4789_vm5, %v2230_v35, %v2231_v36  ;;  %v2982_v49 = vrot.slane %v2981_v44, 4 }
 0x29c   : > { %v3037_v56 = vpop.permute.xlu1 %3036 }
 0x29d   : > { %3109 = vst.msk [vmem:[#allocation2 + $0x60] sm:$0xf] %vm3084_vm13, %v3037_v56  ;;  %v3027_v1 = vpop.permute.xlu0 %3026  ;;  %v2442_v3 = vpop.permute.xlu2 %2441  ;;  %v2987_v59 = vsel %vm4615_vm2, %v2982_v49, %v2986_v50 }
 0x29e   : > { %3104 = vst.msk [vmem:[#allocation2 + $0x4c] sm:$0xf] %vm3084_vm13, %v3027_v1  ;;  %v4321_v1 = vld [vmem:[%s4604_s22 + $0xcc] sm:$0xe]  ;;  %s4438_s22 = sshll.u32 %s6215_s15, 8 }
 0x29f   : > { %3446 = vst.msk [vmem:[#allocation2 + $0x60] sm:$0xf] %vm3421_vm14, %v3374_v47  ;;  %v2971_v47 = vor.u32 %v2970_v37, %v2967_v34  ;;  %s6026_s5 = scalar_lea.vmem %s6204_s3, %s4438_s22 }
 0x2a0   : > { %2531 = vst.msk [vmem:[#allocation2 + $0x1c] sm:$0xf] %vm2523_vm12, %v2442_v3  ;;  %v3322_v3 = vrot.slane %v3320_v60, 4 }
 0x2a1   : > { %v2972_v52 = vrot.slane %v2971_v47, 4 }
 0x2a2   : > { %3369 = vrot.lane.b32.xlu1 %v3293_v4, %s4554_s30  ;;  %v3323_v4 = vrot.slane %v4323_v62, 5 }
 0x2a3   : > { %3046 = vrot.lane.b32.xlu0 %v2963_v6, %s4553_s29  ;;  %3044 = vrot.lane.b32.xlu2 %v2953_v61, %s4553_s29  ;;  %v2977_v56 = vsel %vm4615_vm2, %v2972_v52, %v2976_v40  ;;  %v4339_v6 = vrot.slane %v4321_v1, 9 }
 0x2a4   : > { %v3364_v11 = vpop.permute.xlu1 %3363  ;;  %v3324_v2 = vsel %vm4789_vm5, %v3322_v3, %v3323_v4 }
 0x2a5   : > { %3441 = vst.msk [vmem:[#allocation2 + $0x4c] sm:$0xf] %vm3421_vm14, %v3364_v11  ;;  %v3362_v14 = vpop.permute.xlu0 %3361  ;;  %v3001_v18 = vpop.permute.xlu2 %3000  ;;  %v3321_v61 = vsel %vm4789_vm5, %v4339_v6, %v3320_v60 }
 0x2a6   : > { %3440 = vst.msk [vmem:[#allocation2 + $0x48] sm:$0xf] %vm3421_vm14, %v3362_v14 }
 0x2aa   : > { %3383 = vrot.lane.b32.xlu1 %v3317_v20, %s4554_s30 }
 0x2ab   : > { %3381 = vrot.lane.b32.xlu0 %v3314_v22, %s4554_s30  ;;  %3371 = vrot.lane.b32.xlu2 %v3296_v28, %s4554_s30 }
 0x2ac   : > { %v2440_v33 = vpop.permute.xlu1 %2439 }
 0x2ad   : > { %2530 = vst.msk [vmem:[#allocation2 + $0x18] sm:$0xf] %vm2523_vm12, %v2440_v33  ;;  %v3376_v38 = vpop.permute.xlu0 %3375  ;;  %v4448_v39 = vld [vmem:[#allocation2 + $0x48] sm:$0xff]  ;;  %v3015_v42 = vpop.permute.xlu2 %3014 }
 0x2ae   : > { %3447 = vst.msk [vmem:[#allocation2 + $0x64] sm:$0xf] %vm3421_vm14, %v3376_v38  ;;  %3703 = vmatmul.bf16.gmra.mxu2 %v4448_v39 }
 0x2af   : > { %3091 = vst.msk [vmem:[#allocation2 + $0x18] sm:$0xf] %vm3084_vm13, %v3001_v18 }
 0x2b2   : > { %2487 = vrot.lane.b32.xlu1 %v4226_v43, %s4552_s28 }
 0x2b3   : > { %2295 = vrot.lane.b32.xlu0 %v2232_v46, %s4551_s27  ;;  %2293 = vrot.lane.b32.xlu2 %v2229_v48, %s4551_s27 }
 0x2b4   : > { %v2454_v51 = vpop.permute.xlu1 %2453 }
 0x2b5   : > { %2537 = vst.msk [vmem:[#allocation2 + $0x34] sm:$0xf] %vm2523_vm12, %v2454_v51  ;;  %v2452_v53 = vpop.permute.xlu0 %2451  ;;  %v4451_v55 = vld [vmem:[#allocation2 + $0x60] sm:$0xff]  ;;  %v3350_v58 = vpop.permute.xlu2 %3349 }
 0x2b6   : > { %2536 = vst.msk [vmem:[#allocation2 + $0x30] sm:$0xf] %vm2523_vm12, %v2452_v53  ;;  %3718 = vmatmul.bf16.vlgmr.msra.gmra.mxu3 %v4451_v55 }
 0x2b7   : > { %3098 = vst.msk [vmem:[#allocation2 + $0x34] sm:$0xf] %vm3084_vm13, %v3015_v42 }
 0x2ba   : > { %3050 = vrot.lane.b32.xlu1 %v2987_v59, %s4553_s29 }
 0x2bb   : > { %3048 = vrot.lane.b32.xlu0 %v2977_v56, %s4553_s29  ;;  %2489 = vrot.lane.b32.xlu2 %v4227_v0, %s4552_s28 }
 0x2bc   : > { %v3013_v54 = vpop.permute.xlu1 %3012 }
 0x2bd   : > { %3097 = vst.msk [vmem:[#allocation2 + $0x30] sm:$0xf] %vm3084_vm13, %v3013_v54  ;;  %v3003_v5 = vpop.permute.xlu0 %3002  ;;  %v2470_v25 = vpop.permute.xlu2 %2469 }
 0x2be   : > { %3092 = vst.msk [vmem:[#allocation2 + $0x1c] sm:$0xf] %vm3084_vm13, %v3003_v5 }
 0x2bf   : > { %3434 = vst.msk [vmem:[#allocation2 + $0x30] sm:$0xf] %vm3421_vm14, %v3350_v58 }
 0x2c0   : > { %2545 = vst.msk [vmem:[#allocation2 + $0x54] sm:$0xf] %vm2523_vm12, %v2470_v25 }
 0x2c3   : > { %3387 = vrot.lane.b32.xlu0 %v3324_v2, %s4554_s30  ;;  %v3659_v9 = vpop.f32.mrf.mxu0  ;;  %3385 = vrot.lane.b32.xlu2 %v3321_v61, %s4554_s30  ;;  %s4035_s30 = sshll.u32 %s6215_s15, 1 }
 0x2c4   : > { %v3340_v7 = vpop.permute.xlu1 %3339  ;;  %v3660_v11 = vadd.f32 %v6018_v8, %v3659_v9  ;;  %s267_s8 = scalar_lea.vmem %s6205_s4, %s4035_s30 }
 0x2c5   : > { %3429 = vst.msk [vmem:[#allocation2 + $0x1c] sm:$0xf] %vm3421_vm14, %v3340_v7  ;;  %v3338_v10 = vpop.permute.xlu0 %3337  ;;  %v3029_v63 = vpop.permute.xlu2 %3028 }
 0x2c6   : > { %3428 = vst.msk [vmem:[#allocation2 + $0x18] sm:$0xf] %vm3421_vm14, %v3338_v10  ;;  %v3809_v18 = vmul.f32 %v3660_v11, %v3660_v11 }
 0x2c7   : > { %3739 = vst [vmem:[%s6026_s5] sm:$0xff] %v3660_v11 }
 0x2cb   : > { %v3661_v13 = vpop.f32.mrf.mxu0 }
 0x2cc   : > { %v2468_v12 = vpop.permute.xlu1 %2467  ;;  %v3662_v15 = vadd.f32 %v6018_v8, %v3661_v13 }
 0x2cd   : > { %2544 = vst.msk [vmem:[#allocation2 + $0x50] sm:$0xf] %vm2523_vm12, %v2468_v12  ;;  %v3352_v14 = vpop.permute.xlu0 %3351  ;;  %v4442_v16 = vld [vmem:[#allocation2 + $0x18] sm:$0xff]  ;;  %v3043_v17 = vpop.permute.xlu2 %3042 }
 0x2ce   : > { %3435 = vst.msk [vmem:[#allocation2 + $0x34] sm:$0xf] %vm3421_vm14, %v3352_v14  ;;  %v3771_v19 = vadd.f32 %v3662_v15, %v3660_v11  ;;  %v3810_v20 = vmul.f32 %v3662_v15, %v3662_v15  ;;  %3673 = vmatmul.bf16.gmra.mxu0 %v4442_v16 }
 0x2cf   : > { %3740 = vst [vmem:[%s6026_s5 + $0x8] sm:$0xff] %v3662_v15 }
 0x2d0   : > { %3105 = vst.msk [vmem:[#allocation2 + $0x50] sm:$0xf] %vm3084_vm13, %v3029_v63  ;;  %v3841_v21 = vadd.f32 %v3810_v20, %v3809_v18 }
 0x2d4   : > { %v2482_v22 = vpop.permute.xlu1 %2481 }
 0x2d5   : > { %2551 = vst.msk [vmem:[#allocation2 + $0x6c] sm:$0xf] %vm2523_vm12, %v2482_v22  ;;  %v2480_v23 = vpop.permute.xlu0 %2479  ;;  %v4445_v24 = vld [vmem:[#allocation2 + $0x30] sm:$0xff]  ;;  %v3378_v26 = vpop.permute.xlu2 %3377 }
 0x2d6   : > { %2550 = vst.msk [vmem:[#allocation2 + $0x68] sm:$0xf] %vm2523_vm12, %v2480_v23  ;;  %3688 = vmatmul.bf16.gmra.mxu1 %v4445_v24 }
 0x2d7   : > { %3112 = vst.msk [vmem:[#allocation2 + $0x6c] sm:$0xf] %vm3084_vm13, %v3043_v17 }
 0x2db   : > { %v3664_v28 = vpop.f32.mrf.mxu0 }
 0x2dc   : > { %v3041_v27 = vpop.permute.xlu1 %3040  ;;  %v3665_v30 = vadd.f32 %v6018_v8, %v3664_v28 }
 0x2dd   : > { %3111 = vst.msk [vmem:[#allocation2 + $0x68] sm:$0xf] %vm3084_vm13, %v3041_v27  ;;  %v3031_v29 = vpop.permute.xlu0 %3030  ;;  %v2458_v31 = vpop.permute.xlu2 %2457 }
 0x2de   : > { %3106 = vst.msk [vmem:[#allocation2 + $0x54] sm:$0xf] %vm3084_vm13, %v3031_v29  ;;  %v3772_v33 = vadd.f32 %v3771_v19, %v3665_v30  ;;  %v3811_v35 = vmul.f32 %v3665_v30, %v3665_v30 }
 0x2df   : > { %3741 = vst [vmem:[%s6026_s5 + $0x10] sm:$0xff] %v3665_v30 }
 0x2e0   : > { %3448 = vst.msk [vmem:[#allocation2 + $0x68] sm:$0xf] %vm3421_vm14, %v3378_v26  ;;  %v3842_v36 = vadd.f32 %v3841_v21, %v3811_v35 }
 0x2e1   : > { %2539 = vst.msk [vmem:[#allocation2 + $0x3c] sm:$0xf] %vm2523_vm12, %v2458_v31 }
 0x2e3   : > { %v3666_v37 = vpop.f32.mrf.mxu0  ;;  %v3679_v39 = vpop.f32.mrf.mxu1 }
 0x2e4   : > { %v3368_v34 = vpop.permute.xlu1 %3367  ;;  %v3667_v38 = vadd.f32 %v6018_v8, %v3666_v37  ;;  %v6051_v40 = vadd.f32 %v6018_v8, %v3679_v39 }
 0x2e5   : > { %3443 = vst.msk [vmem:[#allocation2 + $0x54] sm:$0xf] %vm3421_vm14, %v3368_v34  ;;  %v3366_v32 = vpop.permute.xlu0 %3365  ;;  %v3354_v41 = vpop.permute.xlu2 %3353 }
 0x2e6   : > { %3442 = vst.msk [vmem:[#allocation2 + $0x50] sm:$0xf] %vm3421_vm14, %v3366_v32  ;;  %v3773_v42 = vadd.f32 %v3772_v33, %v3667_v38  ;;  %v3812_v43 = vmul.f32 %v3667_v38, %v3667_v38 }
 0x2e7   : > { %3742 = vst [vmem:[%s6026_s5 + $0x18] sm:$0xff] %v3667_v38 }
 0x2e8   : > { %3747 = vst [vmem:[%s6026_s5 + $0x40] sm:$0xff] %v6051_v40  ;;  %v3843_v44 = vadd.f32 %v3842_v36, %v3812_v43 }
 0x2eb   : > { %v3681_v47 = vpop.f32.mrf.mxu1 }
 0x2ec   : > { %v2456_v45 = vpop.permute.xlu1 %2455  ;;  %v6059_v49 = vadd.f32 %v6018_v8, %v3681_v47 }
 0x2ed   : > { %2538 = vst.msk [vmem:[#allocation2 + $0x38] sm:$0xf] %vm2523_vm12, %v2456_v45  ;;  %v3380_v46 = vpop.permute.xlu0 %3379  ;;  %v4449_v48 = vld [vmem:[#allocation2 + $0x50] sm:$0xff]  ;;  %v2472_v50 = vpop.permute.xlu2 %2471 }
 0x2ee   : > { %3449 = vst.msk [vmem:[#allocation2 + $0x6c] sm:$0xf] %vm3421_vm14, %v3380_v46  ;;  %3708 = vmatmul.bf16.gmra.mxu2 %v4449_v48 }
 0x2ef   : > { %2546 = vst.msk [vmem:[#allocation2 + $0x58] sm:$0xf] %vm2523_vm12, %v2472_v50 }
 0x2f0   : > { %3748 = vst [vmem:[%s6026_s5 + $0x48] sm:$0xff] %v6059_v49 }
 0x2f4   : > { %v3019_v51 = vpop.permute.xlu1 %3018 }
 0x2f5   : > { %3100 = vst.msk [vmem:[#allocation2 + $0x3c] sm:$0xf] %vm3084_vm13, %v3019_v51  ;;  %v3017_v52 = vpop.permute.xlu0 %3016  ;;  %v4452_v53 = vld [vmem:[#allocation2 + $0x68] sm:$0xff]  ;;  %v2486_v55 = vpop.permute.xlu2 %2485 }
 0x2f6   : > { %3099 = vst.msk [vmem:[#allocation2 + $0x38] sm:$0xf] %vm3084_vm13, %v3017_v52  ;;  %3723 = vmatmul.bf16.gmra.mxu3 %v4452_v53 }
 0x2f7   : > { %3436 = vst.msk [vmem:[#allocation2 + $0x38] sm:$0xf] %vm3421_vm14, %v3354_v41 }
 0x2f9   : > { %v3699_v57 = vpop.f32.mrf.mxu2 }
 0x2fa   : > { %v6068_v58 = vadd.f32 %v6018_v8, %v3699_v57  ;;  %v3817_v57 = vmul.f32 %v6051_v40, %v6051_v40 }
 0x2fc   : > { %v2292_v59 = vpop.permute.xlu1 %2291  ;;  %3755 = vst [vmem:[%s6026_s5 + $0x80] sm:$0xff] %v6068_v58 }
 0x2fd   : > { %v3356_v56 = vpop.permute.xlu0 %3355  ;;  %2359 = vst.msk [vmem:[#allocation2 + $0x74] sm:$0xf] %vm2329_vm11, %v2292_v59  ;;  %v3045_v60 = vpop.permute.xlu2 %3044 }
 0x2fe   : > { %3437 = vst.msk [vmem:[#allocation2 + $0x3c] sm:$0xf] %vm3421_vm14, %v3356_v56 }
 0x2ff   : > { %2553 = vst.msk [vmem:[#allocation2 + $0x74] sm:$0xf] %vm2523_vm12, %v2486_v55 }
 0x301   : > { %v3701_v62 = vpop.f32.mrf.mxu2 }
 0x302   : > { %v6076_v0 = vadd.f32 %v6018_v8, %v3701_v62 }
 0x304   : > { %v2484_v1 = vpop.permute.xlu1 %2483  ;;  %3756 = vst [vmem:[%s6026_s5 + $0x88] sm:$0xff] %v6076_v0 }
 0x305   : > { %v2474_v54 = vpop.permute.xlu0 %2473  ;;  %2552 = vst.msk [vmem:[#allocation2 + $0x70] sm:$0xf] %vm2523_vm12, %v2484_v1  ;;  %v4446_v3 = vld [vmem:[#allocation2 + $0x38] sm:$0xff]  ;;  %v3372_v4 = vpop.permute.xlu2 %3371 }
 0x306   : > { %2547 = vst.msk [vmem:[#allocation2 + $0x5c] sm:$0xf] %vm2523_vm12, %v2474_v54  ;;  %3693 = vmatmul.bf16.gmra.mxu1 %v4446_v3 }
 0x307   : > { %3113 = vst.msk [vmem:[#allocation2 + $0x70] sm:$0xf] %vm3084_vm13, %v3045_v60  ;;  %v3818_v60 = vmul.f32 %v6059_v49, %v6059_v49 }
 0x30b   : > { %v3669_v6 = vpop.f32.mrf.mxu0 }
 0x30c   : > { %v3035_v5 = vpop.permute.xlu1 %3034  ;;  %v3670_v2 = vadd.f32 %v6018_v8, %v3669_v6 }
 0x30d   : > { %3108 = vst.msk [vmem:[#allocation2 + $0x5c] sm:$0xf] %vm3084_vm13, %v3035_v5  ;;  %v3033_v25 = vpop.permute.xlu0 %3032  ;;  %v2294_v61 = vpop.permute.xlu2 %2293 }
 0x30e   : > { %3107 = vst.msk [vmem:[#allocation2 + $0x58] sm:$0xf] %vm3084_vm13, %v3033_v25  ;;  %v3774_v7 = vadd.f32 %v3773_v42, %v3670_v2  ;;  %v3813_v9 = vmul.f32 %v3670_v2, %v3670_v2 }
 0x30f   : > { %3743 = vst [vmem:[%s6026_s5 + $0x20] sm:$0xff] %v3670_v2 }
 0x310   : > { %3445 = vst.msk [vmem:[#allocation2 + $0x5c] sm:$0xf] %vm3421_vm14, %v3372_v4  ;;  %v3844_v10 = vadd.f32 %v3843_v44, %v3813_v9 }
 0x311   : > { %2360 = vst.msk [vmem:[#allocation2 + $0x78] sm:$0xf] %vm2329_vm11, %v2294_v61 }
 0x313   : > { %v3671_v63 = vpop.f32.mrf.mxu0  ;;  %v3684_v14 = vpop.f32.mrf.mxu1 }
 0x314   : > { %v3370_v11 = vpop.permute.xlu1 %3369  ;;  %v3672_v13 = vadd.f32 %v6018_v8, %v3671_v63  ;;  %v6093_v15 = vadd.f32 %v6018_v8, %v3684_v14 }
 0x315   : > { %3444 = vst.msk [vmem:[#allocation2 + $0x58] sm:$0xf] %vm3421_vm14, %v3370_v11  ;;  %v3047_v12 = vpop.permute.xlu0 %3046  ;;  %v2490_v24 = vpop.permute.xlu2 %2489 }
 0x316   : > { %3114 = vst.msk [vmem:[#allocation2 + $0x74] sm:$0xf] %vm3084_vm13, %v3047_v12  ;;  %v3775_v16 = vadd.f32 %v3774_v7, %v3672_v13  ;;  %v3814_v17 = vmul.f32 %v3672_v13, %v3672_v13  ;;  %v3819_v3 = vmul.f32 %v6093_v15, %v6093_v15 }
 0x317   : > { %3744 = vst [vmem:[%s6026_s5 + $0x28] sm:$0xff] %v3672_v13 }
 0x318   : > { %3749 = vst [vmem:[%s6026_s5 + $0x50] sm:$0xff] %v6093_v15  ;;  %v3845_v18 = vadd.f32 %v3844_v10, %v3814_v17 }
 0x31b   : > { %v3686_v22 = vpop.f32.mrf.mxu1 }
 0x31c   : > { %v3384_v19 = vpop.permute.xlu1 %3383  ;;  %v4450_v20 = vld [vmem:[#allocation2 + $0x58] sm:$0xff]  ;;  %v3687_v23 = vadd.f32 %v6018_v8, %v3686_v22 }
 0x31d   : > { %3451 = vst.msk [vmem:[#allocation2 + $0x74] sm:$0xf] %vm3421_vm14, %v3384_v19  ;;  %v3382_v21 = vpop.permute.xlu0 %3381  ;;  %3713 = vmatmul.bf16.gmra.mxu2 %v4450_v20  ;;  %v3386_v30 = vpop.permute.xlu2 %3385 }
 0x31e   : > { %3450 = vst.msk [vmem:[#allocation2 + $0x70] sm:$0xf] %vm3421_vm14, %v3382_v21  ;;  %v3820_v25 = vmul.f32 %v3687_v23, %v3687_v23 }
 0x31f   : > { %3750 = vst [vmem:[%s6026_s5 + $0x58] sm:$0xff] %v3687_v23 }
 0x324   : > { %v2488_v26 = vpop.permute.xlu1 %2487 }
 0x325   : > { %v2296_v27 = vpop.permute.xlu0 %2295  ;;  %v4453_v28 = vld [vmem:[#allocation2 + $0x70] sm:$0xff]  ;;  %2554 = vst.msk [vmem:[#allocation2 + $0x78] sm:$0xf] %vm2523_vm12, %v2488_v26 }
 0x326   : > { %2361 = vst.msk [vmem:[#allocation2 + $0x7c] sm:$0xf] %vm2329_vm11, %v2296_v27  ;;  %3728 = vmatmul.bf16.gmra.mxu3 %v4453_v28 }
 0x327   : > { %2555 = vst.msk [vmem:[#allocation2 + $0x7c] sm:$0xf] %vm2523_vm12, %v2490_v24 }
 0x32c   : > { %v3051_v29 = vpop.permute.xlu1 %3050 }
 0x32d   : > { %v3049_v31 = vpop.permute.xlu0 %3048  ;;  %3116 = vst.msk [vmem:[#allocation2 + $0x7c] sm:$0xf] %vm3084_vm13, %v3051_v29 }
 0x32e   : > { %3115 = vst.msk [vmem:[#allocation2 + $0x78] sm:$0xf] %vm3084_vm13, %v3049_v31 }
 0x32f   : > { %3452 = vst.msk [vmem:[#allocation2 + $0x78] sm:$0xf] %vm3421_vm14, %v3386_v30  ;;  %v3825_v30 = vmul.f32 %v6068_v58, %v6068_v58 }
 0x331   : > { %v3704_v33 = vpop.f32.mrf.mxu2 }
 0x332   : > { %v6109_v35 = vadd.f32 %v6018_v8, %v3704_v33 }
 0x334   : > { %3757 = vst [vmem:[%s6026_s5 + $0x90] sm:$0xff] %v6109_v35 }
 0x335   : > { %v3388_v36 = vpop.permute.xlu0 %3387 }
 0x336   : > { %3453 = vst.msk [vmem:[#allocation2 + $0x7c] sm:$0xf] %vm3421_vm14, %v3388_v36  ;;  %v3826_v36 = vmul.f32 %v6076_v0, %v6076_v0 }
 0x339   : > { %v3706_v34 = vpop.f32.mrf.mxu2  ;;  %v3719_v37 = vpop.f32.mrf.mxu3 }
 0x33a   : > { %v6115_v32 = vadd.f32 %v6018_v8, %v3706_v34  ;;  %v6118_v38 = vadd.f32 %v6018_v8, %v3719_v37 }
 0x33c   : > { %3758 = vst [vmem:[%s6026_s5 + $0x98] sm:$0xff] %v6115_v32 }
 0x33d   : > { %v4454_v39 = vld [vmem:[#allocation2 + $0x78] sm:$0xff]  ;;  %3763 = vst [vmem:[%s6026_s5 + $0xc0] sm:$0xff] %v6118_v38 }
 0x33e   : > { %3733 = vmatmul.bf16.gmra.mxu3 %v4454_v39  ;;  %v3827_v39 = vmul.f32 %v6109_v35, %v6109_v35 }
 0x341   : > { %v3721_v41 = vpop.f32.mrf.mxu3 }
 0x342   : > { %v6125_v42 = vadd.f32 %v6018_v8, %v3721_v41 }
 0x344   : > { %3764 = vst [vmem:[%s6026_s5 + $0xc8] sm:$0xff] %v6125_v42 }
 0x34b   : > { %v3674_v43 = vpop.f32.mrf.mxu0 }
 0x34c   : > { %v3675_v44 = vadd.f32 %v6018_v8, %v3674_v43 }
 0x34e   : > { %3745 = vst [vmem:[%s6026_s5 + $0x30] sm:$0xff] %v3675_v44  ;;  %v3776_v45 = vadd.f32 %v3775_v16, %v3675_v44  ;;  %v3815_v46 = vmul.f32 %v3675_v44, %v3675_v44  ;;  %v3828_v44 = vmul.f32 %v6115_v32, %v6115_v32 }
 0x350   : > { %v3846_v47 = vadd.f32 %v3845_v18, %v3815_v46 }
 0x353   : > { %v3676_v48 = vpop.f32.mrf.mxu0  ;;  %v3689_v50 = vpop.f32.mrf.mxu1 }
 0x354   : > { %v3677_v51 = vadd.f32 %v6018_v8, %v3676_v48  ;;  %v3690_v52 = vadd.f32 %v6018_v8, %v3689_v50 }
 0x356   : > { %3746 = vst [vmem:[%s6026_s5 + $0x38] sm:$0xff] %v3677_v51  ;;  %v3777_v53 = vadd.f32 %v3776_v45, %v3677_v51  ;;  %v3816_v55 = vmul.f32 %v3677_v51, %v3677_v51  ;;  %v3821_v7 = vmul.f32 %v3690_v52, %v3690_v52 }
 0x357   : > { %3751 = vst [vmem:[%s6026_s5 + $0x60] sm:$0xff] %v3690_v52 }
 0x358   : > { %v3778_v59 = vadd.f32 %v3777_v53, %v6051_v40  ;;  %v3847_v56 = vadd.f32 %v3846_v47, %v3816_v55 }
 0x35a   : > { %v3779_v62 = vadd.f32 %v3778_v59, %v6059_v49  ;;  %v3848_v1 = vadd.f32 %v3847_v56, %v3817_v57 }
 0x35b   : > { %v3691_v54 = vpop.f32.mrf.mxu1 }
 0x35c   : > { %v3849_v4 = vadd.f32 %v3848_v1, %v3818_v60  ;;  %v3780_v5 = vadd.f32 %v3779_v62, %v6093_v15  ;;  %v3692_v6 = vadd.f32 %v6018_v8, %v3691_v54 }
 0x35e   : > { %v3781_v2 = vadd.f32 %v3780_v5, %v3687_v23  ;;  %v3850_v40 = vadd.f32 %v3849_v4, %v3819_v3  ;;  %3752 = vst [vmem:[%s6026_s5 + $0x68] sm:$0xff] %v3692_v6  ;;  %v3822_v11 = vmul.f32 %v3692_v6, %v3692_v6  ;;  %v3833_v3 = vmul.f32 %v6118_v38, %v6118_v38 }
 0x360   : > { %v3782_v61 = vadd.f32 %v3781_v2, %v3690_v52  ;;  %v3851_v49 = vadd.f32 %v3850_v40, %v3820_v25 }
 0x362   : > { %v3852_v9 = vadd.f32 %v3851_v49, %v3821_v7  ;;  %v3783_v10 = vadd.f32 %v3782_v61, %v3692_v6  ;;  %v3834_v6 = vmul.f32 %v6125_v42, %v6125_v42 }
 0x364   : > { %v3853_v63 = vadd.f32 %v3852_v9, %v3822_v11 }
 0x371   : > { %v3709_v12 = vpop.f32.mrf.mxu2 }
 0x372   : > { %v3710_v13 = vadd.f32 %v6018_v8, %v3709_v12 }
 0x374   : > { %3759 = vst [vmem:[%s6026_s5 + $0xa0] sm:$0xff] %v3710_v13  ;;  %v3829_v46 = vmul.f32 %v3710_v13, %v3710_v13 }
 0x379   : > { %v3711_v14 = vpop.f32.mrf.mxu2  ;;  %v3724_v15 = vpop.f32.mrf.mxu3 }
 0x37a   : > { %v3712_v16 = vadd.f32 %v6018_v8, %v3711_v14  ;;  %v3725_v17 = vadd.f32 %v6018_v8, %v3724_v15 }
 0x37c   : > { %3760 = vst [vmem:[%s6026_s5 + $0xa8] sm:$0xff] %v3712_v16  ;;  %v3830_v52 = vmul.f32 %v3712_v16, %v3712_v16  ;;  %v3835_v40 = vmul.f32 %v3725_v17, %v3725_v17 }
 0x37d   : > { %3765 = vst [vmem:[%s6026_s5 + $0xd0] sm:$0xff] %v3725_v17 }
 0x381   : > { %v3726_v18 = vpop.f32.mrf.mxu3 }
 0x382   : > { %v3727_v19 = vadd.f32 %v6018_v8, %v3726_v18 }
 0x383   : > { %v3694_v20 = vpop.f32.mrf.mxu1 }
 0x384   : > { %3766 = vst [vmem:[%s6026_s5 + $0xd8] sm:$0xff] %v3727_v19  ;;  %v3695_v21 = vadd.f32 %v6018_v8, %v3694_v20 }
 0x386   : > { %3753 = vst [vmem:[%s6026_s5 + $0x70] sm:$0xff] %v3695_v21  ;;  %v3823_v22 = vmul.f32 %v3695_v21, %v3695_v21  ;;  %v3784_v24 = vadd.f32 %v3783_v10, %v3695_v21  ;;  %v3836_v10 = vmul.f32 %v3727_v19, %v3727_v19 }
 0x388   : > { %v3854_v27 = vadd.f32 %v3853_v63, %v3823_v22 }
 0x38b   : > { %v3696_v23 = vpop.f32.mrf.mxu1 }
 0x38c   : > { %v3697_v26 = vadd.f32 %v6018_v8, %v3696_v23 }
 0x38e   : > { %3754 = vst [vmem:[%s6026_s5 + $0x78] sm:$0xff] %v3697_v26  ;;  %v3785_v28 = vadd.f32 %v3784_v24, %v3697_v26  ;;  %v3824_v29 = vmul.f32 %v3697_v26, %v3697_v26 }
 0x390   : > { %v3786_v31 = vadd.f32 %v3785_v28, %v6068_v58  ;;  %v3855_v33 = vadd.f32 %v3854_v27, %v3824_v29 }
 0x392   : > { %v3787_v34 = vadd.f32 %v3786_v31, %v6076_v0  ;;  %v3856_v37 = vadd.f32 %v3855_v33, %v3825_v30 }
 0x394   : > { %v3788_v41 = vadd.f32 %v3787_v34, %v6109_v35  ;;  %v3857_v43 = vadd.f32 %v3856_v37, %v3826_v36 }
 0x396   : > { %v3858_v45 = vadd.f32 %v3857_v43, %v3827_v39  ;;  %v3789_v58 = vadd.f32 %v3788_v41, %v6115_v32 }
 0x398   : > { %v3790_v47 = vadd.f32 %v3789_v58, %v3710_v13  ;;  %v3859_v48 = vadd.f32 %v3858_v45, %v3828_v44 }
 0x39a   : > { %v3860_v50 = vadd.f32 %v3859_v48, %v3829_v46  ;;  %v3791_v53 = vadd.f32 %v3790_v47, %v3712_v16 }
 0x39c   : > { %v3861_v59 = vadd.f32 %v3860_v50, %v3830_v52 }
 0x3a0   : > { %v3714_v51 = vpop.f32.mrf.mxu2 }
 0x3a1   : > { %v3715_v0 = vadd.f32 %v6018_v8, %v3714_v51 }
 0x3a3   : > { %3761 = vst [vmem:[%s6026_s5 + $0xb0] sm:$0xff] %v3715_v0  ;;  %v3831_v35 = vmul.f32 %v3715_v0, %v3715_v0  ;;  %v3792_v57 = vadd.f32 %v3791_v53, %v3715_v0 }
 0x3a5   : > { %v3862_v62 = vadd.f32 %v3861_v59, %v3831_v35 }
 0x3a8   : > { %v3716_v55 = vpop.f32.mrf.mxu2 }
 0x3a9   : > { %v3717_v56 = vadd.f32 %v6018_v8, %v3716_v55  ;;  %v3729_v60 = vpop.f32.mrf.mxu3 }
 0x3aa   : > { %v3730_v32 = vadd.f32 %v6018_v8, %v3729_v60 }
 0x3ab   : > { %3762 = vst [vmem:[%s6026_s5 + $0xb8] sm:$0xff] %v3717_v56  ;;  %v3793_v1 = vadd.f32 %v3792_v57, %v3717_v56  ;;  %v3832_v54 = vmul.f32 %v3717_v56, %v3717_v56 }
 0x3ac   : > { %3767 = vst [vmem:[%s6026_s5 + $0xe0] sm:$0xff] %v3730_v32  ;;  %v3837_v15 = vmul.f32 %v3730_v32, %v3730_v32 }
 0x3ad   : > { %v3794_v4 = vadd.f32 %v3793_v1, %v6118_v38  ;;  %v3863_v5 = vadd.f32 %v3862_v62, %v3832_v54 }
 0x3af   : > { %v3795_v25 = vadd.f32 %v3794_v4, %v6125_v42  ;;  %v3864_v2 = vadd.f32 %v3863_v5, %v3833_v3 }
 0x3b1   : > { %v3865_v61 = vadd.f32 %v3864_v2, %v3834_v6  ;;  %v3796_v7 = vadd.f32 %v3795_v25, %v3725_v17  ;;  %v3731_v49 = vpop.f32.mrf.mxu3 }
 0x3b2   : > { %v3732_v9 = vadd.f32 %v6018_v8, %v3731_v49 }
 0x3b3   : > { %v3797_v11 = vadd.f32 %v3796_v7, %v3727_v19  ;;  %v3866_v63 = vadd.f32 %v3865_v61, %v3835_v40 }
 0x3b4   : > { %3768 = vst [vmem:[%s6026_s5 + $0xe8] sm:$0xff] %v3732_v9  ;;  %v3838_v18 = vmul.f32 %v3732_v9, %v3732_v9 }
 0x3b5   : > { %v3867_v38 = vadd.f32 %v3866_v63, %v3836_v10  ;;  %v3798_v14 = vadd.f32 %v3797_v11, %v3730_v32 }
 0x3b7   : > { %v3868_v42 = vadd.f32 %v3867_v38, %v3837_v15  ;;  %v3799_v16 = vadd.f32 %v3798_v14, %v3732_v9 }
 0x3b9   : > { %v3869_v21 = vadd.f32 %v3868_v42, %v3838_v18 }
 0x3c1   : > { %v3734_v12 = vpop.f32.mrf.mxu3 }
 0x3c2   : > { %v3735_v13 = vadd.f32 %v6018_v8, %v3734_v12 }
 0x3c4   : > { %3769 = vst [vmem:[%s6026_s5 + $0xf0] sm:$0xff] %v3735_v13  ;;  %v3839_v17 = vmul.f32 %v3735_v13, %v3735_v13  ;;  %v3800_v22 = vadd.f32 %v3799_v16, %v3735_v13 }
 0x3c6   : > { %v3870_v23 = vadd.f32 %v3869_v21, %v3839_v17 }
 0x3c9   : > { %v3736_v20 = vpop.f32.mrf.mxu3 }
 0x3ca   : > { %v3737_v19 = vadd.f32 %v6018_v8, %v3736_v20 }
 0x3cc   : > { %3770 = vst [vmem:[%s6026_s5 + $0xf8] sm:$0xff] %v3737_v19  ;;  %v3801_v24 = vadd.f32 %v3800_v22, %v3737_v19  ;;  %v3840_v26 = vmul.f32 %v3737_v19, %v3737_v19 }
 0x3ce   : > { %v3802_v27 = vrot.slane %v3801_v24, 4  ;;  %v3871_v28 = vadd.f32 %v3870_v23, %v3840_v26 }
 0x3d0   : > { %v3803_v29 = vadd.f32 %v3802_v27, %v3801_v24  ;;  %v3872_v30 = vrot.slane %v3871_v28, 4 }
 0x3d2   : > { %v3804_v31 = vrot.slane %v3803_v29, 2  ;;  %v3873_v33 = vadd.f32 %v3872_v30, %v3871_v28 }
 0x3d4   : > { %v3805_v36 = vadd.f32 %v3804_v31, %v3803_v29  ;;  %v3874_v34 = vrot.slane %v3873_v33, 2 }
 0x3d6   : > { %v3806_v37 = vrot.slane %v3805_v36, 1  ;;  %v3875_v39 = vadd.f32 %v3874_v34, %v3873_v33 }
 0x3d8   : > { %v3807_v8 = vadd.f32 %v3806_v37, %v3805_v36  ;;  %v3876_v41 = vrot.slane %v3875_v39, 1 }
 0x3da   : > { %3808 = vst [vmem:[%s267_s8] sm:$0x1] %v3807_v8  ;;  %v3877_v43 = vadd.f32 %v3876_v41, %v3875_v39 }
 0x3dc   : > { %3878 = vst [vmem:[%s267_s8 + $0x1] sm:$0x1] %v3877_v43 }
 0x3dd PF: > { %s15_s17 = sadd.s32 1, %s4544_s17   ;;  %s6210_s15 = smov %s4540_s16 }
 0x3de   : > { %p12_p5 = scmp.ge.s32.totalorder %s15_s17, 4   ;;  %s6211_s16 = smov %s6213_s18 }
 0x3e0   :  { %14 = sbr.rel (!%p12_p5) target bundleno = 2 (0x2), region = 82 }

</bundles_post_ra>
